<compile_context>
chip_gen: v7x
topology: tpu7x:2x2x1
jax: 0.10.0
libtpu: 0.0.40
codegen_flags: <defaults>
</compile_context>

<pallas_src>
import functools

import jax
import jax.numpy as jnp
from jax import lax
from jax.experimental import pallas as pl
from jax.experimental.pallas import tpu as pltpu


# --------------------------------- kernel -----------------------------------

def _res_group_kernel(x_ref,
                      w1_ref, b1_ref, w2_ref, b2_ref,
                      wca1_ref, bca1_ref, wca2_ref, bca2_ref,
                      wf_ref, bf_ref,
                      o_ref,
                      ypad_ref, hpad_ref,
                      *, W, pad_top, res_scale):
    """One ResBlock (grid step) of one image; tail conv + residual at the end."""
    _, HW, C = o_ref.shape
    n = pl.program_id(1)
    n_last = pl.num_programs(1) - 1

    # Left/right edge masks for the dx = -1 / +1 taps (row-wrap in the flat
    # index space).  (HW, 1), broadcast over lanes.  Top/bottom edges are
    # handled by the zero halo rows of the padded scratch buffers.
    col = lax.broadcasted_iota(jnp.int32, (HW, 1), 0) % W
    mask_l = (col > 0).astype(jnp.float32)
    mask_r = (col < (W - 1)).astype(jnp.float32)

    @pl.when(n == 0)
    def _init():
        # Zero ONLY the halo rows, once per image; interiors are always
        # overwritten before they are read.
        halo = jnp.zeros((pad_top, C), jnp.float32)
        ypad_ref[pl.ds(0, pad_top), :] = halo
        ypad_ref[pl.ds(pad_top + HW, pad_top), :] = halo
        hpad_ref[pl.ds(0, pad_top), :] = halo
        hpad_ref[pl.ds(pad_top + HW, pad_top), :] = halo
        # Load the image into the residual-stream scratch.
        ypad_ref[pl.ds(pad_top, HW), :] = x_ref[0]

    def conv3x3(src_ref, w_ref, b_ref):
        """src_ref: zero-haloed flat (pad+HW+pad, C) buffer; w_ref: (1,9,C,C)."""
        acc = jnp.zeros((HW, C), jnp.float32)
        for t in range(9):
            ky, kx = divmod(t, 3)
            start = pad_top + (ky - 1) * W + (kx - 1)   # static
            tap = src_ref[pl.ds(start, HW), :]          # (HW, C), no relayout
            if kx == 0:
                tap = tap * mask_l
            elif kx == 2:
                tap = tap * mask_r
            acc = acc + jnp.dot(tap, w_ref[0, t],
                                preferred_element_type=jnp.float32)
        return acc + b_ref[0]

    # ---------------- ResBlock n ----------------
    h = jnp.maximum(conv3x3(ypad_ref, w1_ref, b1_ref), 0.0)
    hpad_ref[pl.ds(pad_top, HW), :] = h
    z = conv3x3(hpad_ref, w2_ref, b2_ref)

    # Channel attention on VPU/XLU (no M=1 MXU matmuls).
    gap = jnp.mean(z, axis=0, keepdims=True)                          # (1, C)
    hid = jnp.maximum(
        jnp.sum(wca1_ref[0] * gap, axis=1, keepdims=True) + bca1_ref[0],
        0.0)                                                          # (Cr, 1)
    feat = jnp.sum(wca2_ref[0] * hid, axis=0, keepdims=True) + bca2_ref[0]
    att = jax.nn.sigmoid(feat)                                        # (1, C)

    y_new = ypad_ref[pl.ds(pad_top, HW), :] + res_scale * (z * att)
    ypad_ref[pl.ds(pad_top, HW), :] = y_new

    # ---------------- tail conv + global residual (last block only) ----------
    @pl.when(n == n_last)
    def _tail():
        tail = conv3x3(ypad_ref, wf_ref, bf_ref)
        o_ref[0] = x_ref[0] + tail


# ------------------------------ pallas wrapper -------------------------------

def res_group_forward(x_nchw, params, res_scale=1.0):
    # NCHW -> NHWC once at the boundary (channels into lanes).  In an NHWC
    # end-to-end model these transposes disappear entirely.
    x = jnp.transpose(x_nchw, (0, 2, 3, 1)).astype(jnp.float32)
    B, H, W, C = x.shape
    HW = H * W
    x_flat = x.reshape(B, HW, C)            # free: same HBM bytes as NHWC

    blocks = params["blocks"]
    N = len(blocks)
    assert N >= 1
    Cr = blocks[0]["wca1"].shape[0]

    pad_top = ((W + 1 + 7) // 8) * 8        # >= W+1, 8-aligned interior
    pad_rows = HW + 2 * pad_top

    def conv_w(w):                          # (3,3,Cin,Cout) HWIO -> (9,Cin,Cout)
        return w.reshape(9, C, C).astype(jnp.float32)

    w1s = jnp.stack([conv_w(b["w1"]) for b in blocks])                # (N,9,C,C)
    w2s = jnp.stack([conv_w(b["w2"]) for b in blocks])                # (N,9,C,C)
    b1s = jnp.stack([b["b1"] for b in blocks])                        # (N,1,C)
    b2s = jnp.stack([b["b2"] for b in blocks])                        # (N,1,C)
    wca1s = jnp.stack([b["wca1"] for b in blocks])                    # (N,Cr,C)
    bca1s = jnp.stack([b["bca1"] for b in blocks])                    # (N,Cr,1)
    wca2s = jnp.stack([b["wca2"] for b in blocks])                    # (N,Cr,C)
    bca2s = jnp.stack([b["bca2"] for b in blocks])                    # (N,1,C)
    wf = conv_w(params["w_final"])[None]                              # (1,9,C,C)
    bf = params["b_final"][None]                                      # (1,1,C)

    kern = functools.partial(_res_group_kernel, W=W, pad_top=pad_top,
                             res_scale=float(res_scale))

    img_spec = pl.BlockSpec((1, HW, C), lambda b, n: (b, 0, 0))

    def per_block(shape):   # one ResBlock's slice per grid step along n
        nd = len(shape)
        return pl.BlockSpec((1,) + shape[1:],
                            lambda b, n, _nd=nd: (n,) + (0,) * (_nd - 1))

    def const(shape):       # resident across the whole grid (fetched once)
        nd = len(shape)
        return pl.BlockSpec(shape, lambda b, n, _nd=nd: (0,) * _nd)

    out = pl.pallas_call(
        kern,
        out_shape=jax.ShapeDtypeStruct((B, HW, C), jnp.float32),
        grid=(B, N),
        in_specs=[img_spec,
                  per_block(w1s.shape), per_block(b1s.shape),
                  per_block(w2s.shape), per_block(b2s.shape),
                  per_block(wca1s.shape), per_block(bca1s.shape),
                  per_block(wca2s.shape), per_block(bca2s.shape),
                  const(wf.shape), const(bf.shape)],
        out_specs=img_spec,
        scratch_shapes=[
            pltpu.VMEM((pad_rows, C), jnp.float32),   # residual stream (zero halo)
            pltpu.VMEM((pad_rows, C), jnp.float32),   # conv1 output (zero halo)
        ],
        compiler_params=pltpu.CompilerParams(
            dimension_semantics=("parallel", "arbitrary"),
            vmem_limit_bytes=32 * 1024 * 1024),
        # NOTE: if B can be 1 on v7x, add a spatial "parallel" split (H strips
        # with a 1-row halo) so both TensorCores are used.
    )(x_flat, w1s, b1s, w2s, b2s, wca1s, bca1s, wca2s, bca2s, wf, bf)

    out = out.reshape(B, H, W, C)
    return jnp.transpose(out, (0, 3, 1, 2))            # back to NCHW


# ----------------------------- pure-JAX reference ----------------------------

def _res_group_reference(x_nchw, params, res_scale=1.0):
    x = jnp.transpose(x_nchw, (0, 2, 3, 1)).astype(jnp.float32)   # NHWC

    def conv(t, w, b):   # w: HWIO (3,3,C,C); b: (1,C)
        y = lax.conv_general_dilated(
            t, w, window_strides=(1, 1), padding="SAME",
            dimension_numbers=("NHWC", "HWIO", "NHWC"),
            precision=lax.Precision.HIGHEST)
        return y + b.reshape(1, 1, 1, -1)

    y = x
    for blk in params["blocks"]:
        h = jnp.maximum(conv(y, blk["w1"], blk["b1"]), 0.0)
        z = conv(h, blk["w2"], blk["b2"])
        gap = jnp.mean(z, axis=(1, 2))                              # (B, C)
        hid = jnp.maximum(gap @ blk["wca1"].T + blk["bca1"][:, 0], 0.0)
        feat = hid @ blk["wca2"] + blk["bca2"][0]                   # (B, C)
        att = jax.nn.sigmoid(feat)[:, None, None, :]
        y = y + res_scale * (z * att)
    out = x + conv(y, params["w_final"], params["b_final"])
    return jnp.transpose(out, (0, 3, 1, 2))


# ------------------------------ parameter init -------------------------------

def init_res_group_params(key, num_res_blocks, num_chans, reduction=16):
    """Layouts (mapping from PyTorch):
       w1/w2/w_final : (3,3,Cin,Cout) HWIO   == conv.weight.permute(2,3,1,0)
       b1/b2/b_final : (1, C)                == conv.bias[None, :]
       wca1          : (Cr, C)               == Linear1.weight
       bca1          : (Cr, 1)               == Linear1.bias[:, None]
       wca2          : (Cr, C)               == Linear2.weight.T
       bca2          : (1, C)                == Linear2.bias[None, :]
    """
    C = num_chans
    Cr = max(C // reduction, 1)
    params = {"blocks": []}
    keys = jax.random.split(key, num_res_blocks * 8 + 2)
    ki = 0

    def nrm(k, shape, scale=0.05):
        return (scale * jax.random.normal(k, shape)).astype(jnp.float32)

    for _ in range(num_res_blocks):
        blk = {
            "w1": nrm(keys[ki + 0], (3, 3, C, C)),
            "b1": nrm(keys[ki + 1], (1, C)),
            "w2": nrm(keys[ki + 2], (3, 3, C, C)),
            "b2": nrm(keys[ki + 3], (1, C)),
            "wca1": nrm(keys[ki + 4], (Cr, C)),
            "bca1": nrm(keys[ki + 5], (Cr, 1)),
            "wca2": nrm(keys[ki + 6], (Cr, C)),
            "bca2": nrm(keys[ki + 7], (1, C)),
        }
        params["blocks"].append(blk)
        ki += 8
    params["w_final"] = nrm(keys[ki + 0], (3, 3, C, C))
    params["b_final"] = nrm(keys[ki + 1], (1, C))
    return params


# ----------------------------------- main ------------------------------------

if __name__ == "__main__":
    B, C, H, W = 2, 32, 16, 16
    num_res_blocks = 2
    reduction = 16
    res_scale = 1.0

    key = jax.random.PRNGKey(0)
    k_x, k_p = jax.random.split(key)
    x = jax.random.normal(k_x, (B, C, H, W), dtype=jnp.float32)
    params = init_res_group_params(k_p, num_res_blocks, C, reduction)

    out = jax.block_until_ready(res_group_forward(x, params, res_scale))
    ref = jax.block_until_ready(_res_group_reference(x, params, res_scale))

    assert out.shape == (B, C, H, W), out.shape
    assert bool(jnp.all(jnp.isfinite(out)))
    max_err = float(jnp.max(jnp.abs(out - ref)))
    assert max_err < 5e-2, f"max abs error vs reference: {max_err}"
    print("KERNEL_OK")
</pallas_src>

<mosaic_0001>
module attributes {stable_mosaic.version = 11 : i64} {
  func.func @_res_group_kernel(%arg0: i32, %arg1: i32, %arg2: memref<1x256x32xf32, #tpu.memory_space<vmem>>, %arg3: memref<1x9x32x32xf32, #tpu.memory_space<vmem>>, %arg4: memref<1x1x32xf32, #tpu.memory_space<vmem>>, %arg5: memref<1x9x32x32xf32, #tpu.memory_space<vmem>>, %arg6: memref<1x1x32xf32, #tpu.memory_space<vmem>>, %arg7: memref<1x2x32xf32, #tpu.memory_space<vmem>>, %arg8: memref<1x2x1xf32, #tpu.memory_space<vmem>>, %arg9: memref<1x2x32xf32, #tpu.memory_space<vmem>>, %arg10: memref<1x1x32xf32, #tpu.memory_space<vmem>>, %arg11: memref<1x9x32x32xf32, #tpu.memory_space<vmem>>, %arg12: memref<1x1x32xf32, #tpu.memory_space<vmem>>, %arg13: memref<1x256x32xf32, #tpu.memory_space<vmem>>, %arg14: memref<304x32xf32, #tpu.memory_space<vmem>>, %arg15: memref<304x32xf32, #tpu.memory_space<vmem>>) attributes {dimension_semantics = [#tpu.dimension_semantics<parallel>, #tpu.dimension_semantics<arbitrary>], iteration_bounds = array<i64: 2, 2>, scalar_prefetch = 0 : i64, scratch_operands = 2 : i64, tpu.core_type = #tpu.core_type<tc>, window_params = [{transform_indices = @transform_0, window_bounds = array<i64: 1, 256, 32>}, {transform_indices = @transform_1, window_bounds = array<i64: 1, 9, 32, 32>}, {transform_indices = @transform_2, window_bounds = array<i64: 1, 1, 32>}, {transform_indices = @transform_3, window_bounds = array<i64: 1, 9, 32, 32>}, {transform_indices = @transform_4, window_bounds = array<i64: 1, 1, 32>}, {transform_indices = @transform_5, window_bounds = array<i64: 1, 2, 32>}, {transform_indices = @transform_6, window_bounds = array<i64: 1, 2, 1>}, {transform_indices = @transform_7, window_bounds = array<i64: 1, 2, 32>}, {transform_indices = @transform_8, window_bounds = array<i64: 1, 1, 32>}, {pipeline_mode = #tpu.pipeline_mode<synchronous>, transform_indices = @transform_9, window_bounds = array<i64: 1, 9, 32, 32>}, {pipeline_mode = #tpu.pipeline_mode<synchronous>, transform_indices = @transform_10, window_bounds = array<i64: 1, 1, 32>}, {transform_indices = @transform_11, window_bounds = array<i64: 1, 256, 32>}]} {
    %0 = tpu.iota {dimensions = array<i32: 0>} : vector<256x1xi32>
    %c16_i32 = arith.constant 16 : i32
    %c0_i32 = arith.constant 0 : i32
    %1 = arith.cmpi eq, %c16_i32, %c0_i32 : i32
    %c1_i32 = arith.constant 1 : i32
    %2 = arith.select %1, %c1_i32, %c16_i32 : i32
    %3 = vector.broadcast %2 : i32 to vector<256x1xi32>
    %4 = arith.remsi %0, %3 : vector<256x1xi32>
    %c0_i32_0 = arith.constant 0 : i32
    %5 = vector.broadcast %c0_i32_0 : i32 to vector<256x1xi32>
    %6 = arith.cmpi ne, %4, %5 : vector<256x1xi32>
    %c0_i32_1 = arith.constant 0 : i32
    %7 = vector.broadcast %c0_i32_1 : i32 to vector<256x1xi32>
    %8 = arith.cmpi slt, %4, %7 : vector<256x1xi32>
    %c0_i32_2 = arith.constant 0 : i32
    %9 = arith.cmpi slt, %2, %c0_i32_2 : i32
    %10 = vector.broadcast %9 : i1 to vector<256x1xi1>
    %11 = vector.broadcast %10 : vector<256x1xi1> to vector<256x1xi1>
    %12 = arith.xori %8, %11 : vector<256x1xi1>
    %13 = arith.andi %12, %6 : vector<256x1xi1>
    %14 = vector.broadcast %2 : i32 to vector<256x1xi32>
    %15 = arith.addi %4, %14 : vector<256x1xi32>
    %16 = arith.select %13, %15, %4 : vector<256x1xi1>, vector<256x1xi32>
    %c0_i32_3 = arith.constant 0 : i32
    %17 = vector.broadcast %c0_i32_3 : i32 to vector<256x1xi32>
    %18 = arith.cmpi sgt, %16, %17 : vector<256x1xi32>
    %19 = arith.extui %18 : vector<256x1xi1> to vector<256x1xi32>
    %20 = arith.sitofp %19 : vector<256x1xi32> to vector<256x1xf32>
    %c15_i32 = arith.constant 15 : i32
    %21 = vector.broadcast %c15_i32 : i32 to vector<256x1xi32>
    %22 = arith.cmpi slt, %16, %21 : vector<256x1xi32>
    %23 = arith.extui %22 : vector<256x1xi1> to vector<256x1xi32>
    %24 = arith.sitofp %23 : vector<256x1xi32> to vector<256x1xf32>
    %c0_i32_4 = arith.constant 0 : i32
    %25 = arith.cmpi eq, %arg1, %c0_i32_4 : i32
    %26 = arith.extui %25 : i1 to i32
    %c0_i32_5 = arith.constant 0 : i32
    %27 = arith.cmpi ne, %26, %c0_i32_5 : i32
    scf.if %27 {
      %cst_151 = arith.constant 0.000000e+00 : f32
      %194 = vector.broadcast %cst_151 : f32 to vector<24x32xf32>
      %c0_152 = arith.constant 0 : index
      %c0_153 = arith.constant 0 : index
      %195 = vector.load %arg14[%c0_152, %c0_153] : memref<304x32xf32, #tpu.memory_space<vmem>>, vector<24x32xf32>
      tpu.vector_store %arg14[%c0_152, %c0_153], %194 {strides = array<i32>} : memref<304x32xf32, #tpu.memory_space<vmem>>, vector<24x32xf32>,
      %c280 = arith.constant 280 : index
      %c0_154 = arith.constant 0 : index
      %196 = vector.load %arg14[%c280, %c0_154] : memref<304x32xf32, #tpu.memory_space<vmem>>, vector<24x32xf32>
      tpu.vector_store %arg14[%c280, %c0_154], %194 {strides = array<i32>} : memref<304x32xf32, #tpu.memory_space<vmem>>, vector<24x32xf32>,
      %c0_155 = arith.constant 0 : index
      %c0_156 = arith.constant 0 : index
      %197 = vector.load %arg15[%c0_155, %c0_156] : memref<304x32xf32, #tpu.memory_space<vmem>>, vector<24x32xf32>
      tpu.vector_store %arg15[%c0_155, %c0_156], %194 {strides = array<i32>} : memref<304x32xf32, #tpu.memory_space<vmem>>, vector<24x32xf32>,
      %c280_157 = arith.constant 280 : index
      %c0_158 = arith.constant 0 : index
      %198 = vector.load %arg15[%c280_157, %c0_158] : memref<304x32xf32, #tpu.memory_space<vmem>>, vector<24x32xf32>
      tpu.vector_store %arg15[%c280_157, %c0_158], %194 {strides = array<i32>} : memref<304x32xf32, #tpu.memory_space<vmem>>, vector<24x32xf32>,
      %c0_159 = arith.constant 0 : index
      %c0_160 = arith.constant 0 : index
      %c0_161 = arith.constant 0 : index
      %199 = vector.load %arg2[%c0_159, %c0_160, %c0_161] : memref<1x256x32xf32, #tpu.memory_space<vmem>>, vector<1x256x32xf32>
      %200 = vector.shape_cast %199 : vector<1x256x32xf32> to vector<256x32xf32>
      %c24_162 = arith.constant 24 : index
      %c0_163 = arith.constant 0 : index
      %201 = vector.load %arg14[%c24_162, %c0_163] : memref<304x32xf32, #tpu.memory_space<vmem>>, vector<256x32xf32>
      tpu.vector_store %arg14[%c24_162, %c0_163], %200 {strides = array<i32>} : memref<304x32xf32, #tpu.memory_space<vmem>>, vector<256x32xf32>,
    } else {
    }
    %cst = arith.constant 0.000000e+00 : f32
    %28 = vector.broadcast %cst : f32 to vector<256x32xf32>
    %c7 = arith.constant 7 : index
    %c0 = arith.constant 0 : index
    %29 = vector.load %arg14[%c7, %c0] : memref<304x32xf32, #tpu.memory_space<vmem>>, vector<256x32xf32>
    %30 = vector.broadcast %20 : vector<256x1xf32> to vector<256x32xf32>
    %31 = arith.mulf %29, %30 : vector<256x32xf32>
    %c0_6 = arith.constant 0 : index
    %c0_7 = arith.constant 0 : index
    %c0_8 = arith.constant 0 : index
    %c0_9 = arith.constant 0 : index
    %32 = vector.load %arg3[%c0_6, %c0_7, %c0_8, %c0_9] : memref<1x9x32x32xf32, #tpu.memory_space<vmem>>, vector<1x1x32x32xf32>
    %33 = vector.shape_cast %32 : vector<1x1x32x32xf32> to vector<32x32xf32>
    %cst_10 = arith.constant dense<0.000000e+00> : vector<256x32xf32>
    %34 = tpu.matmul %31, %33, %cst_10 {dimension_numbers = #tpu.dot_dimension_numbers<[1], [0], [0], [1], [0, 0, 1, 1], [], []>} : vector<256x32xf32>, vector<32x32xf32>, vector<256x32xf32> -> vector<256x32xf32>
    %35 = arith.addf %28, %34 : vector<256x32xf32>
    %c8 = arith.constant 8 : index
    %c0_11 = arith.constant 0 : index
    %36 = vector.load %arg14[%c8, %c0_11] : memref<304x32xf32, #tpu.memory_space<vmem>>, vector<256x32xf32>
    %c0_12 = arith.constant 0 : index
    %c1 = arith.constant 1 : index
    %c0_13 = arith.constant 0 : index
    %c0_14 = arith.constant 0 : index
    %37 = vector.load %arg3[%c0_12, %c1, %c0_13, %c0_14] : memref<1x9x32x32xf32, #tpu.memory_space<vmem>>, vector<1x1x32x32xf32>
    %38 = vector.shape_cast %37 : vector<1x1x32x32xf32> to vector<32x32xf32>
    %cst_15 = arith.constant dense<0.000000e+00> : vector<256x32xf32>
    %39 = tpu.matmul %36, %38, %cst_15 {dimension_numbers = #tpu.dot_dimension_numbers<[1], [0], [0], [1], [0, 0, 1, 1], [], []>} : vector<256x32xf32>, vector<32x32xf32>, vector<256x32xf32> -> vector<256x32xf32>
    %40 = arith.addf %35, %39 : vector<256x32xf32>
    %c9 = arith.constant 9 : index
    %c0_16 = arith.constant 0 : index
    %41 = vector.load %arg14[%c9, %c0_16] : memref<304x32xf32, #tpu.memory_space<vmem>>, vector<256x32xf32>
    %42 = vector.broadcast %24 : vector<256x1xf32> to vector<256x32xf32>
    %43 = arith.mulf %41, %42 : vector<256x32xf32>
    %c0_17 = arith.constant 0 : index
    %c2 = arith.constant 2 : index
    %c0_18 = arith.constant 0 : index
    %c0_19 = arith.constant 0 : index
    %44 = vector.load %arg3[%c0_17, %c2, %c0_18, %c0_19] : memref<1x9x32x32xf32, #tpu.memory_space<vmem>>, vector<1x1x32x32xf32>
    %45 = vector.shape_cast %44 : vector<1x1x32x32xf32> to vector<32x32xf32>
    %cst_20 = arith.constant dense<0.000000e+00> : vector<256x32xf32>
    %46 = tpu.matmul %43, %45, %cst_20 {dimension_numbers = #tpu.dot_dimension_numbers<[1], [0], [0], [1], [0, 0, 1, 1], [], []>} : vector<256x32xf32>, vector<32x32xf32>, vector<256x32xf32> -> vector<256x32xf32>
    %47 = arith.addf %40, %46 : vector<256x32xf32>
    %c23 = arith.constant 23 : index
    %c0_21 = arith.constant 0 : index
    %48 = vector.load %arg14[%c23, %c0_21] : memref<304x32xf32, #tpu.memory_space<vmem>>, vector<256x32xf32>
    %49 = vector.broadcast %20 : vector<256x1xf32> to vector<256x32xf32>
    %50 = arith.mulf %48, %49 : vector<256x32xf32>
    %c0_22 = arith.constant 0 : index
    %c3 = arith.constant 3 : index
    %c0_23 = arith.constant 0 : index
    %c0_24 = arith.constant 0 : index
    %51 = vector.load %arg3[%c0_22, %c3, %c0_23, %c0_24] : memref<1x9x32x32xf32, #tpu.memory_space<vmem>>, vector<1x1x32x32xf32>
    %52 = vector.shape_cast %51 : vector<1x1x32x32xf32> to vector<32x32xf32>
    %cst_25 = arith.constant dense<0.000000e+00> : vector<256x32xf32>
    %53 = tpu.matmul %50, %52, %cst_25 {dimension_numbers = #tpu.dot_dimension_numbers<[1], [0], [0], [1], [0, 0, 1, 1], [], []>} : vector<256x32xf32>, vector<32x32xf32>, vector<256x32xf32> -> vector<256x32xf32>
    %54 = arith.addf %47, %53 : vector<256x32xf32>
    %c24 = arith.constant 24 : index
    %c0_26 = arith.constant 0 : index
    %55 = vector.load %arg14[%c24, %c0_26] : memref<304x32xf32, #tpu.memory_space<vmem>>, vector<256x32xf32>
    %c0_27 = arith.constant 0 : index
    %c4 = arith.constant 4 : index
    %c0_28 = arith.constant 0 : index
    %c0_29 = arith.constant 0 : index
    %56 = vector.load %arg3[%c0_27, %c4, %c0_28, %c0_29] : memref<1x9x32x32xf32, #tpu.memory_space<vmem>>, vector<1x1x32x32xf32>
    %57 = vector.shape_cast %56 : vector<1x1x32x32xf32> to vector<32x32xf32>
    %cst_30 = arith.constant dense<0.000000e+00> : vector<256x32xf32>
    %58 = tpu.matmul %55, %57, %cst_30 {dimension_numbers = #tpu.dot_dimension_numbers<[1], [0], [0], [1], [0, 0, 1, 1], [], []>} : vector<256x32xf32>, vector<32x32xf32>, vector<256x32xf32> -> vector<256x32xf32>
    %59 = arith.addf %54, %58 : vector<256x32xf32>
    %c25 = arith.constant 25 : index
    %c0_31 = arith.constant 0 : index
    %60 = vector.load %arg14[%c25, %c0_31] : memref<304x32xf32, #tpu.memory_space<vmem>>, vector<256x32xf32>
    %61 = vector.broadcast %24 : vector<256x1xf32> to vector<256x32xf32>
    %62 = arith.mulf %60, %61 : vector<256x32xf32>
    %c0_32 = arith.constant 0 : index
    %c5 = arith.constant 5 : index
    %c0_33 = arith.constant 0 : index
    %c0_34 = arith.constant 0 : index
    %63 = vector.load %arg3[%c0_32, %c5, %c0_33, %c0_34] : memref<1x9x32x32xf32, #tpu.memory_space<vmem>>, vector<1x1x32x32xf32>
    %64 = vector.shape_cast %63 : vector<1x1x32x32xf32> to vector<32x32xf32>
    %cst_35 = arith.constant dense<0.000000e+00> : vector<256x32xf32>
    %65 = tpu.matmul %62, %64, %cst_35 {dimension_numbers = #tpu.dot_dimension_numbers<[1], [0], [0], [1], [0, 0, 1, 1], [], []>} : vector<256x32xf32>, vector<32x32xf32>, vector<256x32xf32> -> vector<256x32xf32>
    %66 = arith.addf %59, %65 : vector<256x32xf32>
    %c39 = arith.constant 39 : index
    %c0_36 = arith.constant 0 : index
    %67 = vector.load %arg14[%c39, %c0_36] : memref<304x32xf32, #tpu.memory_space<vmem>>, vector<256x32xf32>
    %68 = vector.broadcast %20 : vector<256x1xf32> to vector<256x32xf32>
    %69 = arith.mulf %67, %68 : vector<256x32xf32>
    %c0_37 = arith.constant 0 : index
    %c6 = arith.constant 6 : index
    %c0_38 = arith.constant 0 : index
    %c0_39 = arith.constant 0 : index
    %70 = vector.load %arg3[%c0_37, %c6, %c0_38, %c0_39] : memref<1x9x32x32xf32, #tpu.memory_space<vmem>>, vector<1x1x32x32xf32>
    %71 = vector.shape_cast %70 : vector<1x1x32x32xf32> to vector<32x32xf32>
    %cst_40 = arith.constant dense<0.000000e+00> : vector<256x32xf32>
    %72 = tpu.matmul %69, %71, %cst_40 {dimension_numbers = #tpu.dot_dimension_numbers<[1], [0], [0], [1], [0, 0, 1, 1], [], []>} : vector<256x32xf32>, vector<32x32xf32>, vector<256x32xf32> -> vector<256x32xf32>
    %73 = arith.addf %66, %72 : vector<256x32xf32>
    %c40 = arith.constant 40 : index
    %c0_41 = arith.constant 0 : index
    %74 = vector.load %arg14[%c40, %c0_41] : memref<304x32xf32, #tpu.memory_space<vmem>>, vector<256x32xf32>
    %c0_42 = arith.constant 0 : index
    %c7_43 = arith.constant 7 : index
    %c0_44 = arith.constant 0 : index
    %c0_45 = arith.constant 0 : index
    %75 = vector.load %arg3[%c0_42, %c7_43, %c0_44, %c0_45] : memref<1x9x32x32xf32, #tpu.memory_space<vmem>>, vector<1x1x32x32xf32>
    %76 = vector.shape_cast %75 : vector<1x1x32x32xf32> to vector<32x32xf32>
    %cst_46 = arith.constant dense<0.000000e+00> : vector<256x32xf32>
    %77 = tpu.matmul %74, %76, %cst_46 {dimension_numbers = #tpu.dot_dimension_numbers<[1], [0], [0], [1], [0, 0, 1, 1], [], []>} : vector<256x32xf32>, vector<32x32xf32>, vector<256x32xf32> -> vector<256x32xf32>
    %78 = arith.addf %73, %77 : vector<256x32xf32>
    %c41 = arith.constant 41 : index
    %c0_47 = arith.constant 0 : index
    %79 = vector.load %arg14[%c41, %c0_47] : memref<304x32xf32, #tpu.memory_space<vmem>>, vector<256x32xf32>
    %80 = vector.broadcast %24 : vector<256x1xf32> to vector<256x32xf32>
    %81 = arith.mulf %79, %80 : vector<256x32xf32>
    %c0_48 = arith.constant 0 : index
    %c8_49 = arith.constant 8 : index
    %c0_50 = arith.constant 0 : index
    %c0_51 = arith.constant 0 : index
    %82 = vector.load %arg3[%c0_48, %c8_49, %c0_50, %c0_51] : memref<1x9x32x32xf32, #tpu.memory_space<vmem>>, vector<1x1x32x32xf32>
    %83 = vector.shape_cast %82 : vector<1x1x32x32xf32> to vector<32x32xf32>
    %cst_52 = arith.constant dense<0.000000e+00> : vector<256x32xf32>
    %84 = tpu.matmul %81, %83, %cst_52 {dimension_numbers = #tpu.dot_dimension_numbers<[1], [0], [0], [1], [0, 0, 1, 1], [], []>} : vector<256x32xf32>, vector<32x32xf32>, vector<256x32xf32> -> vector<256x32xf32>
    %85 = arith.addf %78, %84 : vector<256x32xf32>
    %c0_53 = arith.constant 0 : index
    %c0_54 = arith.constant 0 : index
    %c0_55 = arith.constant 0 : index
    %86 = vector.load %arg4[%c0_53, %c0_54, %c0_55] : memref<1x1x32xf32, #tpu.memory_space<vmem>>, vector<1x1x32xf32>
    %87 = vector.shape_cast %86 : vector<1x1x32xf32> to vector<1x32xf32>
    %88 = vector.broadcast %87 : vector<1x32xf32> to vector<256x32xf32>
    %89 = arith.addf %85, %88 : vector<256x32xf32>
    %cst_56 = arith.constant 0.000000e+00 : f32
    %90 = vector.broadcast %cst_56 : f32 to vector<256x32xf32>
    %91 = arith.maximumf %89, %90 : vector<256x32xf32>
    %c24_57 = arith.constant 24 : index
    %c0_58 = arith.constant 0 : index
    %92 = vector.load %arg15[%c24_57, %c0_58] : memref<304x32xf32, #tpu.memory_space<vmem>>, vector<256x32xf32>
    tpu.vector_store %arg15[%c24_57, %c0_58], %91 {strides = array<i32>} : memref<304x32xf32, #tpu.memory_space<vmem>>, vector<256x32xf32>,
    %cst_59 = arith.constant 0.000000e+00 : f32
    %93 = vector.broadcast %cst_59 : f32 to vector<256x32xf32>
    %c7_60 = arith.constant 7 : index
    %c0_61 = arith.constant 0 : index
    %94 = vector.load %arg15[%c7_60, %c0_61] : memref<304x32xf32, #tpu.memory_space<vmem>>, vector<256x32xf32>
    %95 = vector.broadcast %20 : vector<256x1xf32> to vector<256x32xf32>
    %96 = arith.mulf %94, %95 : vector<256x32xf32>
    %c0_62 = arith.constant 0 : index
    %c0_63 = arith.constant 0 : index
    %c0_64 = arith.constant 0 : index
    %c0_65 = arith.constant 0 : index
    %97 = vector.load %arg5[%c0_62, %c0_63, %c0_64, %c0_65] : memref<1x9x32x32xf32, #tpu.memory_space<vmem>>, vector<1x1x32x32xf32>
    %98 = vector.shape_cast %97 : vector<1x1x32x32xf32> to vector<32x32xf32>
    %cst_66 = arith.constant dense<0.000000e+00> : vector<256x32xf32>
    %99 = tpu.matmul %96, %98, %cst_66 {dimension_numbers = #tpu.dot_dimension_numbers<[1], [0], [0], [1], [0, 0, 1, 1], [], []>} : vector<256x32xf32>, vector<32x32xf32>, vector<256x32xf32> -> vector<256x32xf32>
    %100 = arith.addf %93, %99 : vector<256x32xf32>
    %c8_67 = arith.constant 8 : index
    %c0_68 = arith.constant 0 : index
    %101 = vector.load %arg15[%c8_67, %c0_68] : memref<304x32xf32, #tpu.memory_space<vmem>>, vector<256x32xf32>
    %c0_69 = arith.constant 0 : index
    %c1_70 = arith.constant 1 : index
    %c0_71 = arith.constant 0 : index
    %c0_72 = arith.constant 0 : index
    %102 = vector.load %arg5[%c0_69, %c1_70, %c0_71, %c0_72] : memref<1x9x32x32xf32, #tpu.memory_space<vmem>>, vector<1x1x32x32xf32>
    %103 = vector.shape_cast %102 : vector<1x1x32x32xf32> to vector<32x32xf32>
    %cst_73 = arith.constant dense<0.000000e+00> : vector<256x32xf32>
    %104 = tpu.matmul %101, %103, %cst_73 {dimension_numbers = #tpu.dot_dimension_numbers<[1], [0], [0], [1], [0, 0, 1, 1], [], []>} : vector<256x32xf32>, vector<32x32xf32>, vector<256x32xf32> -> vector<256x32xf32>
    %105 = arith.addf %100, %104 : vector<256x32xf32>
    %c9_74 = arith.constant 9 : index
    %c0_75 = arith.constant 0 : index
    %106 = vector.load %arg15[%c9_74, %c0_75] : memref<304x32xf32, #tpu.memory_space<vmem>>, vector<256x32xf32>
    %107 = vector.broadcast %24 : vector<256x1xf32> to vector<256x32xf32>
    %108 = arith.mulf %106, %107 : vector<256x32xf32>
    %c0_76 = arith.constant 0 : index
    %c2_77 = arith.constant 2 : index
    %c0_78 = arith.constant 0 : index
    %c0_79 = arith.constant 0 : index
    %109 = vector.load %arg5[%c0_76, %c2_77, %c0_78, %c0_79] : memref<1x9x32x32xf32, #tpu.memory_space<vmem>>, vector<1x1x32x32xf32>
    %110 = vector.shape_cast %109 : vector<1x1x32x32xf32> to vector<32x32xf32>
    %cst_80 = arith.constant dense<0.000000e+00> : vector<256x32xf32>
    %111 = tpu.matmul %108, %110, %cst_80 {dimension_numbers = #tpu.dot_dimension_numbers<[1], [0], [0], [1], [0, 0, 1, 1], [], []>} : vector<256x32xf32>, vector<32x32xf32>, vector<256x32xf32> -> vector<256x32xf32>
    %112 = arith.addf %105, %111 : vector<256x32xf32>
    %c23_81 = arith.constant 23 : index
    %c0_82 = arith.constant 0 : index
    %113 = vector.load %arg15[%c23_81, %c0_82] : memref<304x32xf32, #tpu.memory_space<vmem>>, vector<256x32xf32>
    %114 = vector.broadcast %20 : vector<256x1xf32> to vector<256x32xf32>
    %115 = arith.mulf %113, %114 : vector<256x32xf32>
    %c0_83 = arith.constant 0 : index
    %c3_84 = arith.constant 3 : index
    %c0_85 = arith.constant 0 : index
    %c0_86 = arith.constant 0 : index
    %116 = vector.load %arg5[%c0_83, %c3_84, %c0_85, %c0_86] : memref<1x9x32x32xf32, #tpu.memory_space<vmem>>, vector<1x1x32x32xf32>
    %117 = vector.shape_cast %116 : vector<1x1x32x32xf32> to vector<32x32xf32>
    %cst_87 = arith.constant dense<0.000000e+00> : vector<256x32xf32>
    %118 = tpu.matmul %115, %117, %cst_87 {dimension_numbers = #tpu.dot_dimension_numbers<[1], [0], [0], [1], [0, 0, 1, 1], [], []>} : vector<256x32xf32>, vector<32x32xf32>, vector<256x32xf32> -> vector<256x32xf32>
    %119 = arith.addf %112, %118 : vector<256x32xf32>
    %c24_88 = arith.constant 24 : index
    %c0_89 = arith.constant 0 : index
    %120 = vector.load %arg15[%c24_88, %c0_89] : memref<304x32xf32, #tpu.memory_space<vmem>>, vector<256x32xf32>
    %c0_90 = arith.constant 0 : index
    %c4_91 = arith.constant 4 : index
    %c0_92 = arith.constant 0 : index
    %c0_93 = arith.constant 0 : index
    %121 = vector.load %arg5[%c0_90, %c4_91, %c0_92, %c0_93] : memref<1x9x32x32xf32, #tpu.memory_space<vmem>>, vector<1x1x32x32xf32>
    %122 = vector.shape_cast %121 : vector<1x1x32x32xf32> to vector<32x32xf32>
    %cst_94 = arith.constant dense<0.000000e+00> : vector<256x32xf32>
    %123 = tpu.matmul %120, %122, %cst_94 {dimension_numbers = #tpu.dot_dimension_numbers<[1], [0], [0], [1], [0, 0, 1, 1], [], []>} : vector<256x32xf32>, vector<32x32xf32>, vector<256x32xf32> -> vector<256x32xf32>
    %124 = arith.addf %119, %123 : vector<256x32xf32>
    %c25_95 = arith.constant 25 : index
    %c0_96 = arith.constant 0 : index
    %125 = vector.load %arg15[%c25_95, %c0_96] : memref<304x32xf32, #tpu.memory_space<vmem>>, vector<256x32xf32>
    %126 = vector.broadcast %24 : vector<256x1xf32> to vector<256x32xf32>
    %127 = arith.mulf %125, %126 : vector<256x32xf32>
    %c0_97 = arith.constant 0 : index
    %c5_98 = arith.constant 5 : index
    %c0_99 = arith.constant 0 : index
    %c0_100 = arith.constant 0 : index
    %128 = vector.load %arg5[%c0_97, %c5_98, %c0_99, %c0_100] : memref<1x9x32x32xf32, #tpu.memory_space<vmem>>, vector<1x1x32x32xf32>
    %129 = vector.shape_cast %128 : vector<1x1x32x32xf32> to vector<32x32xf32>
    %cst_101 = arith.constant dense<0.000000e+00> : vector<256x32xf32>
    %130 = tpu.matmul %127, %129, %cst_101 {dimension_numbers = #tpu.dot_dimension_numbers<[1], [0], [0], [1], [0, 0, 1, 1], [], []>} : vector<256x32xf32>, vector<32x32xf32>, vector<256x32xf32> -> vector<256x32xf32>
    %131 = arith.addf %124, %130 : vector<256x32xf32>
    %c39_102 = arith.constant 39 : index
    %c0_103 = arith.constant 0 : index
    %132 = vector.load %arg15[%c39_102, %c0_103] : memref<304x32xf32, #tpu.memory_space<vmem>>, vector<256x32xf32>
    %133 = vector.broadcast %20 : vector<256x1xf32> to vector<256x32xf32>
    %134 = arith.mulf %132, %133 : vector<256x32xf32>
    %c0_104 = arith.constant 0 : index
    %c6_105 = arith.constant 6 : index
    %c0_106 = arith.constant 0 : index
    %c0_107 = arith.constant 0 : index
    %135 = vector.load %arg5[%c0_104, %c6_105, %c0_106, %c0_107] : memref<1x9x32x32xf32, #tpu.memory_space<vmem>>, vector<1x1x32x32xf32>
    %136 = vector.shape_cast %135 : vector<1x1x32x32xf32> to vector<32x32xf32>
    %cst_108 = arith.constant dense<0.000000e+00> : vector<256x32xf32>
    %137 = tpu.matmul %134, %136, %cst_108 {dimension_numbers = #tpu.dot_dimension_numbers<[1], [0], [0], [1], [0, 0, 1, 1], [], []>} : vector<256x32xf32>, vector<32x32xf32>, vector<256x32xf32> -> vector<256x32xf32>
    %138 = arith.addf %131, %137 : vector<256x32xf32>
    %c40_109 = arith.constant 40 : index
    %c0_110 = arith.constant 0 : index
    %139 = vector.load %arg15[%c40_109, %c0_110] : memref<304x32xf32, #tpu.memory_space<vmem>>, vector<256x32xf32>
    %c0_111 = arith.constant 0 : index
    %c7_112 = arith.constant 7 : index
    %c0_113 = arith.constant 0 : index
    %c0_114 = arith.constant 0 : index
    %140 = vector.load %arg5[%c0_111, %c7_112, %c0_113, %c0_114] : memref<1x9x32x32xf32, #tpu.memory_space<vmem>>, vector<1x1x32x32xf32>
    %141 = vector.shape_cast %140 : vector<1x1x32x32xf32> to vector<32x32xf32>
    %cst_115 = arith.constant dense<0.000000e+00> : vector<256x32xf32>
    %142 = tpu.matmul %139, %141, %cst_115 {dimension_numbers = #tpu.dot_dimension_numbers<[1], [0], [0], [1], [0, 0, 1, 1], [], []>} : vector<256x32xf32>, vector<32x32xf32>, vector<256x32xf32> -> vector<256x32xf32>
    %143 = arith.addf %138, %142 : vector<256x32xf32>
    %c41_116 = arith.constant 41 : index
    %c0_117 = arith.constant 0 : index
    %144 = vector.load %arg15[%c41_116, %c0_117] : memref<304x32xf32, #tpu.memory_space<vmem>>, vector<256x32xf32>
    %145 = vector.broadcast %24 : vector<256x1xf32> to vector<256x32xf32>
    %146 = arith.mulf %144, %145 : vector<256x32xf32>
    %c0_118 = arith.constant 0 : index
    %c8_119 = arith.constant 8 : index
    %c0_120 = arith.constant 0 : index
    %c0_121 = arith.constant 0 : index
    %147 = vector.load %arg5[%c0_118, %c8_119, %c0_120, %c0_121] : memref<1x9x32x32xf32, #tpu.memory_space<vmem>>, vector<1x1x32x32xf32>
    %148 = vector.shape_cast %147 : vector<1x1x32x32xf32> to vector<32x32xf32>
    %cst_122 = arith.constant dense<0.000000e+00> : vector<256x32xf32>
    %149 = tpu.matmul %146, %148, %cst_122 {dimension_numbers = #tpu.dot_dimension_numbers<[1], [0], [0], [1], [0, 0, 1, 1], [], []>} : vector<256x32xf32>, vector<32x32xf32>, vector<256x32xf32> -> vector<256x32xf32>
    %150 = arith.addf %143, %149 : vector<256x32xf32>
    %c0_123 = arith.constant 0 : index
    %c0_124 = arith.constant 0 : index
    %c0_125 = arith.constant 0 : index
    %151 = vector.load %arg6[%c0_123, %c0_124, %c0_125] : memref<1x1x32xf32, #tpu.memory_space<vmem>>, vector<1x1x32xf32>
    %152 = vector.shape_cast %151 : vector<1x1x32xf32> to vector<1x32xf32>
    %153 = vector.broadcast %152 : vector<1x32xf32> to vector<256x32xf32>
    %154 = arith.addf %150, %153 : vector<256x32xf32>
    %cst_126 = arith.constant dense<0.000000e+00> : vector<32xf32>
    %155 = vector.multi_reduction <add>, %154, %cst_126 [0] : vector<256x32xf32> to vector<32xf32>
    %156 = vector.shape_cast %155 : vector<32xf32> to vector<1x32xf32>
    %cst_127 = arith.constant 2.560000e+02 : f32
    %157 = vector.broadcast %cst_127 : f32 to vector<1x32xf32>
    %158 = arith.divf %156, %157 : vector<1x32xf32>
    %c0_128 = arith.constant 0 : index
    %c0_129 = arith.constant 0 : index
    %c0_130 = arith.constant 0 : index
    %159 = vector.load %arg7[%c0_128, %c0_129, %c0_130] : memref<1x2x32xf32, #tpu.memory_space<vmem>>, vector<1x2x32xf32>
    %160 = vector.shape_cast %159 : vector<1x2x32xf32> to vector<2x32xf32>
    %161 = vector.broadcast %158 : vector<1x32xf32> to vector<2x32xf32>
    %162 = arith.mulf %160, %161 : vector<2x32xf32>
    %cst_131 = arith.constant dense<0.000000e+00> : vector<2xf32>
    %163 = vector.multi_reduction <add>, %162, %cst_131 [1] : vector<2x32xf32> to vector<2xf32>
    %164 = vector.shape_cast %163 : vector<2xf32> to vector<2x1xf32>
    %c0_132 = arith.constant 0 : index
    %c0_133 = arith.constant 0 : index
    %c0_134 = arith.constant 0 : index
    %165 = vector.load %arg8[%c0_132, %c0_133, %c0_134] : memref<1x2x1xf32, #tpu.memory_space<vmem>>, vector<1x2x1xf32>
    %166 = vector.shape_cast %165 : vector<1x2x1xf32> to vector<2x1xf32>
    %167 = arith.addf %164, %166 : vector<2x1xf32>
    %cst_135 = arith.constant 0.000000e+00 : f32
    %168 = vector.broadcast %cst_135 : f32 to vector<2x1xf32>
    %169 = arith.maximumf %167, %168 : vector<2x1xf32>
    %c0_136 = arith.constant 0 : index
    %c0_137 = arith.constant 0 : index
    %c0_138 = arith.constant 0 : index
    %170 = vector.load %arg9[%c0_136, %c0_137, %c0_138] : memref<1x2x32xf32, #tpu.memory_space<vmem>>, vector<1x2x32xf32>
    %171 = vector.shape_cast %170 : vector<1x2x32xf32> to vector<2x32xf32>
    %172 = vector.broadcast %169 : vector<2x1xf32> to vector<2x32xf32>
    %173 = arith.mulf %171, %172 : vector<2x32xf32>
    %cst_139 = arith.constant dense<0.000000e+00> : vector<32xf32>
    %174 = vector.multi_reduction <add>, %173, %cst_139 [0] : vector<2x32xf32> to vector<32xf32>
    %175 = vector.shape_cast %174 : vector<32xf32> to vector<1x32xf32>
    %c0_140 = arith.constant 0 : index
    %c0_141 = arith.constant 0 : index
    %c0_142 = arith.constant 0 : index
    %176 = vector.load %arg10[%c0_140, %c0_141, %c0_142] : memref<1x1x32xf32, #tpu.memory_space<vmem>>, vector<1x1x32xf32>
    %177 = vector.shape_cast %176 : vector<1x1x32xf32> to vector<1x32xf32>
    %178 = arith.addf %175, %177 : vector<1x32xf32>
    %179 = arith.negf %178 : vector<1x32xf32>
    %180 = math.exp %179 : vector<1x32xf32>
    %cst_143 = arith.constant 1.000000e+00 : f32
    %181 = vector.broadcast %cst_143 : f32 to vector<1x32xf32>
    %182 = arith.addf %181, %180 : vector<1x32xf32>
    %183 = arith.divf %181, %182 : vector<1x32xf32>
    %c24_144 = arith.constant 24 : index
    %c0_145 = arith.constant 0 : index
    %184 = vector.load %arg14[%c24_144, %c0_145] : memref<304x32xf32, #tpu.memory_space<vmem>>, vector<256x32xf32>
    %185 = vector.broadcast %183 : vector<1x32xf32> to vector<256x32xf32>
    %186 = arith.mulf %154, %185 : vector<256x32xf32>
    %cst_146 = arith.constant 1.000000e+00 : f32
    %187 = vector.broadcast %cst_146 : f32 to vector<256x32xf32>
    %188 = arith.mulf %187, %186 : vector<256x32xf32>
    %189 = arith.addf %184, %188 : vector<256x32xf32>
    %c24_147 = arith.constant 24 : index
    %c0_148 = arith.constant 0 : index
    %190 = vector.load %arg14[%c24_147, %c0_148] : memref<304x32xf32, #tpu.memory_space<vmem>>, vector<256x32xf32>
    tpu.vector_store %arg14[%c24_147, %c0_148], %189 {strides = array<i32>} : memref<304x32xf32, #tpu.memory_space<vmem>>, vector<256x32xf32>,
    %c1_i32_149 = arith.constant 1 : i32
    %191 = arith.cmpi eq, %arg1, %c1_i32_149 : i32
    %192 = arith.extui %191 : i1 to i32
    %c0_i32_150 = arith.constant 0 : i32
    %193 = arith.cmpi ne, %192, %c0_i32_150 : i32
    scf.if %193 {
      %cst_151 = arith.constant 0.000000e+00 : f32
      %194 = vector.broadcast %cst_151 : f32 to vector<256x32xf32>
      %c7_152 = arith.constant 7 : index
      %c0_153 = arith.constant 0 : index
      %195 = vector.load %arg14[%c7_152, %c0_153] : memref<304x32xf32, #tpu.memory_space<vmem>>, vector<256x32xf32>
      %196 = vector.broadcast %20 : vector<256x1xf32> to vector<256x32xf32>
      %197 = arith.mulf %195, %196 : vector<256x32xf32>
      %c0_154 = arith.constant 0 : index
      %c0_155 = arith.constant 0 : index
      %c0_156 = arith.constant 0 : index
      %c0_157 = arith.constant 0 : index
      %198 = vector.load %arg11[%c0_154, %c0_155, %c0_156, %c0_157] : memref<1x9x32x32xf32, #tpu.memory_space<vmem>>, vector<1x1x32x32xf32>
      %199 = vector.shape_cast %198 : vector<1x1x32x32xf32> to vector<32x32xf32>
      %cst_158 = arith.constant dense<0.000000e+00> : vector<256x32xf32>
      %200 = tpu.matmul %197, %199, %cst_158 {dimension_numbers = #tpu.dot_dimension_numbers<[1], [0], [0], [1], [0, 0, 1, 1], [], []>} : vector<256x32xf32>, vector<32x32xf32>, vector<256x32xf32> -> vector<256x32xf32>
      %201 = arith.addf %194, %200 : vector<256x32xf32>
      %c8_159 = arith.constant 8 : index
      %c0_160 = arith.constant 0 : index
      %202 = vector.load %arg14[%c8_159, %c0_160] : memref<304x32xf32, #tpu.memory_space<vmem>>, vector<256x32xf32>
      %c0_161 = arith.constant 0 : index
      %c1_162 = arith.constant 1 : index
      %c0_163 = arith.constant 0 : index
      %c0_164 = arith.constant 0 : index
      %203 = vector.load %arg11[%c0_161, %c1_162, %c0_163, %c0_164] : memref<1x9x32x32xf32, #tpu.memory_space<vmem>>, vector<1x1x32x32xf32>
      %204 = vector.shape_cast %203 : vector<1x1x32x32xf32> to vector<32x32xf32>
      %cst_165 = arith.constant dense<0.000000e+00> : vector<256x32xf32>
      %205 = tpu.matmul %202, %204, %cst_165 {dimension_numbers = #tpu.dot_dimension_numbers<[1], [0], [0], [1], [0, 0, 1, 1], [], []>} : vector<256x32xf32>, vector<32x32xf32>, vector<256x32xf32> -> vector<256x32xf32>
      %206 = arith.addf %201, %205 : vector<256x32xf32>
      %c9_166 = arith.constant 9 : index
      %c0_167 = arith.constant 0 : index
      %207 = vector.load %arg14[%c9_166, %c0_167] : memref<304x32xf32, #tpu.memory_space<vmem>>, vector<256x32xf32>
      %208 = vector.broadcast %24 : vector<256x1xf32> to vector<256x32xf32>
      %209 = arith.mulf %207, %208 : vector<256x32xf32>
      %c0_168 = arith.constant 0 : index
      %c2_169 = arith.constant 2 : index
      %c0_170 = arith.constant 0 : index
      %c0_171 = arith.constant 0 : index
      %210 = vector.load %arg11[%c0_168, %c2_169, %c0_170, %c0_171] : memref<1x9x32x32xf32, #tpu.memory_space<vmem>>, vector<1x1x32x32xf32>
      %211 = vector.shape_cast %210 : vector<1x1x32x32xf32> to vector<32x32xf32>
      %cst_172 = arith.constant dense<0.000000e+00> : vector<256x32xf32>
      %212 = tpu.matmul %209, %211, %cst_172 {dimension_numbers = #tpu.dot_dimension_numbers<[1], [0], [0], [1], [0, 0, 1, 1], [], []>} : vector<256x32xf32>, vector<32x32xf32>, vector<256x32xf32> -> vector<256x32xf32>
      %213 = arith.addf %206, %212 : vector<256x32xf32>
      %c23_173 = arith.constant 23 : index
      %c0_174 = arith.constant 0 : index
      %214 = vector.load %arg14[%c23_173, %c0_174] : memref<304x32xf32, #tpu.memory_space<vmem>>, vector<256x32xf32>
      %215 = vector.broadcast %20 : vector<256x1xf32> to vector<256x32xf32>
      %216 = arith.mulf %214, %215 : vector<256x32xf32>
      %c0_175 = arith.constant 0 : index
      %c3_176 = arith.constant 3 : index
      %c0_177 = arith.constant 0 : index
      %c0_178 = arith.constant 0 : index
      %217 = vector.load %arg11[%c0_175, %c3_176, %c0_177, %c0_178] : memref<1x9x32x32xf32, #tpu.memory_space<vmem>>, vector<1x1x32x32xf32>
      %218 = vector.shape_cast %217 : vector<1x1x32x32xf32> to vector<32x32xf32>
      %cst_179 = arith.constant dense<0.000000e+00> : vector<256x32xf32>
      %219 = tpu.matmul %216, %218, %cst_179 {dimension_numbers = #tpu.dot_dimension_numbers<[1], [0], [0], [1], [0, 0, 1, 1], [], []>} : vector<256x32xf32>, vector<32x32xf32>, vector<256x32xf32> -> vector<256x32xf32>
      %220 = arith.addf %213, %219 : vector<256x32xf32>
      %c24_180 = arith.constant 24 : index
      %c0_181 = arith.constant 0 : index
      %221 = vector.load %arg14[%c24_180, %c0_181] : memref<304x32xf32, #tpu.memory_space<vmem>>, vector<256x32xf32>
      %c0_182 = arith.constant 0 : index
      %c4_183 = arith.constant 4 : index
      %c0_184 = arith.constant 0 : index
      %c0_185 = arith.constant 0 : index
      %222 = vector.load %arg11[%c0_182, %c4_183, %c0_184, %c0_185] : memref<1x9x32x32xf32, #tpu.memory_space<vmem>>, vector<1x1x32x32xf32>
      %223 = vector.shape_cast %222 : vector<1x1x32x32xf32> to vector<32x32xf32>
      %cst_186 = arith.constant dense<0.000000e+00> : vector<256x32xf32>
      %224 = tpu.matmul %221, %223, %cst_186 {dimension_numbers = #tpu.dot_dimension_numbers<[1], [0], [0], [1], [0, 0, 1, 1], [], []>} : vector<256x32xf32>, vector<32x32xf32>, vector<256x32xf32> -> vector<256x32xf32>
      %225 = arith.addf %220, %224 : vector<256x32xf32>
      %c25_187 = arith.constant 25 : index
      %c0_188 = arith.constant 0 : index
      %226 = vector.load %arg14[%c25_187, %c0_188] : memref<304x32xf32, #tpu.memory_space<vmem>>, vector<256x32xf32>
      %227 = vector.broadcast %24 : vector<256x1xf32> to vector<256x32xf32>
      %228 = arith.mulf %226, %227 : vector<256x32xf32>
      %c0_189 = arith.constant 0 : index
      %c5_190 = arith.constant 5 : index
      %c0_191 = arith.constant 0 : index
      %c0_192 = arith.constant 0 : index
      %229 = vector.load %arg11[%c0_189, %c5_190, %c0_191, %c0_192] : memref<1x9x32x32xf32, #tpu.memory_space<vmem>>, vector<1x1x32x32xf32>
      %230 = vector.shape_cast %229 : vector<1x1x32x32xf32> to vector<32x32xf32>
      %cst_193 = arith.constant dense<0.000000e+00> : vector<256x32xf32>
      %231 = tpu.matmul %228, %230, %cst_193 {dimension_numbers = #tpu.dot_dimension_numbers<[1], [0], [0], [1], [0, 0, 1, 1], [], []>} : vector<256x32xf32>, vector<32x32xf32>, vector<256x32xf32> -> vector<256x32xf32>
      %232 = arith.addf %225, %231 : vector<256x32xf32>
      %c39_194 = arith.constant 39 : index
      %c0_195 = arith.constant 0 : index
      %233 = vector.load %arg14[%c39_194, %c0_195] : memref<304x32xf32, #tpu.memory_space<vmem>>, vector<256x32xf32>
      %234 = vector.broadcast %20 : vector<256x1xf32> to vector<256x32xf32>
      %235 = arith.mulf %233, %234 : vector<256x32xf32>
      %c0_196 = arith.constant 0 : index
      %c6_197 = arith.constant 6 : index
      %c0_198 = arith.constant 0 : index
      %c0_199 = arith.constant 0 : index
      %236 = vector.load %arg11[%c0_196, %c6_197, %c0_198, %c0_199] : memref<1x9x32x32xf32, #tpu.memory_space<vmem>>, vector<1x1x32x32xf32>
      %237 = vector.shape_cast %236 : vector<1x1x32x32xf32> to vector<32x32xf32>
      %cst_200 = arith.constant dense<0.000000e+00> : vector<256x32xf32>
      %238 = tpu.matmul %235, %237, %cst_200 {dimension_numbers = #tpu.dot_dimension_numbers<[1], [0], [0], [1], [0, 0, 1, 1], [], []>} : vector<256x32xf32>, vector<32x32xf32>, vector<256x32xf32> -> vector<256x32xf32>
      %239 = arith.addf %232, %238 : vector<256x32xf32>
      %c40_201 = arith.constant 40 : index
      %c0_202 = arith.constant 0 : index
      %240 = vector.load %arg14[%c40_201, %c0_202] : memref<304x32xf32, #tpu.memory_space<vmem>>, vector<256x32xf32>
      %c0_203 = arith.constant 0 : index
      %c7_204 = arith.constant 7 : index
      %c0_205 = arith.constant 0 : index
      %c0_206 = arith.constant 0 : index
      %241 = vector.load %arg11[%c0_203, %c7_204, %c0_205, %c0_206] : memref<1x9x32x32xf32, #tpu.memory_space<vmem>>, vector<1x1x32x32xf32>
      %242 = vector.shape_cast %241 : vector<1x1x32x32xf32> to vector<32x32xf32>
      %cst_207 = arith.constant dense<0.000000e+00> : vector<256x32xf32>
      %243 = tpu.matmul %240, %242, %cst_207 {dimension_numbers = #tpu.dot_dimension_numbers<[1], [0], [0], [1], [0, 0, 1, 1], [], []>} : vector<256x32xf32>, vector<32x32xf32>, vector<256x32xf32> -> vector<256x32xf32>
      %244 = arith.addf %239, %243 : vector<256x32xf32>
      %c41_208 = arith.constant 41 : index
      %c0_209 = arith.constant 0 : index
      %245 = vector.load %arg14[%c41_208, %c0_209] : memref<304x32xf32, #tpu.memory_space<vmem>>, vector<256x32xf32>
      %246 = vector.broadcast %24 : vector<256x1xf32> to vector<256x32xf32>
      %247 = arith.mulf %245, %246 : vector<256x32xf32>
      %c0_210 = arith.constant 0 : index
      %c8_211 = arith.constant 8 : index
      %c0_212 = arith.constant 0 : index
      %c0_213 = arith.constant 0 : index
      %248 = vector.load %arg11[%c0_210, %c8_211, %c0_212, %c0_213] : memref<1x9x32x32xf32, #tpu.memory_space<vmem>>, vector<1x1x32x32xf32>
      %249 = vector.shape_cast %248 : vector<1x1x32x32xf32> to vector<32x32xf32>
      %cst_214 = arith.constant dense<0.000000e+00> : vector<256x32xf32>
      %250 = tpu.matmul %247, %249, %cst_214 {dimension_numbers = #tpu.dot_dimension_numbers<[1], [0], [0], [1], [0, 0, 1, 1], [], []>} : vector<256x32xf32>, vector<32x32xf32>, vector<256x32xf32> -> vector<256x32xf32>
      %251 = arith.addf %244, %250 : vector<256x32xf32>
      %c0_215 = arith.constant 0 : index
      %c0_216 = arith.constant 0 : index
      %c0_217 = arith.constant 0 : index
      %252 = vector.load %arg12[%c0_215, %c0_216, %c0_217] : memref<1x1x32xf32, #tpu.memory_space<vmem>>, vector<1x1x32xf32>
      %253 = vector.shape_cast %252 : vector<1x1x32xf32> to vector<1x32xf32>
      %254 = vector.broadcast %253 : vector<1x32xf32> to vector<256x32xf32>
      %255 = arith.addf %251, %254 : vector<256x32xf32>
      %c0_218 = arith.constant 0 : index
      %c0_219 = arith.constant 0 : index
      %c0_220 = arith.constant 0 : index
      %256 = vector.load %arg2[%c0_218, %c0_219, %c0_220] : memref<1x256x32xf32, #tpu.memory_space<vmem>>, vector<1x256x32xf32>
      %257 = vector.shape_cast %256 : vector<1x256x32xf32> to vector<256x32xf32>
      %258 = arith.addf %257, %255 : vector<256x32xf32>
      %c0_221 = arith.constant 0 : index
      %c0_222 = arith.constant 0 : index
      %c0_223 = arith.constant 0 : index
      %259 = vector.load %arg13[%c0_221, %c0_222, %c0_223] : memref<1x256x32xf32, #tpu.memory_space<vmem>>, vector<1x256x32xf32>
      %260 = vector.shape_cast %259 : vector<1x256x32xf32> to vector<256x32xf32>
      %261 = vector.shape_cast %258 : vector<256x32xf32> to vector<1x256x32xf32>
      tpu.vector_store %arg13[%c0_221, %c0_222, %c0_223], %261 {strides = array<i32>} : memref<1x256x32xf32, #tpu.memory_space<vmem>>, vector<1x256x32xf32>,
    } else {
    }
    return
  }
  func.func @transform_0(%arg0: i32, %arg1: i32) -> (i32, i32, i32) {
    %c0_i32 = arith.constant 0 : i32
    %c0_i32_0 = arith.constant 0 : i32
    %c0_i32_1 = arith.constant 0 : i32
    return %arg0, %c0_i32, %c0_i32_0 : i32, i32, i32
  }
  func.func @transform_1(%arg0: i32, %arg1: i32) -> (i32, i32, i32, i32) {
    %c0_i32 = arith.constant 0 : i32
    %c0_i32_0 = arith.constant 0 : i32
    %c0_i32_1 = arith.constant 0 : i32
    %c0_i32_2 = arith.constant 0 : i32
    return %arg1, %c0_i32, %c0_i32_0, %c0_i32_1 : i32, i32, i32, i32
  }
  func.func @transform_2(%arg0: i32, %arg1: i32) -> (i32, i32, i32) {
    %c0_i32 = arith.constant 0 : i32
    %c0_i32_0 = arith.constant 0 : i32
    %c0_i32_1 = arith.constant 0 : i32
    return %arg1, %c0_i32, %c0_i32_0 : i32, i32, i32
  }
  func.func @transform_3(%arg0: i32, %arg1: i32) -> (i32, i32, i32, i32) {
    %c0_i32 = arith.constant 0 : i32
    %c0_i32_0 = arith.constant 0 : i32
    %c0_i32_1 = arith.constant 0 : i32
    %c0_i32_2 = arith.constant 0 : i32
    return %arg1, %c0_i32, %c0_i32_0, %c0_i32_1 : i32, i32, i32, i32
  }
  func.func @transform_4(%arg0: i32, %arg1: i32) -> (i32, i32, i32) {
    %c0_i32 = arith.constant 0 : i32
    %c0_i32_0 = arith.constant 0 : i32
    %c0_i32_1 = arith.constant 0 : i32
    return %arg1, %c0_i32, %c0_i32_0 : i32, i32, i32
  }
  func.func @transform_5(%arg0: i32, %arg1: i32) -> (i32, i32, i32) {
    %c0_i32 = arith.constant 0 : i32
    %c0_i32_0 = arith.constant 0 : i32
    %c0_i32_1 = arith.constant 0 : i32
    return %arg1, %c0_i32, %c0_i32_0 : i32, i32, i32
  }
  func.func @transform_6(%arg0: i32, %arg1: i32) -> (i32, i32, i32) {
    %c0_i32 = arith.constant 0 : i32
    %c0_i32_0 = arith.constant 0 : i32
    %c0_i32_1 = arith.constant 0 : i32
    return %arg1, %c0_i32, %c0_i32_0 : i32, i32, i32
  }
  func.func @transform_7(%arg0: i32, %arg1: i32) -> (i32, i32, i32) {
    %c0_i32 = arith.constant 0 : i32
    %c0_i32_0 = arith.constant 0 : i32
    %c0_i32_1 = arith.constant 0 : i32
    return %arg1, %c0_i32, %c0_i32_0 : i32, i32, i32
  }
  func.func @transform_8(%arg0: i32, %arg1: i32) -> (i32, i32, i32) {
    %c0_i32 = arith.constant 0 : i32
    %c0_i32_0 = arith.constant 0 : i32
    %c0_i32_1 = arith.constant 0 : i32
    return %arg1, %c0_i32, %c0_i32_0 : i32, i32, i32
  }
  func.func @transform_9(%arg0: i32, %arg1: i32) -> (i32, i32, i32, i32) {
    %c0_i32 = arith.constant 0 : i32
    %c0_i32_0 = arith.constant 0 : i32
    %c0_i32_1 = arith.constant 0 : i32
    %c0_i32_2 = arith.constant 0 : i32
    %c0_i32_3 = arith.constant 0 : i32
    return %c0_i32, %c0_i32_0, %c0_i32_1, %c0_i32_2 : i32, i32, i32, i32
  }
  func.func @transform_10(%arg0: i32, %arg1: i32) -> (i32, i32, i32) {
    %c0_i32 = arith.constant 0 : i32
    %c0_i32_0 = arith.constant 0 : i32
    %c0_i32_1 = arith.constant 0 : i32
    %c0_i32_2 = arith.constant 0 : i32
    return %c0_i32, %c0_i32_0, %c0_i32_1 : i32, i32, i32
  }
  func.func @transform_11(%arg0: i32, %arg1: i32) -> (i32, i32, i32) {
    %c0_i32 = arith.constant 0 : i32
    %c0_i32_0 = arith.constant 0 : i32
    %c0_i32_1 = arith.constant 0 : i32
    return %arg0, %c0_i32, %c0_i32_0 : i32, i32, i32
  }
}

</mosaic_0001>

<bundles_post_ra>
// kernel: tpu_custom_call.1
= control target key start
LH: loop header
LB: loop body
LE: loop exit
PB: predicated region body
PF: predicated region fallthrough
CT: control target
= control target key end

     0   :  { %s21411_s0 = inlined_call_operand.vmem [shape: f32[2,256,32], index: 0, kind: input, shape index: {}]   ;;  %s21412_s1 = inlined_call_operand.vmem [shape: f32[2,9,32,32], index: 1, kind: input, shape index: {}]   ;;  %s21413_s2 = inlined_call_operand.vmem [shape: f32[2,1,32], index: 2, kind: input, shape index: {}]   ;;  %s21414_s3 = inlined_call_operand.hbm [shape: f32[2,9,32,32], index: 3, kind: input, shape index: {}]   ;;  %s21415_s4 = inlined_call_operand.vmem [shape: f32[2,1,32], index: 4, kind: input, shape index: {}]   ;;  %s21416_s5 = inlined_call_operand.vmem [shape: f32[2,2,32], index: 5, kind: input, shape index: {}]   ;;  %s21417_s6 = inlined_call_operand.vmem [shape: f32[2,2,1], index: 6, kind: input, shape index: {}]   ;;  %s21418_s7 = inlined_call_operand.vmem [shape: f32[2,2,32], index: 7, kind: input, shape index: {}]   ;;  %s21419_s8 = inlined_call_operand.vmem [shape: f32[2,1,32], index: 8, kind: input, shape index: {}]   ;;  %s21420_s9 = inlined_call_operand.hbm [shape: f32[1,9,32,32], index: 9, kind: input, shape index: {}]   ;;  %s21421_s10 = inlined_call_operand.vmem [shape: f32[1,1,32], index: 10, kind: input, shape index: {}]   ;;  %s21422_s11 = inlined_call_operand.vmem [shape: f32[2,256,32], index: 11, kind: output, shape index: {}]  }
   0x1   :  { %21768 = sst [smem:[#allocation164_spill]] %s21420_s9 }
   0x2   :  { %21769 = sst [smem:[#allocation165_spill]] %s21421_s10 }
   0x3   :  { %16 = vsyncpa [#allocation5], 0 }
   0x4   :  { %18 = vsyncpa [#allocation5 + $0x1], 0 }
   0x5   :  { %19 = vsyncpa [#allocation7], 0  ;;  %s17610_s17 = smov 0   ;;  %s17612_s18 = smov 0  }
   0x6   :  { %s17614_s19 = smov 0   ;;  %s17616_s20 = smov 0  }
   0x7   :  { %s17618_s21 = smov 0   ;;  %s17620_s22 = smov 0  }
   0x8   :  { %s17622_s23 = smov 0   ;;  %s17624_s24 = smov 0  }
   0x9 LB: > { %21770 = sst [smem:[#allocation10_spill]] %s17533_s22  ;;  %s12859_s25 = sadd.s32 4294967295, %s17541_s24   ;;  %s17541_s24 = sphi %s17624_s24, %s25_s24   ;;  %s17537_s23 = sphi %s17622_s23, %s22411_s23   ;;  %s17533_s22 = sphi %s17620_s22, %s22410_s22   ;;  %s17529_s21 = sphi %s17618_s21, %s22409_s21   ;;  %s17525_s20 = sphi %s17616_s20, %s22408_s20   ;;  %s17521_s19 = sphi %s17614_s19, %s22414_s19   ;;  %s17517_s18 = sphi %s17612_s18, %s22413_s18   ;;  %s17513_s17 = sphi %s17610_s17, %s22412_s17  }
   0xa   : > { %21771 = sst [smem:[#allocation11_spill]] %s17537_s23  ;;  %p135_p0 = scmp.ne.s32.totalorder %s17517_s18, %s17513_s17 }
   0xb   : > { %p17650_p1 = scmp.eq.s32.totalorder %s12859_s25, 0  ;;  %p12861_p2 = scmp.ge.s32.totalorder %s17541_s24, 1 }
   0xc   : > { %p344_p3 = scmp.lt.s32.totalorder %s17541_s24, 5  ;;  %s17543_s29 = smov [#allocation6]  }
   0xd   : > { %s21772_s26 = scalar_select %p17650_p1, 1, 0 }
   0xe   : > { %p17658_p4 = por %p17650_p1, %p135_p0  ;;  %p17662_p5 = pnand %p12861_p2, %p344_p3 }
   0xf   : > { %s356_s30 = sshll.u32 %s17543_s29, 4  ;;  %s21776_s9 = sld [smem:[#allocation164_spill]]  ;;  %s357_s30 = int_to_ptr.vmem [resolvable:$true] %s356_s30 }
  0x10   : > { %s21773_s27 = scalar_select %p17658_p4, 1, 0 }
  0x11   : > { %s21774_s28 = scalar_select %p17662_p5, 1, 0 }
  0x12   : > { %p17327_p6 = pneg %p17662_p5 }
  0x14   : > { %p17670_p7 = pnand %p17327_p6, %p17650_p1 }
  0x15   : > { %s17413_s15 = scalar_lea.hbm %s21776_s9, 4608 }
  0x16   : > { %p17414_p8 = scmp.ne.s32.totalorder %s21776_s9, %s17413_s15  ;;  %p17415_p9 = pneg %p17670_p7 }
  0x17   : > { %p17420_p12 = scmp.lt.u32.totalorder %s17413_s15, %s21776_s9 }
  0x18   : > { %p17416_p10 = pnand %p17415_p9, %p17414_p8 }
  0x1a   : > { %p17417_p11 = pneg %p17416_p10 }
  0x1c   : > { %p17422_p13 = pnand %p17420_p12, %p17417_p11 }
  0x1e   : > { %17425 = shalt.err (!%p17422_p13)
}
  0x1f   : > { %s17426_s10 = scalar_lea.vmem %s357_s30, 4608  ;;  %p17434_p6 = scmp.lt.s32.totalorder %s357_s30, %s357_s30 }
  0x20   : > { %p17427_p0 = scmp.ne.s32.totalorder %s357_s30, %s17426_s10  ;;  %p17435_p1 = scmp.lt.s32.totalorder %s17426_s10, %s17426_s10 }
  0x22   : > { %p17429_p2 = pnand %p17427_p0, %p17415_p9  ;;  %p17436_p4 = por %p17435_p1, %p17434_p6 }
  0x24   : > { %p17430_p3 = pneg %p17429_p2 }
  0x26   : > { %p17437_p5 = pnand %p17436_p4, %p17430_p3 }
  0x28   : > { %17440 = shalt.err (!%p17437_p5)
}
  0x29   : > { %s21427_s13 = smov 128   ;;  %s21428_s14 = smov 8  }
  0x2a   : > { %17330 = dma.hbm_to_vmem [thread:$0]  (!%p17670_p7), %s21776_s9, 4608, %s357_s30, [#allocation7], %s21427_s13, %s21427_s13, %s21428_s14  }
  0x2b   : > { %s34_s16 = sadd.s32 1, %s17533_s22  ;;  %s37_s17 = sadd.s32 1, %s17537_s23 }
  0x2c   : > { %p35_p1 = scmp.ge.s32.totalorder %s34_s16, 2  ;;  %s122_s25 = sadd.s32 1, %s17521_s19 }
  0x2d   : > { %p129_p4 = scmp.ne.s32.totalorder %s17521_s19, %s17517_s18  ;;  %p130_p5 = scmp.eq.s32.totalorder %s17541_s24, 0 }
  0x2e   : > { %s22416_s16 = smov (%p35_p1, %s34_s16), 0  ;;  %s22418_s17 = smov (!%p35_p1, %s37_s17), %s17537_s23 }
  0x2f   : > { %21777 = sst [smem:[#allocation12_spill]] %s22416_s16  ;;  %s119_s12 = ssub.s32 %s17533_s22, %s22416_s16 }
  0x30   : > { %p39_p8 = scmp.ge.s32.totalorder %s22418_s17, 2  ;;  %p120_p9 = scmp.eq.s32.totalorder %s119_s12, 0 }
  0x31   : > { %p131_p10 = por %p130_p5, %p129_p4  ;;  %p17336_p11 = scmp.lt.s32.totalorder %s17541_s24, 4 }
  0x32   : > { %s22420_s17 = smov (%p39_p8, %s22418_s17), 0  ;;  %s395_s29 = sand.u32 1, %s17521_s19  }
  0x33   : > { %21778 = sst [smem:[#allocation13_spill]] %s22420_s17  ;;  %s17318_s10 = smul.u32 4608, %s17533_s22 }
  0x34   : > { %s17708_s30 = scalar_select %p120_p9, %s17521_s19, %s122_s25  }
  0x35   : > { %s17317_s15 = smul.u32 288, %s395_s29  ;;  %p17712_p7 = pnand %p17336_p11, %p131_p10 }
  0x36   : > { %21779 = sst [smem:[#allocation14_spill]] %s17708_s30  ;;  %s17719_s16 = scalar_lea.hbm %s21414_s3, %s17318_s10 }
  0x37   : > { %s399_s25 = scalar_lea.vmem [#allocation4], %s17317_s15  ;;  %s17723_s17 = scalar_lea.sflag [#allocation5], %s395_s29 }
  0x38   : > { %s406_s12 = sshll.u32 %s399_s25, 4  ;;  %s17441_s23 = scalar_lea.hbm %s17719_s16, 4608  ;;  %s17721_s12 = int_to_ptr.vmem [resolvable:$true] %s406_s12 }
  0x39   : > { %p17442_p12 = scmp.ne.s32.totalorder %s17719_s16, %s17441_s23  ;;  %p17443_p13 = pneg %p17712_p7 }
  0x3a   : > { %s17446_s10 = scalar_lea.hbm %s21414_s3, 9216  ;;  %p17447_p3 = scmp.lt.u32.totalorder %s17719_s16, %s21414_s3 }
  0x3b   : > { %p17444_p0 = pnand %p17443_p13, %p17442_p12  ;;  %p17448_p6 = scmp.lt.u32.totalorder %s17446_s10, %s17441_s23 }
  0x3c   : > { %p17450_p4 = scmp.lt.u32.totalorder %s17441_s23, %s17719_s16 }
  0x3d   : > { %p17445_p2 = pneg %p17444_p0  ;;  %p17449_p1 = por %p17448_p6, %p17447_p3 }
  0x3f   : > { %p17451_p5 = por %p17450_p4, %p17449_p1 }
  0x41   : > { %p17452_p8 = pnand %p17451_p5, %p17445_p2 }
  0x43   : > { %17455 = shalt.err (!%p17452_p8)
}
  0x44   : > { %s17456_s29 = scalar_lea.vmem %s17721_s12, 4608  ;;  %s17546_s15 = smov [#allocation4]  }
  0x45   : > { %p17457_p9 = scmp.ne.s32.totalorder %s17721_s12, %s17456_s29  ;;  %s17461_s25 = sshll.u32 %s17546_s15, 4  ;;  %s17462_s25 = int_to_ptr.vmem [resolvable:$false] %s17461_s25 }
  0x46   : > { %s17463_s22 = scalar_lea.vmem %s17462_s25, 9216  ;;  %p17464_p12 = scmp.lt.s32.totalorder %s17721_s12, %s17462_s25 }
  0x47   : > { %p17459_p10 = pnand %p17457_p9, %p17443_p13  ;;  %p17465_p0 = scmp.lt.s32.totalorder %s17463_s22, %s17456_s29 }
  0x49   : > { %p17460_p11 = pneg %p17459_p10  ;;  %p17466_p3 = por %p17465_p0, %p17464_p12 }
  0x4b   : > { %p17467_p6 = pnand %p17466_p3, %p17460_p11 }
  0x4d   : > { %17470 = shalt.err (!%p17467_p6)
}
  0x4e   : > { %s21781_s23 = smov 8   ;;  %s21782_s30 = smov 128  }
  0x4f   : > { %17334 = dma.hbm_to_vmem [thread:$0]  (!%p17712_p7), %s17719_s16, 4608, %s17721_s12, %s17723_s17, %s21782_s30, %s21782_s30, %s21781_s23  }
  0x50   : > { %p21783_p13 = scmp.ne.s32.totalorder %s21774_s28, 0 }
  0x52   : > { %451 = sbr.rel (%p21783_p13) target bundleno = 2576 (0xa10), region = 64 }
  0x59   : > { %s453_s9 = sand.u32 1, %s17517_s18   ;;  %p21784_p2 = scmp.ne.s32.totalorder %s21773_s27, 0 }
  0x5a   : > { %s17319_s14 = smul.u32 288, %s453_s9  ;;  %s454_s10 = scalar_lea.sflag [#allocation5], %s453_s9 }
  0x5c   : > { %s17757_s29 = scalar_lea.vmem [#allocation4], %s17319_s14 }
  0x5d   : > { %17504 = dma.done.wait (%p21784_p2), %s454_s10, 4608  }
  0x5e   : > { %17506 = vsyncadd (%p21784_p2), %s454_s10, 4294962688  ;;  %p21785_p1 = scmp.ne.s32.totalorder %s21772_s26, 0 }
  0x60   : > { %17508 = dma.done.wait (%p21785_p1), [#allocation7], 4608  }
  0x61   : > { %17510 = vsyncadd (%p21785_p1), [#allocation7], 4294962688  ;;  %p531_p7 = scmp.lt.s32.totalorder %s17529_s21, 1  ;;  %p536_p4 = scmp.lt.s32.totalorder %s17525_s20, 1  ;;  %v567_v0 = vlaneseq }
  0x62   : > { %p12907_p5 = scmp.ne.s32.totalorder %s17525_s20, 0 }
  0x63   : > { %s22422_s21 = smov (!%p531_p7, %s17529_s21), 1  ;;  %v17772_v1 = vshrl.u32 %v567_v0, 7 }
  0x64   : > { %s17775_s27 = scalar_select %p536_p4, %s17525_s20, 1 }
  0x65   : > { %21786 = vst [vmem:[#allocation15_spill] sm:$0xff] %v17772_v1  ;;  %s13843_s26 = sshll.u32 %s22422_s21, 8  ;;  %v17779_v2 = vadd.s32 8, %v17772_v1  ;;  %v17782_v3 = vadd.s32 16, %v17772_v1  ;;  %v17785_v4 = vadd.s32 24, %v17772_v1  ;;  %v17788_v5 = vadd.s32 32, %v17772_v1 }
  0x66   : > { %s17795_s16 = scalar_lea.vmem %s21411_s0, %s13843_s26  ;;  %s17320_s17 = smul.u32 288, %s17775_s27  ;;  %v17799_v6 = vadd.s32 40, %v17772_v1  ;;  %v17802_v7 = vadd.s32 48, %v17772_v1  ;;  %v17805_v8 = vadd.s32 56, %v17772_v1  ;;  %v17808_v9 = vadd.s32 64, %v17772_v1 }
  0x67   : > { %s543_s25 = scalar_lea.vmem %s21413_s2, %s17775_s27  ;;  %v17819_v10 = vadd.s32 72, %v17772_v1  ;;  %v17822_v11 = vadd.s32 80, %v17772_v1  ;;  %v17825_v12 = vadd.s32 88, %v17772_v1  ;;  %v17828_v13 = vadd.s32 96, %v17772_v1  ;;  %s17836_s28 = sshll.u32 %s17775_s27, 1 }
  0x68   : > { %s17833_s10 = scalar_lea.vmem %s21412_s1, %s17320_s17  ;;  %v17839_v14 = vadd.s32 104, %v17772_v1  ;;  %v582_v15 = vadd.s32 112, %v17772_v1  ;;  %v17843_v16 = vadd.s32 120, %v17772_v1  ;;  %v584_v17 = vadd.s32 128, %v17772_v1  ;;  %s554_s23 = scalar_lea.vmem %s21417_s6, %s17836_s28 }
  0x69   : > { %v17855_v18 = vadd.s32 136, %v17772_v1  ;;  %v586_v19 = vadd.s32 144, %v17772_v1  ;;  %v17859_v20 = vadd.s32 152, %v17772_v1  ;;  %v588_v21 = vadd.s32 160, %v17772_v1  ;;  %s558_s30 = scalar_lea.vmem %s21418_s7, %s17836_s28  ;;  %s561_s17 = scalar_lea.vmem %s21419_s8, %s17775_s27 }
  0x6a   : > { %v17871_v22 = vadd.s32 168, %v17772_v1  ;;  %v590_v23 = vadd.s32 176, %v17772_v1  ;;  %v17875_v24 = vadd.s32 184, %v17772_v1  ;;  %v592_v25 = vadd.s32 192, %v17772_v1  ;;  %s17883_s9 = scalar_lea.vmem %s21422_s11, %s13843_s26 }
  0x6b   : > { %v17886_v26 = vadd.s32 200, %v17772_v1  ;;  %v594_v27 = vadd.s32 208, %v17772_v1  ;;  %v17890_v28 = vadd.s32 216, %v17772_v1  ;;  %v596_v29 = vadd.s32 224, %v17772_v1 }
  0x6c   : > { %v17894_v30 = vadd.s32 232, %v17772_v1  ;;  %v598_v31 = vadd.s32 240, %v17772_v1  ;;  %v17898_v32 = vadd.s32 248, %v17772_v1  ;;  %v604_v33 = vand.u32 15, %v17772_v1 }
  0x6d   : > { %v611_v34 = vand.u32 15, %v17779_v2  ;;  %v618_v35 = vand.u32 15, %v17782_v3  ;;  %v625_v36 = vand.u32 15, %v17785_v4  ;;  %v632_v37 = vand.u32 15, %v17788_v5  ;;  %v1193_v5 = vld [vmem:[%s17795_s16] sm:$0xff] (!%p12907_p5)  ;;  %v1212_v2 = vld [vmem:[%s17795_s16 + $0x98] sm:$0xff] (!%p12907_p5) }
  0x6e   : > { %v639_v38 = vand.u32 15, %v17799_v6  ;;  %v646_v39 = vand.u32 15, %v17802_v7  ;;  %v653_v40 = vand.u32 15, %v17805_v8  ;;  %v660_v41 = vand.u32 15, %v17808_v9  ;;  %v1194_v6 = vld [vmem:[%s17795_s16 + $0x8] sm:$0xff] (!%p12907_p5)  ;;  %v1195_v7 = vld [vmem:[%s17795_s16 + $0x10] sm:$0xff] (!%p12907_p5) }
  0x6f   : > { %v667_v42 = vand.u32 15, %v17819_v10  ;;  %v674_v43 = vand.u32 15, %v17822_v11  ;;  %v681_v44 = vand.u32 15, %v17825_v12  ;;  %v688_v45 = vand.u32 15, %v17828_v13  ;;  %v1196_v9 = vld [vmem:[%s17795_s16 + $0x18] sm:$0xff] (!%p12907_p5)  ;;  %v1197_v10 = vld [vmem:[%s17795_s16 + $0x20] sm:$0xff] (!%p12907_p5) }
  0x70   : > { %v695_v46 = vand.u32 15, %v17839_v14  ;;  %v702_v47 = vand.u32 15, %v582_v15  ;;  %v709_v48 = vand.u32 15, %v17843_v16  ;;  %v716_v49 = vand.u32 15, %v584_v17  ;;  %v1198_v11 = vld [vmem:[%s17795_s16 + $0x28] sm:$0xff] (!%p12907_p5)  ;;  %v1199_v12 = vld [vmem:[%s17795_s16 + $0x30] sm:$0xff] (!%p12907_p5) }
  0x71   : > { %v723_v50 = vand.u32 15, %v17855_v18  ;;  %v730_v51 = vand.u32 15, %v586_v19  ;;  %v737_v52 = vand.u32 15, %v17859_v20  ;;  %v744_v53 = vand.u32 15, %v588_v21  ;;  %v1200_v13 = vld [vmem:[%s17795_s16 + $0x38] sm:$0xff] (!%p12907_p5)  ;;  %v1201_v14 = vld [vmem:[%s17795_s16 + $0x40] sm:$0xff] (!%p12907_p5) }
  0x72   : > { %v751_v54 = vand.u32 15, %v17871_v22  ;;  %v758_v55 = vand.u32 15, %v590_v23  ;;  %v765_v56 = vand.u32 15, %v17875_v24  ;;  %v772_v57 = vand.u32 15, %v592_v25  ;;  %v1202_v15 = vld [vmem:[%s17795_s16 + $0x48] sm:$0xff] (!%p12907_p5)  ;;  %v1203_v16 = vld [vmem:[%s17795_s16 + $0x50] sm:$0xff] (!%p12907_p5) }
  0x73   : > { %v779_v58 = vand.u32 15, %v17886_v26  ;;  %v786_v59 = vand.u32 15, %v594_v27  ;;  %v793_v60 = vand.u32 15, %v17890_v28  ;;  %v800_v61 = vand.u32 15, %v596_v29  ;;  %v1204_v17 = vld [vmem:[%s17795_s16 + $0x58] sm:$0xff] (!%p12907_p5)  ;;  %v1205_v18 = vld [vmem:[%s17795_s16 + $0x60] sm:$0xff] (!%p12907_p5) }
  0x74   : > { %v807_v62 = vand.u32 15, %v17894_v30  ;;  %v814_v63 = vand.u32 15, %v598_v31  ;;  %v821_v0 = vand.u32 15, %v17898_v32  ;;  %vm17923_vm0 = vcmp.gt.s32.totalorder %v604_v33, 0 }
  0x75   : > { %vm17927_vm1 = vcmp.gt.s32.totalorder %v618_v35, 0  ;;  %vm17931_vm2 = vcmp.gt.s32.totalorder %v632_v37, 0  ;;  %vm17935_vm3 = vcmp.gt.s32.totalorder %v646_v39, 0  ;;  %vm17939_vm4 = vcmp.gt.s32.totalorder %v660_v41, 0  ;;  %v1207_v39 = vld [vmem:[%s17795_s16 + $0x70] sm:$0xff] (!%p12907_p5)  ;;  %v1208_v41 = vld [vmem:[%s17795_s16 + $0x78] sm:$0xff] (!%p12907_p5) }
  0x76   : > { %vm17943_vm5 = vcmp.gt.s32.totalorder %v674_v43, 0  ;;  %vm17947_vm6 = vcmp.gt.s32.totalorder %v688_v45, 0  ;;  %vm17951_vm7 = vcmp.gt.s32.totalorder %v702_v47, 0  ;;  %vm17955_vm8 = vcmp.gt.s32.totalorder %v716_v49, 0  ;;  %v1209_v43 = vld [vmem:[%s17795_s16 + $0x80] sm:$0xff] (!%p12907_p5)  ;;  %v1210_v45 = vld [vmem:[%s17795_s16 + $0x88] sm:$0xff] (!%p12907_p5) }
  0x77   : > { %vm17959_vm9 = vcmp.gt.s32.totalorder %v730_v51, 0  ;;  %vm17963_vm10 = vcmp.gt.s32.totalorder %v744_v53, 0  ;;  %vm17967_vm11 = vcmp.gt.s32.totalorder %v758_v55, 0  ;;  %vm17971_vm12 = vcmp.gt.s32.totalorder %v772_v57, 0  ;;  %v1211_v47 = vld [vmem:[%s17795_s16 + $0x90] sm:$0xff] (!%p12907_p5)  ;;  %v1221_v49 = vld [vmem:[%s17795_s16 + $0xe0] sm:$0xff] (!%p12907_p5) }
  0x78   : > { %vm17975_vm13 = vcmp.gt.s32.totalorder %v786_v59, 0  ;;  %vm17979_vm14 = vcmp.gt.s32.totalorder %v800_v61, 0  ;;  %vm17983_vm15 = vcmp.gt.s32.totalorder %v814_v63, 0  ;;  %v17547_v19 = vmov 0.0  }
  0x79   : > { %v17989_v20 = vsel %vm17923_vm0, 1.0, %v17547_v19  ;;  %v17993_v21 = vsel %vm17927_vm1, 1.0, %v17547_v19  ;;  %v17997_v22 = vsel %vm17931_vm2, 1.0, %v17547_v19  ;;  %v18001_v23 = vsel %vm17935_vm3, 1.0, %v17547_v19 }
  0x7a   : > { %21819 = vst [vmem:[#allocation16_spill] sm:$0xff] %v17989_v20  ;;  %21820 = vst [vmem:[#allocation17_spill] sm:$0xff] %v17993_v21  ;;  %v18005_v24 = vsel %vm17939_vm4, 1.0, %v17547_v19  ;;  %v18009_v25 = vsel %vm17943_vm5, 1.0, %v17547_v19  ;;  %v18013_v26 = vsel %vm17947_vm6, 1.0, %v17547_v19  ;;  %v18017_v27 = vsel %vm17951_vm7, 1.0, %v17547_v19 }
  0x7b   : > { %21821 = vst [vmem:[#allocation18_spill] sm:$0xff] %v17997_v22  ;;  %21822 = vst [vmem:[#allocation19_spill] sm:$0xff] %v18001_v23  ;;  %v18021_v28 = vsel %vm17955_vm8, 1.0, %v17547_v19  ;;  %v18025_v29 = vsel %vm17959_vm9, 1.0, %v17547_v19  ;;  %v18029_v30 = vsel %vm17963_vm10, 1.0, %v17547_v19  ;;  %v18033_v31 = vsel %vm17967_vm11, 1.0, %v17547_v19 }
  0x7c   : > { %21823 = vst [vmem:[#allocation20_spill] sm:$0xff] %v18005_v24  ;;  %21824 = vst [vmem:[#allocation21_spill] sm:$0xff] %v18009_v25  ;;  %v18037_v32 = vsel %vm17971_vm12, 1.0, %v17547_v19  ;;  %v18041_v33 = vsel %vm17975_vm13, 1.0, %v17547_v19  ;;  %v18045_v35 = vsel %vm17979_vm14, 1.0, %v17547_v19  ;;  %v18049_v37 = vsel %vm17983_vm15, 1.0, %v17547_v19 }
  0x7d   : > { %21825 = vst [vmem:[#allocation22_spill] sm:$0xff] %v18013_v26  ;;  %21826 = vst [vmem:[#allocation23_spill] sm:$0xff] %v18017_v27  ;;  %vm18053_vm0 = vcmp.lt.s32.totalorder %v611_v34, 15  ;;  %vm18057_vm1 = vcmp.lt.s32.totalorder %v625_v36, 15  ;;  %vm18061_vm2 = vcmp.lt.s32.totalorder %v639_v38, 15  ;;  %vm18065_vm3 = vcmp.lt.s32.totalorder %v653_v40, 15 }
  0x7e   : > { %21827 = vst [vmem:[#allocation24_spill] sm:$0xff] %v18021_v28  ;;  %21828 = vst [vmem:[#allocation25_spill] sm:$0xff] %v18025_v29  ;;  %vm18069_vm4 = vcmp.lt.s32.totalorder %v667_v42, 15  ;;  %vm18073_vm5 = vcmp.lt.s32.totalorder %v681_v44, 15  ;;  %vm18077_vm6 = vcmp.lt.s32.totalorder %v695_v46, 15  ;;  %vm18081_vm7 = vcmp.lt.s32.totalorder %v709_v48, 15 }
  0x7f   : > { %21829 = vst [vmem:[#allocation26_spill] sm:$0xff] %v18029_v30  ;;  %21830 = vst [vmem:[#allocation27_spill] sm:$0xff] %v18033_v31  ;;  %vm18085_vm8 = vcmp.lt.s32.totalorder %v723_v50, 15  ;;  %vm18089_vm9 = vcmp.lt.s32.totalorder %v737_v52, 15  ;;  %vm18093_vm10 = vcmp.lt.s32.totalorder %v751_v54, 15  ;;  %vm18097_vm11 = vcmp.lt.s32.totalorder %v765_v56, 15 }
  0x80   : > { %21831 = vst [vmem:[#allocation28_spill] sm:$0xff] %v18037_v32  ;;  %21832 = vst [vmem:[#allocation29_spill] sm:$0xff] %v18041_v33  ;;  %vm18101_vm12 = vcmp.lt.s32.totalorder %v779_v58, 15  ;;  %vm18105_vm13 = vcmp.lt.s32.totalorder %v793_v60, 15  ;;  %vm18109_vm14 = vcmp.lt.s32.totalorder %v807_v62, 15  ;;  %vm18113_vm15 = vcmp.lt.s32.totalorder %v821_v0, 15 }
  0x81   : > { %21833 = vst [vmem:[#allocation30_spill] sm:$0xff] %v18045_v35  ;;  %21834 = vst [vmem:[#allocation31_spill] sm:$0xff] %v18049_v37  ;;  %v18119_v51 = vsel %vm18053_vm0, 1.0, %v17547_v19  ;;  %v18123_v52 = vsel %vm18057_vm1, 1.0, %v17547_v19  ;;  %v18127_v53 = vsel %vm18061_vm2, 1.0, %v17547_v19  ;;  %v18131_v54 = vsel %vm18065_vm3, 1.0, %v17547_v19 }
  0x82   : > { %21867 = vst [vmem:[#allocation32_spill] sm:$0xff] %v18119_v51  ;;  %21868 = vst [vmem:[#allocation33_spill] sm:$0xff] %v18123_v52  ;;  %v18135_v55 = vsel %vm18069_vm4, 1.0, %v17547_v19  ;;  %v18139_v56 = vsel %vm18073_vm5, 1.0, %v17547_v19  ;;  %v18143_v57 = vsel %vm18077_vm6, 1.0, %v17547_v19  ;;  %v18147_v58 = vsel %vm18081_vm7, 1.0, %v17547_v19 }
  0x83   : > { %21869 = vst [vmem:[#allocation34_spill] sm:$0xff] %v18127_v53  ;;  %21870 = vst [vmem:[#allocation35_spill] sm:$0xff] %v18131_v54  ;;  %v18151_v59 = vsel %vm18085_vm8, 1.0, %v17547_v19  ;;  %v18155_v60 = vsel %vm18089_vm9, 1.0, %v17547_v19  ;;  %v18159_v61 = vsel %vm18093_vm10, 1.0, %v17547_v19  ;;  %v18163_v62 = vsel %vm18097_vm11, 1.0, %v17547_v19 }
  0x84   : > { %21871 = vst [vmem:[#allocation36_spill] sm:$0xff] %v18135_v55  ;;  %21872 = vst [vmem:[#allocation37_spill] sm:$0xff] %v18139_v56  ;;  %v18167_v63 = vsel %vm18101_vm12, 1.0, %v17547_v19  ;;  %v18171_v0 = vsel %vm18105_vm13, 1.0, %v17547_v19  ;;  %v18175_v3 = vsel %vm18109_vm14, 1.0, %v17547_v19  ;;  %v18179_v4 = vsel %vm18113_vm15, 1.0, %v17547_v19 }
  0x85   : > { %21873 = vst [vmem:[#allocation38_spill] sm:$0xff] %v18143_v57  ;;  %21874 = vst [vmem:[#allocation39_spill] sm:$0xff] %v18147_v58  ;;  %1179 = sbr.rel (%p12907_p5) target bundleno = 160 (0xa0), region = 76  ;;  %vm1180_vm0 = vcmask (!%p12907_p5), 261120   ;;  %v17548_v8 = vmov (!%p12907_p5), 0.0   ;;  %v1206_v19 = vld [vmem:[%s17795_s16 + $0x68] sm:$0xff] (!%p12907_p5) }
  0x86   : > { %21875 = vst [vmem:[#allocation40_spill] sm:$0xff] %v18151_v59  ;;  %21876 = vst [vmem:[#allocation41_spill] sm:$0xff] %v18155_v60  ;;  %v1213_v34 = vld [vmem:[%s17795_s16 + $0xa0] sm:$0xff] (!%p12907_p5)  ;;  %v1214_v36 = vld [vmem:[%s17795_s16 + $0xa8] sm:$0xff] (!%p12907_p5) }
  0x87   : > { %21877 = vst [vmem:[#allocation42_spill] sm:$0xff] %v18159_v61  ;;  %21878 = vst [vmem:[#allocation43_spill] sm:$0xff] %v18163_v62  ;;  %v1215_v38 = vld [vmem:[%s17795_s16 + $0xb0] sm:$0xff] (!%p12907_p5)  ;;  %v1216_v40 = vld [vmem:[%s17795_s16 + $0xb8] sm:$0xff] (!%p12907_p5) }
  0x88   : > { %21879 = vst [vmem:[#allocation44_spill] sm:$0xff] %v18167_v63  ;;  %21880 = vst [vmem:[#allocation45_spill] sm:$0xff] %v18171_v0  ;;  %v1217_v42 = vld [vmem:[%s17795_s16 + $0xc0] sm:$0xff] (!%p12907_p5)  ;;  %v1218_v44 = vld [vmem:[%s17795_s16 + $0xc8] sm:$0xff] (!%p12907_p5) }
  0x89   : > { %21881 = vst [vmem:[#allocation46_spill] sm:$0xff] %v18175_v3  ;;  %21882 = vst [vmem:[#allocation47_spill] sm:$0xff] %v18179_v4  ;;  %v1219_v46 = vld [vmem:[%s17795_s16 + $0xd0] sm:$0xff] (!%p12907_p5)  ;;  %v1220_v48 = vld [vmem:[%s17795_s16 + $0xd8] sm:$0xff] (!%p12907_p5) }
  0x8a   : > { %1181 = vst.msk [vmem:[#allocation2] sm:$0xff] (!%p12907_p5), %vm1180_vm0, %v17548_v8  ;;  %1182 = vst.msk [vmem:[#allocation2 + $0x8] sm:$0xff] (!%p12907_p5), %vm1180_vm0, %v17548_v8  ;;  %v1222_v50 = vld [vmem:[%s17795_s16 + $0xe8] sm:$0xff] (!%p12907_p5) }
  0x8b   : > { %1183 = vst.msk [vmem:[#allocation2 + $0x10] sm:$0xff] (!%p12907_p5), %vm1180_vm0, %v17548_v8  ;;  %1184 = vst.msk [vmem:[#allocation2 + $0x118] sm:$0xff] (!%p12907_p5), %vm1180_vm0, %v17548_v8 }
  0x8c   : > { %1185 = vst.msk [vmem:[#allocation2 + $0x120] sm:$0xff] %vm1180_vm0, %v17548_v8  ;;  %1186 = vst.msk [vmem:[#allocation2 + $0x128] sm:$0xff] %vm1180_vm0, %v17548_v8 }
  0x8d   : > { %1187 = vst.msk [vmem:[#allocation3] sm:$0xff] %vm1180_vm0, %v17548_v8  ;;  %1188 = vst.msk [vmem:[#allocation3 + $0x8] sm:$0xff] %vm1180_vm0, %v17548_v8 }
  0x8e   : > { %1189 = vst.msk [vmem:[#allocation3 + $0x10] sm:$0xff] %vm1180_vm0, %v17548_v8  ;;  %1190 = vst.msk [vmem:[#allocation3 + $0x118] sm:$0xff] %vm1180_vm0, %v17548_v8 }
  0x8f   : > { %1191 = vst.msk [vmem:[#allocation3 + $0x120] sm:$0xff] %vm1180_vm0, %v17548_v8  ;;  %1192 = vst.msk [vmem:[#allocation3 + $0x128] sm:$0xff] %vm1180_vm0, %v17548_v8 }
  0x90   : > { %1225 = vst.msk [vmem:[#allocation2 + $0x18] sm:$0xff] %vm1180_vm0, %v1193_v5  ;;  %1226 = vst.msk [vmem:[#allocation2 + $0x20] sm:$0xff] %vm1180_vm0, %v1194_v6  ;;  %v1223_v5 = vld [vmem:[%s17795_s16 + $0xf0] sm:$0xff]  ;;  %v1224_v6 = vld [vmem:[%s17795_s16 + $0xf8] sm:$0xff] }
  0x91   : > { %1227 = vst.msk [vmem:[#allocation2 + $0x28] sm:$0xff] %vm1180_vm0, %v1195_v7  ;;  %1228 = vst.msk [vmem:[#allocation2 + $0x30] sm:$0xff] %vm1180_vm0, %v1196_v9 }
  0x92   : > { %1229 = vst.msk [vmem:[#allocation2 + $0x38] sm:$0xff] %vm1180_vm0, %v1197_v10  ;;  %1230 = vst.msk [vmem:[#allocation2 + $0x40] sm:$0xff] %vm1180_vm0, %v1198_v11 }
  0x93   : > { %1231 = vst.msk [vmem:[#allocation2 + $0x48] sm:$0xff] %vm1180_vm0, %v1199_v12  ;;  %1232 = vst.msk [vmem:[#allocation2 + $0x50] sm:$0xff] %vm1180_vm0, %v1200_v13 }
  0x94   : > { %1233 = vst.msk [vmem:[#allocation2 + $0x58] sm:$0xff] %vm1180_vm0, %v1201_v14  ;;  %1234 = vst.msk [vmem:[#allocation2 + $0x60] sm:$0xff] %vm1180_vm0, %v1202_v15 }
  0x95   : > { %1235 = vst.msk [vmem:[#allocation2 + $0x68] sm:$0xff] %vm1180_vm0, %v1203_v16  ;;  %1236 = vst.msk [vmem:[#allocation2 + $0x70] sm:$0xff] %vm1180_vm0, %v1204_v17 }
  0x96   : > { %1237 = vst.msk [vmem:[#allocation2 + $0x78] sm:$0xff] %vm1180_vm0, %v1205_v18  ;;  %1238 = vst.msk [vmem:[#allocation2 + $0x80] sm:$0xff] %vm1180_vm0, %v1206_v19 }
  0x97   : > { %1239 = vst.msk [vmem:[#allocation2 + $0x88] sm:$0xff] %vm1180_vm0, %v1207_v39  ;;  %1240 = vst.msk [vmem:[#allocation2 + $0x90] sm:$0xff] %vm1180_vm0, %v1208_v41 }
  0x98   : > { %1241 = vst.msk [vmem:[#allocation2 + $0x98] sm:$0xff] %vm1180_vm0, %v1209_v43  ;;  %1242 = vst.msk [vmem:[#allocation2 + $0xa0] sm:$0xff] %vm1180_vm0, %v1210_v45 }
  0x99   : > { %1243 = vst.msk [vmem:[#allocation2 + $0xa8] sm:$0xff] %vm1180_vm0, %v1211_v47  ;;  %1244 = vst.msk [vmem:[#allocation2 + $0xb0] sm:$0xff] %vm1180_vm0, %v1212_v2 }
  0x9a   : > { %1245 = vst.msk [vmem:[#allocation2 + $0xb8] sm:$0xff] %vm1180_vm0, %v1213_v34  ;;  %1246 = vst.msk [vmem:[#allocation2 + $0xc0] sm:$0xff] %vm1180_vm0, %v1214_v36 }
  0x9b   : > { %1247 = vst.msk [vmem:[#allocation2 + $0xc8] sm:$0xff] %vm1180_vm0, %v1215_v38  ;;  %1248 = vst.msk [vmem:[#allocation2 + $0xd0] sm:$0xff] %vm1180_vm0, %v1216_v40 }
  0x9c   : > { %1249 = vst.msk [vmem:[#allocation2 + $0xd8] sm:$0xff] %vm1180_vm0, %v1217_v42  ;;  %1250 = vst.msk [vmem:[#allocation2 + $0xe0] sm:$0xff] %vm1180_vm0, %v1218_v44 }
  0x9d   : > { %1251 = vst.msk [vmem:[#allocation2 + $0xe8] sm:$0xff] %vm1180_vm0, %v1219_v46  ;;  %1252 = vst.msk [vmem:[#allocation2 + $0xf0] sm:$0xff] %vm1180_vm0, %v1220_v48 }
  0x9e   : > { %1253 = vst.msk [vmem:[#allocation2 + $0xf8] sm:$0xff] %vm1180_vm0, %v1221_v49  ;;  %1254 = vst.msk [vmem:[#allocation2 + $0x100] sm:$0xff] %vm1180_vm0, %v1222_v50 }
  0x9f   : > { %1255 = vst.msk [vmem:[#allocation2 + $0x108] sm:$0xff] %vm1180_vm0, %v1223_v5  ;;  %1256 = vst.msk [vmem:[#allocation2 + $0x110] sm:$0xff] %vm1180_vm0, %v1224_v6 }
  0xa0 PF: > { %v12908_v7 = vld [vmem:[%s17833_s10 + $0x20] sm:$0xff]  ;;  %v12909_v8 = vld [vmem:[%s17833_s10 + $0x28] sm:$0xff]  ;;  %v12910_v9 = vld [vmem:[%s17833_s10 + $0x30] sm:$0xff]  ;;  %vm1362_vm1 = vcmask 261120   ;;  %s22212_s12 = scalar_lea.vmem %s21416_s5, %s17836_s28  ;;  %vm8747_vm2 = vcmask 254976   ;;  %p13551_p8 = scmp.ne.s32.totalorder %s17525_s20, 1 }
  0xa1   : > { %v16329_v10 = vpack.c.bf16 %v12909_v8, %v12908_v7  ;;  %v12911_v11 = vld [vmem:[%s17833_s10 + $0x38] sm:$0xff]  ;;  %v1321_v14 = vld [vmem:[%s17833_s10] sm:$0xff]  ;;  %v1322_v15 = vld [vmem:[%s17833_s10 + $0x8] sm:$0xff] }
  0xa2   : > { %v16333_v13 = vpack.c.bf16 %v12911_v11, %v12910_v9  ;;  %v16337_v16 = vpack.c.bf16 %v1322_v15, %v1321_v14  ;;  %v1323_v18 = vld [vmem:[%s17833_s10 + $0x10] sm:$0xff]  ;;  %v1324_v19 = vld [vmem:[%s17833_s10 + $0x18] sm:$0xff]  ;;  %v18272_v43 = vld [vmem:[#allocation2 + $0x20] sm:$0xff] }
  0xa3   : > { %16330 = vmatprep.subr.bf16.mxu0 %v16329_v10  ;;  %v18267_v39 = vld [vmem:[#allocation2 + $0x18] sm:$0xff]  ;;  %v16341_v41 = vpack.c.bf16 %v1324_v19, %v1323_v18  ;;  %21884 = vst [vmem:[#allocation49_spill] sm:$0xff] %v18272_v43  ;;  %v18274_v45 = vld [vmem:[#allocation2 + $0x28] sm:$0xff]  ;;  %v12976_v47 = vld [vmem:[%s17833_s10 + $0x40] sm:$0xff] }
  0xa4   : > { %16332 = vmatpush3.bf16.msra.mxu0 %v16329_v10  ;;  %21883 = vst [vmem:[#allocation48_spill] sm:$0xff] %v18267_v39  ;;  %21885 = vst [vmem:[#allocation50_spill] sm:$0xff] %v18274_v45  ;;  %v12977_v2 = vld [vmem:[%s17833_s10 + $0x48] sm:$0xff]  ;;  %v18284_v36 = vld [vmem:[#allocation2 + $0x30] sm:$0xff] }
  0xa5   : > { %v1325_v12 = vld [vmem:[#allocation2 + $0x8] sm:$0xff]  ;;  %16334 = vmatprep.subr.bf16.mxu0 %v16333_v13  ;;  %v18280_v34 = vpack.c.bf16 %v12977_v2, %v12976_v47  ;;  %21886 = vst [vmem:[#allocation51_spill] sm:$0xff] %v18284_v36  ;;  %v18286_v38 = vld [vmem:[#allocation2 + $0x38] sm:$0xff]  ;;  %v18293_v40 = vld [vmem:[#allocation2 + $0x40] sm:$0xff] }
  0xa6   : > { %14825 = vmatprep.mubr.msk.f32.mxu0 %vm1362_vm1, %v1325_v12  ;;  %v1326_v17 = vld [vmem:[#allocation2 + $0x10] sm:$0xff]  ;;  %21887 = vst [vmem:[#allocation52_spill] sm:$0xff] %v18286_v38  ;;  %21888 = vst [vmem:[#allocation53_spill] sm:$0xff] %v18293_v40  ;;  %v18295_v42 = vld [vmem:[#allocation2 + $0x48] sm:$0xff] }
  0xa7   : > { %21889 = vst [vmem:[#allocation54_spill] sm:$0xff] %v18295_v42  ;;  %v18301_v44 = vld [vmem:[#allocation2 + $0x50] sm:$0xff]  ;;  %v18303_v46 = vld [vmem:[#allocation2 + $0x58] sm:$0xff]  ;;  %v18309_v48 = vld [vmem:[#allocation2 + $0x60] sm:$0xff] }
  0xa8   : > { %16336 = vmatpush3.bf16.msra.mxu0 %v16333_v13  ;;  %21890 = vst [vmem:[#allocation55_spill] sm:$0xff] %v18301_v44  ;;  %21891 = vst [vmem:[#allocation56_spill] sm:$0xff] %v18303_v46  ;;  %v18311_v49 = vld [vmem:[#allocation2 + $0x68] sm:$0xff]  ;;  %v18317_v50 = vld [vmem:[#allocation2 + $0x70] sm:$0xff] }
  0xa9   : > { %16338 = vmatprep.subr.bf16.mxu0 %v16337_v16  ;;  %21892 = vst [vmem:[#allocation57_spill] sm:$0xff] %v18309_v48  ;;  %21893 = vst [vmem:[#allocation58_spill] sm:$0xff] %v18311_v49  ;;  %v18319_v5 = vld [vmem:[#allocation2 + $0x78] sm:$0xff]  ;;  %v18325_v6 = vld [vmem:[#allocation2 + $0x80] sm:$0xff] }
  0xaa   : > { %21894 = vst [vmem:[#allocation59_spill] sm:$0xff] %v18317_v50  ;;  %21895 = vst [vmem:[#allocation60_spill] sm:$0xff] %v18319_v5  ;;  %v18327_v7 = vld [vmem:[#allocation2 + $0x88] sm:$0xff]  ;;  %v18333_v8 = vld [vmem:[#allocation2 + $0x90] sm:$0xff] }
  0xab   : > { %14826 = vmatmul.mubr.msk.f32.vlgmr.msra.gmra.mrb[0].mxu0 %vm1362_vm1, %v1326_v17  ;;  %21896 = vst [vmem:[#allocation61_spill] sm:$0xff] %v18325_v6  ;;  %21897 = vst [vmem:[#allocation62_spill] sm:$0xff] %v18327_v7  ;;  %v18335_v9 = vld [vmem:[#allocation2 + $0x98] sm:$0xff]  ;;  %v18341_v10 = vld [vmem:[#allocation2 + $0xa0] sm:$0xff] }
  0xac   : > { %16340 = vmatpush3.bf16.msra.mxu0 %v16337_v16  ;;  %14828 = vmatprep.mubr.msk.f32.mxu0 %vm1362_vm1, %v18267_v39  ;;  %21898 = vst [vmem:[#allocation63_spill] sm:$0xff] %v18333_v8  ;;  %21899 = vst [vmem:[#allocation64_spill] sm:$0xff] %v18335_v9  ;;  %v18343_v11 = vld [vmem:[#allocation2 + $0xa8] sm:$0xff]  ;;  %v18349_v12 = vld [vmem:[#allocation2 + $0xb0] sm:$0xff] }
  0xad   : > { %16342 = vmatprep.subr.bf16.mxu0 %v16341_v41  ;;  %21900 = vst [vmem:[#allocation65_spill] sm:$0xff] %v18341_v10  ;;  %21901 = vst [vmem:[#allocation66_spill] sm:$0xff] %v18343_v11  ;;  %v18351_v13 = vld [vmem:[#allocation2 + $0xb8] sm:$0xff]  ;;  %v18357_v14 = vld [vmem:[#allocation2 + $0xc0] sm:$0xff] }
  0xae   : > { %21902 = vst [vmem:[#allocation67_spill] sm:$0xff] %v18349_v12  ;;  %21903 = vst [vmem:[#allocation68_spill] sm:$0xff] %v18351_v13  ;;  %v18359_v15 = vld [vmem:[#allocation2 + $0xc8] sm:$0xff]  ;;  %v18365_v16 = vld [vmem:[#allocation2 + $0xd0] sm:$0xff] }
  0xaf   : > { %14829 = vmatmul.mubr.msk.f32.gmra.mrb[2].mxu0 %vm1362_vm1, %v18272_v43  ;;  %21904 = vst [vmem:[#allocation69_spill] sm:$0xff] %v18357_v14  ;;  %21905 = vst [vmem:[#allocation70_spill] sm:$0xff] %v18359_v15  ;;  %v18367_v17 = vld [vmem:[#allocation2 + $0xd8] sm:$0xff]  ;;  %v18373_v18 = vld [vmem:[#allocation2 + $0xe0] sm:$0xff] }
  0xb0   : > { %14831 = vmatprep.mubr.msk.f32.mxu0 %vm1362_vm1, %v18274_v45  ;;  %16344 = vmatpush3.bf16.msra.mxu0 %v16341_v41  ;;  %21906 = vst [vmem:[#allocation71_spill] sm:$0xff] %v18365_v16  ;;  %21907 = vst [vmem:[#allocation72_spill] sm:$0xff] %v18367_v17  ;;  %v18375_v19 = vld [vmem:[#allocation2 + $0xe8] sm:$0xff]  ;;  %v18381_v41 = vld [vmem:[#allocation2 + $0xf0] sm:$0xff] }
  0xb1   : > { %16346 = vmatprep.subr.bf16.mxu0 %v18280_v34  ;;  %21908 = vst [vmem:[#allocation73_spill] sm:$0xff] %v18373_v18  ;;  %21909 = vst [vmem:[#allocation74_spill] sm:$0xff] %v18375_v19  ;;  %v18383_v47 = vld [vmem:[#allocation2 + $0xf8] sm:$0xff]  ;;  %v1257_v2 = vld [vmem:[#allocation2 + $0x7] sm:$0xff] }
  0xb2   : > { %21910 = vst [vmem:[#allocation75_spill] sm:$0xff] %v18381_v41  ;;  %21911 = vst [vmem:[#allocation76_spill] sm:$0xff] %v18383_v47  ;;  %v18389_v1 = vld [vmem:[#allocation2 + $0x100] sm:$0xff]  ;;  %v18528_v39 = vld [vmem:[#allocation2 + $0xef] sm:$0xff] }
  0xb3   : > { %14832 = vmatmul.mubr.msk.f32.gmra.mrb[4].mxu0 %vm1362_vm1, %v18284_v36  ;;  %21912 = vst [vmem:[#allocation77_spill] sm:$0xff] %v18389_v1  ;;  %v18514_v45 = vld [vmem:[#allocation2 + $0xe7] sm:$0xff]  ;;  %21919 = vst [vmem:[#allocation84_spill] sm:$0xff] %v18528_v39 }
  0xb4   : > { %14834 = vmatprep.mubr.msk.f32.mxu0 %vm1362_vm1, %v18286_v38  ;;  %v18505_v38 = vld [vmem:[#allocation2 + $0xd7] sm:$0xff]  ;;  %21916 = vst [vmem:[#allocation81_spill] sm:$0xff] %v18514_v45  ;;  %v1317_v43 = vmul.f32 %v18045_v35, %v18514_v45  ;;  %v2005_v45 = vld [vmem:[#allocation2 + $0x9] sm:$0xff] }
  0xb5   : > { %21914 = vst [vmem:[#allocation79_spill] sm:$0xff] %v18505_v38  ;;  %v1315_v36 = vmul.f32 %v18041_v33, %v18505_v38  ;;  %v2006_v35 = vld [vmem:[#allocation2 + $0x11] sm:$0xff] }
  0xb7   : > { %14835 = vmatmul.mubr.msk.f32.gmra.mrb[6].mxu0 %vm1362_vm1, %v18293_v40 }
  0xb8   : > { %14837 = vmatprep.mubr.msk.f32.mxu0 %vm1362_vm1, %v18295_v42  ;;  %v18496_v42 = vld [vmem:[#allocation2 + $0xc7] sm:$0xff] }
  0xb9   : > { %v1313_v40 = vmul.f32 %v18037_v32, %v18496_v42  ;;  %v18543_v32 = vld [vmem:[#allocation2 + $0x21] sm:$0xff] }
  0xba   : > { %v2040_v38 = vmul.f32 %v18123_v52, %v18543_v32 }
  0xbb   : > { %14838 = vmatmul.mubr.msk.f32.gmra.mrb[8].mxu0 %vm1362_vm1, %v18301_v44 }
  0xbc   : > { %14840 = vmatprep.mubr.msk.f32.mxu0 %vm1362_vm1, %v18303_v46  ;;  %v18487_v46 = vld [vmem:[#allocation2 + $0xb7] sm:$0xff] }
  0xbd   : > { %v1311_v44 = vmul.f32 %v18033_v31, %v18487_v46 }
  0xbf   : > { %14841 = vmatmul.mubr.msk.f32.gmra.mrb[10].mxu0 %vm1362_vm1, %v18309_v48 }
  0xc0   : > { %14843 = vmatprep.mubr.msk.f32.mxu0 %vm1362_vm1, %v18311_v49  ;;  %v18478_v49 = vld [vmem:[#allocation2 + $0xa7] sm:$0xff] }
  0xc1   : > { %v1309_v48 = vmul.f32 %v18029_v30, %v18478_v49 }
  0xc3   : > { %14844 = vmatmul.mubr.msk.f32.gmra.mrb[12].mxu0 %vm1362_vm1, %v18317_v50 }
  0xc4   : > { %14846 = vmatprep.mubr.msk.f32.mxu0 %vm1362_vm1, %v18319_v5  ;;  %v18469_v5 = vld [vmem:[#allocation2 + $0x97] sm:$0xff] }
  0xc5   : > { %v1307_v50 = vmul.f32 %v18025_v29, %v18469_v5 }
  0xc7   : > { %14847 = vmatmul.mubr.msk.f32.gmra.mrb[14].mxu0 %vm1362_vm1, %v18325_v6 }
  0xc8   : > { %14849 = vmatprep.mubr.msk.f32.mxu0 %vm1362_vm1, %v18327_v7  ;;  %v18460_v7 = vld [vmem:[#allocation2 + $0x87] sm:$0xff] }
  0xc9   : > { %v1305_v6 = vmul.f32 %v18021_v28, %v18460_v7 }
  0xcb   : > { %14850 = vmatmul.mubr.msk.f32.gmra.mrb[16].mxu0 %vm1362_vm1, %v18333_v8 }
  0xcc   : > { %14852 = vmatprep.mubr.msk.f32.mxu0 %vm1362_vm1, %v18335_v9  ;;  %v18451_v9 = vld [vmem:[#allocation2 + $0x77] sm:$0xff] }
  0xcd   : > { %v1303_v8 = vmul.f32 %v18017_v27, %v18451_v9 }
  0xcf   : > { %14853 = vmatmul.mubr.msk.f32.gmra.mrb[18].mxu0 %vm1362_vm1, %v18341_v10 }
  0xd0   : > { %14855 = vmatprep.mubr.msk.f32.mxu0 %vm1362_vm1, %v18343_v11 }
  0xd3   : > { %14856 = vmatmul.mubr.msk.f32.gmra.mrb[20].mxu0 %vm1362_vm1, %v18349_v12  ;;  %v13013_v12 = vld [vmem:[%s17833_s10 + $0x68] sm:$0xff] }
  0xd4   : > { %14858 = vmatprep.mubr.msk.f32.mxu0 %vm1362_vm1, %v18351_v13  ;;  %v13012_v13 = vld [vmem:[%s17833_s10 + $0x60] sm:$0xff] }
  0xd5   : > { %v18414_v11 = vpack.c.bf16 %v13013_v12, %v13012_v13  ;;  %v18429_v12 = vld [vmem:[#allocation2 + $0x3f] sm:$0xff] }
  0xd7   : > { %14859 = vmatmul.mubr.msk.f32.gmra.mrb[22].mxu0 %vm1362_vm1, %v18357_v14  ;;  %v18401_v14 = vld [vmem:[#allocation2 + $0x27] sm:$0xff] }
  0xd8   : > { %14861 = vmatprep.mubr.msk.f32.mxu0 %vm1362_vm1, %v18359_v15  ;;  %v1258_v15 = vld [vmem:[#allocation2 + $0xf] sm:$0xff] }
  0xdb   : > { %14862 = vmatmul.mubr.msk.f32.gmra.mrb[24].mxu0 %vm1362_vm1, %v18365_v16  ;;  %v12979_v16 = vld [vmem:[%s17833_s10 + $0x58] sm:$0xff] }
  0xdc   : > { %14864 = vmatprep.mubr.msk.f32.mxu0 %vm1362_vm1, %v18367_v17  ;;  %v18392_v17 = vld [vmem:[#allocation2 + $0x17] sm:$0xff] }
  0xdf   : > { %14865 = vmatmul.mubr.msk.f32.gmra.mrb[26].mxu0 %vm1362_vm1, %v18373_v18  ;;  %v1289_v18 = vmul.f32 %v17989_v20, %v1257_v2  ;;  %v18408_v2 = vld [vmem:[#allocation2 + $0x1f] sm:$0xff] }
  0xe0   : > { %14867 = vmatprep.mubr.msk.f32.mxu0 %vm1362_vm1, %v18375_v19  ;;  %v12978_v19 = vld [vmem:[%s17833_s10 + $0x50] sm:$0xff] }
  0xe3   : > { %14868 = vmatmul.mubr.msk.f32.gmra.mrb[28].mxu0 %vm1362_vm1, %v18381_v41  ;;  %v1291_v41 = vmul.f32 %v17993_v21, %v18392_v17 }
  0xe4   : > { %14870 = vmatprep.mubr.msk.f32.mxu0 %vm1362_vm1, %v18383_v47  ;;  %v16349_v47 = vpack.c.bf16 %v12979_v16, %v12978_v19  ;;  %v18423_v16 = vld [vmem:[#allocation2 + $0x47] sm:$0xff]  ;;  %v18433_v19 = vld [vmem:[#allocation2 + $0x57] sm:$0xff] }
  0xe5   : > { %v1297_v13 = vmul.f32 %v18005_v24, %v18423_v16 }
  0xe7   : > { %14871 = vmatmul.mubr.msk.f32.gmra.mrb[30].mxu0 %vm1362_vm1, %v18389_v1  ;;  %v18412_v1 = vld [vmem:[#allocation2 + $0x37] sm:$0xff] }
  0xe8   : > { %14881 = vmatprep.mubr.msk.f32.mxu0 %vm1362_vm1, %v1289_v18  ;;  %v1293_v18 = vmul.f32 %v17997_v22, %v18401_v14 }
  0xeb   : > { %14882 = vmatmul.mubr.msk.f32.vlgmr.msra.gmra.mrb[0].mxu0 %vm1362_vm1, %v1258_v15  ;;  %v18419_v15 = vld [vmem:[#allocation2 + $0x2f] sm:$0xff] }
  0xec   : > { %16348 = vmatpush3.bf16.msra.mxu0 %v18280_v34  ;;  %14884 = vmatprep.mubr.msk.f32.mxu0 %vm1362_vm1, %v1291_v41  ;;  %v1295_v34 = vmul.f32 %v18001_v23, %v18412_v1  ;;  %v18438_v41 = vld [vmem:[#allocation2 + $0x4f] sm:$0xff] }
  0xed   : > { %16350 = vmatprep.subr.bf16.mxu0 %v16349_v47 }
  0xef   : > { %14885 = vmatmul.mubr.msk.f32.gmra.mrb[2].mxu0 %vm1362_vm1, %v18408_v2 }
  0xf0   : > { %14887 = vmatprep.mubr.msk.f32.mxu0 %vm1362_vm1, %v1293_v18  ;;  %16352 = vmatpush3.bf16.msra.mxu0 %v16349_v47  ;;  %v1299_v47 = vmul.f32 %v18009_v25, %v18433_v19  ;;  %v18442_v18 = vld [vmem:[#allocation2 + $0x67] sm:$0xff] }
  0xf1   : > { %16354 = vmatprep.subr.bf16.mxu0 %v18414_v11  ;;  %v1301_v10 = vmul.f32 %v18013_v26, %v18442_v18 }
  0xf3   : > { %14888 = vmatmul.mubr.msk.f32.gmra.mrb[4].mxu0 %vm1362_vm1, %v18419_v15 }
  0xf4   : > { %14890 = vmatprep.mubr.msk.f32.mxu0 %vm1362_vm1, %v1295_v34  ;;  %v18447_v34 = vld [vmem:[#allocation2 + $0x5f] sm:$0xff] }
  0xf7   : > { %14891 = vmatmul.mubr.msk.f32.gmra.mrb[6].mxu0 %vm1362_vm1, %v18429_v12 }
  0xf8   : > { %14893 = vmatprep.mubr.msk.f32.mxu0 %vm1362_vm1, %v1297_v13  ;;  %v18456_v13 = vld [vmem:[#allocation2 + $0x6f] sm:$0xff] }
  0xfb   : > { %14894 = vmatmul.mubr.msk.f32.gmra.mrb[8].mxu0 %vm1362_vm1, %v18438_v41 }
  0xfc   : > { %14896 = vmatprep.mubr.msk.f32.mxu0 %vm1362_vm1, %v1299_v47  ;;  %v18465_v47 = vld [vmem:[#allocation2 + $0x7f] sm:$0xff] }
  0xff   : > { %14897 = vmatmul.mubr.msk.f32.gmra.mrb[10].mxu0 %vm1362_vm1, %v18447_v34 }
 0x100   : > { %14899 = vmatprep.mubr.msk.f32.mxu0 %vm1362_vm1, %v1301_v10  ;;  %v18474_v10 = vld [vmem:[#allocation2 + $0x8f] sm:$0xff] }
 0x103   : > { %14900 = vmatmul.mubr.msk.f32.gmra.mrb[12].mxu0 %vm1362_vm1, %v18456_v13 }
 0x104   : > { %14902 = vmatprep.mubr.msk.f32.mxu0 %vm1362_vm1, %v1303_v8  ;;  %v18483_v8 = vld [vmem:[#allocation2 + $0x9f] sm:$0xff] }
 0x107   : > { %14903 = vmatmul.mubr.msk.f32.gmra.mrb[14].mxu0 %vm1362_vm1, %v18465_v47 }
 0x108   : > { %14905 = vmatprep.mubr.msk.f32.mxu0 %vm1362_vm1, %v1305_v6  ;;  %v18492_v6 = vld [vmem:[#allocation2 + $0xaf] sm:$0xff] }
 0x10b   : > { %14906 = vmatmul.mubr.msk.f32.gmra.mrb[16].mxu0 %vm1362_vm1, %v18474_v10 }
 0x10c   : > { %14908 = vmatprep.mubr.msk.f32.mxu0 %vm1362_vm1, %v1307_v50  ;;  %v18501_v50 = vld [vmem:[#allocation2 + $0xbf] sm:$0xff] }
 0x10d   : > { %21913 = vst [vmem:[#allocation78_spill] sm:$0xff] %v18501_v50 }
 0x10f   : > { %14909 = vmatmul.mubr.msk.f32.gmra.mrb[18].mxu0 %vm1362_vm1, %v18483_v8 }
 0x110   : > { %14911 = vmatprep.mubr.msk.f32.mxu0 %vm1362_vm1, %v1309_v48  ;;  %v18510_v48 = vld [vmem:[#allocation2 + $0xcf] sm:$0xff] }
 0x111   : > { %21915 = vst [vmem:[#allocation80_spill] sm:$0xff] %v18510_v48 }
 0x113   : > { %14912 = vmatmul.mubr.msk.f32.gmra.mrb[20].mxu0 %vm1362_vm1, %v18492_v6 }
 0x114   : > { %14914 = vmatprep.mubr.msk.f32.mxu0 %vm1362_vm1, %v1311_v44  ;;  %v18519_v44 = vld [vmem:[#allocation2 + $0xdf] sm:$0xff] }
 0x115   : > { %21917 = vst [vmem:[#allocation82_spill] sm:$0xff] %v18519_v44 }
 0x117   : > { %14915 = vmatmul.mubr.msk.f32.gmra.mrb[22].mxu0 %vm1362_vm1, %v18501_v50 }
 0x118   : > { %14917 = vmatprep.mubr.msk.f32.mxu0 %vm1362_vm1, %v1313_v40  ;;  %v18523_v40 = vld [vmem:[#allocation2 + $0xf7] sm:$0xff] }
 0x119   : > { %21918 = vst [vmem:[#allocation83_spill] sm:$0xff] %v18523_v40  ;;  %v1319_v33 = vmul.f32 %v18049_v37, %v18523_v40  ;;  %v18545_v37 = vld [vmem:[#allocation2 + $0x19] sm:$0xff] }
 0x11a   : > { %v13048_v40 = vld [vmem:[%s17833_s10 + $0x80] sm:$0xff] }
 0x11b   : > { %14918 = vmatmul.mubr.msk.f32.gmra.mrb[24].mxu0 %vm1362_vm1, %v18510_v48  ;;  %v13014_v48 = vld [vmem:[%s17833_s10 + $0x70] sm:$0xff] }
 0x11c   : > { %14920 = vmatprep.mubr.msk.f32.mxu0 %vm1362_vm1, %v1315_v36  ;;  %v18535_v36 = vld [vmem:[#allocation2 + $0xff] sm:$0xff] }
 0x11d   : > { %21920 = vst [vmem:[#allocation85_spill] sm:$0xff] %v18535_v36 }
 0x11f   : > { %14921 = vmatmul.mubr.msk.f32.gmra.mrb[26].mxu0 %vm1362_vm1, %v18519_v44  ;;  %v13015_v44 = vld [vmem:[%s17833_s10 + $0x78] sm:$0xff] }
 0x120   : > { %14923 = vmatprep.mubr.msk.f32.mxu0 %vm1362_vm1, %v1317_v43  ;;  %v2038_v43 = vmul.f32 %v18119_v51, %v2006_v35  ;;  %v18555_v35 = vld [vmem:[#allocation2 + $0x31] sm:$0xff] }
 0x123   : > { %14924 = vmatmul.mubr.msk.f32.gmra.mrb[28].mxu0 %vm1362_vm1, %v18528_v39  ;;  %v16357_v39 = vpack.c.bf16 %v13015_v44, %v13014_v48  ;;  %v2042_v48 = vmul.f32 %v18127_v53, %v18555_v35  ;;  %v18566_v44 = vld [vmem:[#allocation2 + $0x41] sm:$0xff] }
 0x124   : > { %14926 = vmatprep.mubr.msk.f32.mxu0 %vm1362_vm1, %v1319_v33  ;;  %v13049_v33 = vld [vmem:[%s17833_s10 + $0x88] sm:$0xff] }
 0x125   : > { %v18559_v51 = vpack.c.bf16 %v13049_v33, %v13048_v40  ;;  %v2044_v40 = vmul.f32 %v18131_v54, %v18566_v44  ;;  %v18585_v33 = vld [vmem:[#allocation2 + $0x61] sm:$0xff] }
 0x126   : > { %v2048_v54 = vmul.f32 %v18139_v56, %v18585_v33 }
 0x127   : > { %14927 = vmatmul.mubr.msk.f32.gmra.mrb[30].mxu0 %vm1362_vm1, %v18535_v36 }
 0x128   : > { %14937 = vmatprep.mubr.msk.f32.mxu0 %vm1362_vm1, %v2005_v45  ;;  %v18557_v45 = vld [vmem:[#allocation2 + $0x29] sm:$0xff] }
 0x12b   : > { %14938 = vmatmul.mubr.msk.f32.vlgmr.msra.gmra.mrb[0].mxu0 %vm1362_vm1, %v2038_v43  ;;  %v18578_v43 = vld [vmem:[#allocation2 + $0x49] sm:$0xff] }
 0x12c   : > { %16356 = vmatpush3.bf16.msra.mxu0 %v18414_v11  ;;  %14940 = vmatprep.mubr.msk.f32.mxu0 %vm1362_vm1, %v18545_v37  ;;  %v18568_v11 = vld [vmem:[#allocation2 + $0x39] sm:$0xff]  ;;  %21922 = vst [vmem:[#allocation87_spill] sm:$0xff] %v18578_v43 }
 0x12d   : > { %16358 = vmatprep.subr.bf16.mxu0 %v16357_v39  ;;  %21921 = vst [vmem:[#allocation86_spill] sm:$0xff] %v18568_v11 }
 0x12f   : > { %14941 = vmatmul.mubr.msk.f32.gmra.mrb[2].mxu0 %vm1362_vm1, %v2040_v38  ;;  %v18576_v38 = vld [vmem:[#allocation2 + $0x51] sm:$0xff] }
 0x130   : > { %14943 = vmatprep.mubr.msk.f32.mxu0 %vm1362_vm1, %v18557_v45  ;;  %16360 = vmatpush3.bf16.msra.mxu0 %v16357_v39  ;;  %v2046_v39 = vmul.f32 %v18135_v55, %v18576_v38 }
 0x131   : > { %16362 = vmatprep.subr.bf16.mxu0 %v18559_v51 }
 0x133   : > { %14944 = vmatmul.mubr.msk.f32.gmra.mrb[4].mxu0 %vm1362_vm1, %v2042_v48  ;;  %v18587_v48 = vld [vmem:[#allocation2 + $0x59] sm:$0xff] }
 0x134   : > { %14946 = vmatprep.mubr.msk.f32.mxu0 %vm1362_vm1, %v18568_v11  ;;  %21923 = vst [vmem:[#allocation88_spill] sm:$0xff] %v18587_v48  ;;  %v18594_v11 = vld [vmem:[#allocation2 + $0x71] sm:$0xff] }
 0x135   : > { %v2050_v55 = vmul.f32 %v18143_v57, %v18594_v11 }
 0x137   : > { %14947 = vmatmul.mubr.msk.f32.gmra.mrb[6].mxu0 %vm1362_vm1, %v2044_v40  ;;  %v18596_v40 = vld [vmem:[#allocation2 + $0x69] sm:$0xff] }
 0x138   : > { %14949 = vmatprep.mubr.msk.f32.mxu0 %vm1362_vm1, %v18578_v43  ;;  %21924 = vst [vmem:[#allocation89_spill] sm:$0xff] %v18596_v40  ;;  %v18603_v43 = vld [vmem:[#allocation2 + $0x81] sm:$0xff] }
 0x139   : > { %v2052_v56 = vmul.f32 %v18147_v58, %v18603_v43 }
 0x13b   : > { %14950 = vmatmul.mubr.msk.f32.gmra.mrb[8].mxu0 %vm1362_vm1, %v2046_v39  ;;  %v18605_v39 = vld [vmem:[#allocation2 + $0x79] sm:$0xff] }
 0x13c   : > { %14952 = vmatprep.mubr.msk.f32.mxu0 %vm1362_vm1, %v18587_v48  ;;  %21925 = vst [vmem:[#allocation90_spill] sm:$0xff] %v18605_v39  ;;  %v18612_v48 = vld [vmem:[#allocation2 + $0x91] sm:$0xff] }
 0x13d   : > { %v2054_v57 = vmul.f32 %v18151_v59, %v18612_v48 }
 0x13f   : > { %14953 = vmatmul.mubr.msk.f32.gmra.mrb[10].mxu0 %vm1362_vm1, %v2048_v54  ;;  %v18614_v54 = vld [vmem:[#allocation2 + $0x89] sm:$0xff] }
 0x140   : > { %14955 = vmatprep.mubr.msk.f32.mxu0 %vm1362_vm1, %v18596_v40  ;;  %21926 = vst [vmem:[#allocation91_spill] sm:$0xff] %v18614_v54  ;;  %v18621_v40 = vld [vmem:[#allocation2 + $0xa1] sm:$0xff] }
 0x141   : > { %v2056_v58 = vmul.f32 %v18155_v60, %v18621_v40 }
 0x143   : > { %14956 = vmatmul.mubr.msk.f32.gmra.mrb[12].mxu0 %vm1362_vm1, %v2050_v55  ;;  %v18623_v55 = vld [vmem:[#allocation2 + $0x99] sm:$0xff] }
 0x144   : > { %14958 = vmatprep.mubr.msk.f32.mxu0 %vm1362_vm1, %v18605_v39  ;;  %21927 = vst [vmem:[#allocation92_spill] sm:$0xff] %v18623_v55  ;;  %v18630_v39 = vld [vmem:[#allocation2 + $0xb1] sm:$0xff] }
 0x145   : > { %21928 = vst [vmem:[#allocation93_spill] sm:$0xff] %v18630_v39  ;;  %v2058_v59 = vmul.f32 %v18159_v61, %v18630_v39 }
 0x147   : > { %14959 = vmatmul.mubr.msk.f32.gmra.mrb[14].mxu0 %vm1362_vm1, %v2052_v56  ;;  %v18632_v56 = vld [vmem:[#allocation2 + $0xa9] sm:$0xff] }
 0x148   : > { %14961 = vmatprep.mubr.msk.f32.mxu0 %vm1362_vm1, %v18614_v54  ;;  %21929 = vst [vmem:[#allocation94_spill] sm:$0xff] %v18632_v56  ;;  %v18639_v54 = vld [vmem:[#allocation2 + $0xc1] sm:$0xff] }
 0x149   : > { %21930 = vst [vmem:[#allocation95_spill] sm:$0xff] %v18639_v54  ;;  %v2060_v60 = vmul.f32 %v18163_v62, %v18639_v54 }
 0x14b   : > { %14962 = vmatmul.mubr.msk.f32.gmra.mrb[16].mxu0 %vm1362_vm1, %v2054_v57  ;;  %v18641_v57 = vld [vmem:[#allocation2 + $0xb9] sm:$0xff] }
 0x14c   : > { %14964 = vmatprep.mubr.msk.f32.mxu0 %vm1362_vm1, %v18623_v55  ;;  %21931 = vst [vmem:[#allocation96_spill] sm:$0xff] %v18641_v57  ;;  %v18648_v55 = vld [vmem:[#allocation2 + $0xd1] sm:$0xff] }
 0x14d   : > { %21932 = vst [vmem:[#allocation97_spill] sm:$0xff] %v18648_v55  ;;  %v2062_v61 = vmul.f32 %v18167_v63, %v18648_v55  ;;  %v18668_v63 = vld [vmem:[#allocation2 + $0xe9] sm:$0xff] }
 0x14e   : > { %21937 = vst [vmem:[#allocation102_spill] sm:$0xff] %v18668_v63  ;;  %v13085_v55 = vld [vmem:[%s17833_s10 + $0xa8] sm:$0xff] }
 0x14f   : > { %14965 = vmatmul.mubr.msk.f32.gmra.mrb[18].mxu0 %vm1362_vm1, %v2056_v58  ;;  %v18650_v58 = vld [vmem:[#allocation2 + $0xc9] sm:$0xff] }
 0x150   : > { %14967 = vmatprep.mubr.msk.f32.mxu0 %vm1362_vm1, %v18632_v56  ;;  %21933 = vst [vmem:[#allocation98_spill] sm:$0xff] %v18650_v58  ;;  %v18657_v56 = vld [vmem:[#allocation2 + $0xe1] sm:$0xff] }
 0x151   : > { %21934 = vst [vmem:[#allocation99_spill] sm:$0xff] %v18657_v56  ;;  %v2064_v62 = vmul.f32 %v18171_v0, %v18657_v56  ;;  %v18677_v0 = vld [vmem:[#allocation2 + $0xf9] sm:$0xff]  ;;  %v13050_v56 = vld [vmem:[%s17833_s10 + $0x90] sm:$0xff] }
 0x152   : > { %21939 = vst [vmem:[#allocation104_spill] sm:$0xff] %v18677_v0 }
 0x153   : > { %14968 = vmatmul.mubr.msk.f32.gmra.mrb[20].mxu0 %vm1362_vm1, %v2058_v59  ;;  %v18659_v59 = vld [vmem:[#allocation2 + $0xd9] sm:$0xff] }
 0x154   : > { %14970 = vmatprep.mubr.msk.f32.mxu0 %vm1362_vm1, %v18641_v57  ;;  %21935 = vst [vmem:[#allocation100_spill] sm:$0xff] %v18659_v59 }
 0x157   : > { %14971 = vmatmul.mubr.msk.f32.gmra.mrb[22].mxu0 %vm1362_vm1, %v2060_v60  ;;  %v18666_v60 = vld [vmem:[#allocation2 + $0xf1] sm:$0xff] }
 0x158   : > { %14973 = vmatprep.mubr.msk.f32.mxu0 %vm1362_vm1, %v18650_v58  ;;  %21936 = vst [vmem:[#allocation101_spill] sm:$0xff] %v18666_v60  ;;  %v2066_v58 = vmul.f32 %v18175_v3, %v18666_v60  ;;  %v13051_v3 = vld [vmem:[%s17833_s10 + $0x98] sm:$0xff] }
 0x159   : > { %v16365_v60 = vpack.c.bf16 %v13051_v3, %v13050_v56  ;;  %v2465_v3 = vmul.f32 %v18001_v23, %v18423_v16  ;;  %v2475_v56 = vmul.f32 %v18021_v28, %v18469_v5 }
 0x15b   : > { %14974 = vmatmul.mubr.msk.f32.gmra.mrb[24].mxu0 %vm1362_vm1, %v2062_v61  ;;  %v18675_v61 = vld [vmem:[#allocation2 + $0x101] sm:$0xff] }
 0x15c   : > { %14976 = vmatprep.mubr.msk.f32.mxu0 %vm1362_vm1, %v18659_v59  ;;  %21938 = vst [vmem:[#allocation103_spill] sm:$0xff] %v18675_v61  ;;  %v2068_v59 = vmul.f32 %v18179_v4, %v18675_v61 }
 0x15f   : > { %14977 = vmatmul.mubr.msk.f32.gmra.mrb[26].mxu0 %vm1362_vm1, %v2064_v62  ;;  %v2459_v62 = vmul.f32 %v17989_v20, %v18392_v17  ;;  %v2463_v17 = vmul.f32 %v17997_v22, %v18412_v1 }
 0x160   : > { %14979 = vmatprep.mubr.msk.f32.mxu0 %vm1362_vm1, %v18668_v63  ;;  %v2461_v63 = vmul.f32 %v17993_v21, %v18401_v14 }
 0x163   : > { %14980 = vmatmul.mubr.msk.f32.gmra.mrb[28].mxu0 %vm1362_vm1, %v2066_v58  ;;  %v13084_v58 = vld [vmem:[%s17833_s10 + $0xa0] sm:$0xff] }
 0x164   : > { %14982 = vmatprep.mubr.msk.f32.mxu0 %vm1362_vm1, %v18677_v0 }
 0x167   : > { %14983 = vmatmul.mubr.msk.f32.gmra.mrb[30].mxu0 %vm1362_vm1, %v2068_v59  ;;  %v16369_v59 = vpack.c.bf16 %v13085_v55, %v13084_v58  ;;  %v2473_v55 = vmul.f32 %v18017_v27, %v18460_v7  ;;  %v2481_v58 = vmul.f32 %v18033_v31, %v18496_v42 }
 0x168   : > { %14993 = vmatprep.mubr.msk.f32.mxu0 %vm1362_vm1, %v2459_v62  ;;  %v2479_v62 = vmul.f32 %v18029_v30, %v18487_v46 }
 0x16b   : > { %14994 = vmatmul.mubr.msk.f32.vlgmr.msra.gmra.mrb[0].mxu0 %vm1362_vm1, %v18408_v2  ;;  %v2471_v2 = vmul.f32 %v18013_v26, %v18451_v9 }
 0x16c   : > { %16364 = vmatpush3.bf16.msra.mxu0 %v18559_v51  ;;  %14996 = vmatprep.mubr.msk.f32.mxu0 %vm1362_vm1, %v2461_v63  ;;  %v2467_v51 = vmul.f32 %v18005_v24, %v18433_v19  ;;  %v2469_v63 = vmul.f32 %v18009_v25, %v18442_v18 }
 0x16d   : > { %16366 = vmatprep.subr.bf16.mxu0 %v16365_v60 }
 0x16f   : > { %14997 = vmatmul.mubr.msk.f32.gmra.mrb[2].mxu0 %vm1362_vm1, %v18419_v15 }
 0x170   : > { %14999 = vmatprep.mubr.msk.f32.mxu0 %vm1362_vm1, %v2463_v17  ;;  %16368 = vmatpush3.bf16.msra.mxu0 %v16365_v60  ;;  %v2477_v60 = vmul.f32 %v18025_v29, %v18478_v49  ;;  %v21940_v17 = vld [vmem:[#allocation79_spill] sm:$0xff] }
 0x171   : > { %16370 = vmatprep.subr.bf16.mxu0 %v16369_v59 }
 0x173   : > { %15000 = vmatmul.mubr.msk.f32.gmra.mrb[4].mxu0 %vm1362_vm1, %v18429_v12 }
 0x174   : > { %15002 = vmatprep.mubr.msk.f32.mxu0 %vm1362_vm1, %v2465_v3  ;;  %v21941_v3 = vld [vmem:[#allocation28_spill] sm:$0xff] }
 0x177   : > { %15003 = vmatmul.mubr.msk.f32.gmra.mrb[6].mxu0 %vm1362_vm1, %v18438_v41 }
 0x178   : > { %15005 = vmatprep.mubr.msk.f32.mxu0 %vm1362_vm1, %v2467_v51  ;;  %v2483_v51 = vmul.f32 %v21941_v3, %v21940_v17  ;;  %v21949_v3 = vld [vmem:[#allocation84_spill] sm:$0xff] }
 0x17b   : > { %15006 = vmatmul.mubr.msk.f32.gmra.mrb[8].mxu0 %vm1362_vm1, %v18447_v34 }
 0x17c   : > { %15008 = vmatprep.mubr.msk.f32.mxu0 %vm1362_vm1, %v2469_v63  ;;  %v21942_v63 = vld [vmem:[#allocation80_spill] sm:$0xff] }
 0x17f   : > { %15009 = vmatmul.mubr.msk.f32.gmra.mrb[10].mxu0 %vm1362_vm1, %v18456_v13 }
 0x180   : > { %15011 = vmatprep.mubr.msk.f32.mxu0 %vm1362_vm1, %v2471_v2  ;;  %v21943_v2 = vld [vmem:[#allocation81_spill] sm:$0xff] }
 0x183   : > { %15012 = vmatmul.mubr.msk.f32.gmra.mrb[12].mxu0 %vm1362_vm1, %v18465_v47 }
 0x184   : > { %15014 = vmatprep.mubr.msk.f32.mxu0 %vm1362_vm1, %v2473_v55  ;;  %v21944_v55 = vld [vmem:[#allocation29_spill] sm:$0xff] }
 0x187   : > { %15015 = vmatmul.mubr.msk.f32.gmra.mrb[14].mxu0 %vm1362_vm1, %v18474_v10 }
 0x188   : > { %15017 = vmatprep.mubr.msk.f32.mxu0 %vm1362_vm1, %v2475_v56  ;;  %v2485_v56 = vmul.f32 %v21944_v55, %v21943_v2  ;;  %v13087_v2 = vld [vmem:[%s17833_s10 + $0xb8] sm:$0xff] }
 0x18b   : > { %15018 = vmatmul.mubr.msk.f32.gmra.mrb[16].mxu0 %vm1362_vm1, %v18483_v8 }
 0x18c   : > { %15020 = vmatprep.mubr.msk.f32.mxu0 %vm1362_vm1, %v2477_v60  ;;  %v21945_v60 = vld [vmem:[#allocation82_spill] sm:$0xff] }
 0x18f   : > { %15021 = vmatmul.mubr.msk.f32.gmra.mrb[18].mxu0 %vm1362_vm1, %v18492_v6 }
 0x190   : > { %15023 = vmatprep.mubr.msk.f32.mxu0 %vm1362_vm1, %v2479_v62  ;;  %v21946_v62 = vld [vmem:[#allocation83_spill] sm:$0xff] }
 0x193   : > { %15024 = vmatmul.mubr.msk.f32.gmra.mrb[20].mxu0 %vm1362_vm1, %v18501_v50  ;;  %v18760_v50 = vld [vmem:[#allocation2 + $0x107] sm:$0xff] }
 0x194   : > { %15026 = vmatprep.mubr.msk.f32.mxu0 %vm1362_vm1, %v2481_v58  ;;  %v21947_v58 = vld [vmem:[#allocation30_spill] sm:$0xff]  ;;  %21948 = vst [vmem:[#allocation79_spill] sm:$0xff] %v18760_v50 }
 0x195   : > { %v2487_v31 = vmul.f32 %v21947_v58, %v21946_v62  ;;  %v21951_v58 = vld [vmem:[#allocation48_spill] sm:$0xff] }
 0x196   : > { %v13121_v62 = vld [vmem:[%s17833_s10 + $0xc8] sm:$0xff] }
 0x197   : > { %15027 = vmatmul.mubr.msk.f32.gmra.mrb[22].mxu0 %vm1362_vm1, %v21942_v63  ;;  %v21952_v63 = vld [vmem:[#allocation49_spill] sm:$0xff] }
 0x198   : > { %15029 = vmatprep.mubr.msk.f32.mxu0 %vm1362_vm1, %v2483_v51  ;;  %v21950_v51 = vld [vmem:[#allocation31_spill] sm:$0xff] }
 0x199   : > { %v2489_v55 = vmul.f32 %v21950_v51, %v18760_v50  ;;  %v21953_v51 = vld [vmem:[#allocation50_spill] sm:$0xff]  ;;  %v21955_v50 = vld [vmem:[#allocation52_spill] sm:$0xff] }
 0x19b   : > { %15030 = vmatmul.mubr.msk.f32.gmra.mrb[24].mxu0 %vm1362_vm1, %v21945_v60  ;;  %v18770_v60 = vld [vmem:[#allocation2 + $0x10f] sm:$0xff] }
 0x19c   : > { %15032 = vmatprep.mubr.msk.f32.mxu0 %vm1362_vm1, %v2485_v56  ;;  %v13086_v56 = vld [vmem:[%s17833_s10 + $0xb0] sm:$0xff] }
 0x19f   : > { %15033 = vmatmul.mubr.msk.f32.gmra.mrb[26].mxu0 %vm1362_vm1, %v21949_v3  ;;  %v16373_v3 = vpack.c.bf16 %v13087_v2, %v13086_v56  ;;  %v21956_v2 = vld [vmem:[#allocation53_spill] sm:$0xff]  ;;  %v21965_v56 = vld [vmem:[#allocation62_spill] sm:$0xff] }
 0x1a0   : > { %15035 = vmatprep.mubr.msk.f32.mxu0 %vm1362_vm1, %v2487_v31  ;;  %v13120_v31 = vld [vmem:[%s17833_s10 + $0xc0] sm:$0xff] }
 0x1a3   : > { %15036 = vmatmul.mubr.msk.f32.gmra.mrb[28].mxu0 %vm1362_vm1, %v18535_v36  ;;  %v21954_v36 = vld [vmem:[#allocation51_spill] sm:$0xff] }
 0x1a4   : > { %15038 = vmatprep.mubr.msk.f32.mxu0 %vm1362_vm1, %v2489_v55  ;;  %v16377_v55 = vpack.c.bf16 %v13121_v62, %v13120_v31  ;;  %v21960_v62 = vld [vmem:[#allocation57_spill] sm:$0xff]  ;;  %v21966_v31 = vld [vmem:[#allocation63_spill] sm:$0xff] }
 0x1a7   : > { %15039 = vmatmul.mubr.msk.f32.gmra.mrb[30].mxu0 %vm1362_vm1, %v18770_v60 }
 0x1a8   : > { %15049 = vmatprep.mubr.msk.f32.mxu0 %vm1362_vm1, %v21951_v58  ;;  %v21957_v58 = vld [vmem:[#allocation54_spill] sm:$0xff] }
 0x1ab   : > { %15050 = vmatmul.mubr.msk.f32.vlgmr.msra.gmra.mrb[0].mxu0 %vm1362_vm1, %v21952_v63  ;;  %v21959_v63 = vld [vmem:[#allocation56_spill] sm:$0xff] }
 0x1ac   : > { %16372 = vmatpush3.bf16.msra.mxu0 %v16369_v59  ;;  %15052 = vmatprep.mubr.msk.f32.mxu0 %vm1362_vm1, %v21953_v51  ;;  %v21958_v59 = vld [vmem:[#allocation55_spill] sm:$0xff]  ;;  %v21964_v51 = vld [vmem:[#allocation61_spill] sm:$0xff] }
 0x1ad   : > { %16374 = vmatprep.subr.bf16.mxu0 %v16373_v3 }
 0x1af   : > { %15053 = vmatmul.mubr.msk.f32.gmra.mrb[2].mxu0 %vm1362_vm1, %v21954_v36  ;;  %v21961_v36 = vld [vmem:[#allocation58_spill] sm:$0xff] }
 0x1b0   : > { %15055 = vmatprep.mubr.msk.f32.mxu0 %vm1362_vm1, %v21955_v50  ;;  %16376 = vmatpush3.bf16.msra.mxu0 %v16373_v3  ;;  %v21962_v50 = vld [vmem:[#allocation59_spill] sm:$0xff]  ;;  %v21963_v3 = vld [vmem:[#allocation60_spill] sm:$0xff] }
 0x1b1   : > { %16378 = vmatprep.subr.bf16.mxu0 %v16377_v55 }
 0x1b3   : > { %15056 = vmatmul.mubr.msk.f32.gmra.mrb[4].mxu0 %vm1362_vm1, %v21956_v2  ;;  %v21967_v2 = vld [vmem:[#allocation64_spill] sm:$0xff] }
 0x1b4   : > { %15058 = vmatprep.mubr.msk.f32.mxu0 %vm1362_vm1, %v21957_v58  ;;  %v21968_v58 = vld [vmem:[#allocation65_spill] sm:$0xff] }
 0x1b7   : > { %15059 = vmatmul.mubr.msk.f32.gmra.mrb[6].mxu0 %vm1362_vm1, %v21958_v59  ;;  %v21969_v59 = vld [vmem:[#allocation66_spill] sm:$0xff] }
 0x1b8   : > { %15061 = vmatprep.mubr.msk.f32.mxu0 %vm1362_vm1, %v21959_v63  ;;  %v21970_v63 = vld [vmem:[#allocation67_spill] sm:$0xff] }
 0x1bb   : > { %15062 = vmatmul.mubr.msk.f32.gmra.mrb[8].mxu0 %vm1362_vm1, %v21960_v62  ;;  %v21971_v62 = vld [vmem:[#allocation68_spill] sm:$0xff] }
 0x1bc   : > { %15064 = vmatprep.mubr.msk.f32.mxu0 %vm1362_vm1, %v21961_v36  ;;  %v21972_v36 = vld [vmem:[#allocation69_spill] sm:$0xff] }
 0x1bf   : > { %15065 = vmatmul.mubr.msk.f32.gmra.mrb[10].mxu0 %vm1362_vm1, %v21962_v50  ;;  %v21973_v50 = vld [vmem:[#allocation70_spill] sm:$0xff] }
 0x1c0   : > { %15067 = vmatprep.mubr.msk.f32.mxu0 %vm1362_vm1, %v21963_v3  ;;  %v21974_v3 = vld [vmem:[#allocation71_spill] sm:$0xff] }
 0x1c3   : > { %15068 = vmatmul.mubr.msk.f32.gmra.mrb[12].mxu0 %vm1362_vm1, %v21964_v51  ;;  %v21975_v51 = vld [vmem:[#allocation72_spill] sm:$0xff] }
 0x1c4   : > { %15070 = vmatprep.mubr.msk.f32.mxu0 %vm1362_vm1, %v21965_v56  ;;  %v21976_v56 = vld [vmem:[#allocation73_spill] sm:$0xff] }
 0x1c7   : > { %15071 = vmatmul.mubr.msk.f32.gmra.mrb[14].mxu0 %vm1362_vm1, %v21966_v31  ;;  %v21977_v31 = vld [vmem:[#allocation74_spill] sm:$0xff] }
 0x1c8   : > { %15073 = vmatprep.mubr.msk.f32.mxu0 %vm1362_vm1, %v21967_v2  ;;  %v21978_v2 = vld [vmem:[#allocation75_spill] sm:$0xff] }
 0x1cb   : > { %15074 = vmatmul.mubr.msk.f32.gmra.mrb[16].mxu0 %vm1362_vm1, %v21968_v58  ;;  %v21979_v58 = vld [vmem:[#allocation76_spill] sm:$0xff] }
 0x1cc   : > { %15076 = vmatprep.mubr.msk.f32.mxu0 %vm1362_vm1, %v21969_v59  ;;  %v18836_v59 = vld [vmem:[#allocation2 + $0x108] sm:$0xff] }
 0x1cf   : > { %15077 = vmatmul.mubr.msk.f32.gmra.mrb[18].mxu0 %vm1362_vm1, %v21970_v63  ;;  %v21980_v63 = vld [vmem:[#allocation77_spill] sm:$0xff] }
 0x1d0   : > { %15079 = vmatprep.mubr.msk.f32.mxu0 %vm1362_vm1, %v21971_v62  ;;  %v18842_v62 = vld [vmem:[#allocation2 + $0x110] sm:$0xff] }
 0x1d3   : > { %15080 = vmatmul.mubr.msk.f32.gmra.mrb[20].mxu0 %vm1362_vm1, %v21972_v36  ;;  %v13122_v36 = vld [vmem:[%s17833_s10 + $0xd0] sm:$0xff] }
 0x1d4   : > { %15082 = vmatprep.mubr.msk.f32.mxu0 %vm1362_vm1, %v21973_v50  ;;  %v13123_v50 = vld [vmem:[%s17833_s10 + $0xd8] sm:$0xff] }
 0x1d7   : > { %15083 = vmatmul.mubr.msk.f32.gmra.mrb[22].mxu0 %vm1362_vm1, %v21974_v3  ;;  %v21981_v3 = vld [vmem:[#allocation32_spill] sm:$0xff] }
 0x1d8   : > { %15085 = vmatprep.mubr.msk.f32.mxu0 %vm1362_vm1, %v21975_v51  ;;  %v3272_v51 = vmul.f32 %v21981_v3, %v18543_v32  ;;  %v3276_v32 = vmul.f32 %v18127_v53, %v18566_v44 }
 0x1db   : > { %15086 = vmatmul.mubr.msk.f32.gmra.mrb[24].mxu0 %vm1362_vm1, %v21976_v56  ;;  %v16381_v56 = vpack.c.bf16 %v13123_v50, %v13122_v36  ;;  %v21983_v36 = vld [vmem:[#allocation35_spill] sm:$0xff] }
 0x1dc   : > { %15088 = vmatprep.mubr.msk.f32.mxu0 %vm1362_vm1, %v21977_v31  ;;  %v13156_v31 = vld [vmem:[%s17833_s10 + $0xe0] sm:$0xff] }
 0x1dd   : > { %v21984_v50 = vld [vmem:[#allocation87_spill] sm:$0xff] }
 0x1df   : > { %15089 = vmatmul.mubr.msk.f32.gmra.mrb[26].mxu0 %vm1362_vm1, %v21978_v2  ;;  %v13157_v2 = vld [vmem:[%s17833_s10 + $0xe8] sm:$0xff] }
 0x1e0   : > { %15091 = vmatprep.mubr.msk.f32.mxu0 %vm1362_vm1, %v21979_v58  ;;  %v3274_v58 = vmul.f32 %v18123_v52, %v18555_v35 }
 0x1e3   : > { %15092 = vmatmul.mubr.msk.f32.gmra.mrb[28].mxu0 %vm1362_vm1, %v21980_v63  ;;  %v16385_v63 = vpack.c.bf16 %v13157_v2, %v13156_v31  ;;  %v21986_v2 = vld [vmem:[#allocation88_spill] sm:$0xff] }
 0x1e4   : > { %15094 = vmatprep.mubr.msk.f32.mxu0 %vm1362_vm1, %v18836_v59 }
 0x1e7   : > { %15095 = vmatmul.mubr.msk.f32.gmra.mrb[30].mxu0 %vm1362_vm1, %v18842_v62 }
 0x1e8   : > { %15105 = vmatprep.mubr.msk.f32.mxu0 %vm1362_vm1, %v18545_v37  ;;  %v21982_v37 = vld [vmem:[#allocation86_spill] sm:$0xff] }
 0x1eb   : > { %15106 = vmatmul.mubr.msk.f32.vlgmr.msra.gmra.mrb[0].mxu0 %vm1362_vm1, %v3272_v51  ;;  %v21985_v51 = vld [vmem:[#allocation36_spill] sm:$0xff] }
 0x1ec   : > { %16380 = vmatpush3.bf16.msra.mxu0 %v16377_v55  ;;  %15108 = vmatprep.mubr.msk.f32.mxu0 %vm1362_vm1, %v18557_v45  ;;  %v3278_v55 = vmul.f32 %v21983_v36, %v18576_v38  ;;  %v3280_v31 = vmul.f32 %v21985_v51, %v18585_v33  ;;  %v21989_v36 = vld [vmem:[#allocation38_spill] sm:$0xff]  ;;  %v21991_v51 = vld [vmem:[#allocation39_spill] sm:$0xff] }
 0x1ed   : > { %16382 = vmatprep.subr.bf16.mxu0 %v16381_v56 }
 0x1ef   : > { %15109 = vmatmul.mubr.msk.f32.gmra.mrb[2].mxu0 %vm1362_vm1, %v3274_v58 }
 0x1f0   : > { %15111 = vmatprep.mubr.msk.f32.mxu0 %vm1362_vm1, %v21982_v37  ;;  %16384 = vmatpush3.bf16.msra.mxu0 %v16381_v56  ;;  %v21987_v56 = vld [vmem:[#allocation37_spill] sm:$0xff] }
 0x1f1   : > { %16386 = vmatprep.subr.bf16.mxu0 %v16385_v63  ;;  %v3282_v58 = vmul.f32 %v21987_v56, %v18594_v11  ;;  %v21993_v56 = vld [vmem:[#allocation40_spill] sm:$0xff] }
 0x1f3   : > { %15112 = vmatmul.mubr.msk.f32.gmra.mrb[4].mxu0 %vm1362_vm1, %v3276_v32  ;;  %v21988_v32 = vld [vmem:[#allocation89_spill] sm:$0xff] }
 0x1f4   : > { %15114 = vmatprep.mubr.msk.f32.mxu0 %vm1362_vm1, %v21984_v50  ;;  %v3284_v50 = vmul.f32 %v21989_v36, %v18603_v43  ;;  %v21995_v36 = vld [vmem:[#allocation41_spill] sm:$0xff] }
 0x1f7   : > { %15115 = vmatmul.mubr.msk.f32.gmra.mrb[6].mxu0 %vm1362_vm1, %v3278_v55  ;;  %v21990_v55 = vld [vmem:[#allocation90_spill] sm:$0xff] }
 0x1f8   : > { %15117 = vmatprep.mubr.msk.f32.mxu0 %vm1362_vm1, %v21986_v2  ;;  %v3286_v2 = vmul.f32 %v21991_v51, %v18612_v48  ;;  %v21997_v51 = vld [vmem:[#allocation42_spill] sm:$0xff] }
 0x1fb   : > { %15118 = vmatmul.mubr.msk.f32.gmra.mrb[8].mxu0 %vm1362_vm1, %v3280_v31  ;;  %v21992_v31 = vld [vmem:[#allocation91_spill] sm:$0xff] }
 0x1fc   : > { %15120 = vmatprep.mubr.msk.f32.mxu0 %vm1362_vm1, %v21988_v32  ;;  %v3288_v32 = vmul.f32 %v21993_v56, %v18621_v40  ;;  %v21999_v56 = vld [vmem:[#allocation43_spill] sm:$0xff] }
 0x1ff   : > { %15121 = vmatmul.mubr.msk.f32.gmra.mrb[10].mxu0 %vm1362_vm1, %v3282_v58  ;;  %v21994_v58 = vld [vmem:[#allocation92_spill] sm:$0xff] }
 0x200   : > { %15123 = vmatprep.mubr.msk.f32.mxu0 %vm1362_vm1, %v21990_v55  ;;  %v3290_v55 = vmul.f32 %v21995_v36, %v18630_v39  ;;  %v22001_v36 = vld [vmem:[#allocation99_spill] sm:$0xff]  ;;  %v22003_v39 = vld [vmem:[#allocation100_spill] sm:$0xff] }
 0x203   : > { %15124 = vmatmul.mubr.msk.f32.gmra.mrb[12].mxu0 %vm1362_vm1, %v3284_v50  ;;  %v21996_v50 = vld [vmem:[#allocation94_spill] sm:$0xff] }
 0x204   : > { %15126 = vmatprep.mubr.msk.f32.mxu0 %vm1362_vm1, %v21992_v31  ;;  %v3292_v31 = vmul.f32 %v21997_v51, %v18639_v54  ;;  %v22004_v51 = vld [vmem:[#allocation101_spill] sm:$0xff]  ;;  %v22006_v54 = vld [vmem:[#allocation102_spill] sm:$0xff] }
 0x207   : > { %15127 = vmatmul.mubr.msk.f32.gmra.mrb[14].mxu0 %vm1362_vm1, %v3286_v2  ;;  %v21998_v2 = vld [vmem:[#allocation97_spill] sm:$0xff] }
 0x208   : > { %15129 = vmatprep.mubr.msk.f32.mxu0 %vm1362_vm1, %v21994_v58  ;;  %v3294_v58 = vmul.f32 %v21999_v56, %v21998_v2 }
 0x20b   : > { %15130 = vmatmul.mubr.msk.f32.gmra.mrb[16].mxu0 %vm1362_vm1, %v3288_v32  ;;  %v22000_v32 = vld [vmem:[#allocation98_spill] sm:$0xff] }
 0x20c   : > { %15132 = vmatprep.mubr.msk.f32.mxu0 %vm1362_vm1, %v21996_v50  ;;  %v22002_v50 = vld [vmem:[#allocation44_spill] sm:$0xff] }
 0x20f   : > { %15133 = vmatmul.mubr.msk.f32.gmra.mrb[18].mxu0 %vm1362_vm1, %v3290_v55  ;;  %v3296_v55 = vmul.f32 %v22002_v50, %v22001_v36  ;;  %v18924_v50 = vld [vmem:[#allocation2 + $0x111] sm:$0xff] }
 0x210   : > { %15135 = vmatprep.mubr.msk.f32.mxu0 %vm1362_vm1, %v18641_v57 }
 0x213   : > { %15136 = vmatmul.mubr.msk.f32.gmra.mrb[20].mxu0 %vm1362_vm1, %v3292_v31  ;;  %v22005_v31 = vld [vmem:[#allocation45_spill] sm:$0xff] }
 0x214   : > { %15138 = vmatprep.mubr.msk.f32.mxu0 %vm1362_vm1, %v22000_v32  ;;  %v3298_v57 = vmul.f32 %v22005_v31, %v22004_v51  ;;  %v13158_v31 = vld [vmem:[%s17833_s10 + $0xf0] sm:$0xff] }
 0x217   : > { %15139 = vmatmul.mubr.msk.f32.gmra.mrb[22].mxu0 %vm1362_vm1, %v3294_v58  ;;  %v22007_v58 = vld [vmem:[#allocation46_spill] sm:$0xff] }
 0x218   : > { %15141 = vmatprep.mubr.msk.f32.mxu0 %vm1362_vm1, %v22003_v39  ;;  %v3300_v56 = vmul.f32 %v22007_v58, %v18675_v61  ;;  %v18926_v39 = vld [vmem:[#allocation2 + $0x109] sm:$0xff]  ;;  %v13159_v58 = vld [vmem:[%s17833_s10 + $0xf8] sm:$0xff] }
 0x219   : > { %v16389_v61 = vpack.c.bf16 %v13159_v58, %v13158_v31  ;;  %v22019_v31 = vld [vmem:[#allocation85_spill] sm:$0xff]  ;;  %v22020_v58 = vld [vmem:[#allocation31_spill] sm:$0xff] }
 0x21b   : > { %15142 = vmatmul.mubr.msk.f32.gmra.mrb[24].mxu0 %vm1362_vm1, %v3296_v55  ;;  %v3302_v55 = vmul.f32 %v18179_v4, %v18924_v50 }
 0x21c   : > { %15144 = vmatprep.mubr.msk.f32.mxu0 %vm1362_vm1, %v22006_v54  ;;  %v13193_v54 = vld [vmem:[%s17833_s10 + $0x108] sm:$0xff] }
 0x21f   : > { %15145 = vmatmul.mubr.msk.f32.gmra.mrb[26].mxu0 %vm1362_vm1, %v3298_v57  ;;  %v3693_v57 = vmul.f32 %v17989_v20, %v18401_v14  ;;  %v3697_v14 = vmul.f32 %v17997_v22, %v18423_v16  ;;  %v3705_v16 = vmul.f32 %v18013_v26, %v18460_v7  ;;  %v3711_v7 = vmul.f32 %v18025_v29, %v18487_v46  ;;  %v22011_v46 = vld [vmem:[#allocation81_spill] sm:$0xff] }
 0x220   : > { %15147 = vmatprep.mubr.msk.f32.mxu0 %vm1362_vm1, %v18677_v0  ;;  %v3695_v0 = vmul.f32 %v17993_v21, %v18412_v1  ;;  %v3699_v1 = vmul.f32 %v18001_v23, %v18433_v19  ;;  %v22008_v19 = vld [vmem:[#allocation78_spill] sm:$0xff] }
 0x223   : > { %15148 = vmatmul.mubr.msk.f32.gmra.mrb[28].mxu0 %vm1362_vm1, %v3300_v56  ;;  %v13192_v56 = vld [vmem:[%s17833_s10 + $0x100] sm:$0xff] }
 0x224   : > { %15150 = vmatprep.mubr.msk.f32.mxu0 %vm1362_vm1, %v18926_v39  ;;  %v16393_v20 = vpack.c.bf16 %v13193_v54, %v13192_v56  ;;  %v22017_v54 = vld [vmem:[#allocation79_spill] sm:$0xff]  ;;  %v4083_v56 = vld [vmem:[#allocation2 + $0x28] sm:$0xff] }
 0x227   : > { %15151 = vmatmul.mubr.msk.f32.gmra.mrb[30].mxu0 %vm1362_vm1, %v3302_v55 }
 0x228   : > { %15161 = vmatprep.mubr.msk.f32.mxu0 %vm1362_vm1, %v3693_v57  ;;  %v3692_v57 = vld [vmem:[#allocation2 + $0x11f] sm:$0xff] }
 0x22b   : > { %15162 = vmatmul.mubr.msk.f32.vlgmr.msra.gmra.mrb[0].mxu0 %vm1362_vm1, %v18419_v15  ;;  %v3703_v15 = vmul.f32 %v18009_v25, %v18451_v9  ;;  %v3709_v9 = vmul.f32 %v18021_v28, %v18478_v49  ;;  %v22009_v49 = vld [vmem:[#allocation27_spill] sm:$0xff] }
 0x22c   : > { %16388 = vmatpush3.bf16.msra.mxu0 %v16385_v63  ;;  %15164 = vmatprep.mubr.msk.f32.mxu0 %vm1362_vm1, %v3695_v0  ;;  %v3701_v0 = vmul.f32 %v18005_v24, %v18442_v18  ;;  %v22010_v18 = vld [vmem:[#allocation80_spill] sm:$0xff]  ;;  %v3691_v63 = vld [vmem:[#allocation2 + $0x117] sm:$0xff] }
 0x22d   : > { %16390 = vmatprep.subr.bf16.mxu0 %v16389_v61  ;;  %v3723_v55 = vmul.f32 %v22020_v58, %v3691_v63  ;;  %v4103_v63 = vld [vmem:[#allocation2 + $0xc8] sm:$0xff] }
 0x22f   : > { %15165 = vmatmul.mubr.msk.f32.gmra.mrb[2].mxu0 %vm1362_vm1, %v18429_v12  ;;  %v3707_v12 = vmul.f32 %v18017_v27, %v18469_v5  ;;  %v3713_v5 = vmul.f32 %v18029_v30, %v18496_v42  ;;  %v22014_v42 = vld [vmem:[#allocation83_spill] sm:$0xff] }
 0x230   : > { %15167 = vmatprep.mubr.msk.f32.mxu0 %vm1362_vm1, %v3697_v14  ;;  %16392 = vmatpush3.bf16.msra.mxu0 %v16389_v61  ;;  %v22018_v61 = vld [vmem:[#allocation30_spill] sm:$0xff]  ;;  %v13194_v14 = vld [vmem:[%s17833_s10 + $0x110] sm:$0xff] }
 0x231   : > { %16394 = vmatprep.subr.bf16.mxu0 %v16393_v20 }
 0x233   : > { %15168 = vmatmul.mubr.msk.f32.gmra.mrb[4].mxu0 %vm1362_vm1, %v18438_v41  ;;  %v3715_v41 = vmul.f32 %v22009_v49, %v21940_v17  ;;  %v3721_v17 = vmul.f32 %v22018_v61, %v22017_v54  ;;  %v4101_v54 = vld [vmem:[#allocation2 + $0xb8] sm:$0xff] }
 0x234   : > { %15170 = vmatprep.mubr.msk.f32.mxu0 %vm1362_vm1, %v3699_v1  ;;  %v13195_v1 = vld [vmem:[%s17833_s10 + $0x118] sm:$0xff]  ;;  %s22211_s10 = scalar_lea.vmem %s21415_s4, %s17775_s27 }
 0x237   : > { %15171 = vmatmul.mubr.msk.f32.gmra.mrb[6].mxu0 %vm1362_vm1, %v18447_v34  ;;  %v22012_v34 = vld [vmem:[#allocation28_spill] sm:$0xff] }
 0x238   : > { %15173 = vmatprep.mubr.msk.f32.mxu0 %vm1362_vm1, %v3701_v0  ;;  %v4084_v0 = vld [vmem:[#allocation2 + $0x30] sm:$0xff] }
 0x23b   : > { %15174 = vmatmul.mubr.msk.f32.gmra.mrb[8].mxu0 %vm1362_vm1, %v18456_v13  ;;  %v3717_v13 = vmul.f32 %v22012_v34, %v22011_v46  ;;  %v4095_v46 = vld [vmem:[#allocation2 + $0x88] sm:$0xff] }
 0x23c   : > { %15176 = vmatprep.mubr.msk.f32.mxu0 %vm1362_vm1, %v3703_v15  ;;  %v4085_v15 = vld [vmem:[#allocation2 + $0x38] sm:$0xff] }
 0x23f   : > { %15177 = vmatmul.mubr.msk.f32.gmra.mrb[10].mxu0 %vm1362_vm1, %v18465_v47  ;;  %v22013_v47 = vld [vmem:[#allocation82_spill] sm:$0xff] }
 0x240   : > { %15179 = vmatprep.mubr.msk.f32.mxu0 %vm1362_vm1, %v3705_v16  ;;  %v16397_v16 = vpack.c.bf16 %v13195_v1, %v13194_v14  ;;  %v4108_v14 = vld [vmem:[#allocation2 + $0xf0] sm:$0xff]  ;;  %v4109_v1 = vld [vmem:[#allocation2 + $0xf8] sm:$0xff] }
 0x243   : > { %15180 = vmatmul.mubr.msk.f32.gmra.mrb[12].mxu0 %vm1362_vm1, %v18474_v10  ;;  %v22015_v10 = vld [vmem:[#allocation29_spill] sm:$0xff] }
 0x244   : > { %15182 = vmatprep.mubr.msk.f32.mxu0 %vm1362_vm1, %v3707_v12  ;;  %v4086_v12 = vld [vmem:[#allocation2 + $0x40] sm:$0xff] }
 0x247   : > { %15183 = vmatmul.mubr.msk.f32.gmra.mrb[14].mxu0 %vm1362_vm1, %v18483_v8  ;;  %v3719_v8 = vmul.f32 %v22015_v10, %v22014_v42  ;;  %v4098_v42 = vld [vmem:[#allocation2 + $0xa0] sm:$0xff] }
 0x248   : > { %15185 = vmatprep.mubr.msk.f32.mxu0 %vm1362_vm1, %v3709_v9  ;;  %v4088_v9 = vld [vmem:[#allocation2 + $0x50] sm:$0xff] }
 0x24b   : > { %15186 = vmatmul.mubr.msk.f32.gmra.mrb[16].mxu0 %vm1362_vm1, %v18492_v6  ;;  %v22016_v6 = vld [vmem:[#allocation84_spill] sm:$0xff] }
 0x24c   : > { %15188 = vmatprep.mubr.msk.f32.mxu0 %vm1362_vm1, %v3711_v7  ;;  %v4089_v7 = vld [vmem:[#allocation2 + $0x58] sm:$0xff] }
 0x24f   : > { %15189 = vmatmul.mubr.msk.f32.gmra.mrb[18].mxu0 %vm1362_vm1, %v22008_v19  ;;  %v4091_v19 = vld [vmem:[#allocation2 + $0x68] sm:$0xff] }
 0x250   : > { %15191 = vmatprep.mubr.msk.f32.mxu0 %vm1362_vm1, %v3713_v5  ;;  %v4090_v5 = vld [vmem:[#allocation2 + $0x60] sm:$0xff] }
 0x253   : > { %15192 = vmatmul.mubr.msk.f32.gmra.mrb[20].mxu0 %vm1362_vm1, %v22010_v18  ;;  %v4094_v18 = vld [vmem:[#allocation2 + $0x80] sm:$0xff] }
 0x254   : > { %15194 = vmatprep.mubr.msk.f32.mxu0 %vm1362_vm1, %v3715_v41  ;;  %v4093_v41 = vld [vmem:[#allocation2 + $0x78] sm:$0xff] }
 0x257   : > { %15195 = vmatmul.mubr.msk.f32.gmra.mrb[22].mxu0 %vm1362_vm1, %v22013_v47  ;;  %v4097_v47 = vld [vmem:[#allocation2 + $0x98] sm:$0xff] }
 0x258   : > { %15197 = vmatprep.mubr.msk.f32.mxu0 %vm1362_vm1, %v3717_v13  ;;  %v4096_v13 = vld [vmem:[#allocation2 + $0x90] sm:$0xff] }
 0x25b   : > { %15198 = vmatmul.mubr.msk.f32.gmra.mrb[24].mxu0 %vm1362_vm1, %v22016_v6  ;;  %v4100_v6 = vld [vmem:[#allocation2 + $0xb0] sm:$0xff] }
 0x25c   : > { %15200 = vmatprep.mubr.msk.f32.mxu0 %vm1362_vm1, %v3719_v8  ;;  %v4099_v8 = vld [vmem:[#allocation2 + $0xa8] sm:$0xff] }
 0x25f   : > { %15201 = vmatmul.mubr.msk.f32.gmra.mrb[26].mxu0 %vm1362_vm1, %v22019_v31  ;;  %v4104_v31 = vld [vmem:[#allocation2 + $0xd0] sm:$0xff] }
 0x260   : > { %15203 = vmatprep.mubr.msk.f32.mxu0 %vm1362_vm1, %v3721_v17  ;;  %v4102_v17 = vld [vmem:[#allocation2 + $0xc0] sm:$0xff] }
 0x263   : > { %15204 = vmatmul.mubr.msk.f32.gmra.mrb[28].mxu0 %vm1362_vm1, %v18770_v60  ;;  %v4087_v60 = vld [vmem:[#allocation2 + $0x48] sm:$0xff] }
 0x264   : > { %15206 = vmatprep.mubr.msk.f32.mxu0 %vm1362_vm1, %v3723_v55  ;;  %v4105_v55 = vld [vmem:[#allocation2 + $0xd8] sm:$0xff] }
 0x267   : > { %15207 = vmatmul.mubr.msk.f32.gmra.mrb[30].mxu0 %vm1362_vm1, %v3692_v57  ;;  %v4106_v57 = vld [vmem:[#allocation2 + $0xe0] sm:$0xff] }
 0x268   : > { %15217 = vmatprep.mubr.msk.f32.mxu0 %vm1362_vm1, %v4083_v56  ;;  %v4107_v56 = vld [vmem:[#allocation2 + $0xe8] sm:$0xff] }
 0x26b   : > { %15218 = vmatmul.mubr.msk.f32.vlgmr.msra.gmra.mrb[0].mxu0 %vm1362_vm1, %v4084_v0  ;;  %v4110_v0 = vld [vmem:[#allocation2 + $0x100] sm:$0xff] }
 0x26c   : > { %16396 = vmatpush3.bf16.msra.mxu0 %v16393_v20  ;;  %15220 = vmatprep.mubr.msk.f32.mxu0 %vm1362_vm1, %v4085_v15  ;;  %v4092_v20 = vld [vmem:[#allocation2 + $0x70] sm:$0xff]  ;;  %v4113_v15 = vld [vmem:[#allocation2 + $0x118] sm:$0xff] }
 0x26d   : > { %16398 = vmatprep.subr.bf16.mxu0 %v16397_v16 }
 0x26f   : > { %15221 = vmatmul.mubr.msk.f32.gmra.mrb[2].mxu0 %vm1362_vm1, %v4086_v12  ;;  %v4506_v12 = vmul.f32 %v21981_v3, %v18555_v35  ;;  %v22022_v35 = vld [vmem:[#allocation35_spill] sm:$0xff] }
 0x270   : > { %15223 = vmatprep.mubr.msk.f32.mxu0 %vm1362_vm1, %v4087_v60  ;;  %16400 = vmatpush3.bf16.msra.mxu0 %v16397_v16  ;;  %v4114_v16 = vld [vmem:[#allocation2 + $0x120] sm:$0xff] }
 0x271   : > { %v22021_v60 = vld [vmem:[#allocation87_spill] sm:$0xff] }
 0x273   : > { %15224 = vmatmul.mubr.msk.f32.gmra.mrb[4].mxu0 %vm1362_vm1, %v4088_v9  ;;  %v22023_v9 = vld [vmem:[#allocation88_spill] sm:$0xff] }
 0x274   : > { %15226 = vmatprep.mubr.msk.f32.mxu0 %vm1362_vm1, %v4089_v7  ;;  %v22025_v7 = vld [vmem:[#allocation89_spill] sm:$0xff] }
 0x277   : > { %15227 = vmatmul.mubr.msk.f32.gmra.mrb[6].mxu0 %vm1362_vm1, %v4090_v5 }
 0x278   : > { %15229 = vmatprep.mubr.msk.f32.mxu0 %vm1362_vm1, %v4091_v19  ;;  %v22027_v19 = vld [vmem:[#allocation90_spill] sm:$0xff] }
 0x27b   : > { %15230 = vmatmul.mubr.msk.f32.gmra.mrb[8].mxu0 %vm1362_vm1, %v4092_v20 }
 0x27c   : > { %15232 = vmatprep.mubr.msk.f32.mxu0 %vm1362_vm1, %v4093_v41  ;;  %v22029_v41 = vld [vmem:[#allocation91_spill] sm:$0xff] }
 0x27f   : > { %15233 = vmatmul.mubr.msk.f32.gmra.mrb[10].mxu0 %vm1362_vm1, %v4094_v18 }
 0x280   : > { %15235 = vmatprep.mubr.msk.f32.mxu0 %vm1362_vm1, %v4095_v46  ;;  %v22031_v46 = vld [vmem:[#allocation92_spill] sm:$0xff] }
 0x283   : > { %15236 = vmatmul.mubr.msk.f32.gmra.mrb[12].mxu0 %vm1362_vm1, %v4096_v13  ;;  %v22033_v13 = vld [vmem:[#allocation40_spill] sm:$0xff] }
 0x284   : > { %15238 = vmatprep.mubr.msk.f32.mxu0 %vm1362_vm1, %v4097_v47 }
 0x287   : > { %15239 = vmatmul.mubr.msk.f32.gmra.mrb[14].mxu0 %vm1362_vm1, %v4098_v42  ;;  %v22034_v42 = vld [vmem:[#allocation94_spill] sm:$0xff] }
 0x288   : > { %15241 = vmatprep.mubr.msk.f32.mxu0 %vm1362_vm1, %v4099_v8  ;;  %v22036_v8 = vld [vmem:[#allocation41_spill] sm:$0xff] }
 0x28b   : > { %15242 = vmatmul.mubr.msk.f32.gmra.mrb[16].mxu0 %vm1362_vm1, %v4100_v6 }
 0x28c   : > { %15244 = vmatprep.mubr.msk.f32.mxu0 %vm1362_vm1, %v4101_v54  ;;  %v22037_v54 = vld [vmem:[#allocation96_spill] sm:$0xff] }
 0x28f   : > { %15245 = vmatmul.mubr.msk.f32.gmra.mrb[18].mxu0 %vm1362_vm1, %v4102_v17 }
 0x290   : > { %15247 = vmatprep.mubr.msk.f32.mxu0 %vm1362_vm1, %v4103_v63  ;;  %v22039_v63 = vld [vmem:[#allocation43_spill] sm:$0xff] }
 0x293   : > { %15248 = vmatmul.mubr.msk.f32.gmra.mrb[20].mxu0 %vm1362_vm1, %v4104_v31  ;;  %v4528_v31 = vmul.f32 %v22039_v63, %v22001_v36  ;;  %v22046_v36 = vld [vmem:[#allocation46_spill] sm:$0xff] }
 0x294   : > { %15250 = vmatprep.mubr.msk.f32.mxu0 %vm1362_vm1, %v4105_v55  ;;  %v22040_v55 = vld [vmem:[#allocation100_spill] sm:$0xff] }
 0x297   : > { %15251 = vmatmul.mubr.msk.f32.gmra.mrb[22].mxu0 %vm1362_vm1, %v4106_v57  ;;  %v22041_v57 = vld [vmem:[#allocation44_spill] sm:$0xff] }
 0x298   : > { %15253 = vmatprep.mubr.msk.f32.mxu0 %vm1362_vm1, %v4107_v56  ;;  %v4530_v56 = vmul.f32 %v22041_v57, %v22004_v51  ;;  %v4504_v51 = vld [vmem:[#allocation2 + $0x121] sm:$0xff] }
 0x29b   : > { %15254 = vmatmul.mubr.msk.f32.gmra.mrb[24].mxu0 %vm1362_vm1, %v4108_v14  ;;  %v22042_v14 = vld [vmem:[#allocation102_spill] sm:$0xff] }
 0x29c   : > { %15256 = vmatprep.mubr.msk.f32.mxu0 %vm1362_vm1, %v4109_v1 }
 0x29f   : > { %15257 = vmatmul.mubr.msk.f32.gmra.mrb[26].mxu0 %vm1362_vm1, %v4110_v0  ;;  %v22045_v0 = vld [vmem:[#allocation104_spill] sm:$0xff] }
 0x2a0   : > { %15259 = vmatprep.mubr.msk.f32.mxu0 %vm1362_vm1, %v18836_v59  ;;  %v4508_v59 = vmul.f32 %v18123_v52, %v18566_v44  ;;  %v22024_v44 = vld [vmem:[#allocation36_spill] sm:$0xff] }
 0x2a3   : > { %15260 = vmatmul.mubr.msk.f32.gmra.mrb[28].mxu0 %vm1362_vm1, %v18842_v62  ;;  %v4510_v62 = vmul.f32 %v18127_v53, %v18576_v38  ;;  %v22026_v38 = vld [vmem:[#allocation37_spill] sm:$0xff] }
 0x2a4   : > { %15262 = vmatprep.mubr.msk.f32.mxu0 %vm1362_vm1, %v4113_v15  ;;  %v4516_v5 = vmul.f32 %v22026_v38, %v18603_v43  ;;  %v22032_v43 = vld [vmem:[#allocation93_spill] sm:$0xff]  ;;  %v4534_v15 = vmul.f32 %v22046_v36, %v18924_v50  ;;  %v13232_v50 = vld [vmem:[%s17757_s29 + $0x38] sm:$0xff] }
 0x2a5   : > { %v4522_v47 = vmul.f32 %v22033_v13, %v22032_v43  ;;  %v13298_v43 = vld [vmem:[%s17757_s29 + $0x48] sm:$0xff] }
 0x2a7   : > { %15263 = vmatmul.mubr.msk.f32.gmra.mrb[30].mxu0 %vm1362_vm1, %v4114_v16  ;;  %v4503_v16 = vld [vmem:[#allocation2 + $0x119] sm:$0xff] }
 0x2a8   : > { %15273 = vmatprep.mubr.msk.f32.mxu0 %vm1362_vm1, %v18557_v45  ;;  %v4512_v45 = vmul.f32 %v22022_v35, %v18585_v33  ;;  %v22028_v33 = vld [vmem:[#allocation38_spill] sm:$0xff] }
 0x2a9   : > { %v4518_v20 = vmul.f32 %v22028_v33, %v18612_v48  ;;  %v22035_v48 = vld [vmem:[#allocation95_spill] sm:$0xff] }
 0x2aa   : > { %v4524_v6 = vmul.f32 %v22036_v8, %v22035_v48 }
 0x2ab   : > { %15274 = vmatmul.mubr.msk.f32.vlgmr.msra.gmra.mrb[0].mxu0 %vm1362_vm1, %v4506_v12  ;;  %v4536_v12 = vmul.f32 %v18179_v4, %v4504_v51 }
 0x2ac   : > { %15276 = vmatprep.mubr.msk.f32.mxu0 %vm1362_vm1, %v21982_v37  ;;  %v4514_v37 = vmul.f32 %v22024_v44, %v18594_v11  ;;  %v22030_v11 = vld [vmem:[#allocation39_spill] sm:$0xff] }
 0x2ad   : > { %v4520_v18 = vmul.f32 %v22030_v11, %v18621_v40  ;;  %v22038_v40 = vld [vmem:[#allocation42_spill] sm:$0xff] }
 0x2ae   : > { %v4526_v17 = vmul.f32 %v22038_v40, %v21998_v2  ;;  %v22043_v2 = vld [vmem:[#allocation103_spill] sm:$0xff] }
 0x2af   : > { %15277 = vmatmul.mubr.msk.f32.gmra.mrb[2].mxu0 %vm1362_vm1, %v4508_v59  ;;  %v13229_v59 = vld [vmem:[%s17757_s29 + $0x20] sm:$0xff] }
 0x2b0   : > { %15279 = vmatprep.mubr.msk.f32.mxu0 %vm1362_vm1, %v22021_v60 }
 0x2b3   : > { %15280 = vmatmul.mubr.msk.f32.gmra.mrb[4].mxu0 %vm1362_vm1, %v4510_v62  ;;  %v13230_v62 = vld [vmem:[%s17757_s29 + $0x28] sm:$0xff] }
 0x2b4   : > { %15282 = vmatprep.mubr.msk.f32.mxu0 %vm1362_vm1, %v22023_v9  ;;  %v16401_v60 = vpack.c.bf16 %v13230_v62, %v13229_v59  ;;  %v5066_v9 = vld [vmem:[#allocation3 + $0x8] sm:$0xff] }
 0x2b5   : > { %15329 = vmatprep.mubr.msk.f32.mxu1 %vm1362_vm1, %v5066_v9 }
 0x2b6   : > { %16402 = vmatprep.subr.bf16.mxu1 %v16401_v60 }
 0x2b7   : > { %15283 = vmatmul.mubr.msk.f32.gmra.mrb[6].mxu0 %vm1362_vm1, %v4512_v45  ;;  %16404 = vmatpush3.bf16.msra.mxu1 %v16401_v60 }
 0x2b8   : > { %15285 = vmatprep.mubr.msk.f32.mxu0 %vm1362_vm1, %v22025_v7  ;;  %v5062_v7 = vld [vmem:[%s17757_s29] sm:$0xff] }
 0x2bb   : > { %15286 = vmatmul.mubr.msk.f32.gmra.mrb[8].mxu0 %vm1362_vm1, %v4514_v37  ;;  %v5067_v37 = vld [vmem:[#allocation3 + $0x10] sm:$0xff] }
 0x2bc   : > { %15288 = vmatprep.mubr.msk.f32.mxu0 %vm1362_vm1, %v22027_v19 }
 0x2bf   : > { %15289 = vmatmul.mubr.msk.f32.gmra.mrb[10].mxu0 %vm1362_vm1, %v4516_v5  ;;  %v5063_v5 = vld [vmem:[%s17757_s29 + $0x8] sm:$0xff] }
 0x2c0   : > { %15291 = vmatprep.mubr.msk.f32.mxu0 %vm1362_vm1, %v22029_v41  ;;  %v16409_v19 = vpack.c.bf16 %v5063_v5, %v5062_v7  ;;  %v5065_v41 = vld [vmem:[%s17757_s29 + $0x18] sm:$0xff] }
 0x2c3   : > { %15292 = vmatmul.mubr.msk.f32.gmra.mrb[12].mxu0 %vm1362_vm1, %v4518_v20  ;;  %v5064_v20 = vld [vmem:[%s17757_s29 + $0x10] sm:$0xff] }
 0x2c4   : > { %15294 = vmatprep.mubr.msk.f32.mxu0 %vm1362_vm1, %v22031_v46  ;;  %v13297_v46 = vld [vmem:[%s17757_s29 + $0x40] sm:$0xff] }
 0x2c7   : > { %15295 = vmatmul.mubr.msk.f32.gmra.mrb[14].mxu0 %vm1362_vm1, %v4520_v18  ;;  %v16413_v18 = vpack.c.bf16 %v5065_v41, %v5064_v20 }
 0x2c8   : > { %15297 = vmatprep.mubr.msk.f32.mxu0 %vm1362_vm1, %v22034_v42  ;;  %v19150_v42 = vld [vmem:[%s543_s25] ss:$0 sm:$0xff] }
 0x2cb   : > { %15298 = vmatmul.mubr.msk.f32.gmra.mrb[16].mxu0 %vm1362_vm1, %v4522_v47  ;;  %v19142_v47 = vpack.c.bf16 %v13298_v43, %v13297_v46 }
 0x2cc   : > { %15300 = vmatprep.mubr.msk.f32.mxu0 %vm1362_vm1, %v22037_v54 }
 0x2cf   : > { %15301 = vmatmul.mubr.msk.f32.gmra.mrb[18].mxu0 %vm1362_vm1, %v4524_v6 }
 0x2d0   : > { %15303 = vmatprep.mubr.msk.f32.mxu0 %vm1362_vm1, %v22000_v32  ;;  %v22044_v32 = vld [vmem:[#allocation45_spill] sm:$0xff] }
 0x2d1   : > { %v4532_v1 = vmul.f32 %v22044_v32, %v22043_v2 }
 0x2d3   : > { %15304 = vmatmul.mubr.msk.f32.gmra.mrb[20].mxu0 %vm1362_vm1, %v4526_v17 }
 0x2d4   : > { %15306 = vmatprep.mubr.msk.f32.mxu0 %vm1362_vm1, %v22040_v55 }
 0x2d7   : > { %15307 = vmatmul.mubr.msk.f32.gmra.mrb[22].mxu0 %vm1362_vm1, %v4528_v31 }
 0x2d8   : > { %15309 = vmatprep.mubr.msk.f32.mxu0 %vm1362_vm1, %v22042_v14 }
 0x2db   : > { %15310 = vmatmul.mubr.msk.f32.gmra.mrb[24].mxu0 %vm1362_vm1, %v4530_v56 }
 0x2dc   : > { %15312 = vmatprep.mubr.msk.f32.mxu0 %vm1362_vm1, %v22045_v0 }
 0x2df   : > { %15313 = vmatmul.mubr.msk.f32.gmra.mrb[26].mxu0 %vm1362_vm1, %v4532_v1 }
 0x2e0   : > { %15315 = vmatprep.mubr.msk.f32.mxu0 %vm1362_vm1, %v18926_v39  ;;  %v13231_v39 = vld [vmem:[%s17757_s29 + $0x30] sm:$0xff] }
 0x2e1   : > { %v16405_v45 = vpack.c.bf16 %v13232_v50, %v13231_v39 }
 0x2e3   : > { %15316 = vmatmul.mubr.msk.f32.gmra.mrb[28].mxu0 %vm1362_vm1, %v4534_v15  ;;  %16406 = vmatprep.subr.bf16.mxu1 %v16405_v45 }
 0x2e4   : > { %15318 = vmatprep.mubr.msk.f32.mxu0 %vm1362_vm1, %v4503_v16  ;;  %16408 = vmatpush3.bf16.msra.mxu1 %v16405_v45 }
 0x2e5   : > { %16410 = vmatprep.subr.bf16.mxu1 %v16409_v19 }
 0x2e7   : > { %15319 = vmatmul.mubr.msk.f32.gmra.mrb[30].mxu0 %vm1362_vm1, %v4536_v12  ;;  %15330 = vmatmul.mubr.msk.f32.vlgmr.msra.gmra.mrb[0].mxu1 %vm1362_vm1, %v5067_v37 }
 0x2e8   : > { %16412 = vmatpush3.bf16.msra.mxu1 %v16409_v19 }
 0x2e9   : > { %16414 = vmatprep.subr.bf16.mxu1 %v16413_v18 }
 0x2ec   : > { %16416 = vmatpush3.bf16.msra.mxu1 %v16413_v18 }
 0x2ed   : > { %16418 = vmatprep.subr.bf16.mxu1 %v19142_v47 }
 0x37e   : > { %v15275_v48 = vpop.f32.mrb[0].mxu0 }
 0x37f   : > { %v4903_v6 = vadd.f32 %v15275_v48, %v19150_v42  ;;  %v4704_v54 = vpop.f32.mrb[1].mxu0 }
 0x380   : > { %v4902_v17 = vadd.f32 %v19150_v42, %v4704_v54 }
 0x381   : > { %v4935_v31 = vmax.f32 %v4903_v6, 0.0 }
 0x382   : > { %v4934_v55 = vmax.f32 %v4902_v17, 0.0  ;;  %v15278_v56 = vpop.f32.mrb[2].mxu0 }
 0x383   : > { %4967 = vst.msk [vmem:[#allocation3 + $0x20] sm:$0xff] %vm1362_vm1, %v4935_v31  ;;  %v4905_v14 = vadd.f32 %v15278_v56, %v19150_v42  ;;  %v4714_v2 = vpop.f32.mrb[3].mxu0 }
 0x384   : > { %4966 = vst.msk [vmem:[#allocation3 + $0x18] sm:$0xff] %vm1362_vm1, %v4934_v55  ;;  %v4904_v1 = vadd.f32 %v19150_v42, %v4714_v2 }
 0x385   : > { %v4937_v0 = vmax.f32 %v4905_v14, 0.0 }
 0x386   : > { %v4936_v15 = vmax.f32 %v4904_v1, 0.0  ;;  %v15281_v51 = vpop.f32.mrb[4].mxu0 }
 0x387   : > { %4969 = vst.msk [vmem:[#allocation3 + $0x30] sm:$0xff] %vm1362_vm1, %v4937_v0  ;;  %v4907_v16 = vadd.f32 %v15281_v51, %v19150_v42  ;;  %v4724_v12 = vpop.f32.mrb[5].mxu0 }
 0x388   : > { %4968 = vst.msk [vmem:[#allocation3 + $0x28] sm:$0xff] %vm1362_vm1, %v4936_v15  ;;  %v4906_v59 = vadd.f32 %v19150_v42, %v4724_v12 }
 0x389   : > { %v4939_v62 = vmax.f32 %v4907_v16, 0.0 }
 0x38a   : > { %v4938_v60 = vmax.f32 %v4906_v59, 0.0  ;;  %v15284_v39 = vpop.f32.mrb[6].mxu0  ;;  %v19170_v7 = vld [vmem:[#allocation3 + $0x20] sm:$0xff] }
 0x38b   : > { %4971 = vst.msk [vmem:[#allocation3 + $0x40] sm:$0xff] %vm1362_vm1, %v4939_v62  ;;  %v4909_v50 = vadd.f32 %v15284_v39, %v19150_v42  ;;  %v4734_v45 = vpop.f32.mrb[7].mxu0  ;;  %v19164_v9 = vld [vmem:[#allocation3 + $0x18] sm:$0xff]  ;;  %22048 = vst [vmem:[#allocation49_spill] sm:$0xff] %v19170_v7 }
 0x38c   : > { %22047 = vst [vmem:[#allocation48_spill] sm:$0xff] %v19164_v9  ;;  %4970 = vst.msk [vmem:[#allocation3 + $0x38] sm:$0xff] %vm1362_vm1, %v4938_v60  ;;  %v4908_v37 = vadd.f32 %v19150_v42, %v4734_v45  ;;  %15332 = vmatprep.mubr.msk.f32.mxu1 %vm1362_vm1, %v19164_v9 }
 0x38d   : > { %v4941_v5 = vmax.f32 %v4909_v50, 0.0  ;;  %15333 = vmatmul.mubr.msk.f32.gmra.mrb[2].mxu1 %vm1362_vm1, %v19170_v7 }
 0x38e   : > { %v4940_v19 = vmax.f32 %v4908_v37, 0.0  ;;  %v15287_v20 = vpop.f32.mrb[8].mxu0  ;;  %v19182_v48 = vld [vmem:[#allocation3 + $0x30] sm:$0xff] }
 0x38f   : > { %4973 = vst.msk [vmem:[#allocation3 + $0x50] sm:$0xff] %vm1362_vm1, %v4941_v5  ;;  %v4911_v41 = vadd.f32 %v15287_v20, %v19150_v42  ;;  %v4744_v18 = vpop.f32.mrb[9].mxu0  ;;  %v19176_v46 = vld [vmem:[#allocation3 + $0x28] sm:$0xff]  ;;  %22050 = vst [vmem:[#allocation51_spill] sm:$0xff] %v19182_v48 }
 0x390   : > { %22049 = vst [vmem:[#allocation50_spill] sm:$0xff] %v19176_v46  ;;  %4972 = vst.msk [vmem:[#allocation3 + $0x48] sm:$0xff] %vm1362_vm1, %v4940_v19  ;;  %v4910_v43 = vadd.f32 %v19150_v42, %v4744_v18  ;;  %15335 = vmatprep.mubr.msk.f32.mxu1 %vm1362_vm1, %v19176_v46 }
 0x391   : > { %v4943_v6 = vmax.f32 %v4911_v41, 0.0  ;;  %15336 = vmatmul.mubr.msk.f32.gmra.mrb[4].mxu1 %vm1362_vm1, %v19182_v48 }
 0x392   : > { %v4942_v54 = vmax.f32 %v4910_v43, 0.0  ;;  %v15290_v17 = vpop.f32.mrb[10].mxu0  ;;  %v19194_v2 = vld [vmem:[#allocation3 + $0x40] sm:$0xff] }
 0x393   : > { %4975 = vst.msk [vmem:[#allocation3 + $0x60] sm:$0xff] %vm1362_vm1, %v4943_v6  ;;  %v4913_v31 = vadd.f32 %v15290_v17, %v19150_v42  ;;  %v4754_v55 = vpop.f32.mrb[11].mxu0  ;;  %v19188_v56 = vld [vmem:[#allocation3 + $0x38] sm:$0xff]  ;;  %22052 = vst [vmem:[#allocation53_spill] sm:$0xff] %v19194_v2 }
 0x394   : > { %22051 = vst [vmem:[#allocation52_spill] sm:$0xff] %v19188_v56  ;;  %4974 = vst.msk [vmem:[#allocation3 + $0x58] sm:$0xff] %vm1362_vm1, %v4942_v54  ;;  %v4912_v14 = vadd.f32 %v19150_v42, %v4754_v55  ;;  %15338 = vmatprep.mubr.msk.f32.mxu1 %vm1362_vm1, %v19188_v56 }
 0x395   : > { %v4945_v1 = vmax.f32 %v4913_v31, 0.0  ;;  %15339 = vmatmul.mubr.msk.f32.gmra.mrb[6].mxu1 %vm1362_vm1, %v19194_v2 }
 0x396   : > { %v4944_v0 = vmax.f32 %v4912_v14, 0.0  ;;  %v15293_v15 = vpop.f32.mrb[12].mxu0  ;;  %v19206_v62 = vld [vmem:[#allocation3 + $0x50] sm:$0xff] }
 0x397   : > { %4977 = vst.msk [vmem:[#allocation3 + $0x70] sm:$0xff] %vm1362_vm1, %v4945_v1  ;;  %v4915_v51 = vadd.f32 %v15293_v15, %v19150_v42  ;;  %v4764_v16 = vpop.f32.mrb[13].mxu0  ;;  %v19200_v12 = vld [vmem:[#allocation3 + $0x48] sm:$0xff]  ;;  %22054 = vst [vmem:[#allocation55_spill] sm:$0xff] %v19206_v62 }
 0x398   : > { %22053 = vst [vmem:[#allocation54_spill] sm:$0xff] %v19200_v12  ;;  %4976 = vst.msk [vmem:[#allocation3 + $0x68] sm:$0xff] %vm1362_vm1, %v4944_v0  ;;  %v4914_v59 = vadd.f32 %v19150_v42, %v4764_v16  ;;  %15341 = vmatprep.mubr.msk.f32.mxu1 %vm1362_vm1, %v19200_v12 }
 0x399   : > { %v4947_v60 = vmax.f32 %v4915_v51, 0.0  ;;  %15342 = vmatmul.mubr.msk.f32.gmra.mrb[8].mxu1 %vm1362_vm1, %v19206_v62 }
 0x39a   : > { %v4946_v39 = vmax.f32 %v4914_v59, 0.0  ;;  %v15296_v50 = vpop.f32.mrb[14].mxu0  ;;  %v19218_v20 = vld [vmem:[#allocation3 + $0x60] sm:$0xff] }
 0x39b   : > { %4979 = vst.msk [vmem:[#allocation3 + $0x80] sm:$0xff] %vm1362_vm1, %v4947_v60  ;;  %v4917_v45 = vadd.f32 %v15296_v50, %v19150_v42  ;;  %v4774_v37 = vpop.f32.mrb[15].mxu0  ;;  %v19212_v5 = vld [vmem:[#allocation3 + $0x58] sm:$0xff]  ;;  %22056 = vst [vmem:[#allocation57_spill] sm:$0xff] %v19218_v20 }
 0x39c   : > { %22055 = vst [vmem:[#allocation56_spill] sm:$0xff] %v19212_v5  ;;  %4978 = vst.msk [vmem:[#allocation3 + $0x78] sm:$0xff] %vm1362_vm1, %v4946_v39  ;;  %v4916_v19 = vadd.f32 %v19150_v42, %v4774_v37  ;;  %15344 = vmatprep.mubr.msk.f32.mxu1 %vm1362_vm1, %v19212_v5 }
 0x39d   : > { %v4949_v41 = vmax.f32 %v4917_v45, 0.0  ;;  %15345 = vmatmul.mubr.msk.f32.gmra.mrb[10].mxu1 %vm1362_vm1, %v19218_v20 }
 0x39e   : > { %v4948_v18 = vmax.f32 %v4916_v19, 0.0  ;;  %v15299_v43 = vpop.f32.mrb[16].mxu0  ;;  %v19230_v55 = vld [vmem:[#allocation3 + $0x70] sm:$0xff] }
 0x39f   : > { %4981 = vst.msk [vmem:[#allocation3 + $0x90] sm:$0xff] %vm1362_vm1, %v4949_v41  ;;  %v4919_v6 = vadd.f32 %v15299_v43, %v19150_v42  ;;  %v4784_v54 = vpop.f32.mrb[17].mxu0  ;;  %v19224_v17 = vld [vmem:[#allocation3 + $0x68] sm:$0xff]  ;;  %22058 = vst [vmem:[#allocation59_spill] sm:$0xff] %v19230_v55 }
 0x3a0   : > { %22057 = vst [vmem:[#allocation58_spill] sm:$0xff] %v19224_v17  ;;  %4980 = vst.msk [vmem:[#allocation3 + $0x88] sm:$0xff] %vm1362_vm1, %v4948_v18  ;;  %v4918_v31 = vadd.f32 %v19150_v42, %v4784_v54  ;;  %15347 = vmatprep.mubr.msk.f32.mxu1 %vm1362_vm1, %v19224_v17 }
 0x3a1   : > { %v4951_v14 = vmax.f32 %v4919_v6, 0.0  ;;  %15348 = vmatmul.mubr.msk.f32.gmra.mrb[12].mxu1 %vm1362_vm1, %v19230_v55 }
 0x3a2   : > { %v4950_v1 = vmax.f32 %v4918_v31, 0.0  ;;  %v15302_v0 = vpop.f32.mrb[18].mxu0  ;;  %v19242_v60 = vld [vmem:[#allocation3 + $0x80] sm:$0xff] }
 0x3a3   : > { %4983 = vst.msk [vmem:[#allocation3 + $0xa0] sm:$0xff] %vm1362_vm1, %v4951_v14  ;;  %v4921_v15 = vadd.f32 %v15302_v0, %v19150_v42  ;;  %v4794_v51 = vpop.f32.mrb[19].mxu0  ;;  %v19236_v16 = vld [vmem:[#allocation3 + $0x78] sm:$0xff]  ;;  %22060 = vst [vmem:[#allocation61_spill] sm:$0xff] %v19242_v60 }
 0x3a4   : > { %22059 = vst [vmem:[#allocation60_spill] sm:$0xff] %v19236_v16  ;;  %4982 = vst.msk [vmem:[#allocation3 + $0x98] sm:$0xff] %vm1362_vm1, %v4950_v1  ;;  %v4920_v59 = vadd.f32 %v19150_v42, %v4794_v51  ;;  %15350 = vmatprep.mubr.msk.f32.mxu1 %vm1362_vm1, %v19236_v16 }
 0x3a5   : > { %v4953_v39 = vmax.f32 %v4921_v15, 0.0  ;;  %15351 = vmatmul.mubr.msk.f32.gmra.mrb[14].mxu1 %vm1362_vm1, %v19242_v60 }
 0x3a6   : > { %v4952_v50 = vmax.f32 %v4920_v59, 0.0  ;;  %v15305_v45 = vpop.f32.mrb[20].mxu0  ;;  %v19254_v43 = vld [vmem:[#allocation3 + $0x90] sm:$0xff] }
 0x3a7   : > { %4985 = vst.msk [vmem:[#allocation3 + $0xb0] sm:$0xff] %vm1362_vm1, %v4953_v39  ;;  %v4923_v37 = vadd.f32 %v15305_v45, %v19150_v42  ;;  %v4804_v19 = vpop.f32.mrb[21].mxu0  ;;  %v19248_v41 = vld [vmem:[#allocation3 + $0x88] sm:$0xff]  ;;  %22062 = vst [vmem:[#allocation63_spill] sm:$0xff] %v19254_v43 }
 0x3a8   : > { %22061 = vst [vmem:[#allocation62_spill] sm:$0xff] %v19248_v41  ;;  %4984 = vst.msk [vmem:[#allocation3 + $0xa8] sm:$0xff] %vm1362_vm1, %v4952_v50  ;;  %v4922_v18 = vadd.f32 %v19150_v42, %v4804_v19  ;;  %15353 = vmatprep.mubr.msk.f32.mxu1 %vm1362_vm1, %v19248_v41  ;;  %v19408_v41 = vld [vmem:[#allocation3 + $0x7f] sm:$0xff]  ;;  %v19417_v16 = vld [vmem:[#allocation3 + $0x8f] sm:$0xff] }
 0x3a9   : > { %v4955_v6 = vmax.f32 %v4923_v37, 0.0  ;;  %15354 = vmatmul.mubr.msk.f32.gmra.mrb[16].mxu1 %vm1362_vm1, %v19254_v43 }
 0x3aa   : > { %v4954_v54 = vmax.f32 %v4922_v18, 0.0  ;;  %v15308_v31 = vpop.f32.mrb[22].mxu0  ;;  %v19266_v51 = vld [vmem:[#allocation3 + $0xa0] sm:$0xff] }
 0x3ab   : > { %4987 = vst.msk [vmem:[#allocation3 + $0xc0] sm:$0xff] %vm1362_vm1, %v4955_v6  ;;  %v4925_v14 = vadd.f32 %v15308_v31, %v19150_v42  ;;  %v4814_v1 = vpop.f32.mrb[23].mxu0  ;;  %v19260_v0 = vld [vmem:[#allocation3 + $0x98] sm:$0xff]  ;;  %22064 = vst [vmem:[#allocation65_spill] sm:$0xff] %v19266_v51 }
 0x3ac   : > { %22063 = vst [vmem:[#allocation64_spill] sm:$0xff] %v19260_v0  ;;  %4986 = vst.msk [vmem:[#allocation3 + $0xb8] sm:$0xff] %vm1362_vm1, %v4954_v54  ;;  %v4924_v15 = vadd.f32 %v19150_v42, %v4814_v1  ;;  %15356 = vmatprep.mubr.msk.f32.mxu1 %vm1362_vm1, %v19260_v0  ;;  %v19399_v0 = vld [vmem:[#allocation3 + $0x6f] sm:$0xff]  ;;  %v19426_v17 = vld [vmem:[#allocation3 + $0x9f] sm:$0xff] }
 0x3ad   : > { %v4957_v59 = vmax.f32 %v4925_v14, 0.0  ;;  %15357 = vmatmul.mubr.msk.f32.gmra.mrb[18].mxu1 %vm1362_vm1, %v19266_v51 }
 0x3ae   : > { %v4956_v39 = vmax.f32 %v4924_v15, 0.0  ;;  %v15311_v50 = vpop.f32.mrb[24].mxu0  ;;  %v19278_v6 = vld [vmem:[#allocation3 + $0xb0] sm:$0xff] }
 0x3af   : > { %4989 = vst.msk [vmem:[#allocation3 + $0xd0] sm:$0xff] %vm1362_vm1, %v4957_v59  ;;  %v4927_v45 = vadd.f32 %v15311_v50, %v19150_v42  ;;  %v4824_v37 = vpop.f32.mrb[25].mxu0  ;;  %v19272_v19 = vld [vmem:[#allocation3 + $0xa8] sm:$0xff]  ;;  %22066 = vst [vmem:[#allocation67_spill] sm:$0xff] %v19278_v6 }
 0x3b0   : > { %22065 = vst [vmem:[#allocation66_spill] sm:$0xff] %v19272_v19  ;;  %4988 = vst.msk [vmem:[#allocation3 + $0xc8] sm:$0xff] %vm1362_vm1, %v4956_v39  ;;  %v4926_v18 = vadd.f32 %v19150_v42, %v4824_v37  ;;  %15359 = vmatprep.mubr.msk.f32.mxu1 %vm1362_vm1, %v19272_v19  ;;  %v19390_v19 = vld [vmem:[#allocation3 + $0x5f] sm:$0xff]  ;;  %v19435_v5 = vld [vmem:[#allocation3 + $0xaf] sm:$0xff] }
 0x3b1   : > { %v4959_v54 = vmax.f32 %v4927_v45, 0.0  ;;  %15360 = vmatmul.mubr.msk.f32.gmra.mrb[20].mxu1 %vm1362_vm1, %v19278_v6 }
 0x3b2   : > { %v4958_v31 = vmax.f32 %v4926_v18, 0.0  ;;  %v15314_v14 = vpop.f32.mrb[26].mxu0  ;;  %v19290_v50 = vld [vmem:[#allocation3 + $0xc0] sm:$0xff] }
 0x3b3   : > { %4991 = vst.msk [vmem:[#allocation3 + $0xe0] sm:$0xff] %vm1362_vm1, %v4959_v54  ;;  %v4929_v1 = vadd.f32 %v15314_v14, %v19150_v42  ;;  %v4834_v15 = vpop.f32.mrb[27].mxu0  ;;  %v19284_v59 = vld [vmem:[#allocation3 + $0xb8] sm:$0xff]  ;;  %22068 = vst [vmem:[#allocation69_spill] sm:$0xff] %v19290_v50 }
 0x3b4   : > { %22067 = vst [vmem:[#allocation68_spill] sm:$0xff] %v19284_v59  ;;  %4990 = vst.msk [vmem:[#allocation3 + $0xd8] sm:$0xff] %vm1362_vm1, %v4958_v31  ;;  %v4928_v39 = vadd.f32 %v19150_v42, %v4834_v15  ;;  %15362 = vmatprep.mubr.msk.f32.mxu1 %vm1362_vm1, %v19284_v59  ;;  %v19444_v12 = vld [vmem:[#allocation3 + $0xbf] sm:$0xff] }
 0x3b5   : > { %v4961_v45 = vmax.f32 %v4929_v1, 0.0  ;;  %15363 = vmatmul.mubr.msk.f32.gmra.mrb[22].mxu1 %vm1362_vm1, %v19290_v50 }
 0x3b6   : > { %v4960_v37 = vmax.f32 %v4928_v39, 0.0  ;;  %v15317_v18 = vpop.f32.mrb[28].mxu0  ;;  %v19302_v1 = vld [vmem:[#allocation3 + $0xd0] sm:$0xff] }
 0x3b7   : > { %4993 = vst.msk [vmem:[#allocation3 + $0xf0] sm:$0xff] %vm1362_vm1, %v4961_v45  ;;  %v4931_v54 = vadd.f32 %v15317_v18, %v19150_v42  ;;  %v4844_v14 = vpop.f32.mrb[29].mxu0  ;;  %v19296_v6 = vld [vmem:[#allocation3 + $0xc8] sm:$0xff]  ;;  %22070 = vst [vmem:[#allocation71_spill] sm:$0xff] %v19302_v1 }
 0x3b8   : > { %22069 = vst [vmem:[#allocation70_spill] sm:$0xff] %v19296_v6  ;;  %4992 = vst.msk [vmem:[#allocation3 + $0xe8] sm:$0xff] %vm1362_vm1, %v4960_v37  ;;  %v4930_v31 = vadd.f32 %v19150_v42, %v4844_v14  ;;  %15365 = vmatprep.mubr.msk.f32.mxu1 %vm1362_vm1, %v19296_v6  ;;  %v19353_v6 = vld [vmem:[#allocation3 + $0x1f] sm:$0xff]  ;;  %v19453_v56 = vld [vmem:[#allocation3 + $0xcf] sm:$0xff] }
 0x3b9   : > { %v4963_v15 = vmax.f32 %v4931_v54, 0.0  ;;  %15366 = vmatmul.mubr.msk.f32.gmra.mrb[24].mxu1 %vm1362_vm1, %v19302_v1  ;;  %v13334_v1 = vld [vmem:[%s17757_s29 + $0x68] sm:$0xff]  ;;  %22079 = vst [vmem:[#allocation97_spill] sm:$0xff] %v19453_v56 }
 0x3ba   : > { %v4962_v39 = vmax.f32 %v4930_v31, 0.0  ;;  %v15320_v45 = vpop.f32.mrb[30].mxu0  ;;  %v19314_v54 = vld [vmem:[#allocation3 + $0xe0] sm:$0xff] }
 0x3bb   : > { %4995 = vst.msk [vmem:[#allocation3 + $0x100] sm:$0xff] %vm1362_vm1, %v4963_v15  ;;  %v4933_v18 = vadd.f32 %v15320_v45, %v19150_v42  ;;  %v4854_v50 = vpop.f32.mrb[31].mxu0  ;;  %v19308_v59 = vld [vmem:[#allocation3 + $0xd8] sm:$0xff]  ;;  %22072 = vst [vmem:[#allocation73_spill] sm:$0xff] %v19314_v54  ;;  %v4998_v45 = vld [vmem:[#allocation3 + $0x7] sm:$0xff] }
 0x3bc   : > { %22071 = vst [vmem:[#allocation72_spill] sm:$0xff] %v19308_v59  ;;  %4994 = vst.msk [vmem:[#allocation3 + $0xf8] sm:$0xff] %vm1362_vm1, %v4962_v39  ;;  %v4932_v37 = vadd.f32 %v19150_v42, %v4854_v50  ;;  %15368 = vmatprep.mubr.msk.f32.mxu1 %vm1362_vm1, %v19308_v59  ;;  %v22075_v50 = vld [vmem:[#allocation16_spill] sm:$0xff]  ;;  %v13333_v59 = vld [vmem:[%s17757_s29 + $0x60] sm:$0xff] }
 0x3bd   : > { %v4965_v14 = vmax.f32 %v4933_v18, 0.0  ;;  %15369 = vmatmul.mubr.msk.f32.gmra.mrb[26].mxu1 %vm1362_vm1, %v19314_v54  ;;  %v5030_v39 = vmul.f32 %v22075_v50, %v4998_v45  ;;  %v4999_v54 = vld [vmem:[#allocation3 + $0xf] sm:$0xff]  ;;  %v19462_v46 = vld [vmem:[#allocation3 + $0xdf] sm:$0xff] }
 0x3be   : > { %v4964_v31 = vmax.f32 %v4932_v37, 0.0  ;;  %v19324_v42 = vld [vmem:[#allocation3 + $0xf0] sm:$0xff]  ;;  %22081 = vst [vmem:[#allocation99_spill] sm:$0xff] %v19462_v46 }
 0x3bf   : > { %4997 = vst.msk [vmem:[#allocation3 + $0x110] sm:$0xff] %vm1362_vm1, %v4965_v14  ;;  %v19319_v15 = vld [vmem:[#allocation3 + $0xe8] sm:$0xff]  ;;  %22074 = vst [vmem:[#allocation75_spill] sm:$0xff] %v19324_v42  ;;  %v13299_v14 = vld [vmem:[%s17757_s29 + $0x50] sm:$0xff] }
 0x3c0   : > { %22073 = vst [vmem:[#allocation74_spill] sm:$0xff] %v19319_v15  ;;  %4996 = vst.msk [vmem:[#allocation3 + $0x108] sm:$0xff] %vm1362_vm1, %v4964_v31  ;;  %15371 = vmatprep.mubr.msk.f32.mxu1 %vm1362_vm1, %v19319_v15  ;;  %v13300_v31 = vld [vmem:[%s17757_s29 + $0x58] sm:$0xff]  ;;  %v19339_v15 = vld [vmem:[#allocation3 + $0x17] sm:$0xff] }
 0x3c1   : > { %15372 = vmatmul.mubr.msk.f32.gmra.mrb[28].mxu1 %vm1362_vm1, %v19324_v42  ;;  %v16421_v42 = vpack.c.bf16 %v13300_v31, %v13299_v14  ;;  %v5032_v45 = vmul.f32 %v17993_v21, %v19339_v15  ;;  %v19359_v14 = vld [vmem:[#allocation3 + $0x37] sm:$0xff]  ;;  %v19471_v9 = vld [vmem:[#allocation3 + $0xef] sm:$0xff] }
 0x3c2   : > { %v19333_v37 = vld [vmem:[#allocation3 + $0x100] sm:$0xff]  ;;  %22083 = vst [vmem:[#allocation78_spill] sm:$0xff] %v19471_v9 }
 0x3c3   : > { %v19329_v18 = vld [vmem:[#allocation3 + $0xf8] sm:$0xff]  ;;  %22077 = vst [vmem:[#allocation77_spill] sm:$0xff] %v19333_v37 }
 0x3c4   : > { %22076 = vst [vmem:[#allocation76_spill] sm:$0xff] %v19329_v18  ;;  %15374 = vmatprep.mubr.msk.f32.mxu1 %vm1362_vm1, %v19329_v18  ;;  %v19347_v18 = vld [vmem:[#allocation3 + $0x27] sm:$0xff] }
 0x3c5   : > { %15375 = vmatmul.mubr.msk.f32.gmra.mrb[30].mxu1 %vm1362_vm1, %v19333_v37  ;;  %v19351_v37 = vpack.c.bf16 %v13334_v1, %v13333_v59  ;;  %v19369_v59 = vld [vmem:[#allocation3 + $0x47] sm:$0xff]  ;;  %v19372_v1 = vld [vmem:[#allocation3 + $0x3f] sm:$0xff] }
 0x3c6   : > { %15385 = vmatprep.mubr.msk.f32.mxu1 %vm1362_vm1, %v5030_v39  ;;  %v5034_v39 = vmul.f32 %v17997_v22, %v19347_v18  ;;  %v5038_v31 = vmul.f32 %v18005_v24, %v19369_v59 }
 0x3c9   : > { %15386 = vmatmul.mubr.msk.f32.vlgmr.msra.gmra.mrb[0].mxu1 %vm1362_vm1, %v4999_v54  ;;  %v19363_v54 = vld [vmem:[#allocation3 + $0x2f] sm:$0xff] }
 0x3ca   : > { %15388 = vmatprep.mubr.msk.f32.mxu1 %vm1362_vm1, %v5032_v45  ;;  %16420 = vmatpush3.bf16.msra.mxu1 %v19142_v47  ;;  %v5036_v47 = vmul.f32 %v18001_v23, %v19359_v14  ;;  %v19381_v45 = vld [vmem:[#allocation3 + $0x4f] sm:$0xff] }
 0x3cb   : > { %16422 = vmatprep.subr.bf16.mxu1 %v16421_v42 }
 0x3cd   : > { %15389 = vmatmul.mubr.msk.f32.gmra.mrb[2].mxu1 %vm1362_vm1, %v19353_v6 }
 0x3ce   : > { %15391 = vmatprep.mubr.msk.f32.mxu1 %vm1362_vm1, %v5034_v39  ;;  %16424 = vmatpush3.bf16.msra.mxu1 %v16421_v42  ;;  %v19378_v42 = vld [vmem:[#allocation3 + $0x57] sm:$0xff] }
 0x3cf   : > { %16426 = vmatprep.subr.bf16.mxu1 %v19351_v37  ;;  %v5040_v39 = vmul.f32 %v18009_v25, %v19378_v42 }
 0x3d1   : > { %15392 = vmatmul.mubr.msk.f32.gmra.mrb[4].mxu1 %vm1362_vm1, %v19363_v54 }
 0x3d2   : > { %15394 = vmatprep.mubr.msk.f32.mxu1 %vm1362_vm1, %v5036_v47  ;;  %v19387_v47 = vld [vmem:[#allocation3 + $0x67] sm:$0xff] }
 0x3d3   : > { %v5042_v51 = vmul.f32 %v18013_v26, %v19387_v47 }
 0x3d5   : > { %15395 = vmatmul.mubr.msk.f32.gmra.mrb[6].mxu1 %vm1362_vm1, %v19372_v1 }
 0x3d6   : > { %15397 = vmatprep.mubr.msk.f32.mxu1 %vm1362_vm1, %v5038_v31  ;;  %v19396_v31 = vld [vmem:[#allocation3 + $0x77] sm:$0xff] }
 0x3d7   : > { %v5044_v43 = vmul.f32 %v18017_v27, %v19396_v31 }
 0x3d9   : > { %15398 = vmatmul.mubr.msk.f32.gmra.mrb[8].mxu1 %vm1362_vm1, %v19381_v45 }
 0x3da   : > { %15400 = vmatprep.mubr.msk.f32.mxu1 %vm1362_vm1, %v5040_v39  ;;  %v19405_v39 = vld [vmem:[#allocation3 + $0x87] sm:$0xff] }
 0x3db   : > { %v5046_v60 = vmul.f32 %v18021_v28, %v19405_v39 }
 0x3dd   : > { %15401 = vmatmul.mubr.msk.f32.gmra.mrb[10].mxu1 %vm1362_vm1, %v19390_v19 }
 0x3de   : > { %15403 = vmatprep.mubr.msk.f32.mxu1 %vm1362_vm1, %v5042_v51  ;;  %v19414_v51 = vld [vmem:[#allocation3 + $0x97] sm:$0xff] }
 0x3df   : > { %v5048_v55 = vmul.f32 %v18025_v29, %v19414_v51 }
 0x3e1   : > { %15404 = vmatmul.mubr.msk.f32.gmra.mrb[12].mxu1 %vm1362_vm1, %v19399_v0 }
 0x3e2   : > { %15406 = vmatprep.mubr.msk.f32.mxu1 %vm1362_vm1, %v5044_v43  ;;  %v19423_v43 = vld [vmem:[#allocation3 + $0xa7] sm:$0xff] }
 0x3e3   : > { %v5050_v20 = vmul.f32 %v18029_v30, %v19423_v43 }
 0x3e5   : > { %15407 = vmatmul.mubr.msk.f32.gmra.mrb[14].mxu1 %vm1362_vm1, %v19408_v41 }
 0x3e6   : > { %15409 = vmatprep.mubr.msk.f32.mxu1 %vm1362_vm1, %v5046_v60  ;;  %v19432_v60 = vld [vmem:[#allocation3 + $0xb7] sm:$0xff] }
 0x3e7   : > { %v5052_v62 = vmul.f32 %v22009_v49, %v19432_v60 }
 0x3e9   : > { %15410 = vmatmul.mubr.msk.f32.gmra.mrb[16].mxu1 %vm1362_vm1, %v19417_v16 }
 0x3ea   : > { %15412 = vmatprep.mubr.msk.f32.mxu1 %vm1362_vm1, %v5048_v55  ;;  %v19441_v55 = vld [vmem:[#allocation3 + $0xc7] sm:$0xff] }
 0x3eb   : > { %v5054_v2 = vmul.f32 %v22012_v34, %v19441_v55 }
 0x3ed   : > { %15413 = vmatmul.mubr.msk.f32.gmra.mrb[18].mxu1 %vm1362_vm1, %v19426_v17 }
 0x3ee   : > { %15415 = vmatprep.mubr.msk.f32.mxu1 %vm1362_vm1, %v5050_v20  ;;  %v19450_v20 = vld [vmem:[#allocation3 + $0xd7] sm:$0xff] }
 0x3ef   : > { %22078 = vst [vmem:[#allocation86_spill] sm:$0xff] %v19450_v20  ;;  %v5056_v48 = vmul.f32 %v22015_v10, %v19450_v20 }
 0x3f1   : > { %15416 = vmatmul.mubr.msk.f32.gmra.mrb[20].mxu1 %vm1362_vm1, %v19435_v5 }
 0x3f2   : > { %15418 = vmatprep.mubr.msk.f32.mxu1 %vm1362_vm1, %v5052_v62  ;;  %v19459_v62 = vld [vmem:[#allocation3 + $0xe7] sm:$0xff] }
 0x3f3   : > { %22080 = vst [vmem:[#allocation98_spill] sm:$0xff] %v19459_v62  ;;  %v5058_v7 = vmul.f32 %v22018_v61, %v19459_v62  ;;  %v5746_v61 = vld [vmem:[#allocation3 + $0x11] sm:$0xff]  ;;  %v19478_v62 = vld [vmem:[#allocation3 + $0xff] sm:$0xff] }
 0x3f4   : > { %22084 = vst [vmem:[#allocation80_spill] sm:$0xff] %v19478_v62 }
 0x3f5   : > { %15419 = vmatmul.mubr.msk.f32.gmra.mrb[22].mxu1 %vm1362_vm1, %v19444_v12 }
 0x3f6   : > { %15421 = vmatprep.mubr.msk.f32.mxu1 %vm1362_vm1, %v5054_v2  ;;  %v19468_v2 = vld [vmem:[#allocation3 + $0xf7] sm:$0xff] }
 0x3f7   : > { %22082 = vst [vmem:[#allocation101_spill] sm:$0xff] %v19468_v2  ;;  %v5060_v10 = vmul.f32 %v22020_v58, %v19468_v2  ;;  %v19486_v58 = vld [vmem:[#allocation3 + $0x21] sm:$0xff]  ;;  %v13369_v2 = vld [vmem:[%s17757_s29 + $0x80] sm:$0xff] }
 0x3f9   : > { %15422 = vmatmul.mubr.msk.f32.gmra.mrb[24].mxu1 %vm1362_vm1, %v19453_v56  ;;  %v13336_v56 = vld [vmem:[%s17757_s29 + $0x78] sm:$0xff] }
 0x3fa   : > { %15424 = vmatprep.mubr.msk.f32.mxu1 %vm1362_vm1, %v5056_v48  ;;  %v5745_v48 = vld [vmem:[#allocation3 + $0x9] sm:$0xff] }
 0x3fd   : > { %15425 = vmatmul.mubr.msk.f32.gmra.mrb[26].mxu1 %vm1362_vm1, %v19462_v46  ;;  %v13335_v46 = vld [vmem:[%s17757_s29 + $0x70] sm:$0xff] }
 0x3fe   : > { %15427 = vmatprep.mubr.msk.f32.mxu1 %vm1362_vm1, %v5058_v7  ;;  %v5778_v7 = vmul.f32 %v21981_v3, %v5746_v61  ;;  %v16429_v34 = vpack.c.bf16 %v13336_v56, %v13335_v46  ;;  %v19500_v61 = vld [vmem:[#allocation3 + $0x31] sm:$0xff]  ;;  %v19503_v46 = vld [vmem:[#allocation3 + $0x29] sm:$0xff] }
 0x3ff   : > { %v5782_v56 = vmul.f32 %v18127_v53, %v19500_v61  ;;  %v19531_v53 = vld [vmem:[#allocation3 + $0x59] sm:$0xff] }
 0x400   : > { %22086 = vst [vmem:[#allocation82_spill] sm:$0xff] %v19531_v53 }
 0x401   : > { %15428 = vmatmul.mubr.msk.f32.gmra.mrb[28].mxu1 %vm1362_vm1, %v19471_v9  ;;  %v13370_v9 = vld [vmem:[%s17757_s29 + $0x88] sm:$0xff] }
 0x402   : > { %15430 = vmatprep.mubr.msk.f32.mxu1 %vm1362_vm1, %v5060_v10  ;;  %v19491_v10 = vld [vmem:[#allocation3 + $0x19] sm:$0xff] }
 0x405   : > { %15431 = vmatmul.mubr.msk.f32.gmra.mrb[30].mxu1 %vm1362_vm1, %v19478_v62  ;;  %v5780_v62 = vmul.f32 %v18123_v52, %v19486_v58 }
 0x406   : > { %15441 = vmatprep.mubr.msk.f32.mxu1 %vm1362_vm1, %v5745_v48  ;;  %v19498_v48 = vpack.c.bf16 %v13370_v9, %v13369_v2  ;;  %v19513_v9 = vld [vmem:[#allocation3 + $0x39] sm:$0xff]  ;;  %v19519_v2 = vld [vmem:[#allocation3 + $0x51] sm:$0xff] }
 0x409   : > { %15442 = vmatmul.mubr.msk.f32.vlgmr.msra.gmra.mrb[0].mxu1 %vm1362_vm1, %v5778_v7  ;;  %v5786_v7 = vmul.f32 %v22024_v44, %v19519_v2  ;;  %v19546_v44 = vld [vmem:[#allocation3 + $0x81] sm:$0xff] }
 0x40a   : > { %15444 = vmatprep.mubr.msk.f32.mxu1 %vm1362_vm1, %v19491_v10  ;;  %16428 = vmatpush3.bf16.msra.mxu1 %v19351_v37  ;;  %v19510_v37 = vld [vmem:[#allocation3 + $0x41] sm:$0xff] }
 0x40b   : > { %16430 = vmatprep.subr.bf16.mxu1 %v16429_v34 }
 0x40d   : > { %15445 = vmatmul.mubr.msk.f32.gmra.mrb[2].mxu1 %vm1362_vm1, %v5780_v62  ;;  %v5784_v62 = vmul.f32 %v22022_v35, %v19510_v37  ;;  %v19537_v35 = vld [vmem:[#allocation3 + $0x71] sm:$0xff] }
 0x40e   : > { %15447 = vmatprep.mubr.msk.f32.mxu1 %vm1362_vm1, %v19503_v46  ;;  %16432 = vmatpush3.bf16.msra.mxu1 %v16429_v34  ;;  %v19522_v34 = vld [vmem:[#allocation3 + $0x49] sm:$0xff] }
 0x40f   : > { %16434 = vmatprep.subr.bf16.mxu1 %v19498_v48  ;;  %22085 = vst [vmem:[#allocation81_spill] sm:$0xff] %v19522_v34 }
 0x411   : > { %15448 = vmatmul.mubr.msk.f32.gmra.mrb[4].mxu1 %vm1362_vm1, %v5782_v56  ;;  %v19528_v56 = vld [vmem:[#allocation3 + $0x61] sm:$0xff] }
 0x412   : > { %15450 = vmatprep.mubr.msk.f32.mxu1 %vm1362_vm1, %v19513_v9 }
 0x415   : > { %15451 = vmatmul.mubr.msk.f32.gmra.mrb[6].mxu1 %vm1362_vm1, %v5784_v62  ;;  %v5788_v62 = vmul.f32 %v22026_v38, %v19528_v56  ;;  %v19555_v38 = vld [vmem:[#allocation3 + $0x91] sm:$0xff] }
 0x416   : > { %15453 = vmatprep.mubr.msk.f32.mxu1 %vm1362_vm1, %v19522_v34  ;;  %v19540_v34 = vld [vmem:[#allocation3 + $0x69] sm:$0xff] }
 0x417   : > { %22087 = vst [vmem:[#allocation83_spill] sm:$0xff] %v19540_v34 }
 0x419   : > { %15454 = vmatmul.mubr.msk.f32.gmra.mrb[8].mxu1 %vm1362_vm1, %v5786_v7  ;;  %v5790_v7 = vmul.f32 %v22028_v33, %v19537_v35  ;;  %v19564_v33 = vld [vmem:[#allocation3 + $0xa1] sm:$0xff] }
 0x41a   : > { %15456 = vmatprep.mubr.msk.f32.mxu1 %vm1362_vm1, %v19531_v53  ;;  %v19549_v53 = vld [vmem:[#allocation3 + $0x79] sm:$0xff]  ;;  %22090 = vst [vmem:[#allocation85_spill] sm:$0xff] %v19564_v33 }
 0x41b   : > { %22088 = vst [vmem:[#allocation84_spill] sm:$0xff] %v19549_v53 }
 0x41d   : > { %15457 = vmatmul.mubr.msk.f32.gmra.mrb[10].mxu1 %vm1362_vm1, %v5788_v62  ;;  %v5792_v62 = vmul.f32 %v22030_v11, %v19546_v44  ;;  %v19573_v11 = vld [vmem:[#allocation3 + $0xb1] sm:$0xff] }
 0x41e   : > { %15459 = vmatprep.mubr.msk.f32.mxu1 %vm1362_vm1, %v19540_v34  ;;  %v19558_v34 = vld [vmem:[#allocation3 + $0x89] sm:$0xff]  ;;  %22092 = vst [vmem:[#allocation88_spill] sm:$0xff] %v19573_v11 }
 0x41f   : > { %22089 = vst [vmem:[#allocation79_spill] sm:$0xff] %v19558_v34 }
 0x421   : > { %15460 = vmatmul.mubr.msk.f32.gmra.mrb[12].mxu1 %vm1362_vm1, %v5790_v7  ;;  %v5794_v7 = vmul.f32 %v22033_v13, %v19555_v38  ;;  %v19582_v13 = vld [vmem:[#allocation3 + $0xc1] sm:$0xff] }
 0x422   : > { %15462 = vmatprep.mubr.msk.f32.mxu1 %vm1362_vm1, %v19549_v53  ;;  %v19567_v53 = vld [vmem:[#allocation3 + $0x99] sm:$0xff]  ;;  %22094 = vst [vmem:[#allocation90_spill] sm:$0xff] %v19582_v13 }
 0x423   : > { %22091 = vst [vmem:[#allocation87_spill] sm:$0xff] %v19567_v53 }
 0x425   : > { %15463 = vmatmul.mubr.msk.f32.gmra.mrb[14].mxu1 %vm1362_vm1, %v5792_v62  ;;  %v5796_v62 = vmul.f32 %v22036_v8, %v19564_v33  ;;  %v19591_v8 = vld [vmem:[#allocation3 + $0xd1] sm:$0xff] }
 0x426   : > { %15465 = vmatprep.mubr.msk.f32.mxu1 %vm1362_vm1, %v19558_v34  ;;  %v19576_v34 = vld [vmem:[#allocation3 + $0xa9] sm:$0xff]  ;;  %22096 = vst [vmem:[#allocation92_spill] sm:$0xff] %v19591_v8 }
 0x427   : > { %22093 = vst [vmem:[#allocation89_spill] sm:$0xff] %v19576_v34 }
 0x429   : > { %15466 = vmatmul.mubr.msk.f32.gmra.mrb[16].mxu1 %vm1362_vm1, %v5794_v7  ;;  %v5798_v7 = vmul.f32 %v22038_v40, %v19573_v11  ;;  %v19600_v40 = vld [vmem:[#allocation3 + $0xe1] sm:$0xff] }
 0x42a   : > { %15468 = vmatprep.mubr.msk.f32.mxu1 %vm1362_vm1, %v19567_v53  ;;  %v19585_v53 = vld [vmem:[#allocation3 + $0xb9] sm:$0xff]  ;;  %22098 = vst [vmem:[#allocation94_spill] sm:$0xff] %v19600_v40 }
 0x42b   : > { %22095 = vst [vmem:[#allocation91_spill] sm:$0xff] %v19585_v53 }
 0x42d   : > { %15469 = vmatmul.mubr.msk.f32.gmra.mrb[18].mxu1 %vm1362_vm1, %v5796_v62  ;;  %v5800_v62 = vmul.f32 %v22039_v63, %v19582_v13  ;;  %v19609_v63 = vld [vmem:[#allocation3 + $0xf1] sm:$0xff] }
 0x42e   : > { %15471 = vmatprep.mubr.msk.f32.mxu1 %vm1362_vm1, %v19576_v34  ;;  %v19594_v34 = vld [vmem:[#allocation3 + $0xc9] sm:$0xff]  ;;  %22100 = vst [vmem:[#allocation96_spill] sm:$0xff] %v19609_v63 }
 0x42f   : > { %22097 = vst [vmem:[#allocation93_spill] sm:$0xff] %v19594_v34 }
 0x431   : > { %15472 = vmatmul.mubr.msk.f32.gmra.mrb[20].mxu1 %vm1362_vm1, %v5798_v7  ;;  %v5802_v7 = vmul.f32 %v22041_v57, %v19591_v8  ;;  %v19612_v57 = vld [vmem:[#allocation3 + $0xe9] sm:$0xff]  ;;  %v19618_v8 = vld [vmem:[#allocation3 + $0x101] sm:$0xff] }
 0x432   : > { %15474 = vmatprep.mubr.msk.f32.mxu1 %vm1362_vm1, %v19585_v53  ;;  %v19603_v53 = vld [vmem:[#allocation3 + $0xd9] sm:$0xff]  ;;  %22101 = vst [vmem:[#allocation100_spill] sm:$0xff] %v19612_v57  ;;  %22102 = vst [vmem:[#allocation102_spill] sm:$0xff] %v19618_v8 }
 0x433   : > { %22099 = vst [vmem:[#allocation95_spill] sm:$0xff] %v19603_v53 }
 0x435   : > { %15475 = vmatmul.mubr.msk.f32.gmra.mrb[22].mxu1 %vm1362_vm1, %v5800_v62  ;;  %v5804_v62 = vmul.f32 %v22044_v32, %v19600_v40  ;;  %v6199_v32 = vmul.f32 %v22075_v50, %v19339_v15  ;;  %v13371_v40 = vld [vmem:[%s17757_s29 + $0x90] sm:$0xff] }
 0x436   : > { %15477 = vmatprep.mubr.msk.f32.mxu1 %vm1362_vm1, %v19594_v34  ;;  %v13406_v34 = vld [vmem:[%s17757_s29 + $0xa8] sm:$0xff] }
 0x439   : > { %15478 = vmatmul.mubr.msk.f32.gmra.mrb[24].mxu1 %vm1362_vm1, %v5802_v7  ;;  %v5806_v7 = vmul.f32 %v22046_v36, %v19609_v63  ;;  %v13405_v63 = vld [vmem:[%s17757_s29 + $0xa0] sm:$0xff] }
 0x43a   : > { %15480 = vmatprep.mubr.msk.f32.mxu1 %vm1362_vm1, %v19603_v53  ;;  %v19621_v53 = vld [vmem:[#allocation3 + $0xf9] sm:$0xff]  ;;  %v16441_v15 = vpack.c.bf16 %v13406_v34, %v13405_v63  ;;  %v6207_v63 = vmul.f32 %v18005_v24, %v19378_v42  ;;  %v6219_v34 = vmul.f32 %v18029_v30, %v19432_v60 }
 0x43b   : > { %22103 = vst [vmem:[#allocation103_spill] sm:$0xff] %v19621_v53 }
 0x43d   : > { %15481 = vmatmul.mubr.msk.f32.gmra.mrb[26].mxu1 %vm1362_vm1, %v5804_v62  ;;  %v5808_v62 = vmul.f32 %v18179_v4, %v19618_v8 }
 0x43e   : > { %15483 = vmatprep.mubr.msk.f32.mxu1 %vm1362_vm1, %v19612_v57  ;;  %v13372_v57 = vld [vmem:[%s17757_s29 + $0x98] sm:$0xff] }
 0x43f   : > { %v16437_v36 = vpack.c.bf16 %v13372_v57, %v13371_v40  ;;  %v6205_v40 = vmul.f32 %v18001_v23, %v19369_v59  ;;  %v6209_v57 = vmul.f32 %v18009_v25, %v19387_v47 }
 0x441   : > { %15484 = vmatmul.mubr.msk.f32.gmra.mrb[28].mxu1 %vm1362_vm1, %v5806_v7  ;;  %v6201_v7 = vmul.f32 %v17993_v21, %v19347_v18 }
 0x442   : > { %15486 = vmatprep.mubr.msk.f32.mxu1 %vm1362_vm1, %v19621_v53 }
 0x445   : > { %15487 = vmatmul.mubr.msk.f32.gmra.mrb[30].mxu1 %vm1362_vm1, %v5808_v62  ;;  %v6203_v62 = vmul.f32 %v17997_v22, %v19359_v14 }
 0x446   : > { %15497 = vmatprep.mubr.msk.f32.mxu1 %vm1362_vm1, %v6199_v32  ;;  %v6211_v32 = vmul.f32 %v18013_v26, %v19396_v31 }
 0x449   : > { %15498 = vmatmul.mubr.msk.f32.vlgmr.msra.gmra.mrb[0].mxu1 %vm1362_vm1, %v19353_v6  ;;  %v6215_v6 = vmul.f32 %v18021_v28, %v19414_v51 }
 0x44a   : > { %15500 = vmatprep.mubr.msk.f32.mxu1 %vm1362_vm1, %v6201_v7  ;;  %16436 = vmatpush3.bf16.msra.mxu1 %v19498_v48  ;;  %v6217_v48 = vmul.f32 %v18025_v29, %v19423_v43  ;;  %v6221_v7 = vmul.f32 %v22009_v49, %v19441_v55  ;;  %v22111_v49 = vld [vmem:[#allocation78_spill] sm:$0xff] }
 0x44b   : > { %16438 = vmatprep.subr.bf16.mxu1 %v16437_v36 }
 0x44d   : > { %15501 = vmatmul.mubr.msk.f32.gmra.mrb[2].mxu1 %vm1362_vm1, %v19363_v54 }
 0x44e   : > { %15503 = vmatprep.mubr.msk.f32.mxu1 %vm1362_vm1, %v6203_v62  ;;  %16440 = vmatpush3.bf16.msra.mxu1 %v16437_v36  ;;  %v6213_v36 = vmul.f32 %v18017_v27, %v19405_v39  ;;  %v22104_v62 = vld [vmem:[#allocation28_spill] sm:$0xff] }
 0x44f   : > { %16442 = vmatprep.subr.bf16.mxu1 %v16441_v15 }
 0x451   : > { %15504 = vmatmul.mubr.msk.f32.gmra.mrb[4].mxu1 %vm1362_vm1, %v19372_v1 }
 0x452   : > { %15506 = vmatprep.mubr.msk.f32.mxu1 %vm1362_vm1, %v6205_v40  ;;  %v6223_v40 = vmul.f32 %v22104_v62, %v19450_v20  ;;  %v19705_v62 = vld [vmem:[#allocation3 + $0x107] sm:$0xff] }
 0x453   : > { %22112 = vst [vmem:[#allocation104_spill] sm:$0xff] %v19705_v62  ;;  %v22116_v20 = vld [vmem:[#allocation49_spill] sm:$0xff] }
 0x455   : > { %15507 = vmatmul.mubr.msk.f32.gmra.mrb[6].mxu1 %vm1362_vm1, %v19381_v45 }
 0x456   : > { %15509 = vmatprep.mubr.msk.f32.mxu1 %vm1362_vm1, %v6207_v63  ;;  %v22105_v63 = vld [vmem:[#allocation97_spill] sm:$0xff] }
 0x459   : > { %15510 = vmatmul.mubr.msk.f32.gmra.mrb[8].mxu1 %vm1362_vm1, %v19390_v19 }
 0x45a   : > { %15512 = vmatprep.mubr.msk.f32.mxu1 %vm1362_vm1, %v6209_v57  ;;  %v22106_v57 = vld [vmem:[#allocation98_spill] sm:$0xff] }
 0x45d   : > { %15513 = vmatmul.mubr.msk.f32.gmra.mrb[10].mxu1 %vm1362_vm1, %v19399_v0 }
 0x45e   : > { %15515 = vmatprep.mubr.msk.f32.mxu1 %vm1362_vm1, %v6211_v32  ;;  %v22107_v32 = vld [vmem:[#allocation29_spill] sm:$0xff] }
 0x461   : > { %15516 = vmatmul.mubr.msk.f32.gmra.mrb[12].mxu1 %vm1362_vm1, %v19408_v41 }
 0x462   : > { %15518 = vmatprep.mubr.msk.f32.mxu1 %vm1362_vm1, %v6213_v36  ;;  %v6225_v36 = vmul.f32 %v22107_v32, %v22106_v57  ;;  %v22114_v57 = vld [vmem:[#allocation80_spill] sm:$0xff] }
 0x465   : > { %15519 = vmatmul.mubr.msk.f32.gmra.mrb[14].mxu1 %vm1362_vm1, %v19417_v16 }
 0x466   : > { %15521 = vmatprep.mubr.msk.f32.mxu1 %vm1362_vm1, %v6215_v6  ;;  %v22108_v6 = vld [vmem:[#allocation99_spill] sm:$0xff] }
 0x469   : > { %15522 = vmatmul.mubr.msk.f32.gmra.mrb[16].mxu1 %vm1362_vm1, %v19426_v17 }
 0x46a   : > { %15524 = vmatprep.mubr.msk.f32.mxu1 %vm1362_vm1, %v6217_v48  ;;  %v22109_v48 = vld [vmem:[#allocation101_spill] sm:$0xff] }
 0x46d   : > { %15525 = vmatmul.mubr.msk.f32.gmra.mrb[18].mxu1 %vm1362_vm1, %v19435_v5 }
 0x46e   : > { %15527 = vmatprep.mubr.msk.f32.mxu1 %vm1362_vm1, %v6219_v34  ;;  %v22110_v34 = vld [vmem:[#allocation30_spill] sm:$0xff] }
 0x471   : > { %15528 = vmatmul.mubr.msk.f32.gmra.mrb[20].mxu1 %vm1362_vm1, %v19444_v12 }
 0x472   : > { %15530 = vmatprep.mubr.msk.f32.mxu1 %vm1362_vm1, %v6221_v7  ;;  %v6227_v7 = vmul.f32 %v22110_v34, %v22109_v48  ;;  %v22115_v34 = vld [vmem:[#allocation48_spill] sm:$0xff] }
 0x473   : > { %v13442_v48 = vld [vmem:[%s17757_s29 + $0xc8] sm:$0xff] }
 0x475   : > { %15531 = vmatmul.mubr.msk.f32.gmra.mrb[22].mxu1 %vm1362_vm1, %v22105_v63  ;;  %v13408_v63 = vld [vmem:[%s17757_s29 + $0xb8] sm:$0xff] }
 0x476   : > { %15533 = vmatprep.mubr.msk.f32.mxu1 %vm1362_vm1, %v6223_v40  ;;  %v22113_v40 = vld [vmem:[#allocation31_spill] sm:$0xff] }
 0x477   : > { %v6229_v32 = vmul.f32 %v22113_v40, %v19705_v62  ;;  %v22117_v40 = vld [vmem:[#allocation50_spill] sm:$0xff]  ;;  %v22119_v62 = vld [vmem:[#allocation52_spill] sm:$0xff] }
 0x479   : > { %15534 = vmatmul.mubr.msk.f32.gmra.mrb[24].mxu1 %vm1362_vm1, %v22108_v6  ;;  %v19713_v6 = vld [vmem:[#allocation3 + $0x10f] sm:$0xff] }
 0x47a   : > { %15536 = vmatprep.mubr.msk.f32.mxu1 %vm1362_vm1, %v6225_v36  ;;  %v13407_v36 = vld [vmem:[%s17757_s29 + $0xb0] sm:$0xff] }
 0x47d   : > { %15537 = vmatmul.mubr.msk.f32.gmra.mrb[26].mxu1 %vm1362_vm1, %v22111_v49  ;;  %v16445_v49 = vpack.c.bf16 %v13408_v63, %v13407_v36  ;;  %v22120_v63 = vld [vmem:[#allocation53_spill] sm:$0xff]  ;;  %v22129_v36 = vld [vmem:[#allocation62_spill] sm:$0xff] }
 0x47e   : > { %15539 = vmatprep.mubr.msk.f32.mxu1 %vm1362_vm1, %v6227_v7  ;;  %v13441_v7 = vld [vmem:[%s17757_s29 + $0xc0] sm:$0xff] }
 0x481   : > { %15540 = vmatmul.mubr.msk.f32.gmra.mrb[28].mxu1 %vm1362_vm1, %v22114_v57  ;;  %v22118_v57 = vld [vmem:[#allocation51_spill] sm:$0xff] }
 0x482   : > { %15542 = vmatprep.mubr.msk.f32.mxu1 %vm1362_vm1, %v6229_v32  ;;  %v16449_v32 = vpack.c.bf16 %v13442_v48, %v13441_v7  ;;  %v22124_v48 = vld [vmem:[#allocation57_spill] sm:$0xff]  ;;  %v22130_v7 = vld [vmem:[#allocation63_spill] sm:$0xff] }
 0x485   : > { %15543 = vmatmul.mubr.msk.f32.gmra.mrb[30].mxu1 %vm1362_vm1, %v19713_v6 }
 0x486   : > { %15553 = vmatprep.mubr.msk.f32.mxu1 %vm1362_vm1, %v22115_v34  ;;  %v22121_v34 = vld [vmem:[#allocation54_spill] sm:$0xff] }
 0x489   : > { %15554 = vmatmul.mubr.msk.f32.vlgmr.msra.gmra.mrb[0].mxu1 %vm1362_vm1, %v22116_v20  ;;  %v22122_v20 = vld [vmem:[#allocation55_spill] sm:$0xff] }
 0x48a   : > { %15556 = vmatprep.mubr.msk.f32.mxu1 %vm1362_vm1, %v22117_v40  ;;  %16444 = vmatpush3.bf16.msra.mxu1 %v16441_v15  ;;  %v22123_v15 = vld [vmem:[#allocation56_spill] sm:$0xff]  ;;  %v22128_v40 = vld [vmem:[#allocation61_spill] sm:$0xff] }
 0x48b   : > { %16446 = vmatprep.subr.bf16.mxu1 %v16445_v49 }
 0x48d   : > { %15557 = vmatmul.mubr.msk.f32.gmra.mrb[2].mxu1 %vm1362_vm1, %v22118_v57  ;;  %v22125_v57 = vld [vmem:[#allocation58_spill] sm:$0xff] }
 0x48e   : > { %15559 = vmatprep.mubr.msk.f32.mxu1 %vm1362_vm1, %v22119_v62  ;;  %16448 = vmatpush3.bf16.msra.mxu1 %v16445_v49  ;;  %v22126_v49 = vld [vmem:[#allocation59_spill] sm:$0xff]  ;;  %v22127_v62 = vld [vmem:[#allocation60_spill] sm:$0xff] }
 0x48f   : > { %16450 = vmatprep.subr.bf16.mxu1 %v16449_v32 }
 0x491   : > { %15560 = vmatmul.mubr.msk.f32.gmra.mrb[4].mxu1 %vm1362_vm1, %v22120_v63  ;;  %v22131_v63 = vld [vmem:[#allocation64_spill] sm:$0xff] }
 0x492   : > { %15562 = vmatprep.mubr.msk.f32.mxu1 %vm1362_vm1, %v22121_v34  ;;  %v22132_v34 = vld [vmem:[#allocation65_spill] sm:$0xff] }
 0x495   : > { %15563 = vmatmul.mubr.msk.f32.gmra.mrb[6].mxu1 %vm1362_vm1, %v22122_v20  ;;  %v22133_v20 = vld [vmem:[#allocation66_spill] sm:$0xff] }
 0x496   : > { %15565 = vmatprep.mubr.msk.f32.mxu1 %vm1362_vm1, %v22123_v15  ;;  %v22134_v15 = vld [vmem:[#allocation67_spill] sm:$0xff] }
 0x499   : > { %15566 = vmatmul.mubr.msk.f32.gmra.mrb[8].mxu1 %vm1362_vm1, %v22124_v48  ;;  %v22135_v48 = vld [vmem:[#allocation68_spill] sm:$0xff] }
 0x49a   : > { %15568 = vmatprep.mubr.msk.f32.mxu1 %vm1362_vm1, %v22125_v57  ;;  %v22136_v57 = vld [vmem:[#allocation69_spill] sm:$0xff] }
 0x49d   : > { %15569 = vmatmul.mubr.msk.f32.gmra.mrb[10].mxu1 %vm1362_vm1, %v22126_v49  ;;  %v22137_v49 = vld [vmem:[#allocation70_spill] sm:$0xff] }
 0x49e   : > { %15571 = vmatprep.mubr.msk.f32.mxu1 %vm1362_vm1, %v22127_v62  ;;  %v22138_v62 = vld [vmem:[#allocation71_spill] sm:$0xff] }
 0x4a1   : > { %15572 = vmatmul.mubr.msk.f32.gmra.mrb[12].mxu1 %vm1362_vm1, %v22128_v40  ;;  %v22139_v40 = vld [vmem:[#allocation72_spill] sm:$0xff] }
 0x4a2   : > { %15574 = vmatprep.mubr.msk.f32.mxu1 %vm1362_vm1, %v22129_v36  ;;  %v22140_v36 = vld [vmem:[#allocation73_spill] sm:$0xff] }
 0x4a5   : > { %15575 = vmatmul.mubr.msk.f32.gmra.mrb[14].mxu1 %vm1362_vm1, %v22130_v7  ;;  %v22141_v7 = vld [vmem:[#allocation74_spill] sm:$0xff] }
 0x4a6   : > { %15577 = vmatprep.mubr.msk.f32.mxu1 %vm1362_vm1, %v22131_v63  ;;  %v22142_v63 = vld [vmem:[#allocation75_spill] sm:$0xff] }
 0x4a9   : > { %15578 = vmatmul.mubr.msk.f32.gmra.mrb[16].mxu1 %vm1362_vm1, %v22132_v34  ;;  %v22143_v34 = vld [vmem:[#allocation76_spill] sm:$0xff] }
 0x4aa   : > { %15580 = vmatprep.mubr.msk.f32.mxu1 %vm1362_vm1, %v22133_v20  ;;  %v22144_v20 = vld [vmem:[#allocation77_spill] sm:$0xff] }
 0x4ad   : > { %15581 = vmatmul.mubr.msk.f32.gmra.mrb[18].mxu1 %vm1362_vm1, %v22134_v15  ;;  %v19781_v15 = vld [vmem:[#allocation3 + $0x108] sm:$0xff] }
 0x4ae   : > { %15583 = vmatprep.mubr.msk.f32.mxu1 %vm1362_vm1, %v22135_v48  ;;  %v19785_v48 = vld [vmem:[#allocation3 + $0x110] sm:$0xff] }
 0x4b1   : > { %15584 = vmatmul.mubr.msk.f32.gmra.mrb[20].mxu1 %vm1362_vm1, %v22136_v57  ;;  %v13443_v57 = vld [vmem:[%s17757_s29 + $0xd0] sm:$0xff] }
 0x4b2   : > { %15586 = vmatprep.mubr.msk.f32.mxu1 %vm1362_vm1, %v22137_v49  ;;  %v13444_v49 = vld [vmem:[%s17757_s29 + $0xd8] sm:$0xff] }
 0x4b5   : > { %15587 = vmatmul.mubr.msk.f32.gmra.mrb[22].mxu1 %vm1362_vm1, %v22138_v62  ;;  %v7012_v62 = vmul.f32 %v21981_v3, %v19486_v58  ;;  %v22145_v58 = vld [vmem:[#allocation34_spill] sm:$0xff] }
 0x4b6   : > { %15589 = vmatprep.mubr.msk.f32.mxu1 %vm1362_vm1, %v22139_v40  ;;  %v16453_v40 = vpack.c.bf16 %v13444_v49, %v13443_v57  ;;  %v22148_v49 = vld [vmem:[#allocation82_spill] sm:$0xff] }
 0x4b9   : > { %15590 = vmatmul.mubr.msk.f32.gmra.mrb[24].mxu1 %vm1362_vm1, %v22140_v36  ;;  %v13477_v36 = vld [vmem:[%s17757_s29 + $0xe0] sm:$0xff] }
 0x4ba   : > { %15592 = vmatprep.mubr.msk.f32.mxu1 %vm1362_vm1, %v22141_v7  ;;  %v13478_v7 = vld [vmem:[%s17757_s29 + $0xe8] sm:$0xff] }
 0x4bd   : > { %15593 = vmatmul.mubr.msk.f32.gmra.mrb[26].mxu1 %vm1362_vm1, %v22142_v63  ;;  %v7014_v63 = vmul.f32 %v18123_v52, %v19500_v61 }
 0x4be   : > { %15595 = vmatprep.mubr.msk.f32.mxu1 %vm1362_vm1, %v22143_v34  ;;  %v16457_v34 = vpack.c.bf16 %v13478_v7, %v13477_v36  ;;  %v22150_v36 = vld [vmem:[#allocation83_spill] sm:$0xff]  ;;  %v22151_v7 = vld [vmem:[#allocation37_spill] sm:$0xff] }
 0x4c1   : > { %15596 = vmatmul.mubr.msk.f32.gmra.mrb[28].mxu1 %vm1362_vm1, %v22144_v20  ;;  %v22146_v20 = vld [vmem:[#allocation81_spill] sm:$0xff] }
 0x4c2   : > { %15598 = vmatprep.mubr.msk.f32.mxu1 %vm1362_vm1, %v19781_v15 }
 0x4c5   : > { %15599 = vmatmul.mubr.msk.f32.gmra.mrb[30].mxu1 %vm1362_vm1, %v19785_v48 }
 0x4c6   : > { %15609 = vmatprep.mubr.msk.f32.mxu1 %vm1362_vm1, %v19491_v10  ;;  %v7016_v10 = vmul.f32 %v22145_v58, %v19510_v37 }
 0x4c9   : > { %15610 = vmatmul.mubr.msk.f32.vlgmr.msra.gmra.mrb[0].mxu1 %vm1362_vm1, %v7012_v62  ;;  %v22149_v62 = vld [vmem:[#allocation36_spill] sm:$0xff] }
 0x4ca   : > { %15612 = vmatprep.mubr.msk.f32.mxu1 %vm1362_vm1, %v19503_v46  ;;  %16452 = vmatpush3.bf16.msra.mxu1 %v16449_v32  ;;  %v22147_v32 = vld [vmem:[#allocation35_spill] sm:$0xff] }
 0x4cb   : > { %16454 = vmatprep.subr.bf16.mxu1 %v16453_v40  ;;  %v7018_v57 = vmul.f32 %v22147_v32, %v19519_v2 }
 0x4cd   : > { %15613 = vmatmul.mubr.msk.f32.gmra.mrb[2].mxu1 %vm1362_vm1, %v7014_v63  ;;  %v7022_v63 = vmul.f32 %v22151_v7, %v19537_v35 }
 0x4ce   : > { %15615 = vmatprep.mubr.msk.f32.mxu1 %vm1362_vm1, %v19513_v9  ;;  %16456 = vmatpush3.bf16.msra.mxu1 %v16453_v40  ;;  %v7020_v40 = vmul.f32 %v22149_v62, %v19528_v56 }
 0x4cf   : > { %16458 = vmatprep.subr.bf16.mxu1 %v16457_v34 }
 0x4d1   : > { %15616 = vmatmul.mubr.msk.f32.gmra.mrb[4].mxu1 %vm1362_vm1, %v7016_v10  ;;  %v22152_v10 = vld [vmem:[#allocation84_spill] sm:$0xff] }
 0x4d2   : > { %15618 = vmatprep.mubr.msk.f32.mxu1 %vm1362_vm1, %v22146_v20 }
 0x4d5   : > { %15619 = vmatmul.mubr.msk.f32.gmra.mrb[6].mxu1 %vm1362_vm1, %v7018_v57  ;;  %v22153_v57 = vld [vmem:[#allocation38_spill] sm:$0xff] }
 0x4d6   : > { %15621 = vmatprep.mubr.msk.f32.mxu1 %vm1362_vm1, %v22148_v49  ;;  %v7024_v32 = vmul.f32 %v22153_v57, %v19546_v44  ;;  %v22154_v49 = vld [vmem:[#allocation79_spill] sm:$0xff] }
 0x4d9   : > { %15622 = vmatmul.mubr.msk.f32.gmra.mrb[8].mxu1 %vm1362_vm1, %v7020_v40  ;;  %v22155_v40 = vld [vmem:[#allocation39_spill] sm:$0xff] }
 0x4da   : > { %15624 = vmatprep.mubr.msk.f32.mxu1 %vm1362_vm1, %v22150_v36  ;;  %v7026_v62 = vmul.f32 %v22155_v40, %v19555_v38  ;;  %v22156_v36 = vld [vmem:[#allocation87_spill] sm:$0xff] }
 0x4dd   : > { %15625 = vmatmul.mubr.msk.f32.gmra.mrb[10].mxu1 %vm1362_vm1, %v7022_v63  ;;  %v22157_v63 = vld [vmem:[#allocation40_spill] sm:$0xff] }
 0x4de   : > { %15627 = vmatprep.mubr.msk.f32.mxu1 %vm1362_vm1, %v22152_v10  ;;  %v7028_v7 = vmul.f32 %v22157_v63, %v19564_v33  ;;  %v22158_v10 = vld [vmem:[#allocation89_spill] sm:$0xff]  ;;  %v22164_v63 = vld [vmem:[#allocation43_spill] sm:$0xff] }
 0x4e1   : > { %15628 = vmatmul.mubr.msk.f32.gmra.mrb[12].mxu1 %vm1362_vm1, %v7024_v32  ;;  %v22159_v32 = vld [vmem:[#allocation41_spill] sm:$0xff] }
 0x4e2   : > { %15630 = vmatprep.mubr.msk.f32.mxu1 %vm1362_vm1, %v22154_v49  ;;  %v7030_v57 = vmul.f32 %v22159_v32, %v19573_v11  ;;  %v22160_v49 = vld [vmem:[#allocation91_spill] sm:$0xff] }
 0x4e3   : > { %v22165_v32 = vld [vmem:[#allocation95_spill] sm:$0xff] }
 0x4e5   : > { %15631 = vmatmul.mubr.msk.f32.gmra.mrb[14].mxu1 %vm1362_vm1, %v7026_v62  ;;  %v22161_v62 = vld [vmem:[#allocation42_spill] sm:$0xff] }
 0x4e6   : > { %15633 = vmatprep.mubr.msk.f32.mxu1 %vm1362_vm1, %v22156_v36  ;;  %v7032_v40 = vmul.f32 %v22161_v62, %v19582_v13  ;;  %v22162_v36 = vld [vmem:[#allocation93_spill] sm:$0xff]  ;;  %v22168_v62 = vld [vmem:[#allocation100_spill] sm:$0xff] }
 0x4e9   : > { %15634 = vmatmul.mubr.msk.f32.gmra.mrb[16].mxu1 %vm1362_vm1, %v7028_v7  ;;  %v22163_v7 = vld [vmem:[#allocation92_spill] sm:$0xff] }
 0x4ea   : > { %15636 = vmatprep.mubr.msk.f32.mxu1 %vm1362_vm1, %v22158_v10  ;;  %v7034_v33 = vmul.f32 %v22164_v63, %v22163_v7 }
 0x4ed   : > { %15637 = vmatmul.mubr.msk.f32.gmra.mrb[18].mxu1 %vm1362_vm1, %v7030_v57  ;;  %v22166_v57 = vld [vmem:[#allocation94_spill] sm:$0xff] }
 0x4ee   : > { %15639 = vmatprep.mubr.msk.f32.mxu1 %vm1362_vm1, %v22160_v49  ;;  %v22167_v49 = vld [vmem:[#allocation44_spill] sm:$0xff] }
 0x4ef   : > { %v7036_v11 = vmul.f32 %v22167_v49, %v22166_v57  ;;  %v13479_v49 = vld [vmem:[%s17757_s29 + $0xf0] sm:$0xff] }
 0x4f1   : > { %15640 = vmatmul.mubr.msk.f32.gmra.mrb[20].mxu1 %vm1362_vm1, %v7032_v40  ;;  %v22169_v40 = vld [vmem:[#allocation96_spill] sm:$0xff] }
 0x4f2   : > { %15642 = vmatprep.mubr.msk.f32.mxu1 %vm1362_vm1, %v22162_v36  ;;  %v22170_v36 = vld [vmem:[#allocation45_spill] sm:$0xff] }
 0x4f3   : > { %v7038_v13 = vmul.f32 %v22170_v36, %v22169_v40  ;;  %v13514_v40 = vld [vmem:[%s17757_s29 + $0x108] sm:$0xff] }
 0x4f5   : > { %15643 = vmatmul.mubr.msk.f32.gmra.mrb[22].mxu1 %vm1362_vm1, %v7034_v33  ;;  %v22171_v33 = vld [vmem:[#allocation46_spill] sm:$0xff] }
 0x4f6   : > { %15645 = vmatprep.mubr.msk.f32.mxu1 %vm1362_vm1, %v22165_v32  ;;  %v7040_v63 = vmul.f32 %v22171_v33, %v19618_v8  ;;  %v19867_v32 = vld [vmem:[#allocation3 + $0x111] sm:$0xff] }
 0x4f7   : > { %v7042_v36 = vmul.f32 %v18179_v4, %v19867_v32  ;;  %v13513_v8 = vld [vmem:[%s17757_s29 + $0x100] sm:$0xff] }
 0x4f9   : > { %15646 = vmatmul.mubr.msk.f32.gmra.mrb[24].mxu1 %vm1362_vm1, %v7036_v11  ;;  %v19870_v11 = vld [vmem:[#allocation3 + $0x109] sm:$0xff] }
 0x4fa   : > { %15648 = vmatprep.mubr.msk.f32.mxu1 %vm1362_vm1, %v22168_v62 }
 0x4fd   : > { %15649 = vmatmul.mubr.msk.f32.gmra.mrb[26].mxu1 %vm1362_vm1, %v7038_v13  ;;  %v7433_v13 = vmul.f32 %v22075_v50, %v19347_v18  ;;  %v16465_v50 = vpack.c.bf16 %v13514_v40, %v13513_v8  ;;  %v7437_v18 = vmul.f32 %v17997_v22, %v19369_v59  ;;  %v7441_v8 = vmul.f32 %v18005_v24, %v19387_v47  ;;  %v22172_v59 = vld [vmem:[#allocation86_spill] sm:$0xff]  ;;  %v22184_v40 = vld [vmem:[#allocation31_spill] sm:$0xff] }
 0x4fe   : > { %15651 = vmatprep.mubr.msk.f32.mxu1 %vm1362_vm1, %v19621_v53  ;;  %v13480_v53 = vld [vmem:[%s17757_s29 + $0xf8] sm:$0xff] }
 0x4ff   : > { %v16461_v33 = vpack.c.bf16 %v13480_v53, %v13479_v49  ;;  %v7439_v53 = vmul.f32 %v18001_v23, %v19378_v42  ;;  %v22174_v42 = vld [vmem:[#allocation97_spill] sm:$0xff]  ;;  %v22183_v49 = vld [vmem:[#allocation80_spill] sm:$0xff]  ;;  %v8796_v22 = vld [vmem:[#allocation2 + $0xb8] sm:$0xff] }
 0x501   : > { %15652 = vmatmul.mubr.msk.f32.gmra.mrb[28].mxu1 %vm1362_vm1, %v7040_v63  ;;  %v7435_v63 = vmul.f32 %v17993_v21, %v19359_v14  ;;  %v7443_v14 = vmul.f32 %v18009_v25, %v19396_v31  ;;  %v22177_v31 = vld [vmem:[#allocation99_spill] sm:$0xff] }
 0x502   : > { %15654 = vmatprep.mubr.msk.f32.mxu1 %vm1362_vm1, %v19870_v11  ;;  %v8797_v21 = vld [vmem:[#allocation2 + $0xc0] sm:$0xff] }
 0x505   : > { %15655 = vmatmul.mubr.msk.f32.gmra.mrb[30].mxu1 %vm1362_vm1, %v7042_v36  ;;  %v7431_v36 = vld [vmem:[#allocation3 + $0x117] sm:$0xff] }
 0x506   : > { %15665 = vmatprep.mubr.msk.f32.mxu1 %vm1362_vm1, %v7433_v13  ;;  %v7432_v13 = vld [vmem:[#allocation3 + $0x11f] sm:$0xff] }
 0x509   : > { %15666 = vmatmul.mubr.msk.f32.vlgmr.msra.gmra.mrb[0].mxu1 %vm1362_vm1, %v19363_v54  ;;  %v7445_v54 = vmul.f32 %v18013_v26, %v19405_v39  ;;  %v22179_v39 = vld [vmem:[#allocation29_spill] sm:$0xff] }
 0x50a   : > { %15668 = vmatprep.mubr.msk.f32.mxu1 %vm1362_vm1, %v7435_v63  ;;  %16460 = vmatpush3.bf16.msra.mxu1 %v16457_v34  ;;  %v13515_v63 = vld [vmem:[%s17757_s29 + $0x110] sm:$0xff] }
 0x50b   : > { %16462 = vmatprep.subr.bf16.mxu1 %v16461_v33  ;;  %v8795_v26 = vld [vmem:[#allocation2 + $0xb0] sm:$0xff] }
 0x50d   : > { %15669 = vmatmul.mubr.msk.f32.gmra.mrb[2].mxu1 %vm1362_vm1, %v19372_v1 }
 0x50e   : > { %15671 = vmatprep.mubr.msk.f32.mxu1 %vm1362_vm1, %v7437_v18  ;;  %16464 = vmatpush3.bf16.msra.mxu1 %v16461_v33  ;;  %v7463_v33 = vmul.f32 %v22184_v40, %v7431_v36  ;;  %v13516_v18 = vld [vmem:[%s17757_s29 + $0x118] sm:$0xff]  ;;  %v7848_v36 = vld [vmem:[#allocation3 + $0xf0] sm:$0xff]  ;;  %v7849_v40 = vld [vmem:[#allocation3 + $0xf8] sm:$0xff] }
 0x50f   : > { %16466 = vmatprep.subr.bf16.mxu1 %v16465_v50 }
 0x511   : > { %15672 = vmatmul.mubr.msk.f32.gmra.mrb[4].mxu1 %vm1362_vm1, %v19381_v45  ;;  %v22176_v45 = vld [vmem:[#allocation28_spill] sm:$0xff] }
 0x512   : > { %15674 = vmatprep.mubr.msk.f32.mxu1 %vm1362_vm1, %v7439_v53  ;;  %v7823_v53 = vld [vmem:[#allocation3 + $0x28] sm:$0xff] }
 0x515   : > { %15675 = vmatmul.mubr.msk.f32.gmra.mrb[6].mxu1 %vm1362_vm1, %v19390_v19  ;;  %v7447_v19 = vmul.f32 %v18017_v27, %v19414_v51  ;;  %v8794_v27 = vld [vmem:[#allocation2 + $0xa8] sm:$0xff] }
 0x516   : > { %15677 = vmatprep.mubr.msk.f32.mxu1 %vm1362_vm1, %v7441_v8  ;;  %v16469_v8 = vpack.c.bf16 %v13516_v18, %v13515_v63  ;;  %v7854_v63 = vld [vmem:[#allocation3 + $0x120] sm:$0xff]  ;;  %v8246_v18 = vmul.f32 %v21981_v3, %v19500_v61  ;;  %v22186_v3 = vld [vmem:[#allocation35_spill] sm:$0xff] }
 0x517   : > { %v8252_v61 = vmul.f32 %v22186_v3, %v19528_v56  ;;  %v22192_v56 = vld [vmem:[#allocation38_spill] sm:$0xff] }
 0x519   : > { %15678 = vmatmul.mubr.msk.f32.gmra.mrb[8].mxu1 %vm1362_vm1, %v19399_v0  ;;  %v7449_v0 = vmul.f32 %v18021_v28, %v19423_v43  ;;  %v22180_v43 = vld [vmem:[#allocation78_spill] sm:$0xff] }
 0x51a   : > { %15680 = vmatprep.mubr.msk.f32.mxu1 %vm1362_vm1, %v7443_v14  ;;  %v7824_v14 = vld [vmem:[#allocation3 + $0x30] sm:$0xff]  ;;  %v8792_v28 = vld [vmem:[#allocation2 + $0x98] sm:$0xff] }
 0x51d   : > { %15681 = vmatmul.mubr.msk.f32.gmra.mrb[10].mxu1 %vm1362_vm1, %v19408_v41  ;;  %v7451_v41 = vmul.f32 %v18025_v29, %v19432_v60  ;;  %v22181_v60 = vld [vmem:[#allocation104_spill] sm:$0xff]  ;;  %v8791_v29 = vld [vmem:[#allocation2 + $0x90] sm:$0xff] }
 0x51e   : > { %15683 = vmatprep.mubr.msk.f32.mxu1 %vm1362_vm1, %v7445_v54  ;;  %v7825_v54 = vld [vmem:[#allocation3 + $0x38] sm:$0xff] }
 0x521   : > { %15684 = vmatmul.mubr.msk.f32.gmra.mrb[12].mxu1 %vm1362_vm1, %v19417_v16  ;;  %v7453_v16 = vmul.f32 %v18029_v30, %v19441_v55  ;;  %v22182_v55 = vld [vmem:[#allocation30_spill] sm:$0xff] }
 0x522   : > { %15686 = vmatprep.mubr.msk.f32.mxu1 %vm1362_vm1, %v7447_v19  ;;  %v7461_v34 = vmul.f32 %v22182_v55, %v22181_v60  ;;  %v7827_v19 = vld [vmem:[#allocation3 + $0x48] sm:$0xff]  ;;  %v7844_v60 = vld [vmem:[#allocation3 + $0xd0] sm:$0xff]  ;;  %v7845_v55 = vld [vmem:[#allocation3 + $0xd8] sm:$0xff] }
 0x525   : > { %15687 = vmatmul.mubr.msk.f32.gmra.mrb[14].mxu1 %vm1362_vm1, %v19426_v17  ;;  %v22173_v17 = vld [vmem:[#allocation27_spill] sm:$0xff] }
 0x526   : > { %15689 = vmatprep.mubr.msk.f32.mxu1 %vm1362_vm1, %v7449_v0  ;;  %v7455_v1 = vmul.f32 %v22173_v17, %v22172_v59  ;;  %v7828_v0 = vld [vmem:[#allocation3 + $0x50] sm:$0xff]  ;;  %v7831_v59 = vld [vmem:[#allocation3 + $0x68] sm:$0xff]  ;;  %v7833_v17 = vld [vmem:[#allocation3 + $0x78] sm:$0xff] }
 0x529   : > { %15690 = vmatmul.mubr.msk.f32.gmra.mrb[16].mxu1 %vm1362_vm1, %v19435_v5  ;;  %v22175_v5 = vld [vmem:[#allocation98_spill] sm:$0xff] }
 0x52a   : > { %15692 = vmatprep.mubr.msk.f32.mxu1 %vm1362_vm1, %v7451_v41  ;;  %v7457_v47 = vmul.f32 %v22176_v45, %v22175_v5  ;;  %v7829_v41 = vld [vmem:[#allocation3 + $0x58] sm:$0xff]  ;;  %v7836_v5 = vld [vmem:[#allocation3 + $0x90] sm:$0xff] }
 0x52b   : > { %v7837_v45 = vld [vmem:[#allocation3 + $0x98] sm:$0xff] }
 0x52d   : > { %15693 = vmatmul.mubr.msk.f32.gmra.mrb[18].mxu1 %vm1362_vm1, %v19444_v12  ;;  %v22178_v12 = vld [vmem:[#allocation101_spill] sm:$0xff] }
 0x52e   : > { %15695 = vmatprep.mubr.msk.f32.mxu1 %vm1362_vm1, %v7453_v16  ;;  %v7459_v51 = vmul.f32 %v22179_v39, %v22178_v12  ;;  %v7830_v16 = vld [vmem:[#allocation3 + $0x60] sm:$0xff]  ;;  %v7840_v12 = vld [vmem:[#allocation3 + $0xb0] sm:$0xff]  ;;  %v7841_v39 = vld [vmem:[#allocation3 + $0xb8] sm:$0xff] }
 0x531   : > { %15696 = vmatmul.mubr.msk.f32.gmra.mrb[20].mxu1 %vm1362_vm1, %v22174_v42  ;;  %v7835_v42 = vld [vmem:[#allocation3 + $0x88] sm:$0xff] }
 0x532   : > { %15698 = vmatprep.mubr.msk.f32.mxu1 %vm1362_vm1, %v7455_v1  ;;  %v7834_v1 = vld [vmem:[#allocation3 + $0x80] sm:$0xff] }
 0x535   : > { %15699 = vmatmul.mubr.msk.f32.gmra.mrb[22].mxu1 %vm1362_vm1, %v22177_v31  ;;  %v7839_v31 = vld [vmem:[#allocation3 + $0xa8] sm:$0xff] }
 0x536   : > { %15701 = vmatprep.mubr.msk.f32.mxu1 %vm1362_vm1, %v7457_v47  ;;  %v7838_v47 = vld [vmem:[#allocation3 + $0xa0] sm:$0xff] }
 0x539   : > { %15702 = vmatmul.mubr.msk.f32.gmra.mrb[24].mxu1 %vm1362_vm1, %v22180_v43  ;;  %v7843_v43 = vld [vmem:[#allocation3 + $0xc8] sm:$0xff] }
 0x53a   : > { %15704 = vmatprep.mubr.msk.f32.mxu1 %vm1362_vm1, %v7459_v51  ;;  %v7842_v51 = vld [vmem:[#allocation3 + $0xc0] sm:$0xff] }
 0x53d   : > { %15705 = vmatmul.mubr.msk.f32.gmra.mrb[26].mxu1 %vm1362_vm1, %v22183_v49  ;;  %v7847_v49 = vld [vmem:[#allocation3 + $0xe8] sm:$0xff] }
 0x53e   : > { %15707 = vmatprep.mubr.msk.f32.mxu1 %vm1362_vm1, %v7461_v34  ;;  %v7846_v34 = vld [vmem:[#allocation3 + $0xe0] sm:$0xff] }
 0x541   : > { %15708 = vmatmul.mubr.msk.f32.gmra.mrb[28].mxu1 %vm1362_vm1, %v19713_v6  ;;  %v7826_v6 = vld [vmem:[#allocation3 + $0x40] sm:$0xff] }
 0x542   : > { %15710 = vmatprep.mubr.msk.f32.mxu1 %vm1362_vm1, %v7463_v33  ;;  %v7850_v33 = vld [vmem:[#allocation3 + $0x100] sm:$0xff] }
 0x545   : > { %15711 = vmatmul.mubr.msk.f32.gmra.mrb[30].mxu1 %vm1362_vm1, %v7432_v13  ;;  %v7853_v13 = vld [vmem:[#allocation3 + $0x118] sm:$0xff] }
 0x546   : > { %15721 = vmatprep.mubr.msk.f32.mxu1 %vm1362_vm1, %v7823_v53 }
 0x549   : > { %15722 = vmatmul.mubr.msk.f32.vlgmr.msra.gmra.mrb[0].mxu1 %vm1362_vm1, %v7824_v14  ;;  %v8258_v14 = vmul.f32 %v22192_v56, %v19555_v38  ;;  %v22199_v38 = vld [vmem:[#allocation90_spill] sm:$0xff] }
 0x54a   : > { %15724 = vmatprep.mubr.msk.f32.mxu1 %vm1362_vm1, %v7825_v54  ;;  %16468 = vmatpush3.bf16.msra.mxu1 %v16465_v50  ;;  %v7832_v50 = vld [vmem:[#allocation3 + $0x70] sm:$0xff] }
 0x54b   : > { %16470 = vmatprep.subr.bf16.mxu1 %v16469_v8  ;;  %v22193_v54 = vld [vmem:[#allocation87_spill] sm:$0xff] }
 0x54d   : > { %15725 = vmatmul.mubr.msk.f32.gmra.mrb[2].mxu1 %vm1362_vm1, %v7826_v6  ;;  %v22195_v6 = vld [vmem:[#allocation39_spill] sm:$0xff] }
 0x54e   : > { %15727 = vmatprep.mubr.msk.f32.mxu1 %vm1362_vm1, %v7827_v19  ;;  %16472 = vmatpush3.bf16.msra.mxu1 %v16469_v8  ;;  %v22191_v8 = vld [vmem:[#allocation79_spill] sm:$0xff] }
 0x551   : > { %15728 = vmatmul.mubr.msk.f32.gmra.mrb[4].mxu1 %vm1362_vm1, %v7828_v0  ;;  %v22197_v0 = vld [vmem:[#allocation40_spill] sm:$0xff] }
 0x552   : > { %15730 = vmatprep.mubr.msk.f32.mxu1 %vm1362_vm1, %v7829_v41 }
 0x555   : > { %15731 = vmatmul.mubr.msk.f32.gmra.mrb[6].mxu1 %vm1362_vm1, %v7830_v16  ;;  %v22198_v16 = vld [vmem:[#allocation91_spill] sm:$0xff] }
 0x556   : > { %15733 = vmatprep.mubr.msk.f32.mxu1 %vm1362_vm1, %v7831_v59  ;;  %v22200_v59 = vld [vmem:[#allocation41_spill] sm:$0xff] }
 0x559   : > { %15734 = vmatmul.mubr.msk.f32.gmra.mrb[8].mxu1 %vm1362_vm1, %v7832_v50  ;;  %v8264_v50 = vmul.f32 %v22200_v59, %v22199_v38 }
 0x55a   : > { %15736 = vmatprep.mubr.msk.f32.mxu1 %vm1362_vm1, %v7833_v17  ;;  %v22201_v17 = vld [vmem:[#allocation93_spill] sm:$0xff] }
 0x55d   : > { %15737 = vmatmul.mubr.msk.f32.gmra.mrb[10].mxu1 %vm1362_vm1, %v7834_v1  ;;  %v22202_v1 = vld [vmem:[#allocation42_spill] sm:$0xff] }
 0x55e   : > { %15739 = vmatprep.mubr.msk.f32.mxu1 %vm1362_vm1, %v7835_v42  ;;  %v8266_v42 = vmul.f32 %v22202_v1, %v22163_v7  ;;  %v22207_v7 = vld [vmem:[#allocation103_spill] sm:$0xff] }
 0x561   : > { %15740 = vmatmul.mubr.msk.f32.gmra.mrb[12].mxu1 %vm1362_vm1, %v7836_v5  ;;  %v22204_v5 = vld [vmem:[#allocation43_spill] sm:$0xff] }
 0x562   : > { %15742 = vmatprep.mubr.msk.f32.mxu1 %vm1362_vm1, %v7837_v45  ;;  %v8268_v45 = vmul.f32 %v22204_v5, %v22166_v57  ;;  %v8244_v57 = vld [vmem:[#allocation3 + $0x121] sm:$0xff] }
 0x565   : > { %15743 = vmatmul.mubr.msk.f32.gmra.mrb[14].mxu1 %vm1362_vm1, %v7838_v47  ;;  %v22205_v47 = vld [vmem:[#allocation96_spill] sm:$0xff] }
 0x566   : > { %15745 = vmatprep.mubr.msk.f32.mxu1 %vm1362_vm1, %v7839_v31  ;;  %v22206_v31 = vld [vmem:[#allocation44_spill] sm:$0xff] }
 0x569   : > { %15746 = vmatmul.mubr.msk.f32.gmra.mrb[16].mxu1 %vm1362_vm1, %v7840_v12  ;;  %v8270_v12 = vmul.f32 %v22206_v31, %v22205_v47 }
 0x56a   : > { %15748 = vmatprep.mubr.msk.f32.mxu1 %vm1362_vm1, %v7841_v39  ;;  %v22208_v39 = vld [vmem:[#allocation102_spill] sm:$0xff] }
 0x56d   : > { %15749 = vmatmul.mubr.msk.f32.gmra.mrb[18].mxu1 %vm1362_vm1, %v7842_v51  ;;  %v22209_v51 = vld [vmem:[#allocation45_spill] sm:$0xff] }
 0x56e   : > { %15751 = vmatprep.mubr.msk.f32.mxu1 %vm1362_vm1, %v7843_v43  ;;  %v8272_v43 = vmul.f32 %v22209_v51, %v22208_v39 }
 0x571   : > { %15752 = vmatmul.mubr.msk.f32.gmra.mrb[20].mxu1 %vm1362_vm1, %v7844_v60  ;;  %v22210_v60 = vld [vmem:[#allocation46_spill] sm:$0xff] }
 0x572   : > { %15754 = vmatprep.mubr.msk.f32.mxu1 %vm1362_vm1, %v7845_v55  ;;  %v8243_v55 = vld [vmem:[#allocation3 + $0x119] sm:$0xff] }
 0x575   : > { %15755 = vmatmul.mubr.msk.f32.gmra.mrb[22].mxu1 %vm1362_vm1, %v7846_v34  ;;  %v8276_v34 = vmul.f32 %v18179_v4, %v8244_v57 }
 0x576   : > { %15757 = vmatprep.mubr.msk.f32.mxu1 %vm1362_vm1, %v7847_v49  ;;  %v20078_v49 = vld [vmem:[%s22211_s10] ss:$0 sm:$0xff] }
 0x579   : > { %15758 = vmatmul.mubr.msk.f32.gmra.mrb[24].mxu1 %vm1362_vm1, %v7848_v36 }
 0x57a   : > { %15760 = vmatprep.mubr.msk.f32.mxu1 %vm1362_vm1, %v7849_v40 }
 0x57d   : > { %15761 = vmatmul.mubr.msk.f32.gmra.mrb[26].mxu1 %vm1362_vm1, %v7850_v33 }
 0x57e   : > { %15763 = vmatprep.mubr.msk.f32.mxu1 %vm1362_vm1, %v19781_v15  ;;  %v8248_v15 = vmul.f32 %v18123_v52, %v19510_v37  ;;  %v22188_v37 = vld [vmem:[#allocation36_spill] sm:$0xff] }
 0x57f   : > { %v8254_v53 = vmul.f32 %v22188_v37, %v19537_v35  ;;  %v22194_v35 = vld [vmem:[#allocation85_spill] sm:$0xff] }
 0x580   : > { %v8260_v19 = vmul.f32 %v22195_v6, %v22194_v35 }
 0x581   : > { %15764 = vmatmul.mubr.msk.f32.gmra.mrb[28].mxu1 %vm1362_vm1, %v19785_v48  ;;  %v8250_v48 = vmul.f32 %v22145_v58, %v19519_v2  ;;  %v22190_v2 = vld [vmem:[#allocation37_spill] sm:$0xff] }
 0x582   : > { %15766 = vmatprep.mubr.msk.f32.mxu1 %vm1362_vm1, %v7853_v13  ;;  %v8256_v58 = vmul.f32 %v22190_v2, %v19546_v44  ;;  %v22196_v44 = vld [vmem:[#allocation88_spill] sm:$0xff] }
 0x583   : > { %v8262_v41 = vmul.f32 %v22197_v0, %v22196_v44 }
 0x585   : > { %15767 = vmatmul.mubr.msk.f32.gmra.mrb[30].mxu1 %vm1362_vm1, %v7854_v63 }
 0x586   : > { %15777 = vmatprep.mubr.msk.f32.mxu1 %vm1362_vm1, %v19503_v46  ;;  %v22185_v46 = vld [vmem:[#allocation82_spill] sm:$0xff] }
 0x589   : > { %15778 = vmatmul.mubr.msk.f32.vlgmr.msra.gmra.mrb[0].mxu1 %vm1362_vm1, %v8246_v18 }
 0x58a   : > { %15780 = vmatprep.mubr.msk.f32.mxu1 %vm1362_vm1, %v19513_v9  ;;  %v22187_v9 = vld [vmem:[#allocation83_spill] sm:$0xff] }
 0x58d   : > { %15781 = vmatmul.mubr.msk.f32.gmra.mrb[2].mxu1 %vm1362_vm1, %v8248_v15 }
 0x58e   : > { %15783 = vmatprep.mubr.msk.f32.mxu1 %vm1362_vm1, %v22146_v20  ;;  %v22189_v20 = vld [vmem:[#allocation84_spill] sm:$0xff] }
 0x591   : > { %15784 = vmatmul.mubr.msk.f32.gmra.mrb[4].mxu1 %vm1362_vm1, %v8250_v48 }
 0x592   : > { %15786 = vmatprep.mubr.msk.f32.mxu1 %vm1362_vm1, %v22185_v46 }
 0x595   : > { %15787 = vmatmul.mubr.msk.f32.gmra.mrb[6].mxu1 %vm1362_vm1, %v8252_v61 }
 0x596   : > { %15789 = vmatprep.mubr.msk.f32.mxu1 %vm1362_vm1, %v22187_v9 }
 0x599   : > { %15790 = vmatmul.mubr.msk.f32.gmra.mrb[8].mxu1 %vm1362_vm1, %v8254_v53 }
 0x59a   : > { %15792 = vmatprep.mubr.msk.f32.mxu1 %vm1362_vm1, %v22189_v20 }
 0x59d   : > { %15793 = vmatmul.mubr.msk.f32.gmra.mrb[10].mxu1 %vm1362_vm1, %v8256_v58 }
 0x59e   : > { %15795 = vmatprep.mubr.msk.f32.mxu1 %vm1362_vm1, %v22191_v8 }
 0x5a1   : > { %15796 = vmatmul.mubr.msk.f32.gmra.mrb[12].mxu1 %vm1362_vm1, %v8258_v14 }
 0x5a2   : > { %15798 = vmatprep.mubr.msk.f32.mxu1 %vm1362_vm1, %v22193_v54 }
 0x5a5   : > { %15799 = vmatmul.mubr.msk.f32.gmra.mrb[14].mxu1 %vm1362_vm1, %v8260_v19 }
 0x5a6   : > { %15801 = vmatprep.mubr.msk.f32.mxu1 %vm1362_vm1, %v22158_v10  ;;  %v22203_v10 = vld [vmem:[#allocation95_spill] sm:$0xff] }
 0x5a9   : > { %15802 = vmatmul.mubr.msk.f32.gmra.mrb[16].mxu1 %vm1362_vm1, %v8262_v41 }
 0x5aa   : > { %15804 = vmatprep.mubr.msk.f32.mxu1 %vm1362_vm1, %v22198_v16 }
 0x5ad   : > { %15805 = vmatmul.mubr.msk.f32.gmra.mrb[18].mxu1 %vm1362_vm1, %v8264_v50 }
 0x5ae   : > { %15807 = vmatprep.mubr.msk.f32.mxu1 %vm1362_vm1, %v22201_v17 }
 0x5b1   : > { %15808 = vmatmul.mubr.msk.f32.gmra.mrb[20].mxu1 %vm1362_vm1, %v8266_v42 }
 0x5b2   : > { %15810 = vmatprep.mubr.msk.f32.mxu1 %vm1362_vm1, %v22203_v10 }
 0x5b5   : > { %15811 = vmatmul.mubr.msk.f32.gmra.mrb[22].mxu1 %vm1362_vm1, %v8268_v45 }
 0x5b6   : > { %15813 = vmatprep.mubr.msk.f32.mxu1 %vm1362_vm1, %v22168_v62  ;;  %v8274_v62 = vmul.f32 %v22210_v60, %v19867_v32 }
 0x5b9   : > { %15814 = vmatmul.mubr.msk.f32.gmra.mrb[24].mxu1 %vm1362_vm1, %v8270_v12 }
 0x5ba   : > { %15816 = vmatprep.mubr.msk.f32.mxu1 %vm1362_vm1, %v22207_v7 }
 0x5bd   : > { %15817 = vmatmul.mubr.msk.f32.gmra.mrb[26].mxu1 %vm1362_vm1, %v8272_v43 }
 0x5be   : > { %15819 = vmatprep.mubr.msk.f32.mxu1 %vm1362_vm1, %v19870_v11 }
 0x5c1   : > { %15820 = vmatmul.mubr.msk.f32.gmra.mrb[28].mxu1 %vm1362_vm1, %v8274_v62 }
 0x5c2   : > { %15822 = vmatprep.mubr.msk.f32.mxu1 %vm1362_vm1, %v8243_v55 }
 0x5c5   : > { %15823 = vmatmul.mubr.msk.f32.gmra.mrb[30].mxu1 %vm1362_vm1, %v8276_v34 }
 0x65c   : > { %v15779_v11 = vpop.f32.mrb[0].mxu1 }
 0x65d   : > { %v20081_v36 = vadd.f32 %v15779_v11, %v20078_v49  ;;  %v8444_v32 = vpop.f32.mrb[1].mxu1 }
 0x65e   : > { %v20084_v40 = vadd.f32 %v20078_v49, %v8444_v32 }
 0x65f   : > { %v8675_v33 = vsel %vm1362_vm1, %v20081_v36, 0.0 }
 0x660   : > { %v8674_v13 = vsel %vm1362_vm1, %v20084_v40, 0.0  ;;  %v15782_v63 = vpop.f32.mrb[2].mxu1 }
 0x661   : > { %v8454_v18 = vpop.f32.mrb[3].mxu1  ;;  %v20091_v15 = vadd.f32 %v15782_v63, %v20078_v49  ;;  %v8676_v46 = vadd.f32 %v8675_v33, %v8674_v13 }
 0x662   : > { %v20094_v48 = vadd.f32 %v20078_v49, %v8454_v18 }
 0x663   : > { %v8679_v53 = vsel %vm1362_vm1, %v20091_v15, 0.0 }
 0x664   : > { %v8677_v3 = vsel %vm1362_vm1, %v20094_v48, 0.0  ;;  %v15785_v61 = vpop.f32.mrb[4].mxu1 }
 0x665   : > { %v8678_v9 = vadd.f32 %v8677_v3, %v8676_v46  ;;  %v8464_v37 = vpop.f32.mrb[5].mxu1  ;;  %v20101_v20 = vadd.f32 %v15785_v61, %v20078_v49 }
 0x666   : > { %v20104_v2 = vadd.f32 %v20078_v49, %v8464_v37 }
 0x667   : > { %v8680_v58 = vadd.f32 %v8679_v53, %v8678_v9  ;;  %v8683_v35 = vsel %vm1362_vm1, %v20101_v20, 0.0 }
 0x668   : > { %v8681_v8 = vsel %vm1362_vm1, %v20104_v2, 0.0  ;;  %v15788_v56 = vpop.f32.mrb[6].mxu1 }
 0x669   : > { %v8682_v14 = vadd.f32 %v8681_v8, %v8680_v58  ;;  %v8474_v54 = vpop.f32.mrb[7].mxu1  ;;  %v20111_v6 = vadd.f32 %v15788_v56, %v20078_v49 }
 0x66a   : > { %v20114_v19 = vadd.f32 %v20078_v49, %v8474_v54 }
 0x66b   : > { %v8684_v44 = vadd.f32 %v8683_v35, %v8682_v14  ;;  %v8687_v59 = vsel %vm1362_vm1, %v20111_v6, 0.0 }
 0x66c   : > { %v8685_v0 = vsel %vm1362_vm1, %v20114_v19, 0.0  ;;  %v15791_v41 = vpop.f32.mrb[8].mxu1 }
 0x66d   : > { %v8686_v16 = vadd.f32 %v8685_v0, %v8684_v44  ;;  %v8484_v38 = vpop.f32.mrb[9].mxu1  ;;  %v20121_v50 = vadd.f32 %v15791_v41, %v20078_v49 }
 0x66e   : > { %v20124_v17 = vadd.f32 %v20078_v49, %v8484_v38 }
 0x66f   : > { %v8688_v1 = vadd.f32 %v8687_v59, %v8686_v16  ;;  %v8691_v47 = vsel %vm1362_vm1, %v20121_v50, 0.0 }
 0x670   : > { %v8689_v42 = vsel %vm1362_vm1, %v20124_v17, 0.0  ;;  %v15794_v10 = vpop.f32.mrb[10].mxu1 }
 0x671   : > { %v8690_v5 = vadd.f32 %v8689_v42, %v8688_v1  ;;  %v8494_v45 = vpop.f32.mrb[11].mxu1  ;;  %v20131_v31 = vadd.f32 %v15794_v10, %v20078_v49 }
 0x672   : > { %v20134_v12 = vadd.f32 %v20078_v49, %v8494_v45 }
 0x673   : > { %v8692_v7 = vadd.f32 %v8691_v47, %v8690_v5  ;;  %v8695_v60 = vsel %vm1362_vm1, %v20131_v31, 0.0 }
 0x674   : > { %v8693_v39 = vsel %vm1362_vm1, %v20134_v12, 0.0  ;;  %v15797_v51 = vpop.f32.mrb[12].mxu1 }
 0x675   : > { %v8694_v43 = vadd.f32 %v8693_v39, %v8692_v7  ;;  %v8504_v57 = vpop.f32.mrb[13].mxu1  ;;  %v20141_v62 = vadd.f32 %v15797_v51, %v20078_v49 }
 0x676   : > { %v20144_v55 = vadd.f32 %v20078_v49, %v8504_v57 }
 0x677   : > { %v8696_v34 = vadd.f32 %v8695_v60, %v8694_v43  ;;  %v8699_v63 = vsel %vm1362_vm1, %v20141_v62, 0.0 }
 0x678   : > { %v8697_v11 = vsel %vm1362_vm1, %v20144_v55, 0.0  ;;  %v15800_v32 = vpop.f32.mrb[14].mxu1 }
 0x679   : > { %v8698_v33 = vadd.f32 %v8697_v11, %v8696_v34  ;;  %v8514_v13 = vpop.f32.mrb[15].mxu1  ;;  %v20151_v18 = vadd.f32 %v15800_v32, %v20078_v49 }
 0x67a   : > { %v20154_v46 = vadd.f32 %v20078_v49, %v8514_v13 }
 0x67b   : > { %v8700_v3 = vadd.f32 %v8699_v63, %v8698_v33  ;;  %v8703_v58 = vsel %vm1362_vm1, %v20151_v18, 0.0 }
 0x67c   : > { %v8701_v61 = vsel %vm1362_vm1, %v20154_v46, 0.0  ;;  %v15803_v9 = vpop.f32.mrb[16].mxu1 }
 0x67d   : > { %v8702_v37 = vadd.f32 %v8701_v61, %v8700_v3  ;;  %v8524_v53 = vpop.f32.mrb[17].mxu1  ;;  %v20161_v8 = vadd.f32 %v15803_v9, %v20078_v49 }
 0x67e   : > { %v20164_v56 = vadd.f32 %v20078_v49, %v8524_v53 }
 0x67f   : > { %v8704_v14 = vadd.f32 %v8703_v58, %v8702_v37  ;;  %v8707_v41 = vsel %vm1362_vm1, %v20161_v8, 0.0 }
 0x680   : > { %v8705_v54 = vsel %vm1362_vm1, %v20164_v56, 0.0  ;;  %v15806_v35 = vpop.f32.mrb[18].mxu1 }
 0x681   : > { %v8706_v44 = vadd.f32 %v8705_v54, %v8704_v14  ;;  %v8534_v0 = vpop.f32.mrb[19].mxu1  ;;  %v20171_v16 = vadd.f32 %v15806_v35, %v20078_v49 }
 0x682   : > { %v20174_v38 = vadd.f32 %v20078_v49, %v8534_v0 }
 0x683   : > { %v8708_v59 = vadd.f32 %v8707_v41, %v8706_v44  ;;  %v8711_v45 = vsel %vm1362_vm1, %v20171_v16, 0.0 }
 0x684   : > { %v8709_v1 = vsel %vm1362_vm1, %v20174_v38, 0.0  ;;  %v15809_v42 = vpop.f32.mrb[20].mxu1 }
 0x685   : > { %v8710_v10 = vadd.f32 %v8709_v1, %v8708_v59  ;;  %v8544_v5 = vpop.f32.mrb[21].mxu1  ;;  %v20181_v47 = vadd.f32 %v15809_v42, %v20078_v49 }
 0x686   : > { %v20184_v7 = vadd.f32 %v20078_v49, %v8544_v5 }
 0x687   : > { %v8712_v39 = vadd.f32 %v8711_v45, %v8710_v10  ;;  %v8715_v34 = vsel %vm1362_vm1, %v20181_v47, 0.0 }
 0x688   : > { %v8713_v51 = vsel %vm1362_vm1, %v20184_v7, 0.0  ;;  %v15812_v43 = vpop.f32.mrb[22].mxu1 }
 0x689   : > { %v8714_v57 = vadd.f32 %v8713_v51, %v8712_v39  ;;  %v8554_v60 = vpop.f32.mrb[23].mxu1  ;;  %v20191_v11 = vadd.f32 %v15812_v43, %v20078_v49 }
 0x68a   : > { %v20194_v32 = vadd.f32 %v20078_v49, %v8554_v60 }
 0x68b   : > { %v8716_v33 = vadd.f32 %v8715_v34, %v8714_v57  ;;  %v8719_v9 = vsel %vm1362_vm1, %v20191_v11, 0.0 }
 0x68c   : > { %v8717_v13 = vsel %vm1362_vm1, %v20194_v32, 0.0  ;;  %v15815_v63 = vpop.f32.mrb[24].mxu1 }
 0x68d   : > { %v8718_v3 = vadd.f32 %v8717_v13, %v8716_v33  ;;  %v8564_v61 = vpop.f32.mrb[25].mxu1  ;;  %v20201_v37 = vadd.f32 %v15815_v63, %v20078_v49 }
 0x68e   : > { %v20204_v53 = vadd.f32 %v20078_v49, %v8564_v61 }
 0x68f   : > { %v8720_v58 = vadd.f32 %v8719_v9, %v8718_v3  ;;  %v8723_v0 = vsel %vm1362_vm1, %v20201_v37, 0.0 }
 0x690   : > { %v8721_v14 = vsel %vm1362_vm1, %v20204_v53, 0.0  ;;  %v15818_v54 = vpop.f32.mrb[26].mxu1 }
 0x691   : > { %v8722_v35 = vadd.f32 %v8721_v14, %v8720_v58  ;;  %v8574_v44 = vpop.f32.mrb[27].mxu1  ;;  %v20211_v41 = vadd.f32 %v15818_v54, %v20078_v49 }
 0x692   : > { %v20214_v59 = vadd.f32 %v20078_v49, %v8574_v44 }
 0x693   : > { %v8724_v1 = vadd.f32 %v8723_v0, %v8722_v35  ;;  %v8727_v39 = vsel %vm1362_vm1, %v20211_v41, 0.0 }
 0x694   : > { %v8725_v42 = vsel %vm1362_vm1, %v20214_v59, 0.0  ;;  %v15821_v10 = vpop.f32.mrb[28].mxu1 }
 0x695   : > { %v8726_v5 = vadd.f32 %v8725_v42, %v8724_v1  ;;  %v8584_v45 = vpop.f32.mrb[29].mxu1  ;;  %v20221_v51 = vadd.f32 %v15821_v10, %v20078_v49 }
 0x696   : > { %v20224_v43 = vadd.f32 %v20078_v49, %v8584_v45 }
 0x697   : > { %v8728_v57 = vadd.f32 %v8727_v39, %v8726_v5  ;;  %v8731_v63 = vsel %vm1362_vm1, %v20221_v51, 0.0 }
 0x698   : > { %v8729_v60 = vsel %vm1362_vm1, %v20224_v43, 0.0  ;;  %v15824_v34 = vpop.f32.mrb[30].mxu1 }
 0x699   : > { %v8730_v33 = vadd.f32 %v8729_v60, %v8728_v57  ;;  %v8594_v13 = vpop.f32.mrb[31].mxu1  ;;  %v20231_v3 = vadd.f32 %v15824_v34, %v20078_v49  ;;  %v17549_v60 = vmov 0   ;;  %v8751_v34 = vld [vmem:[%s554_s23] sm:$0x3] }
 0x69a   : > { %v20234_v61 = vadd.f32 %v20078_v49, %v8594_v13  ;;  %v8745_v49 = vld [vmem:[%s22212_s12] sm:$0x3]  ;;  %17408 = vset.pattern.permute.xlu0 %v17549_v60 }
 0x69b   : > { %v8732_v9 = vadd.f32 %v8731_v63, %v8730_v33  ;;  %v8735_v54 = vsel %vm1362_vm1, %v20231_v3, 0.0  ;;  %v22213_v60 = vld [vmem:[#allocation15_spill] sm:$0xff] }
 0x69c   : > { %v8733_v58 = vsel %vm1362_vm1, %v20234_v61, 0.0 }
 0x69d   : > { %v8734_v14 = vadd.f32 %v8733_v58, %v8732_v9  ;;  %v8754_v9 = vld [vmem:[%s558_s30] sm:$0x3] }
 0x69f   : > { %v8736_v35 = vadd.f32 %v8735_v54, %v8734_v14 }
 0x6a1   : > { %v8737_v44 = vrot.slane %v8736_v35, 4 }
 0x6a3   : > { %v8738_v0 = vadd.f32 %v8737_v44, %v8736_v35 }
 0x6a5   : > { %v8739_v1 = vrot.slane %v8738_v0, 2 }
 0x6a7   : > { %v8740_v42 = vadd.f32 %v8739_v1, %v8738_v0 }
 0x6a9   : > { %v8741_v10 = vrot.slane %v8740_v42, 1 }
 0x6ab   : > { %v8742_v5 = vadd.f32 %v8741_v10, %v8740_v42  ;;  %v8768_v10 = vld [vmem:[%s561_s17] sm:$0x1] }
 0x6ad   : > { %v8744_v45 = vmul.f32 0.00390625, %v8742_v5 }
 0x6af   : > { %v8746_v39 = vmul.f32 %v8745_v49, %v8744_v45 }
 0x6b1   : > { %v8748_v57 = vsel %vm8747_vm2, %v8746_v39, 0.0 }
 0x6b2   : > { %8749 = vadd.xlane.f32.xlu0 %v8748_v57 }
 0x73f   : > { %v8750_v33 = vpop.xlane.xlu0 %8749 }
 0x740   : > { %v8752_v13 = vadd.f32 %v8751_v34, %v8750_v33  ;;  %v8810_v34 = vsub.s32 0, %v22213_v60 }
 0x742   : > { %v8753_v63 = vmax.f32 %v8752_v13, 0.0 }
 0x744   : > { %8757 = vperm.xlu0 %17408, %v8753_v63  }
 0x7c3   : > { %v8758_v58 = vpop.permute.xlu0 %8757 }
 0x7c4   : > { %v8760_v14 = vmul.f32 %v8758_v58, %v8754_v9 }
 0x7c6   : > { %v8761_v54 = vsel %vm8747_vm2, %v8760_v14, 0.0 }
 0x7c7   : > { %v8762_v35 = vrot.slane %v8761_v54, 4 }
 0x7c9   : > { %v8763_v44 = vadd.f32 %v8762_v35, %v8761_v54 }
 0x7cb   : > { %v8764_v0 = vrot.slane %v8763_v44, 2 }
 0x7cd   : > { %v8765_v1 = vadd.f32 %v8764_v0, %v8763_v44 }
 0x7cf   : > { %v8766_v42 = vrot.slane %v8765_v1, 1 }
 0x7d1   : > { %v8767_v5 = vadd.f32 %v8766_v42, %v8765_v1 }
 0x7d3   : > { %v8769_v49 = vadd.f32 %v8768_v10, %v8767_v5  ;;  %v8776_v10 = vld [vmem:[#allocation2 + $0x18] sm:$0xff]  ;;  %v8778_v5 = vld [vmem:[#allocation2 + $0x28] sm:$0xff] }
 0x7d5   : > { %v13550_v45 = vmul.f32 -1.442695, %v8769_v49  ;;  %v8780_v49 = vld [vmem:[#allocation2 + $0x38] sm:$0xff] }
 0x7d7   : > { %17409 = vpow2.f32 %v13550_v45  ;;  %v8782_v45 = vld [vmem:[#allocation2 + $0x48] sm:$0xff] }
 0x7e1   : > { %v17410_v39 = vpop.eup %17409 }
 0x7e2   : > { %v8773_v57 = vadd.f32 1.0, %v17410_v39 }
 0x7e4   : > { %17411 = vrcp.f32 %v8773_v57  ;;  %v8786_v57 = vld [vmem:[#allocation2 + $0x68] sm:$0xff] }
 0x7ee   : > { %v17412_v33 = vpop.eup %17411 }
 0x7ef   : > { %v8811_v13 = vrot.slane %v17412_v33, %v8810_v34  ;;  %v8788_v34 = vld [vmem:[#allocation2 + $0x78] sm:$0xff]  ;;  %v8789_v33 = vld [vmem:[#allocation2 + $0x80] sm:$0xff] }
 0x7f1   : > { %v8812_v63 = vmul.f32 %v8811_v13, %v20084_v40  ;;  %v8813_v9 = vmul.f32 %v8811_v13, %v20081_v36  ;;  %v8814_v58 = vmul.f32 %v8811_v13, %v20094_v48  ;;  %v8815_v14 = vmul.f32 %v8811_v13, %v20091_v15  ;;  %v8777_v48 = vld [vmem:[#allocation2 + $0x20] sm:$0xff]  ;;  %v8779_v15 = vld [vmem:[#allocation2 + $0x30] sm:$0xff] }
 0x7f2   : > { %v8816_v54 = vmul.f32 %v8811_v13, %v20104_v2  ;;  %v8817_v35 = vmul.f32 %v8811_v13, %v20101_v20  ;;  %v8818_v44 = vmul.f32 %v8811_v13, %v20114_v19  ;;  %v8819_v0 = vmul.f32 %v8811_v13, %v20111_v6 }
 0x7f3   : > { %v8820_v1 = vmul.f32 %v8811_v13, %v20124_v17  ;;  %v8821_v42 = vmul.f32 %v8811_v13, %v20121_v50  ;;  %v8822_v40 = vmul.f32 %v8811_v13, %v20134_v12  ;;  %v8823_v36 = vmul.f32 %v8811_v13, %v20131_v31  ;;  %v8781_v17 = vld [vmem:[#allocation2 + $0x40] sm:$0xff]  ;;  %v8783_v50 = vld [vmem:[#allocation2 + $0x50] sm:$0xff] }
 0x7f4   : > { %v8824_v2 = vmul.f32 %v8811_v13, %v20144_v55  ;;  %v8825_v20 = vmul.f32 %v8811_v13, %v20141_v62  ;;  %v8826_v19 = vmul.f32 %v8811_v13, %v20154_v46  ;;  %v8827_v6 = vmul.f32 %v8811_v13, %v20151_v18  ;;  %v8784_v62 = vld [vmem:[#allocation2 + $0x58] sm:$0xff]  ;;  %v8785_v46 = vld [vmem:[#allocation2 + $0x60] sm:$0xff] }
 0x7f5   : > { %v20278_v12 = vmul.f32 %v8811_v13, %v20164_v56  ;;  %v20281_v31 = vmul.f32 %v8811_v13, %v20161_v8  ;;  %v20284_v39 = vmul.f32 %v8811_v13, %v20174_v38  ;;  %v20287_v55 = vmul.f32 %v8811_v13, %v20171_v16  ;;  %v8787_v38 = vld [vmem:[#allocation2 + $0x70] sm:$0xff] }
 0x7f6   : > { %v20290_v18 = vmul.f32 %v8811_v13, %v20184_v7  ;;  %v20293_v60 = vmul.f32 %v8811_v13, %v20181_v47  ;;  %v20296_v56 = vmul.f32 %v8811_v13, %v20194_v32  ;;  %v20299_v8 = vmul.f32 %v8811_v13, %v20191_v11  ;;  %v8790_v32 = vld [vmem:[#allocation2 + $0x88] sm:$0xff] }
 0x7f7   : > { %v20302_v16 = vmul.f32 %v8811_v13, %v20204_v53  ;;  %v20305_v30 = vmul.f32 %v8811_v13, %v20201_v37  ;;  %v20308_v7 = vmul.f32 %v8811_v13, %v20214_v59  ;;  %v20311_v47 = vmul.f32 %v8811_v13, %v20211_v41  ;;  %v8793_v59 = vld [vmem:[#allocation2 + $0xa0] sm:$0xff] }
 0x7f8   : > { %v20314_v11 = vmul.f32 %v8811_v13, %v20224_v43  ;;  %v20317_v4 = vmul.f32 %v8811_v13, %v20221_v51  ;;  %v20320_v53 = vmul.f32 %v8811_v13, %v20234_v61  ;;  %v20323_v37 = vmul.f32 %v8811_v13, %v20231_v3  ;;  %v8798_v43 = vld [vmem:[#allocation2 + $0xc8] sm:$0xff]  ;;  %v8800_v61 = vld [vmem:[#allocation2 + $0xd8] sm:$0xff] }
 0x7f9   : > { %22214 = vst [vmem:[#allocation48_spill] sm:$0xff] %v20308_v7  ;;  %22215 = vst [vmem:[#allocation49_spill] sm:$0xff] %v20311_v47  ;;  %v8844_v41 = vadd.f32 %v8812_v63, %v8776_v10  ;;  %v8845_v25 = vadd.f32 %v8813_v9, %v8777_v48  ;;  %v8846_v24 = vadd.f32 %v8814_v58, %v8778_v5  ;;  %v8799_v47 = vld [vmem:[#allocation2 + $0xd0] sm:$0xff]  ;;  %v8802_v63 = vld [vmem:[#allocation2 + $0xe8] sm:$0xff] }
 0x7fa   : > { %22216 = vst [vmem:[#allocation50_spill] sm:$0xff] %v20314_v11  ;;  %22217 = vst [vmem:[#allocation51_spill] sm:$0xff] %v20317_v4  ;;  %v8847_v23 = vadd.f32 %v8815_v14, %v8779_v15  ;;  %v8848_v52 = vadd.f32 %v8816_v54, %v8780_v49  ;;  %v8849_v11 = vadd.f32 %v8817_v35, %v8781_v17  ;;  %v8803_v9 = vld [vmem:[#allocation2 + $0xf0] sm:$0xff]  ;;  %v8804_v58 = vld [vmem:[#allocation2 + $0xf8] sm:$0xff] }
 0x7fb   : > { %22218 = vst [vmem:[#allocation52_spill] sm:$0xff] %v20320_v53  ;;  %22219 = vst [vmem:[#allocation53_spill] sm:$0xff] %v20323_v37  ;;  %v8850_v51 = vadd.f32 %v8818_v44, %v8782_v45  ;;  %v8851_v4 = vadd.f32 %v8819_v0, %v8783_v50  ;;  %v8801_v53 = vld [vmem:[#allocation2 + $0xe0] sm:$0xff]  ;;  %v8852_v7 = vadd.f32 %v8820_v1, %v8784_v62  ;;  %v8806_v0 = vld [vmem:[#allocation2 + $0x108] sm:$0xff] }
 0x7fc   : > { %v8853_v3 = vadd.f32 %v8821_v42, %v8785_v46  ;;  %v8854_v13 = vadd.f32 %v8822_v40, %v8786_v57  ;;  %v8855_v37 = vadd.f32 %v8823_v36, %v8787_v38  ;;  %8876 = vst.msk [vmem:[#allocation2 + $0x18] sm:$0xff] %vm1362_vm1, %v8844_v41  ;;  %8877 = vst.msk [vmem:[#allocation2 + $0x20] sm:$0xff] %vm1362_vm1, %v8845_v25  ;;  %v8805_v25 = vld [vmem:[#allocation2 + $0x100] sm:$0xff] }
 0x7fd   : > { %8878 = vst.msk [vmem:[#allocation2 + $0x28] sm:$0xff] %vm1362_vm1, %v8846_v24  ;;  %8879 = vst.msk [vmem:[#allocation2 + $0x30] sm:$0xff] %vm1362_vm1, %v8847_v23  ;;  %v8856_v14 = vadd.f32 %v8824_v2, %v8788_v34  ;;  %v8857_v54 = vadd.f32 %v8825_v20, %v8789_v33  ;;  %v8858_v35 = vadd.f32 %v8826_v19, %v8790_v32  ;;  %v8807_v24 = vld [vmem:[#allocation2 + $0x110] sm:$0xff] }
 0x7fe   : > { %v8859_v44 = vadd.f32 %v8827_v6, %v8791_v29  ;;  %8880 = vst.msk [vmem:[#allocation2 + $0x38] sm:$0xff] %vm1362_vm1, %v8848_v52  ;;  %8881 = vst.msk [vmem:[#allocation2 + $0x40] sm:$0xff] %vm1362_vm1, %v8849_v11  ;;  %v8860_v23 = vadd.f32 %v20278_v12, %v8792_v28  ;;  %v8861_v1 = vadd.f32 %v20281_v31, %v8793_v59 }
 0x7ff   : > { %8882 = vst.msk [vmem:[#allocation2 + $0x48] sm:$0xff] %vm1362_vm1, %v8850_v51  ;;  %8883 = vst.msk [vmem:[#allocation2 + $0x50] sm:$0xff] %vm1362_vm1, %v8851_v4  ;;  %v8862_v42 = vadd.f32 %v20284_v39, %v8794_v27  ;;  %v8863_v40 = vadd.f32 %v20287_v55, %v8795_v26  ;;  %v8864_v29 = vadd.f32 %v20290_v18, %v8796_v22 }
 0x800   : > { %8884 = vst.msk [vmem:[#allocation2 + $0x58] sm:$0xff] %vm1362_vm1, %v8852_v7  ;;  %8885 = vst.msk [vmem:[#allocation2 + $0x60] sm:$0xff] %vm1362_vm1, %v8853_v3  ;;  %v8865_v52 = vadd.f32 %v20293_v60, %v8797_v21  ;;  %v8866_v28 = vadd.f32 %v20296_v56, %v8798_v43  ;;  %v8867_v4 = vadd.f32 %v20299_v8, %v8799_v47  ;;  %v22220_v36 = vld [vmem:[#allocation48_spill] sm:$0xff]  ;;  %v22221_v10 = vld [vmem:[#allocation49_spill] sm:$0xff] }
 0x801   : > { %8886 = vst.msk [vmem:[#allocation2 + $0x68] sm:$0xff] %vm1362_vm1, %v8854_v13  ;;  %8887 = vst.msk [vmem:[#allocation2 + $0x70] sm:$0xff] %vm1362_vm1, %v8855_v37  ;;  %v8868_v26 = vadd.f32 %v20302_v16, %v8800_v61  ;;  %v8869_v27 = vadd.f32 %v20305_v30, %v8801_v53  ;;  %v8870_v22 = vadd.f32 %v22220_v36, %v8802_v63  ;;  %v22222_v48 = vld [vmem:[#allocation50_spill] sm:$0xff]  ;;  %v22223_v15 = vld [vmem:[#allocation51_spill] sm:$0xff] }
 0x802   : > { %8888 = vst.msk [vmem:[#allocation2 + $0x78] sm:$0xff] %vm1362_vm1, %v8856_v14  ;;  %8889 = vst.msk [vmem:[#allocation2 + $0x80] sm:$0xff] %vm1362_vm1, %v8857_v54  ;;  %v8871_v21 = vadd.f32 %v22221_v10, %v8803_v9  ;;  %v8872_v5 = vadd.f32 %v22222_v48, %v8804_v58  ;;  %v8873_v2 = vadd.f32 %v22223_v15, %v8805_v25  ;;  %v22224_v20 = vld [vmem:[#allocation52_spill] sm:$0xff]  ;;  %v22225_v6 = vld [vmem:[#allocation53_spill] sm:$0xff] }
 0x803   : > { %8890 = vst.msk [vmem:[#allocation2 + $0x88] sm:$0xff] %vm1362_vm1, %v8858_v35  ;;  %8891 = vst.msk [vmem:[#allocation2 + $0x90] sm:$0xff] %vm1362_vm1, %v8859_v44  ;;  %v8874_v19 = vadd.f32 %v22224_v20, %v8806_v0  ;;  %v8875_v30 = vadd.f32 %v22225_v6, %v8807_v24 }
 0x804   : > { %8892 = vst.msk [vmem:[#allocation2 + $0x98] sm:$0xff] %vm1362_vm1, %v8860_v23  ;;  %8893 = vst.msk [vmem:[#allocation2 + $0xa0] sm:$0xff] %vm1362_vm1, %v8861_v1 }
 0x805   : > { %8894 = vst.msk [vmem:[#allocation2 + $0xa8] sm:$0xff] %vm1362_vm1, %v8862_v42  ;;  %8895 = vst.msk [vmem:[#allocation2 + $0xb0] sm:$0xff] %vm1362_vm1, %v8863_v40  ;;  %8911 = sbr.rel (%p13551_p8) target bundleno = 2576 (0xa10), region = 80 }
 0x806   : > { %8896 = vst.msk [vmem:[#allocation2 + $0xb8] sm:$0xff] %vm1362_vm1, %v8864_v29  ;;  %8897 = vst.msk [vmem:[#allocation2 + $0xc0] sm:$0xff] %vm1362_vm1, %v8865_v52 }
 0x807   : > { %8898 = vst.msk [vmem:[#allocation2 + $0xc8] sm:$0xff] %vm1362_vm1, %v8866_v28  ;;  %8899 = vst.msk [vmem:[#allocation2 + $0xd0] sm:$0xff] %vm1362_vm1, %v8867_v4 }
 0x808   : > { %8900 = vst.msk [vmem:[#allocation2 + $0xd8] sm:$0xff] %vm1362_vm1, %v8868_v26  ;;  %8901 = vst.msk [vmem:[#allocation2 + $0xe0] sm:$0xff] %vm1362_vm1, %v8869_v27 }
 0x809   : > { %8902 = vst.msk [vmem:[#allocation2 + $0xe8] sm:$0xff] %vm1362_vm1, %v8870_v22  ;;  %8903 = vst.msk [vmem:[#allocation2 + $0xf0] sm:$0xff] %vm1362_vm1, %v8871_v21 }
 0x80a   : > { %8904 = vst.msk [vmem:[#allocation2 + $0xf8] sm:$0xff] %vm1362_vm1, %v8872_v5  ;;  %8905 = vst.msk [vmem:[#allocation2 + $0x100] sm:$0xff] %vm1362_vm1, %v8873_v2 }
 0x80b   : > { %8906 = vst.msk [vmem:[#allocation2 + $0x108] sm:$0xff] %vm1362_vm1, %v8874_v19  ;;  %8907 = vst.msk [vmem:[#allocation2 + $0x110] sm:$0xff] %vm1362_vm1, %v8875_v30 }
 0x80c   : > { %v9013_v49 = vld [vmem:[#allocation6 + $0x20] sm:$0xff]  ;;  %v9014_v17 = vld [vmem:[#allocation6 + $0x28] sm:$0xff]  ;;  %v9015_v31 = vld [vmem:[#allocation6 + $0x30] sm:$0xff]  ;;  %s22406_s30 = sld [smem:[#allocation165_spill]] }
 0x80d   : > { %v10536_v45 = vld [vmem:[#allocation6 + $0x80] sm:$0xff]  ;;  %v16473_v50 = vpack.c.bf16 %v9014_v17, %v9013_v49  ;;  %v10537_v12 = vld [vmem:[#allocation6 + $0x88] sm:$0xff]  ;;  %v9016_v39 = vld [vmem:[#allocation6 + $0x38] sm:$0xff] }
 0x80e   : > { %v20374_v55 = vpack.c.bf16 %v10537_v12, %v10536_v45  ;;  %v16477_v62 = vpack.c.bf16 %v9016_v39, %v9015_v31  ;;  %v10538_v46 = vld [vmem:[#allocation6 + $0x90] sm:$0xff]  ;;  %v10539_v57 = vld [vmem:[#allocation6 + $0x98] sm:$0xff]  ;;  %v8980_v18 = vld [vmem:[#allocation2 + $0x8] sm:$0xff] }
 0x80f   : > { %16474 = vmatprep.subr.bf16.mxu1 %v16473_v50  ;;  %v20376_v60 = vpack.c.bf16 %v10539_v57, %v10538_v46  ;;  %15833 = vmatprep.mubr.msk.f32.mxu1 %vm1362_vm1, %v8980_v18  ;;  %v10503_v56 = vld [vmem:[#allocation2 + $0x18] sm:$0xff]  ;;  %v8976_v8 = vld [vmem:[#allocation6] sm:$0xff]  ;;  %v8977_v38 = vld [vmem:[#allocation6 + $0x8] sm:$0xff] }
 0x810   : > { %16506 = vmatprep.subr.bf16.mxu0 %v20374_v55  ;;  %16476 = vmatpush3.bf16.msra.mxu1 %v16473_v50  ;;  %v10958_v34 = vld [vmem:[#allocation6 + $0xa0] sm:$0xff]  ;;  %v16481_v33 = vpack.c.bf16 %v8977_v38, %v8976_v8  ;;  %v10959_v16 = vld [vmem:[#allocation6 + $0xa8] sm:$0xff]  ;;  %v8981_v47 = vld [vmem:[#allocation2 + $0x10] sm:$0xff] }
 0x811   : > { %22226 = vst [vmem:[#allocation105_spill] sm:$0xff] %v20376_v60  ;;  %16508 = vmatpush3.bf16.msra.mxu0 %v20374_v55  ;;  %16478 = vmatprep.subr.bf16.mxu1 %v16477_v62  ;;  %v16513_v7 = vpack.c.bf16 %v10959_v16, %v10958_v34  ;;  %v10960_v32 = vld [vmem:[#allocation6 + $0xb0] sm:$0xff]  ;;  %v10961_v11 = vld [vmem:[#allocation6 + $0xb8] sm:$0xff]  ;;  %v10504_v53 = vld [vmem:[#allocation2 + $0x20] sm:$0xff] }
 0x812   : > { %16510 = vmatprep.subr.bf16.mxu0 %v20376_v60  ;;  %16057 = vmatprep.mubr.msk.f32.mxu0 %vm1362_vm1, %v10503_v56  ;;  %v16517_v37 = vpack.c.bf16 %v10961_v11, %v10960_v32  ;;  %v20385_v59 = vld [vmem:[#allocation2 + $0x28] sm:$0xff]  ;;  %v8978_v41 = vld [vmem:[#allocation6 + $0x10] sm:$0xff]  ;;  %v8979_v43 = vld [vmem:[#allocation6 + $0x18] sm:$0xff] }
 0x813   : > { %v16485_v51 = vpack.c.bf16 %v8979_v43, %v8978_v41  ;;  %v11380_v61 = vld [vmem:[#allocation6 + $0xc0] sm:$0xff]  ;;  %v11381_v3 = vld [vmem:[#allocation6 + $0xc8] sm:$0xff]  ;;  %v20389_v13 = vld [vmem:[#allocation2 + $0x30] sm:$0xff] }
 0x814   : > { %16480 = vmatpush3.bf16.msra.mxu1 %v16477_v62  ;;  %22227 = vst [vmem:[#allocation106_spill] sm:$0xff] %v20389_v13  ;;  %v20393_v63 = vld [vmem:[#allocation2 + $0x38] sm:$0xff]  ;;  %v20395_v9 = vpack.c.bf16 %v11381_v3, %v11380_v61  ;;  %v20404_v58 = vld [vmem:[#allocation2 + $0x40] sm:$0xff]  ;;  %v20406_v14 = vld [vmem:[#allocation2 + $0x48] sm:$0xff] }
 0x815   : > { %16512 = vmatpush3.bf16.msra.mxu0 %v20376_v60  ;;  %16482 = vmatprep.subr.bf16.mxu1 %v16481_v33  ;;  %22228 = vst [vmem:[#allocation107_spill] sm:$0xff] %v20393_v63  ;;  %22229 = vst [vmem:[#allocation108_spill] sm:$0xff] %v20404_v58  ;;  %v20417_v54 = vld [vmem:[#allocation2 + $0x50] sm:$0xff]  ;;  %v20419_v35 = vld [vmem:[#allocation2 + $0x58] sm:$0xff] }
 0x816   : > { %16514 = vmatprep.subr.bf16.mxu0 %v16513_v7  ;;  %22230 = vst [vmem:[#allocation109_spill] sm:$0xff] %v20406_v14  ;;  %22231 = vst [vmem:[#allocation110_spill] sm:$0xff] %v20417_v54  ;;  %v9724_v44 = vld [vmem:[#allocation6 + $0x40] sm:$0xff]  ;;  %v9725_v25 = vld [vmem:[#allocation6 + $0x48] sm:$0xff] }
 0x817   : > { %15834 = vmatmul.mubr.msk.f32.vlgmr.msra.gmra.mrb[0].mxu1 %vm1362_vm1, %v8981_v47  ;;  %22232 = vst [vmem:[#allocation111_spill] sm:$0xff] %v20419_v35  ;;  %v20427_v0 = vpack.c.bf16 %v9725_v25, %v9724_v44  ;;  %v20431_v24 = vld [vmem:[#allocation2 + $0x60] sm:$0xff]  ;;  %v20433_v23 = vld [vmem:[#allocation2 + $0x68] sm:$0xff]  ;;  %v20444_v1 = vld [vmem:[#allocation2 + $0x70] sm:$0xff] }
 0x818   : > { %16058 = vmatmul.mubr.msk.f32.vlgmr.msra.gmra.mrb[0].mxu0 %vm1362_vm1, %v10504_v53  ;;  %16484 = vmatpush3.bf16.msra.mxu1 %v16481_v33  ;;  %22233 = vst [vmem:[#allocation112_spill] sm:$0xff] %v20431_v24  ;;  %22234 = vst [vmem:[#allocation113_spill] sm:$0xff] %v20433_v23  ;;  %v20446_v42 = vld [vmem:[#allocation2 + $0x78] sm:$0xff]  ;;  %v20456_v40 = vld [vmem:[#allocation2 + $0x80] sm:$0xff] }
 0x819   : > { %16516 = vmatpush3.bf16.msra.mxu0 %v16513_v7  ;;  %15836 = vmatprep.mubr.msk.f32.mxu1 %vm1362_vm1, %v10503_v56  ;;  %22235 = vst [vmem:[#allocation114_spill] sm:$0xff] %v20444_v1  ;;  %22236 = vst [vmem:[#allocation115_spill] sm:$0xff] %v20446_v42  ;;  %v20458_v29 = vld [vmem:[#allocation2 + $0x88] sm:$0xff]  ;;  %v20468_v52 = vld [vmem:[#allocation2 + $0x90] sm:$0xff] }
 0x81a   : > { %16060 = vmatprep.mubr.msk.f32.mxu0 %vm1362_vm1, %v20385_v59  ;;  %16518 = vmatprep.subr.bf16.mxu0 %v16517_v37  ;;  %22237 = vst [vmem:[#allocation116_spill] sm:$0xff] %v20456_v40  ;;  %22238 = vst [vmem:[#allocation117_spill] sm:$0xff] %v20458_v29  ;;  %v20470_v28 = vld [vmem:[#allocation2 + $0x21] sm:$0xff]  ;;  %v20472_v4 = vld [vmem:[#allocation2 + $0x19] sm:$0xff] }
 0x81b   : > { %15837 = vmatmul.mubr.msk.f32.gmra.mrb[2].mxu1 %vm1362_vm1, %v10504_v53  ;;  %16486 = vmatprep.subr.bf16.mxu1 %v16485_v51  ;;  %22239 = vst [vmem:[#allocation118_spill] sm:$0xff] %v20468_v52  ;;  %v11382_v26 = vld [vmem:[#allocation6 + $0xd0] sm:$0xff]  ;;  %v11383_v27 = vld [vmem:[#allocation6 + $0xd8] sm:$0xff]  ;;  %v22240_v36 = vld [vmem:[#allocation32_spill] sm:$0xff] }
 0x81c   : > { %16061 = vmatmul.mubr.msk.f32.gmra.mrb[2].mxu0 %vm1362_vm1, %v20389_v13  ;;  %15839 = vmatprep.mubr.msk.f32.mxu1 %vm1362_vm1, %v20385_v59  ;;  %v10926_v22 = vmul.f32 %v22240_v36, %v20470_v28  ;;  %v20484_v10 = vld [vmem:[#allocation2 + $0x98] sm:$0xff]  ;;  %v20488_v48 = vld [vmem:[#allocation2 + $0x29] sm:$0xff]  ;;  %v16525_v5 = vpack.c.bf16 %v11383_v27, %v11382_v26  ;;  %v11770_v15 = vld [vmem:[#allocation6 + $0xe0] sm:$0xff] }
 0x81d   : > { %16063 = vmatprep.mubr.msk.f32.mxu0 %vm1362_vm1, %v20393_v63  ;;  %16520 = vmatpush3.bf16.msra.mxu0 %v16517_v37  ;;  %22241 = vst [vmem:[#allocation119_spill] sm:$0xff] %v20484_v10  ;;  %v20486_v21 = vld [vmem:[#allocation2 + $0x31] sm:$0xff]  ;;  %v11771_v2 = vld [vmem:[#allocation6 + $0xe8] sm:$0xff]  ;;  %v20495_v20 = vld [vmem:[#allocation2 + $0xa0] sm:$0xff] }
 0x81e   : > { %16522 = vmatprep.subr.bf16.mxu0 %v20395_v9  ;;  %16488 = vmatpush3.bf16.msra.mxu1 %v16485_v51  ;;  %22242 = vst [vmem:[#allocation120_spill] sm:$0xff] %v20495_v20  ;;  %v22243_v19 = vld [vmem:[#allocation33_spill] sm:$0xff]  ;;  %v20502_v30 = vld [vmem:[#allocation2 + $0xa8] sm:$0xff]  ;;  %v20506_v17 = vld [vmem:[#allocation2 + $0x39] sm:$0xff]  ;;  %v20508_v45 = vpack.c.bf16 %v11771_v2, %v11770_v15 }
 0x81f   : > { %15840 = vmatmul.mubr.msk.f32.gmra.mrb[4].mxu1 %vm1362_vm1, %v20389_v13  ;;  %16490 = vmatprep.subr.bf16.mxu1 %v20427_v0  ;;  %v10928_v6 = vmul.f32 %v22243_v19, %v20486_v21  ;;  %22244 = vst [vmem:[#allocation121_spill] sm:$0xff] %v20502_v30  ;;  %v20504_v49 = vld [vmem:[#allocation2 + $0x41] sm:$0xff]  ;;  %v20515_v50 = vld [vmem:[#allocation2 + $0xb0] sm:$0xff]  ;;  %v22246_v12 = vld [vmem:[#allocation34_spill] sm:$0xff] }
 0x820   : > { %16064 = vmatmul.mubr.msk.f32.gmra.mrb[4].mxu0 %vm1362_vm1, %v20404_v58  ;;  %15842 = vmatprep.mubr.msk.f32.mxu1 %vm1362_vm1, %v20393_v63  ;;  %22245 = vst [vmem:[#allocation122_spill] sm:$0xff] %v20515_v50  ;;  %v10930_v31 = vmul.f32 %v22246_v12, %v20504_v49  ;;  %v20521_v39 = vld [vmem:[#allocation2 + $0xb8] sm:$0xff]  ;;  %v20525_v46 = vld [vmem:[#allocation2 + $0x49] sm:$0xff]  ;;  %v20533_v57 = vld [vmem:[#allocation2 + $0xc0] sm:$0xff] }
 0x821   : > { %16066 = vmatprep.mubr.msk.f32.mxu0 %vm1362_vm1, %v20406_v14  ;;  %22247 = vst [vmem:[#allocation123_spill] sm:$0xff] %v20521_v39  ;;  %v20523_v62 = vld [vmem:[#allocation2 + $0x51] sm:$0xff]  ;;  %22248 = vst [vmem:[#allocation124_spill] sm:$0xff] %v20533_v57  ;;  %v22249_v18 = vld [vmem:[#allocation35_spill] sm:$0xff] }
 0x822   : > { %v10932_v56 = vmul.f32 %v22249_v18, %v20523_v62  ;;  %v20539_v8 = vld [vmem:[#allocation2 + $0xc8] sm:$0xff]  ;;  %v20543_v34 = vld [vmem:[#allocation2 + $0x59] sm:$0xff]  ;;  %v20550_v33 = vld [vmem:[#allocation2 + $0xd0] sm:$0xff] }
 0x823   : > { %15843 = vmatmul.mubr.msk.f32.gmra.mrb[6].mxu1 %vm1362_vm1, %v20404_v58  ;;  %22250 = vst [vmem:[#allocation125_spill] sm:$0xff] %v20539_v8  ;;  %v20541_v38 = vld [vmem:[#allocation2 + $0x61] sm:$0xff]  ;;  %22251 = vst [vmem:[#allocation126_spill] sm:$0xff] %v20550_v33  ;;  %v20556_v47 = vld [vmem:[#allocation2 + $0xd8] sm:$0xff] }
 0x824   : > { %16067 = vmatmul.mubr.msk.f32.gmra.mrb[6].mxu0 %vm1362_vm1, %v20417_v54  ;;  %15845 = vmatprep.mubr.msk.f32.mxu1 %vm1362_vm1, %v20406_v14  ;;  %v22252_v16 = vld [vmem:[#allocation36_spill] sm:$0xff]  ;;  %22253 = vst [vmem:[#allocation127_spill] sm:$0xff] %v20556_v47  ;;  %v20558_v32 = vld [vmem:[#allocation2 + $0x71] sm:$0xff]  ;;  %v20567_v53 = vld [vmem:[#allocation2 + $0xe0] sm:$0xff] }
 0x825   : > { %16069 = vmatprep.mubr.msk.f32.mxu0 %vm1362_vm1, %v20419_v35  ;;  %v10934_v7 = vmul.f32 %v22252_v16, %v20541_v38  ;;  %v20560_v11 = vld [vmem:[#allocation2 + $0x69] sm:$0xff]  ;;  %22254 = vst [vmem:[#allocation128_spill] sm:$0xff] %v20567_v53  ;;  %v20575_v51 = vld [vmem:[#allocation2 + $0x81] sm:$0xff]  ;;  %v20577_v61 = vld [vmem:[#allocation2 + $0x79] sm:$0xff] }
 0x826   : > { %v22255_v37 = vld [vmem:[#allocation37_spill] sm:$0xff]  ;;  %v20573_v43 = vld [vmem:[#allocation2 + $0xe8] sm:$0xff]  ;;  %v20590_v25 = vld [vmem:[#allocation2 + $0xf8] sm:$0xff] }
 0x827   : > { %15846 = vmatmul.mubr.msk.f32.gmra.mrb[8].mxu1 %vm1362_vm1, %v20417_v54  ;;  %v10936_v41 = vmul.f32 %v22255_v37, %v20558_v32  ;;  %22256 = vst [vmem:[#allocation129_spill] sm:$0xff] %v20573_v43  ;;  %v20584_v3 = vld [vmem:[#allocation2 + $0xf0] sm:$0xff]  ;;  %22259 = vst [vmem:[#allocation131_spill] sm:$0xff] %v20590_v25  ;;  %v8912_v27 = vld [vmem:[#allocation2 + $0x7] sm:$0xff] }
 0x828   : > { %16070 = vmatmul.mubr.msk.f32.gmra.mrb[8].mxu0 %vm1362_vm1, %v20431_v24  ;;  %15848 = vmatprep.mubr.msk.f32.mxu1 %vm1362_vm1, %v20419_v35  ;;  %22257 = vst [vmem:[#allocation130_spill] sm:$0xff] %v20584_v3  ;;  %v20592_v26 = vld [vmem:[#allocation2 + $0x91] sm:$0xff]  ;;  %v22261_v15 = vld [vmem:[#allocation39_spill] sm:$0xff]  ;;  %v20703_v54 = vld [vmem:[#allocation2 + $0xe9] sm:$0xff] }
 0x829   : > { %16072 = vmatprep.mubr.msk.f32.mxu0 %vm1362_vm1, %v20433_v23  ;;  %v10940_v2 = vmul.f32 %v22261_v15, %v20592_v26  ;;  %v20633_v60 = vld [vmem:[#allocation2 + $0x1f] sm:$0xff]  ;;  %v20699_v35 = vld [vmem:[#allocation2 + $0xf1] sm:$0xff]  ;;  %22292 = vst [vmem:[#allocation152_spill] sm:$0xff] %v20703_v54  ;;  %v20737_v58 = vld [vmem:[#allocation2 + $0x87] sm:$0xff] }
 0x82a   : > { %22270 = vst [vmem:[#allocation138_spill] sm:$0xff] %v20633_v60  ;;  %22290 = vst [vmem:[#allocation150_spill] sm:$0xff] %v20699_v35  ;;  %v20721_v14 = vld [vmem:[#allocation2 + $0xf9] sm:$0xff] }
 0x82b   : > { %15849 = vmatmul.mubr.msk.f32.gmra.mrb[10].mxu1 %vm1362_vm1, %v20431_v24  ;;  %22298 = vst [vmem:[#allocation156_spill] sm:$0xff] %v20721_v14  ;;  %22303 = vst [vmem:[#allocation159_spill] sm:$0xff] %v20737_v58  ;;  %v20755_v63 = vld [vmem:[#allocation2 + $0x97] sm:$0xff]  ;;  %v12192_v13 = vld [vmem:[#allocation6 + $0x100] sm:$0xff] }
 0x82c   : > { %16073 = vmatmul.mubr.msk.f32.gmra.mrb[10].mxu0 %vm1362_vm1, %v20444_v1  ;;  %15851 = vmatprep.mubr.msk.f32.mxu1 %vm1362_vm1, %v20433_v23  ;;  %v20685_v23 = vld [vmem:[#allocation2 + $0xd9] sm:$0xff]  ;;  %22308 = vst [vmem:[#allocation162_spill] sm:$0xff] %v20755_v63 }
 0x82d   : > { %16075 = vmatprep.mubr.msk.f32.mxu0 %vm1362_vm1, %v20446_v42  ;;  %22286 = vst [vmem:[#allocation148_spill] sm:$0xff] %v20685_v23 }
 0x82f   : > { %15852 = vmatmul.mubr.msk.f32.gmra.mrb[12].mxu1 %vm1362_vm1, %v20444_v1  ;;  %v20683_v1 = vld [vmem:[#allocation2 + $0x57] sm:$0xff] }
 0x830   : > { %16076 = vmatmul.mubr.msk.f32.gmra.mrb[12].mxu0 %vm1362_vm1, %v20456_v40  ;;  %15854 = vmatprep.mubr.msk.f32.mxu1 %vm1362_vm1, %v20446_v42  ;;  %22285 = vst [vmem:[#allocation147_spill] sm:$0xff] %v20683_v1 }
 0x831   : > { %16078 = vmatprep.mubr.msk.f32.mxu0 %vm1362_vm1, %v20458_v29 }
 0x833   : > { %15855 = vmatmul.mubr.msk.f32.gmra.mrb[14].mxu1 %vm1362_vm1, %v20456_v40  ;;  %v22283_v40 = vld [vmem:[#allocation20_spill] sm:$0xff] }
 0x834   : > { %16079 = vmatmul.mubr.msk.f32.gmra.mrb[14].mxu0 %vm1362_vm1, %v20468_v52  ;;  %15857 = vmatprep.mubr.msk.f32.mxu1 %vm1362_vm1, %v20458_v29 }
 0x835   : > { %16113 = vmatprep.mubr.msk.f32.mxu0 %vm1362_vm1, %v20472_v4 }
 0x837   : > { %15858 = vmatmul.mubr.msk.f32.gmra.mrb[16].mxu1 %vm1362_vm1, %v20468_v52 }
 0x838   : > { %16114 = vmatmul.mubr.msk.f32.vlgmr.msra.gmra.mrb[0].mxu0 %vm1362_vm1, %v10926_v22  ;;  %15860 = vmatprep.mubr.msk.f32.mxu1 %vm1362_vm1, %v20484_v10  ;;  %v20594_v22 = vld [vmem:[#allocation2 + $0x89] sm:$0xff] }
 0x839   : > { %16524 = vmatpush3.bf16.msra.mxu0 %v20395_v9  ;;  %16116 = vmatprep.mubr.msk.f32.mxu0 %vm1362_vm1, %v20488_v48  ;;  %v22258_v9 = vld [vmem:[#allocation38_spill] sm:$0xff] }
 0x83a   : > { %16526 = vmatprep.subr.bf16.mxu0 %v16525_v5  ;;  %v10938_v44 = vmul.f32 %v22258_v9, %v20575_v51 }
 0x83b   : > { %15861 = vmatmul.mubr.msk.f32.gmra.mrb[18].mxu1 %vm1362_vm1, %v20495_v20 }
 0x83c   : > { %16117 = vmatmul.mubr.msk.f32.gmra.mrb[2].mxu0 %vm1362_vm1, %v10928_v6  ;;  %15863 = vmatprep.mubr.msk.f32.mxu1 %vm1362_vm1, %v20502_v30  ;;  %v22262_v6 = vld [vmem:[#allocation16_spill] sm:$0xff]  ;;  %v22272_v30 = vld [vmem:[#allocation18_spill] sm:$0xff] }
 0x83d   : > { %16119 = vmatprep.mubr.msk.f32.mxu0 %vm1362_vm1, %v20506_v17  ;;  %16528 = vmatpush3.bf16.msra.mxu0 %v16525_v5  ;;  %v20601_v5 = vld [vmem:[#allocation2 + $0x100] sm:$0xff] }
 0x83e   : > { %16530 = vmatprep.subr.bf16.mxu0 %v20508_v45  ;;  %22260 = vst [vmem:[#allocation132_spill] sm:$0xff] %v20601_v5 }
 0x83f   : > { %15864 = vmatmul.mubr.msk.f32.gmra.mrb[20].mxu1 %vm1362_vm1, %v20515_v50 }
 0x840   : > { %16120 = vmatmul.mubr.msk.f32.gmra.mrb[4].mxu0 %vm1362_vm1, %v10930_v31  ;;  %15866 = vmatprep.mubr.msk.f32.mxu1 %vm1362_vm1, %v20521_v39  ;;  %v8944_v31 = vmul.f32 %v22262_v6, %v8912_v27  ;;  %v22265_v27 = vld [vmem:[#allocation40_spill] sm:$0xff]  ;;  %v22271_v39 = vld [vmem:[#allocation41_spill] sm:$0xff] }
 0x841   : > { %16122 = vmatprep.mubr.msk.f32.mxu0 %vm1362_vm1, %v20525_v46 }
 0x843   : > { %15867 = vmatmul.mubr.msk.f32.gmra.mrb[22].mxu1 %vm1362_vm1, %v20533_v57 }
 0x844   : > { %16123 = vmatmul.mubr.msk.f32.gmra.mrb[6].mxu0 %vm1362_vm1, %v10932_v56  ;;  %15869 = vmatprep.mubr.msk.f32.mxu1 %vm1362_vm1, %v20539_v8  ;;  %v20608_v56 = vld [vmem:[#allocation2 + $0xa1] sm:$0xff] }
 0x845   : > { %16125 = vmatprep.mubr.msk.f32.mxu0 %vm1362_vm1, %v20543_v34  ;;  %v20626_v8 = vld [vmem:[#allocation2 + $0x27] sm:$0xff] }
 0x846   : > { %22268 = vst [vmem:[#allocation136_spill] sm:$0xff] %v20626_v8  ;;  %v8948_v20 = vmul.f32 %v22272_v30, %v20626_v8 }
 0x847   : > { %15870 = vmatmul.mubr.msk.f32.gmra.mrb[24].mxu1 %vm1362_vm1, %v20550_v33  ;;  %v20624_v33 = vld [vmem:[#allocation2 + $0xb1] sm:$0xff] }
 0x848   : > { %16126 = vmatmul.mubr.msk.f32.gmra.mrb[8].mxu0 %vm1362_vm1, %v10934_v7  ;;  %15872 = vmatprep.mubr.msk.f32.mxu1 %vm1362_vm1, %v20556_v47  ;;  %v20610_v7 = vld [vmem:[#allocation2 + $0x99] sm:$0xff]  ;;  %22267 = vst [vmem:[#allocation135_spill] sm:$0xff] %v20624_v33  ;;  %v10944_v50 = vmul.f32 %v22271_v39, %v20624_v33  ;;  %v11347_v33 = vmul.f32 %v22262_v6, %v20626_v8  ;;  %v20768_v8 = vld [vmem:[#allocation2 + $0xa7] sm:$0xff] }
 0x849   : > { %16128 = vmatprep.mubr.msk.f32.mxu0 %vm1362_vm1, %v20560_v11  ;;  %22263 = vst [vmem:[#allocation133_spill] sm:$0xff] %v20610_v7  ;;  %22310 = vst [vmem:[#allocation163_spill] sm:$0xff] %v20768_v8 }
 0x84b   : > { %15873 = vmatmul.mubr.msk.f32.gmra.mrb[26].mxu1 %vm1362_vm1, %v20567_v53  ;;  %v22266_v53 = vld [vmem:[#allocation17_spill] sm:$0xff] }
 0x84c   : > { %16129 = vmatmul.mubr.msk.f32.gmra.mrb[10].mxu0 %vm1362_vm1, %v10936_v41  ;;  %15875 = vmatprep.mubr.msk.f32.mxu1 %vm1362_vm1, %v20573_v43  ;;  %v20612_v41 = vld [vmem:[#allocation2 + $0x17] sm:$0xff]  ;;  %v10942_v43 = vmul.f32 %v22265_v27, %v20608_v56 }
 0x84d   : > { %16131 = vmatprep.mubr.msk.f32.mxu0 %vm1362_vm1, %v20577_v61  ;;  %22264 = vst [vmem:[#allocation134_spill] sm:$0xff] %v20612_v41  ;;  %v8946_v47 = vmul.f32 %v22266_v53, %v20612_v41  ;;  %v22277_v41 = vld [vmem:[#allocation19_spill] sm:$0xff] }
 0x84f   : > { %15876 = vmatmul.mubr.msk.f32.gmra.mrb[28].mxu1 %vm1362_vm1, %v20584_v3  ;;  %v8913_v3 = vld [vmem:[#allocation2 + $0xf] sm:$0xff] }
 0x850   : > { %16132 = vmatmul.mubr.msk.f32.gmra.mrb[12].mxu0 %vm1362_vm1, %v10938_v44  ;;  %15878 = vmatprep.mubr.msk.f32.mxu1 %vm1362_vm1, %v20590_v25  ;;  %v9726_v44 = vld [vmem:[#allocation6 + $0x50] sm:$0xff]  ;;  %v9727_v25 = vld [vmem:[#allocation6 + $0x58] sm:$0xff] }
 0x851   : > { %16134 = vmatprep.mubr.msk.f32.mxu0 %vm1362_vm1, %v20594_v22  ;;  %v16493_v57 = vpack.c.bf16 %v9727_v25, %v9726_v44  ;;  %v20644_v25 = vld [vmem:[#allocation2 + $0x37] sm:$0xff] }
 0x852   : > { %22274 = vst [vmem:[#allocation140_spill] sm:$0xff] %v20644_v25  ;;  %v22276_v44 = vld [vmem:[#allocation42_spill] sm:$0xff]  ;;  %v8950_v52 = vmul.f32 %v22277_v41, %v20644_v25 }
 0x853   : > { %15879 = vmatmul.mubr.msk.f32.gmra.mrb[30].mxu1 %vm1362_vm1, %v20601_v5  ;;  %v20628_v5 = vld [vmem:[#allocation2 + $0xa9] sm:$0xff] }
 0x854   : > { %16135 = vmatmul.mubr.msk.f32.gmra.mrb[14].mxu0 %vm1362_vm1, %v10940_v2  ;;  %15889 = vmatprep.mubr.msk.f32.mxu1 %vm1362_vm1, %v8944_v31  ;;  %22269 = vst [vmem:[#allocation137_spill] sm:$0xff] %v20628_v5  ;;  %v10146_v2 = vld [vmem:[#allocation6 + $0x60] sm:$0xff]  ;;  %v10147_v31 = vld [vmem:[#allocation6 + $0x68] sm:$0xff] }
 0x855   : > { %16137 = vmatprep.mubr.msk.f32.mxu0 %vm1362_vm1, %v20610_v7 }
 0x857   : > { %15890 = vmatmul.mubr.msk.f32.vlgmr.msra.gmra.mrb[0].mxu1 %vm1362_vm1, %v8913_v3  ;;  %v20642_v3 = vld [vmem:[#allocation2 + $0xc1] sm:$0xff] }
 0x858   : > { %16138 = vmatmul.mubr.msk.f32.gmra.mrb[16].mxu0 %vm1362_vm1, %v10942_v43  ;;  %16492 = vmatpush3.bf16.msra.mxu1 %v20427_v0  ;;  %22273 = vst [vmem:[#allocation139_spill] sm:$0xff] %v20642_v3  ;;  %v20646_v43 = vld [vmem:[#allocation2 + $0xb9] sm:$0xff]  ;;  %v20648_v0 = vpack.c.bf16 %v10147_v31, %v10146_v2  ;;  %v10946_v10 = vmul.f32 %v22276_v44, %v20642_v3  ;;  %v20662_v2 = vld [vmem:[#allocation2 + $0xd1] sm:$0xff]  ;;  %v20664_v31 = vld [vmem:[#allocation2 + $0x47] sm:$0xff] }
 0x859   : > { %15892 = vmatprep.mubr.msk.f32.mxu1 %vm1362_vm1, %v8946_v47  ;;  %16140 = vmatprep.mubr.msk.f32.mxu0 %vm1362_vm1, %v20628_v5  ;;  %22275 = vst [vmem:[#allocation141_spill] sm:$0xff] %v20646_v43  ;;  %v20654_v47 = vld [vmem:[#allocation2 + $0x2f] sm:$0xff]  ;;  %22278 = vst [vmem:[#allocation142_spill] sm:$0xff] %v20662_v2  ;;  %v8952_v42 = vmul.f32 %v22283_v40, %v20664_v31  ;;  %v20719_v3 = vld [vmem:[#allocation2 + $0x77] sm:$0xff] }
 0x85a   : > { %16494 = vmatprep.subr.bf16.mxu1 %v16493_v57  ;;  %22279 = vst [vmem:[#allocation143_spill] sm:$0xff] %v20664_v31  ;;  %22297 = vst [vmem:[#allocation155_spill] sm:$0xff] %v20719_v3  ;;  %v20735_v5 = vld [vmem:[#allocation2 + $0x111] sm:$0xff]  ;;  %v20739_v44 = vld [vmem:[#allocation2 + $0x109] sm:$0xff] }
 0x85b   : > { %15893 = vmatmul.mubr.msk.f32.gmra.mrb[2].mxu1 %vm1362_vm1, %v20633_v60  ;;  %v20666_v60 = vld [vmem:[#allocation2 + $0xc9] sm:$0xff]  ;;  %22302 = vst [vmem:[#allocation158_spill] sm:$0xff] %v20735_v5  ;;  %22304 = vst [vmem:[#allocation160_spill] sm:$0xff] %v20739_v44 }
 0x85c   : > { %16141 = vmatmul.mubr.msk.f32.gmra.mrb[18].mxu0 %vm1362_vm1, %v10944_v50  ;;  %15895 = vmatprep.mubr.msk.f32.mxu1 %vm1362_vm1, %v8948_v20  ;;  %22280 = vst [vmem:[#allocation144_spill] sm:$0xff] %v20666_v60  ;;  %v20673_v20 = vld [vmem:[#allocation2 + $0x3f] sm:$0xff] }
 0x85d   : > { %16143 = vmatprep.mubr.msk.f32.mxu0 %vm1362_vm1, %v20646_v43  ;;  %16496 = vmatpush3.bf16.msra.mxu1 %v16493_v57  ;;  %22281 = vst [vmem:[#allocation145_spill] sm:$0xff] %v20673_v20  ;;  %v22282_v50 = vld [vmem:[#allocation43_spill] sm:$0xff] }
 0x85e   : > { %16498 = vmatprep.subr.bf16.mxu1 %v20648_v0  ;;  %v10948_v29 = vmul.f32 %v22282_v50, %v20662_v2  ;;  %v20681_v57 = vld [vmem:[#allocation2 + $0xe1] sm:$0xff] }
 0x85f   : > { %15896 = vmatmul.mubr.msk.f32.gmra.mrb[4].mxu1 %vm1362_vm1, %v20654_v47  ;;  %22284 = vst [vmem:[#allocation146_spill] sm:$0xff] %v20681_v57  ;;  %v20701_v43 = vld [vmem:[#allocation2 + $0x67] sm:$0xff] }
 0x860   : > { %16144 = vmatmul.mubr.msk.f32.gmra.mrb[20].mxu0 %vm1362_vm1, %v10946_v10  ;;  %15898 = vmatprep.mubr.msk.f32.mxu1 %vm1362_vm1, %v8950_v52  ;;  %v20691_v52 = vld [vmem:[#allocation2 + $0x4f] sm:$0xff]  ;;  %22291 = vst [vmem:[#allocation151_spill] sm:$0xff] %v20701_v43  ;;  %v20717_v50 = vld [vmem:[#allocation2 + $0x101] sm:$0xff] }
 0x861   : > { %16146 = vmatprep.mubr.msk.f32.mxu0 %vm1362_vm1, %v20666_v60  ;;  %22287 = vst [vmem:[#allocation149_spill] sm:$0xff] %v20691_v52  ;;  %v22288_v10 = vld [vmem:[#allocation44_spill] sm:$0xff]  ;;  %v22289_v60 = vld [vmem:[#allocation21_spill] sm:$0xff]  ;;  %22296 = vst [vmem:[#allocation154_spill] sm:$0xff] %v20717_v50 }
 0x862   : > { %v10950_v24 = vmul.f32 %v22288_v10, %v20681_v57  ;;  %v8954_v2 = vmul.f32 %v22289_v60, %v20683_v1 }
 0x863   : > { %15899 = vmatmul.mubr.msk.f32.gmra.mrb[6].mxu1 %vm1362_vm1, %v20673_v20 }
 0x864   : > { %16147 = vmatmul.mubr.msk.f32.gmra.mrb[22].mxu0 %vm1362_vm1, %v10948_v29  ;;  %15901 = vmatprep.mubr.msk.f32.mxu1 %vm1362_vm1, %v8952_v42  ;;  %v20709_v42 = vld [vmem:[#allocation2 + $0x5f] sm:$0xff]  ;;  %v22294_v29 = vld [vmem:[#allocation45_spill] sm:$0xff] }
 0x865   : > { %16149 = vmatprep.mubr.msk.f32.mxu0 %vm1362_vm1, %v20685_v23  ;;  %22293 = vst [vmem:[#allocation153_spill] sm:$0xff] %v20709_v42  ;;  %v10952_v57 = vmul.f32 %v22294_v29, %v20699_v35  ;;  %v22295_v23 = vld [vmem:[#allocation22_spill] sm:$0xff] }
 0x866   : > { %v8956_v10 = vmul.f32 %v22295_v23, %v20701_v43 }
 0x867   : > { %15902 = vmatmul.mubr.msk.f32.gmra.mrb[8].mxu1 %vm1362_vm1, %v20691_v52 }
 0x868   : > { %16150 = vmatmul.mubr.msk.f32.gmra.mrb[24].mxu0 %vm1362_vm1, %v10950_v24  ;;  %15904 = vmatprep.mubr.msk.f32.mxu1 %vm1362_vm1, %v8954_v2  ;;  %v20727_v24 = vld [vmem:[#allocation2 + $0x6f] sm:$0xff]  ;;  %v22300_v2 = vld [vmem:[#allocation46_spill] sm:$0xff] }
 0x869   : > { %16152 = vmatprep.mubr.msk.f32.mxu0 %vm1362_vm1, %v20703_v54  ;;  %22299 = vst [vmem:[#allocation157_spill] sm:$0xff] %v20727_v24  ;;  %v10954_v35 = vmul.f32 %v22300_v2, %v20717_v50  ;;  %v22301_v54 = vld [vmem:[#allocation23_spill] sm:$0xff] }
 0x86a   : > { %v8958_v29 = vmul.f32 %v22301_v54, %v20719_v3 }
 0x86b   : > { %15905 = vmatmul.mubr.msk.f32.gmra.mrb[10].mxu1 %vm1362_vm1, %v20709_v42 }
 0x86c   : > { %16153 = vmatmul.mubr.msk.f32.gmra.mrb[26].mxu0 %vm1362_vm1, %v10952_v57  ;;  %15907 = vmatprep.mubr.msk.f32.mxu1 %vm1362_vm1, %v8956_v10  ;;  %v20745_v57 = vld [vmem:[#allocation2 + $0x7f] sm:$0xff] }
 0x86d   : > { %16155 = vmatprep.mubr.msk.f32.mxu0 %vm1362_vm1, %v20721_v14  ;;  %22305 = vst [vmem:[#allocation161_spill] sm:$0xff] %v20745_v57  ;;  %v22306_v10 = vld [vmem:[#allocation47_spill] sm:$0xff]  ;;  %v22307_v14 = vld [vmem:[#allocation24_spill] sm:$0xff] }
 0x86e   : > { %v10956_v50 = vmul.f32 %v22306_v10, %v20735_v5  ;;  %v8960_v2 = vmul.f32 %v22307_v14, %v20737_v58  ;;  %v20761_v5 = vld [vmem:[#allocation2 + $0x8f] sm:$0xff] }
 0x86f   : > { %15908 = vmatmul.mubr.msk.f32.gmra.mrb[12].mxu1 %vm1362_vm1, %v20727_v24  ;;  %v22309_v10 = vld [vmem:[#allocation25_spill] sm:$0xff] }
 0x870   : > { %16156 = vmatmul.mubr.msk.f32.gmra.mrb[28].mxu0 %vm1362_vm1, %v10954_v35  ;;  %15910 = vmatprep.mubr.msk.f32.mxu1 %vm1362_vm1, %v8958_v29  ;;  %v11772_v35 = vld [vmem:[#allocation6 + $0xf0] sm:$0xff]  ;;  %v11773_v29 = vld [vmem:[#allocation6 + $0xf8] sm:$0xff]  ;;  %v8962_v7 = vmul.f32 %v22309_v10, %v20755_v63 }
 0x871   : > { %16158 = vmatprep.mubr.msk.f32.mxu0 %vm1362_vm1, %v20739_v44  ;;  %v11349_v44 = vmul.f32 %v22266_v53, %v20644_v25  ;;  %v16533_v6 = vpack.c.bf16 %v11773_v29, %v11772_v35  ;;  %v11351_v35 = vmul.f32 %v22272_v30, %v20664_v31  ;;  %v20783_v29 = vld [vmem:[#allocation2 + $0xb7] sm:$0xff]  ;;  %v11353_v31 = vmul.f32 %v22277_v41, %v20683_v1 }
 0x872   : > { %v20814_v1 = vld [vmem:[#allocation2 + $0xd7] sm:$0xff] }
 0x873   : > { %15911 = vmatmul.mubr.msk.f32.gmra.mrb[14].mxu1 %vm1362_vm1, %v20745_v57 }
 0x874   : > { %16159 = vmatmul.mubr.msk.f32.gmra.mrb[30].mxu0 %vm1362_vm1, %v10956_v50  ;;  %15913 = vmatprep.mubr.msk.f32.mxu1 %vm1362_vm1, %v8960_v2  ;;  %v12193_v50 = vld [vmem:[#allocation6 + $0x108] sm:$0xff]  ;;  %v20775_v2 = vld [vmem:[#allocation2 + $0x9f] sm:$0xff] }
 0x875   : > { %16169 = vmatprep.mubr.msk.f32.mxu0 %vm1362_vm1, %v11347_v33  ;;  %v22311_v33 = vld [vmem:[#allocation26_spill] sm:$0xff]  ;;  %v20785_v25 = vpack.c.bf16 %v12193_v50, %v12192_v13  ;;  %v20799_v13 = vld [vmem:[#allocation2 + $0xc7] sm:$0xff] }
 0x876   : > { %v8964_v39 = vmul.f32 %v22311_v33, %v20768_v8  ;;  %v22313_v50 = vld [vmem:[#allocation28_spill] sm:$0xff] }
 0x877   : > { %15914 = vmatmul.mubr.msk.f32.gmra.mrb[16].mxu1 %vm1362_vm1, %v20761_v5 }
 0x878   : > { %16170 = vmatmul.mubr.msk.f32.vlgmr.msra.gmra.mrb[0].mxu0 %vm1362_vm1, %v20654_v47  ;;  %15916 = vmatprep.mubr.msk.f32.mxu1 %vm1362_vm1, %v8962_v7  ;;  %v20792_v7 = vld [vmem:[#allocation2 + $0xaf] sm:$0xff] }
 0x879   : > { %16532 = vmatpush3.bf16.msra.mxu0 %v20508_v45  ;;  %16172 = vmatprep.mubr.msk.f32.mxu0 %vm1362_vm1, %v11349_v44  ;;  %v22312_v45 = vld [vmem:[#allocation27_spill] sm:$0xff] }
 0x87a   : > { %16534 = vmatprep.subr.bf16.mxu0 %v16533_v6  ;;  %v8966_v44 = vmul.f32 %v22312_v45, %v20783_v29 }
 0x87b   : > { %15917 = vmatmul.mubr.msk.f32.gmra.mrb[18].mxu1 %vm1362_vm1, %v20775_v2 }
 0x87c   : > { %16173 = vmatmul.mubr.msk.f32.gmra.mrb[2].mxu0 %vm1362_vm1, %v20673_v20  ;;  %15919 = vmatprep.mubr.msk.f32.mxu1 %vm1362_vm1, %v8964_v39  ;;  %v20807_v39 = vld [vmem:[#allocation2 + $0xbf] sm:$0xff] }
 0x87d   : > { %16175 = vmatprep.mubr.msk.f32.mxu0 %vm1362_vm1, %v11351_v35  ;;  %16536 = vmatpush3.bf16.msra.mxu0 %v16533_v6  ;;  %v8968_v35 = vmul.f32 %v22313_v50, %v20799_v13  ;;  %v11355_v6 = vmul.f32 %v22283_v40, %v20701_v43  ;;  %v20828_v43 = vld [vmem:[#allocation2 + $0xe7] sm:$0xff] }
 0x87e   : > { %16538 = vmatprep.subr.bf16.mxu0 %v20785_v25 }
 0x87f   : > { %15920 = vmatmul.mubr.msk.f32.gmra.mrb[20].mxu1 %vm1362_vm1, %v20792_v7 }
 0x880   : > { %16176 = vmatmul.mubr.msk.f32.gmra.mrb[4].mxu0 %vm1362_vm1, %v20691_v52  ;;  %15922 = vmatprep.mubr.msk.f32.mxu1 %vm1362_vm1, %v8966_v44  ;;  %v20821_v44 = vld [vmem:[#allocation2 + $0xcf] sm:$0xff] }
 0x881   : > { %16178 = vmatprep.mubr.msk.f32.mxu0 %vm1362_vm1, %v11353_v31  ;;  %v22314_v52 = vld [vmem:[#allocation29_spill] sm:$0xff]  ;;  %v11357_v31 = vmul.f32 %v22289_v60, %v20719_v3 }
 0x882   : > { %v8970_v20 = vmul.f32 %v22314_v52, %v20814_v1  ;;  %v20842_v3 = vld [vmem:[#allocation2 + $0xf7] sm:$0xff] }
 0x883   : > { %15923 = vmatmul.mubr.msk.f32.gmra.mrb[22].mxu1 %vm1362_vm1, %v20807_v39 }
 0x884   : > { %16179 = vmatmul.mubr.msk.f32.gmra.mrb[6].mxu0 %vm1362_vm1, %v20709_v42  ;;  %15925 = vmatprep.mubr.msk.f32.mxu1 %vm1362_vm1, %v8968_v35  ;;  %v20835_v35 = vld [vmem:[#allocation2 + $0xdf] sm:$0xff] }
 0x885   : > { %16181 = vmatprep.mubr.msk.f32.mxu0 %vm1362_vm1, %v11355_v6  ;;  %v22315_v42 = vld [vmem:[#allocation30_spill] sm:$0xff]  ;;  %v11359_v6 = vmul.f32 %v22295_v23, %v20737_v58  ;;  %v9659_v58 = vld [vmem:[#allocation2 + $0x9] sm:$0xff] }
 0x886   : > { %v8972_v40 = vmul.f32 %v22315_v42, %v20828_v43  ;;  %v10149_v23 = vld [vmem:[#allocation6 + $0x78] sm:$0xff] }
 0x887   : > { %15926 = vmatmul.mubr.msk.f32.gmra.mrb[24].mxu1 %vm1362_vm1, %v20821_v44 }
 0x888   : > { %16182 = vmatmul.mubr.msk.f32.gmra.mrb[8].mxu0 %vm1362_vm1, %v20727_v24  ;;  %15928 = vmatprep.mubr.msk.f32.mxu1 %vm1362_vm1, %v8970_v20  ;;  %v20849_v20 = vld [vmem:[#allocation2 + $0xef] sm:$0xff]  ;;  %v22316_v24 = vld [vmem:[#allocation31_spill] sm:$0xff] }
 0x889   : > { %16184 = vmatprep.mubr.msk.f32.mxu0 %vm1362_vm1, %v11357_v31  ;;  %v8974_v60 = vmul.f32 %v22316_v24, %v20842_v3  ;;  %v11361_v31 = vmul.f32 %v22301_v54, %v20755_v63  ;;  %v10148_v54 = vld [vmem:[#allocation6 + $0x70] sm:$0xff] }
 0x88b   : > { %15929 = vmatmul.mubr.msk.f32.gmra.mrb[26].mxu1 %vm1362_vm1, %v20835_v35 }
 0x88c   : > { %16185 = vmatmul.mubr.msk.f32.gmra.mrb[10].mxu0 %vm1362_vm1, %v20745_v57  ;;  %15931 = vmatprep.mubr.msk.f32.mxu1 %vm1362_vm1, %v8972_v40  ;;  %v20861_v57 = vld [vmem:[#allocation2 + $0xff] sm:$0xff]  ;;  %v9660_v40 = vld [vmem:[#allocation2 + $0x11] sm:$0xff] }
 0x88d   : > { %16187 = vmatprep.mubr.msk.f32.mxu0 %vm1362_vm1, %v11359_v6  ;;  %v11363_v6 = vmul.f32 %v22307_v14, %v20768_v8  ;;  %v9692_v63 = vmul.f32 %v22240_v36, %v9660_v40  ;;  %v9694_v8 = vmul.f32 %v22243_v19, %v20470_v28  ;;  %v11371_v28 = vmul.f32 %v22313_v50, %v20828_v43 }
 0x88e   : > { %v9702_v40 = vmul.f32 %v22255_v37, %v20541_v38 }
 0x88f   : > { %15932 = vmatmul.mubr.msk.f32.gmra.mrb[28].mxu1 %vm1362_vm1, %v20849_v20 }
 0x890   : > { %16188 = vmatmul.mubr.msk.f32.gmra.mrb[12].mxu0 %vm1362_vm1, %v20761_v5  ;;  %15934 = vmatprep.mubr.msk.f32.mxu1 %vm1362_vm1, %v8974_v60  ;;  %v11365_v60 = vmul.f32 %v22309_v10, %v20783_v29 }
 0x891   : > { %16190 = vmatprep.mubr.msk.f32.mxu0 %vm1362_vm1, %v11361_v31  ;;  %v16501_v31 = vpack.c.bf16 %v10149_v23, %v10148_v54  ;;  %v11369_v54 = vmul.f32 %v22312_v45, %v20814_v1  ;;  %v9698_v23 = vmul.f32 %v22249_v18, %v20504_v49 }
 0x893   : > { %15935 = vmatmul.mubr.msk.f32.gmra.mrb[30].mxu1 %vm1362_vm1, %v20861_v57 }
 0x894   : > { %16191 = vmatmul.mubr.msk.f32.gmra.mrb[14].mxu0 %vm1362_vm1, %v20775_v2  ;;  %15945 = vmatprep.mubr.msk.f32.mxu1 %vm1362_vm1, %v9659_v58  ;;  %v11367_v58 = vmul.f32 %v22311_v33, %v20799_v13 }
 0x895   : > { %16193 = vmatprep.mubr.msk.f32.mxu0 %vm1362_vm1, %v11363_v6 }
 0x897   : > { %15946 = vmatmul.mubr.msk.f32.vlgmr.msra.gmra.mrb[0].mxu1 %vm1362_vm1, %v9692_v63  ;;  %v9696_v63 = vmul.f32 %v22246_v12, %v20486_v21 }
 0x898   : > { %16194 = vmatmul.mubr.msk.f32.gmra.mrb[16].mxu0 %vm1362_vm1, %v20792_v7  ;;  %16500 = vmatpush3.bf16.msra.mxu1 %v20648_v0  ;;  %v20917_v0 = vld [vmem:[#allocation2 + $0x107] sm:$0xff] }
 0x899   : > { %15948 = vmatprep.mubr.msk.f32.mxu1 %vm1362_vm1, %v20472_v4  ;;  %16196 = vmatprep.mubr.msk.f32.mxu0 %vm1362_vm1, %v11365_v60  ;;  %v9700_v4 = vmul.f32 %v22252_v16, %v20523_v62  ;;  %v11375_v6 = vmul.f32 %v22315_v42, %v20917_v0  ;;  %v11345_v60 = vld [vmem:[#allocation2 + $0x117] sm:$0xff] }
 0x89a   : > { %16502 = vmatprep.subr.bf16.mxu1 %v16501_v31 }
 0x89b   : > { %15949 = vmatmul.mubr.msk.f32.gmra.mrb[2].mxu1 %vm1362_vm1, %v9694_v8  ;;  %v11373_v8 = vmul.f32 %v22314_v52, %v20842_v3 }
 0x89c   : > { %16197 = vmatmul.mubr.msk.f32.gmra.mrb[18].mxu0 %vm1362_vm1, %v20807_v39  ;;  %15951 = vmatprep.mubr.msk.f32.mxu1 %vm1362_vm1, %v20488_v48 }
 0x89d   : > { %16199 = vmatprep.mubr.msk.f32.mxu0 %vm1362_vm1, %v11367_v58  ;;  %16504 = vmatpush3.bf16.msra.mxu1 %v16501_v31  ;;  %v9704_v31 = vmul.f32 %v22258_v9, %v20558_v32  ;;  %v20937_v58 = vld [vmem:[#allocation2 + $0x10f] sm:$0xff] }
 0x89e   : > { %17057 = vmatprep.subr.bf16.mxu1 %v20374_v55 }
 0x89f   : > { %15952 = vmatmul.mubr.msk.f32.gmra.mrb[4].mxu1 %vm1362_vm1, %v9696_v63  ;;  %v11377_v63 = vmul.f32 %v22316_v24, %v11345_v60 }
 0x8a0   : > { %16200 = vmatmul.mubr.msk.f32.gmra.mrb[20].mxu0 %vm1362_vm1, %v20821_v44  ;;  %15954 = vmatprep.mubr.msk.f32.mxu1 %vm1362_vm1, %v20506_v17 }
 0x8a1   : > { %16202 = vmatprep.mubr.msk.f32.mxu0 %vm1362_vm1, %v11369_v54  ;;  %v9706_v54 = vmul.f32 %v22261_v15, %v20575_v51 }
 0x8a3   : > { %15955 = vmatmul.mubr.msk.f32.gmra.mrb[6].mxu1 %vm1362_vm1, %v9698_v23  ;;  %v11346_v23 = vld [vmem:[#allocation2 + $0x11f] sm:$0xff] }
 0x8a4   : > { %16203 = vmatmul.mubr.msk.f32.gmra.mrb[22].mxu0 %vm1362_vm1, %v20835_v35  ;;  %15957 = vmatprep.mubr.msk.f32.mxu1 %vm1362_vm1, %v20525_v46 }
 0x8a5   : > { %16205 = vmatprep.mubr.msk.f32.mxu0 %vm1362_vm1, %v11371_v28  ;;  %v9708_v28 = vmul.f32 %v22265_v27, %v20592_v26  ;;  %v22328_v27 = vld [vmem:[#allocation110_spill] sm:$0xff] }
 0x8a7   : > { %15958 = vmatmul.mubr.msk.f32.gmra.mrb[8].mxu1 %vm1362_vm1, %v9700_v4  ;;  %v12194_v4 = vld [vmem:[#allocation6 + $0x110] sm:$0xff] }
 0x8a8   : > { %16206 = vmatmul.mubr.msk.f32.gmra.mrb[24].mxu0 %vm1362_vm1, %v20849_v20  ;;  %15960 = vmatprep.mubr.msk.f32.mxu1 %vm1362_vm1, %v20543_v34 }
 0x8a9   : > { %16208 = vmatprep.mubr.msk.f32.mxu0 %vm1362_vm1, %v11373_v8  ;;  %v12195_v8 = vld [vmem:[#allocation6 + $0x118] sm:$0xff] }
 0x8ab   : > { %15961 = vmatmul.mubr.msk.f32.gmra.mrb[10].mxu1 %vm1362_vm1, %v9702_v40  ;;  %v16541_v40 = vpack.c.bf16 %v12195_v8, %v12194_v4  ;;  %v22323_v4 = vld [vmem:[#allocation108_spill] sm:$0xff]  ;;  %v22324_v8 = vld [vmem:[#allocation137_spill] sm:$0xff] }
 0x8ac   : > { %16209 = vmatmul.mubr.msk.f32.gmra.mrb[26].mxu0 %vm1362_vm1, %v20861_v57  ;;  %15963 = vmatprep.mubr.msk.f32.mxu1 %vm1362_vm1, %v20560_v11 }
 0x8ad   : > { %16211 = vmatprep.mubr.msk.f32.mxu0 %vm1362_vm1, %v11375_v6  ;;  %v22317_v6 = vld [vmem:[#allocation41_spill] sm:$0xff] }
 0x8ae   : > { %v9710_v60 = vmul.f32 %v22317_v6, %v20608_v56 }
 0x8af   : > { %15964 = vmatmul.mubr.msk.f32.gmra.mrb[12].mxu1 %vm1362_vm1, %v9704_v31  ;;  %v22318_v31 = vld [vmem:[#allocation106_spill] sm:$0xff] }
 0x8b0   : > { %16212 = vmatmul.mubr.msk.f32.gmra.mrb[28].mxu0 %vm1362_vm1, %v20937_v58  ;;  %15966 = vmatprep.mubr.msk.f32.mxu1 %vm1362_vm1, %v20577_v61 }
 0x8b1   : > { %16214 = vmatprep.mubr.msk.f32.mxu0 %vm1362_vm1, %v11377_v63  ;;  %v22319_v63 = vld [vmem:[#allocation133_spill] sm:$0xff] }
 0x8b3   : > { %15967 = vmatmul.mubr.msk.f32.gmra.mrb[14].mxu1 %vm1362_vm1, %v9706_v54  ;;  %v22320_v54 = vld [vmem:[#allocation107_spill] sm:$0xff] }
 0x8b4   : > { %16215 = vmatmul.mubr.msk.f32.gmra.mrb[30].mxu0 %vm1362_vm1, %v11346_v23  ;;  %15969 = vmatprep.mubr.msk.f32.mxu1 %vm1362_vm1, %v20594_v22  ;;  %v22322_v23 = vld [vmem:[#allocation42_spill] sm:$0xff] }
 0x8b5   : > { %16225 = vmatprep.mubr.msk.f32.mxu0 %vm1362_vm1, %v20385_v59  ;;  %v22321_v59 = vld [vmem:[#allocation135_spill] sm:$0xff] }
 0x8b7   : > { %15970 = vmatmul.mubr.msk.f32.gmra.mrb[16].mxu1 %vm1362_vm1, %v9708_v28  ;;  %v9712_v28 = vmul.f32 %v22322_v23, %v22321_v59  ;;  %v22330_v23 = vld [vmem:[#allocation111_spill] sm:$0xff] }
 0x8b8   : > { %16226 = vmatmul.mubr.msk.f32.vlgmr.msra.gmra.mrb[0].mxu0 %vm1362_vm1, %v22318_v31  ;;  %15972 = vmatprep.mubr.msk.f32.mxu1 %vm1362_vm1, %v22319_v63  ;;  %v22325_v31 = vld [vmem:[#allocation109_spill] sm:$0xff]  ;;  %v22352_v59 = vld [vmem:[#allocation119_spill] sm:$0xff] }
 0x8b9   : > { %16540 = vmatpush3.bf16.msra.mxu0 %v20785_v25  ;;  %16228 = vmatprep.mubr.msk.f32.mxu0 %vm1362_vm1, %v22320_v54  ;;  %v22326_v25 = vld [vmem:[#allocation139_spill] sm:$0xff] }
 0x8ba   : > { %16542 = vmatprep.subr.bf16.mxu0 %v16541_v40  ;;  %v22327_v54 = vld [vmem:[#allocation43_spill] sm:$0xff] }
 0x8bb   : > { %15973 = vmatmul.mubr.msk.f32.gmra.mrb[18].mxu1 %vm1362_vm1, %v9710_v60  ;;  %v9714_v6 = vmul.f32 %v22327_v54, %v22326_v25  ;;  %v22329_v60 = vld [vmem:[#allocation141_spill] sm:$0xff] }
 0x8bc   : > { %16229 = vmatmul.mubr.msk.f32.gmra.mrb[2].mxu0 %vm1362_vm1, %v22323_v4  ;;  %15975 = vmatprep.mubr.msk.f32.mxu1 %vm1362_vm1, %v22324_v8  ;;  %v22331_v4 = vld [vmem:[#allocation142_spill] sm:$0xff]  ;;  %v22332_v8 = vld [vmem:[#allocation44_spill] sm:$0xff]  ;;  %v22335_v54 = vld [vmem:[#allocation113_spill] sm:$0xff] }
 0x8bd   : > { %16231 = vmatprep.mubr.msk.f32.mxu0 %vm1362_vm1, %v22325_v31  ;;  %16544 = vmatpush3.bf16.msra.mxu0 %v16541_v40  ;;  %v9716_v31 = vmul.f32 %v22332_v8, %v22331_v4  ;;  %v22333_v40 = vld [vmem:[#allocation112_spill] sm:$0xff]  ;;  %v22340_v8 = vld [vmem:[#allocation115_spill] sm:$0xff] }
 0x8bf   : > { %15976 = vmatmul.mubr.msk.f32.gmra.mrb[20].mxu1 %vm1362_vm1, %v9712_v28  ;;  %v22334_v28 = vld [vmem:[#allocation144_spill] sm:$0xff] }
 0x8c0   : > { %16232 = vmatmul.mubr.msk.f32.gmra.mrb[4].mxu0 %vm1362_vm1, %v22328_v27  ;;  %15978 = vmatprep.mubr.msk.f32.mxu1 %vm1362_vm1, %v22329_v60  ;;  %v22336_v27 = vld [vmem:[#allocation146_spill] sm:$0xff]  ;;  %v22337_v60 = vld [vmem:[#allocation45_spill] sm:$0xff] }
 0x8c1   : > { %16234 = vmatprep.mubr.msk.f32.mxu0 %vm1362_vm1, %v22330_v23  ;;  %v9718_v25 = vmul.f32 %v22337_v60, %v22336_v27  ;;  %v22338_v23 = vld [vmem:[#allocation114_spill] sm:$0xff]  ;;  %v22345_v60 = vld [vmem:[#allocation117_spill] sm:$0xff] }
 0x8c3   : > { %15979 = vmatmul.mubr.msk.f32.gmra.mrb[22].mxu1 %vm1362_vm1, %v9714_v6  ;;  %v22339_v6 = vld [vmem:[#allocation148_spill] sm:$0xff] }
 0x8c4   : > { %16235 = vmatmul.mubr.msk.f32.gmra.mrb[6].mxu0 %vm1362_vm1, %v22333_v40  ;;  %15981 = vmatprep.mubr.msk.f32.mxu1 %vm1362_vm1, %v22334_v28  ;;  %v22341_v40 = vld [vmem:[#allocation150_spill] sm:$0xff] }
 0x8c5   : > { %16237 = vmatprep.mubr.msk.f32.mxu0 %vm1362_vm1, %v22335_v54  ;;  %v22342_v28 = vld [vmem:[#allocation46_spill] sm:$0xff]  ;;  %v22343_v54 = vld [vmem:[#allocation116_spill] sm:$0xff] }
 0x8c6   : > { %v9720_v4 = vmul.f32 %v22342_v28, %v22341_v40  ;;  %v22350_v28 = vld [vmem:[#allocation134_spill] sm:$0xff]  ;;  %v22351_v40 = vld [vmem:[#allocation16_spill] sm:$0xff] }
 0x8c7   : > { %15982 = vmatmul.mubr.msk.f32.gmra.mrb[24].mxu1 %vm1362_vm1, %v9716_v31  ;;  %v22344_v31 = vld [vmem:[#allocation152_spill] sm:$0xff] }
 0x8c8   : > { %16238 = vmatmul.mubr.msk.f32.gmra.mrb[8].mxu0 %vm1362_vm1, %v22338_v23  ;;  %15984 = vmatprep.mubr.msk.f32.mxu1 %vm1362_vm1, %v22339_v6  ;;  %v22346_v23 = vld [vmem:[#allocation154_spill] sm:$0xff]  ;;  %v22347_v6 = vld [vmem:[#allocation47_spill] sm:$0xff] }
 0x8c9   : > { %16240 = vmatprep.mubr.msk.f32.mxu0 %vm1362_vm1, %v22340_v8  ;;  %v9722_v27 = vmul.f32 %v22347_v6, %v22346_v23  ;;  %v22348_v8 = vld [vmem:[#allocation118_spill] sm:$0xff] }
 0x8cb   : > { %15985 = vmatmul.mubr.msk.f32.gmra.mrb[26].mxu1 %vm1362_vm1, %v9718_v25  ;;  %v22349_v25 = vld [vmem:[#allocation156_spill] sm:$0xff] }
 0x8cc   : > { %16241 = vmatmul.mubr.msk.f32.gmra.mrb[10].mxu0 %vm1362_vm1, %v22343_v54  ;;  %15987 = vmatprep.mubr.msk.f32.mxu1 %vm1362_vm1, %v22344_v31  ;;  %v10113_v54 = vmul.f32 %v22351_v40, %v22350_v28  ;;  %v22357_v28 = vld [vmem:[#allocation122_spill] sm:$0xff]  ;;  %v22359_v40 = vld [vmem:[#allocation123_spill] sm:$0xff] }
 0x8cd   : > { %16243 = vmatprep.mubr.msk.f32.mxu0 %vm1362_vm1, %v22345_v60  ;;  %v22353_v60 = vld [vmem:[#allocation120_spill] sm:$0xff] }
 0x8cf   : > { %15988 = vmatmul.mubr.msk.f32.gmra.mrb[28].mxu1 %vm1362_vm1, %v9720_v4  ;;  %v22354_v4 = vld [vmem:[#allocation121_spill] sm:$0xff] }
 0x8d0   : > { %16244 = vmatmul.mubr.msk.f32.gmra.mrb[12].mxu0 %vm1362_vm1, %v22348_v8  ;;  %15990 = vmatprep.mubr.msk.f32.mxu1 %vm1362_vm1, %v22349_v25  ;;  %v22355_v8 = vld [vmem:[#allocation136_spill] sm:$0xff]  ;;  %v22356_v25 = vld [vmem:[#allocation138_spill] sm:$0xff] }
 0x8d1   : > { %16246 = vmatprep.mubr.msk.f32.mxu0 %vm1362_vm1, %v22352_v59  ;;  %v10115_v6 = vmul.f32 %v22266_v53, %v22355_v8  ;;  %v22358_v59 = vld [vmem:[#allocation140_spill] sm:$0xff] }
 0x8d2   : > { %v22361_v53 = vld [vmem:[#allocation124_spill] sm:$0xff] }
 0x8d3   : > { %15991 = vmatmul.mubr.msk.f32.gmra.mrb[30].mxu1 %vm1362_vm1, %v9722_v27  ;;  %v10117_v27 = vmul.f32 %v22272_v30, %v22358_v59  ;;  %v22364_v30 = vld [vmem:[#allocation145_spill] sm:$0xff]  ;;  %v22370_v59 = vld [vmem:[#allocation128_spill] sm:$0xff] }
 0x8d4   : > { %16247 = vmatmul.mubr.msk.f32.gmra.mrb[14].mxu0 %vm1362_vm1, %v22353_v60  ;;  %16001 = vmatprep.mubr.msk.f32.mxu1 %vm1362_vm1, %v10113_v54  ;;  %v22360_v54 = vld [vmem:[#allocation105_spill] sm:$0xff] }
 0x8d5   : > { %16249 = vmatprep.mubr.msk.f32.mxu0 %vm1362_vm1, %v22354_v4  ;;  %v22363_v60 = vld [vmem:[#allocation125_spill] sm:$0xff]  ;;  %v22367_v4 = vld [vmem:[#allocation20_spill] sm:$0xff] }
 0x8d7   : > { %16002 = vmatmul.mubr.msk.f32.vlgmr.msra.gmra.mrb[0].mxu1 %vm1362_vm1, %v22356_v25  ;;  %v22362_v25 = vld [vmem:[#allocation143_spill] sm:$0xff] }
 0x8d8   : > { %16250 = vmatmul.mubr.msk.f32.gmra.mrb[16].mxu0 %vm1362_vm1, %v22357_v28  ;;  %17059 = vmatpush3.bf16.msra.mxu1 %v20374_v55  ;;  %v10119_v55 = vmul.f32 %v22277_v41, %v22362_v25  ;;  %v22368_v28 = vld [vmem:[#allocation127_spill] sm:$0xff]  ;;  %v22369_v41 = vld [vmem:[#allocation149_spill] sm:$0xff] }
 0x8d9   : > { %16004 = vmatprep.mubr.msk.f32.mxu1 %vm1362_vm1, %v10115_v6  ;;  %16252 = vmatprep.mubr.msk.f32.mxu0 %vm1362_vm1, %v22359_v40  ;;  %v22365_v6 = vld [vmem:[#allocation126_spill] sm:$0xff]  ;;  %v22372_v40 = vld [vmem:[#allocation21_spill] sm:$0xff] }
 0x8da   : > { %17058 = vmatprep.subr.bf16.mxu1 %v22360_v54  ;;  %v22374_v25 = vld [vmem:[#allocation153_spill] sm:$0xff] }
 0x8db   : > { %16005 = vmatmul.mubr.msk.f32.gmra.mrb[2].mxu1 %vm1362_vm1, %v20654_v47  ;;  %v22366_v47 = vld [vmem:[#allocation147_spill] sm:$0xff] }
 0x8dc   : > { %16253 = vmatmul.mubr.msk.f32.gmra.mrb[18].mxu0 %vm1362_vm1, %v22361_v53  ;;  %16007 = vmatprep.mubr.msk.f32.mxu1 %vm1362_vm1, %v10117_v27  ;;  %v10121_v8 = vmul.f32 %v22367_v4, %v22366_v47  ;;  %v22371_v27 = vld [vmem:[#allocation151_spill] sm:$0xff]  ;;  %v22373_v53 = vld [vmem:[#allocation129_spill] sm:$0xff]  ;;  %v21078_v4 = vld [vmem:[#allocation2 + $0x108] sm:$0xff] }
 0x8dd   : > { %16255 = vmatprep.mubr.msk.f32.mxu0 %vm1362_vm1, %v22363_v60  ;;  %17060 = vmatpush3.bf16.msra.mxu1 %v22360_v54  ;;  %v10123_v54 = vmul.f32 %v22372_v40, %v22371_v27  ;;  %v22376_v60 = vld [vmem:[#allocation155_spill] sm:$0xff]  ;;  %v21089_v40 = vld [vmem:[#allocation2 + $0x110] sm:$0xff] }
 0x8de   : > { %v22378_v47 = vld [vmem:[#allocation131_spill] sm:$0xff] }
 0x8df   : > { %16008 = vmatmul.mubr.msk.f32.gmra.mrb[4].mxu1 %vm1362_vm1, %v22364_v30  ;;  %v22377_v30 = vld [vmem:[#allocation22_spill] sm:$0xff] }
 0x8e0   : > { %16256 = vmatmul.mubr.msk.f32.gmra.mrb[20].mxu0 %vm1362_vm1, %v22365_v6  ;;  %16010 = vmatprep.mubr.msk.f32.mxu1 %vm1362_vm1, %v10119_v55  ;;  %v22375_v55 = vld [vmem:[#allocation130_spill] sm:$0xff]  ;;  %v10125_v6 = vmul.f32 %v22377_v30, %v22376_v60  ;;  %v11768_v60 = vld [vmem:[#allocation2 + $0x120] sm:$0xff]  ;;  %v12160_v30 = vmul.f32 %v22240_v36, %v20486_v21  ;;  %v12164_v36 = vmul.f32 %v22246_v12, %v20523_v62 }
 0x8e1   : > { %16258 = vmatprep.mubr.msk.f32.mxu0 %vm1362_vm1, %v22368_v28  ;;  %v22380_v28 = vld [vmem:[#allocation132_spill] sm:$0xff]  ;;  %v10135_v21 = vmul.f32 %v22312_v45, %v20799_v13  ;;  %v10141_v12 = vmul.f32 %v22315_v42, %v20842_v3  ;;  %v12172_v62 = vmul.f32 %v22258_v9, %v20592_v26  ;;  %v22389_v9 = vld [vmem:[#allocation139_spill] sm:$0xff]  ;;  %v22390_v26 = vld [vmem:[#allocation41_spill] sm:$0xff] }
 0x8e2   : > { %v10524_v3 = vld [vmem:[#allocation2 + $0xc0] sm:$0xff]  ;;  %v10527_v45 = vld [vmem:[#allocation2 + $0xd8] sm:$0xff] }
 0x8e3   : > { %16011 = vmatmul.mubr.msk.f32.gmra.mrb[6].mxu1 %vm1362_vm1, %v22369_v41  ;;  %v22381_v41 = vld [vmem:[#allocation159_spill] sm:$0xff] }
 0x8e4   : > { %16259 = vmatmul.mubr.msk.f32.gmra.mrb[22].mxu0 %vm1362_vm1, %v22370_v59  ;;  %16013 = vmatprep.mubr.msk.f32.mxu1 %vm1362_vm1, %v10121_v8  ;;  %v22379_v8 = vld [vmem:[#allocation157_spill] sm:$0xff]  ;;  %v22382_v59 = vld [vmem:[#allocation23_spill] sm:$0xff] }
 0x8e5   : > { %16261 = vmatprep.mubr.msk.f32.mxu0 %vm1362_vm1, %v22373_v53  ;;  %v10127_v27 = vmul.f32 %v22382_v59, %v22381_v41  ;;  %v22383_v53 = vld [vmem:[#allocation161_spill] sm:$0xff]  ;;  %v10528_v13 = vld [vmem:[#allocation2 + $0xe0] sm:$0xff]  ;;  %v22403_v41 = vld [vmem:[#allocation46_spill] sm:$0xff] }
 0x8e7   : > { %16014 = vmatmul.mubr.msk.f32.gmra.mrb[8].mxu1 %vm1362_vm1, %v22374_v25  ;;  %v22384_v25 = vld [vmem:[#allocation162_spill] sm:$0xff] }
 0x8e8   : > { %16262 = vmatmul.mubr.msk.f32.gmra.mrb[24].mxu0 %vm1362_vm1, %v22375_v55  ;;  %16016 = vmatprep.mubr.msk.f32.mxu1 %vm1362_vm1, %v10123_v54  ;;  %v11767_v54 = vld [vmem:[#allocation2 + $0x118] sm:$0xff]  ;;  %v10129_v55 = vmul.f32 %v22307_v14, %v22384_v25  ;;  %v12162_v14 = vmul.f32 %v22243_v19, %v20504_v49  ;;  %v10137_v19 = vmul.f32 %v22313_v50, %v20814_v1  ;;  %v22399_v50 = vld [vmem:[#allocation44_spill] sm:$0xff] }
 0x8e9   : > { %16264 = vmatprep.mubr.msk.f32.mxu0 %vm1362_vm1, %v22378_v47  ;;  %v12168_v49 = vmul.f32 %v22252_v16, %v20558_v32  ;;  %v12170_v1 = vmul.f32 %v22255_v37, %v20575_v51  ;;  %v22386_v16 = vld [vmem:[#allocation135_spill] sm:$0xff]  ;;  %v22387_v32 = vld [vmem:[#allocation40_spill] sm:$0xff]  ;;  %v22388_v37 = vld [vmem:[#allocation137_spill] sm:$0xff] }
 0x8ea   : > { %v10521_v51 = vld [vmem:[#allocation2 + $0xa8] sm:$0xff] }
 0x8eb   : > { %16017 = vmatmul.mubr.msk.f32.gmra.mrb[10].mxu1 %vm1362_vm1, %v22379_v8  ;;  %v10531_v8 = vld [vmem:[#allocation2 + $0xf8] sm:$0xff] }
 0x8ec   : > { %16265 = vmatmul.mubr.msk.f32.gmra.mrb[26].mxu0 %vm1362_vm1, %v22380_v28  ;;  %16019 = vmatprep.mubr.msk.f32.mxu1 %vm1362_vm1, %v10125_v6  ;;  %v22385_v6 = vld [vmem:[#allocation163_spill] sm:$0xff]  ;;  %v22402_v28 = vld [vmem:[#allocation158_spill] sm:$0xff] }
 0x8ed   : > { %16267 = vmatprep.mubr.msk.f32.mxu0 %vm1362_vm1, %v21078_v4  ;;  %v10131_v47 = vmul.f32 %v22309_v10, %v22385_v6  ;;  %v10526_v10 = vld [vmem:[#allocation2 + $0xd0] sm:$0xff]  ;;  %v12188_v59 = vmul.f32 %v22403_v41, %v22402_v28 }
 0x8ef   : > { %16020 = vmatmul.mubr.msk.f32.gmra.mrb[12].mxu1 %vm1362_vm1, %v22383_v53  ;;  %v12157_v53 = vld [vmem:[#allocation2 + $0x119] sm:$0xff] }
 0x8f0   : > { %16268 = vmatmul.mubr.msk.f32.gmra.mrb[28].mxu0 %vm1362_vm1, %v21089_v40  ;;  %16022 = vmatprep.mubr.msk.f32.mxu1 %vm1362_vm1, %v10127_v27  ;;  %v22404_v27 = vld [vmem:[#allocation160_spill] sm:$0xff] }
 0x8f1   : > { %16270 = vmatprep.mubr.msk.f32.mxu0 %vm1362_vm1, %v11767_v54  ;;  %v12158_v54 = vld [vmem:[#allocation2 + $0x121] sm:$0xff] }
 0x8f3   : > { %16023 = vmatmul.mubr.msk.f32.gmra.mrb[14].mxu1 %vm1362_vm1, %v20761_v5  ;;  %v10133_v5 = vmul.f32 %v22311_v33, %v20783_v29  ;;  %v22396_v33 = vld [vmem:[#allocation43_spill] sm:$0xff] }
 0x8f4   : > { %16271 = vmatmul.mubr.msk.f32.gmra.mrb[30].mxu0 %vm1362_vm1, %v11768_v60  ;;  %16025 = vmatprep.mubr.msk.f32.mxu1 %vm1362_vm1, %v10129_v55 }
 0x8f5   : > { %16281 = vmatprep.mubr.msk.f32.mxu0 %vm1362_vm1, %v20488_v48  ;;  %v12166_v48 = vmul.f32 %v22249_v18, %v20541_v38  ;;  %v12174_v18 = vmul.f32 %v22261_v15, %v20608_v56  ;;  %v10519_v38 = vld [vmem:[#allocation2 + $0x98] sm:$0xff]  ;;  %v22391_v15 = vld [vmem:[#allocation141_spill] sm:$0xff] }
 0x8f6   : > { %v10523_v56 = vld [vmem:[#allocation2 + $0xb8] sm:$0xff] }
 0x8f7   : > { %16026 = vmatmul.mubr.msk.f32.gmra.mrb[16].mxu1 %vm1362_vm1, %v20775_v2  ;;  %v22395_v2 = vld [vmem:[#allocation146_spill] sm:$0xff] }
 0x8f8   : > { %16282 = vmatmul.mubr.msk.f32.vlgmr.msra.gmra.mrb[0].mxu0 %vm1362_vm1, %v12160_v30  ;;  %16028 = vmatprep.mubr.msk.f32.mxu1 %vm1362_vm1, %v10131_v47  ;;  %v12182_v29 = vmul.f32 %v22396_v33, %v22395_v2  ;;  %v12593_v2 = vld [vmem:[%s17795_s16 + $0x28] sm:$0xff] }
 0x8f9   : > { %16284 = vmatprep.mubr.msk.f32.mxu0 %vm1362_vm1, %v20506_v17  ;;  %v10139_v17 = vmul.f32 %v22314_v52, %v20828_v43  ;;  %v22392_v43 = vld [vmem:[#allocation142_spill] sm:$0xff] }
 0x8fa   : > { %v22393_v52 = vld [vmem:[#allocation42_spill] sm:$0xff] }
 0x8fb   : > { %16029 = vmatmul.mubr.msk.f32.gmra.mrb[18].mxu1 %vm1362_vm1, %v20792_v7  ;;  %v12180_v42 = vmul.f32 %v22393_v52, %v22392_v43  ;;  %v22397_v7 = vld [vmem:[#allocation148_spill] sm:$0xff] }
 0x8fc   : > { %16285 = vmatmul.mubr.msk.f32.gmra.mrb[2].mxu0 %vm1362_vm1, %v12162_v14  ;;  %16031 = vmatprep.mubr.msk.f32.mxu1 %vm1362_vm1, %v10133_v5 }
 0x8fd   : > { %16287 = vmatprep.mubr.msk.f32.mxu0 %vm1362_vm1, %v20525_v46  ;;  %v10143_v46 = vmul.f32 %v22316_v24, %v20917_v0  ;;  %v22394_v24 = vld [vmem:[#allocation144_spill] sm:$0xff]  ;;  %v22400_v0 = vld [vmem:[#allocation45_spill] sm:$0xff] }
 0x8ff   : > { %16032 = vmatmul.mubr.msk.f32.gmra.mrb[20].mxu1 %vm1362_vm1, %v20807_v39  ;;  %v22398_v39 = vld [vmem:[#allocation150_spill] sm:$0xff] }
 0x900   : > { %16288 = vmatmul.mubr.msk.f32.gmra.mrb[4].mxu0 %vm1362_vm1, %v12164_v36  ;;  %16034 = vmatprep.mubr.msk.f32.mxu1 %vm1362_vm1, %v10135_v21 }
 0x901   : > { %16290 = vmatprep.mubr.msk.f32.mxu0 %vm1362_vm1, %v20543_v34  ;;  %v10520_v34 = vld [vmem:[#allocation2 + $0xa0] sm:$0xff] }
 0x903   : > { %16035 = vmatmul.mubr.msk.f32.gmra.mrb[22].mxu1 %vm1362_vm1, %v20821_v44  ;;  %v12184_v44 = vmul.f32 %v22399_v50, %v22398_v39 }
 0x904   : > { %16291 = vmatmul.mubr.msk.f32.gmra.mrb[6].mxu0 %vm1362_vm1, %v12166_v48  ;;  %16037 = vmatprep.mubr.msk.f32.mxu1 %vm1362_vm1, %v10137_v19 }
 0x905   : > { %16293 = vmatprep.mubr.msk.f32.mxu0 %vm1362_vm1, %v20560_v11  ;;  %v12176_v11 = vmul.f32 %v22387_v32, %v22386_v16  ;;  %v12588_v32 = vld [vmem:[%s17795_s16] sm:$0xff] }
 0x907   : > { %16038 = vmatmul.mubr.msk.f32.gmra.mrb[24].mxu1 %vm1362_vm1, %v20835_v35  ;;  %v10529_v35 = vld [vmem:[#allocation2 + $0xe8] sm:$0xff] }
 0x908   : > { %16294 = vmatmul.mubr.msk.f32.gmra.mrb[8].mxu0 %vm1362_vm1, %v12168_v49  ;;  %16040 = vmatprep.mubr.msk.f32.mxu1 %vm1362_vm1, %v10139_v17 }
 0x909   : > { %16296 = vmatprep.mubr.msk.f32.mxu0 %vm1362_vm1, %v20577_v61  ;;  %v10522_v61 = vld [vmem:[#allocation2 + $0xb0] sm:$0xff] }
 0x90b   : > { %16041 = vmatmul.mubr.msk.f32.gmra.mrb[26].mxu1 %vm1362_vm1, %v20849_v20  ;;  %v10530_v20 = vld [vmem:[#allocation2 + $0xf0] sm:$0xff] }
 0x90c   : > { %16297 = vmatmul.mubr.msk.f32.gmra.mrb[10].mxu0 %vm1362_vm1, %v12170_v1  ;;  %16043 = vmatprep.mubr.msk.f32.mxu1 %vm1362_vm1, %v10141_v12 }
 0x90d   : > { %16299 = vmatprep.mubr.msk.f32.mxu0 %vm1362_vm1, %v20594_v22  ;;  %v12178_v22 = vmul.f32 %v22390_v26, %v22389_v9 }
 0x90f   : > { %16044 = vmatmul.mubr.msk.f32.gmra.mrb[28].mxu1 %vm1362_vm1, %v20861_v57  ;;  %v10525_v57 = vld [vmem:[#allocation2 + $0xc8] sm:$0xff] }
 0x910   : > { %16300 = vmatmul.mubr.msk.f32.gmra.mrb[12].mxu0 %vm1362_vm1, %v12172_v62  ;;  %16046 = vmatprep.mubr.msk.f32.mxu1 %vm1362_vm1, %v10143_v46  ;;  %v21251_v62 = vld [vmem:[%s22406_s30] ss:$0 sm:$0xff] }
 0x911   : > { %16302 = vmatprep.mubr.msk.f32.mxu0 %vm1362_vm1, %v22319_v63  ;;  %v22401_v63 = vld [vmem:[#allocation156_spill] sm:$0xff] }
 0x913   : > { %16047 = vmatmul.mubr.msk.f32.gmra.mrb[30].mxu1 %vm1362_vm1, %v20937_v58  ;;  %v12186_v58 = vmul.f32 %v22400_v0, %v22346_v23  ;;  %v22405_v23 = vld [vmem:[#allocation47_spill] sm:$0xff] }
 0x914   : > { %16303 = vmatmul.mubr.msk.f32.gmra.mrb[14].mxu0 %vm1362_vm1, %v12174_v18  ;;  %16081 = vmatprep.mubr.msk.f32.mxu1 %vm1362_vm1, %v10519_v38  ;;  %v12190_v25 = vmul.f32 %v22405_v23, %v12158_v54  ;;  %v12589_v38 = vld [vmem:[%s17795_s16 + $0x8] sm:$0xff] }
 0x915   : > { %16305 = vmatprep.mubr.msk.f32.mxu0 %vm1362_vm1, %v22388_v37  ;;  %v12597_v54 = vld [vmem:[%s17795_s16 + $0x48] sm:$0xff] }
 0x917   : > { %16082 = vmatmul.mubr.msk.f32.vlgmr.msra.gmra.mrb[16].mxu1 %vm1362_vm1, %v10520_v34 }
 0x918   : > { %16306 = vmatmul.mubr.msk.f32.gmra.mrb[16].mxu0 %vm1362_vm1, %v12176_v11  ;;  %16084 = vmatprep.mubr.msk.f32.mxu1 %vm1362_vm1, %v10521_v51 }
 0x919   : > { %16308 = vmatprep.mubr.msk.f32.mxu0 %vm1362_vm1, %v22391_v15 }
 0x91b   : > { %16085 = vmatmul.mubr.msk.f32.gmra.mrb[18].mxu1 %vm1362_vm1, %v10522_v61 }
 0x91c   : > { %16309 = vmatmul.mubr.msk.f32.gmra.mrb[18].mxu0 %vm1362_vm1, %v12178_v22  ;;  %16087 = vmatprep.mubr.msk.f32.mxu1 %vm1362_vm1, %v10523_v56  ;;  %v12591_v22 = vld [vmem:[%s17795_s16 + $0x18] sm:$0xff] }
 0x91d   : > { %16311 = vmatprep.mubr.msk.f32.mxu0 %vm1362_vm1, %v22394_v24 }
 0x91f   : > { %16088 = vmatmul.mubr.msk.f32.gmra.mrb[20].mxu1 %vm1362_vm1, %v10524_v3  ;;  %v12590_v3 = vld [vmem:[%s17795_s16 + $0x10] sm:$0xff] }
 0x920   : > { %16312 = vmatmul.mubr.msk.f32.gmra.mrb[20].mxu0 %vm1362_vm1, %v12180_v42  ;;  %16090 = vmatprep.mubr.msk.f32.mxu1 %vm1362_vm1, %v10525_v57 }
 0x921   : > { %16314 = vmatprep.mubr.msk.f32.mxu0 %vm1362_vm1, %v22397_v7  ;;  %v12592_v7 = vld [vmem:[%s17795_s16 + $0x20] sm:$0xff] }
 0x923   : > { %16091 = vmatmul.mubr.msk.f32.gmra.mrb[22].mxu1 %vm1362_vm1, %v10526_v10 }
 0x924   : > { %16315 = vmatmul.mubr.msk.f32.gmra.mrb[22].mxu0 %vm1362_vm1, %v12182_v29  ;;  %16093 = vmatprep.mubr.msk.f32.mxu1 %vm1362_vm1, %v10527_v45 }
 0x925   : > { %16317 = vmatprep.mubr.msk.f32.mxu0 %vm1362_vm1, %v22344_v31  ;;  %v10532_v31 = vld [vmem:[#allocation2 + $0x100] sm:$0xff] }
 0x927   : > { %16094 = vmatmul.mubr.msk.f32.gmra.mrb[24].mxu1 %vm1362_vm1, %v10528_v13 }
 0x928   : > { %16318 = vmatmul.mubr.msk.f32.gmra.mrb[24].mxu0 %vm1362_vm1, %v12184_v44  ;;  %16096 = vmatprep.mubr.msk.f32.mxu1 %vm1362_vm1, %v10529_v35 }
 0x929   : > { %16320 = vmatprep.mubr.msk.f32.mxu0 %vm1362_vm1, %v22401_v63  ;;  %v12594_v63 = vld [vmem:[%s17795_s16 + $0x30] sm:$0xff] }
 0x92b   : > { %16097 = vmatmul.mubr.msk.f32.gmra.mrb[26].mxu1 %vm1362_vm1, %v10530_v20  ;;  %v12595_v20 = vld [vmem:[%s17795_s16 + $0x38] sm:$0xff] }
 0x92c   : > { %16321 = vmatmul.mubr.msk.f32.gmra.mrb[26].mxu0 %vm1362_vm1, %v12186_v58  ;;  %16099 = vmatprep.mubr.msk.f32.mxu1 %vm1362_vm1, %v10531_v8 }
 0x92d   : > { %16323 = vmatprep.mubr.msk.f32.mxu0 %vm1362_vm1, %v22404_v27 }
 0x92f   : > { %16100 = vmatmul.mubr.msk.f32.gmra.mrb[28].mxu1 %vm1362_vm1, %v10532_v31 }
 0x930   : > { %16324 = vmatmul.mubr.msk.f32.gmra.mrb[28].mxu0 %vm1362_vm1, %v12188_v59  ;;  %16102 = vmatprep.mubr.msk.f32.mxu1 %vm1362_vm1, %v21078_v4 }
 0x931   : > { %16326 = vmatprep.mubr.msk.f32.mxu0 %vm1362_vm1, %v12157_v53 }
 0x933   : > { %16103 = vmatmul.mubr.msk.f32.gmra.mrb[30].mxu1 %vm1362_vm1, %v21089_v40 }
 0x934   : > { %16327 = vmatmul.mubr.msk.f32.gmra.mrb[30].mxu0 %vm1362_vm1, %v12190_v25  ;;  %v12596_v25 = vld [vmem:[%s17795_s16 + $0x40] sm:$0xff] }
 0x9aa   : > { %v16003_v55 = vpop.f32.mrb[0].mxu1 }
 0x9ab   : > { %v10312_v60 = vpop.f32.mrb[1].mxu1 }
 0x9ae   : > { %v16006_v30 = vpop.f32.mrb[2].mxu1 }
 0x9af   : > { %v10322_v6 = vpop.f32.mrb[3].mxu1 }
 0x9b2   : > { %v16009_v47 = vpop.f32.mrb[4].mxu1 }
 0x9b3   : > { %v10332_v14 = vpop.f32.mrb[5].mxu1 }
 0x9b6   : > { %v16012_v5 = vpop.f32.mrb[6].mxu1 }
 0x9b7   : > { %v10342_v36 = vpop.f32.mrb[7].mxu1 }
 0x9ba   : > { %v16015_v4 = vpop.f32.mrb[8].mxu1 }
 0x9bb   : > { %v10352_v21 = vpop.f32.mrb[9].mxu1 }
 0x9be   : > { %v21236_v48 = vpop.f32.mrb[10].mxu1 }
 0x9bf   : > { %v21238_v19 = vpop.f32.mrb[11].mxu1 }
 0x9c2   : > { %v21240_v49 = vpop.f32.mrb[12].mxu1 }
 0x9c3   : > { %v21242_v40 = vpop.f32.mrb[13].mxu1 }
 0x9c6   : > { %v21244_v17 = vpop.f32.mrb[14].mxu1 }
 0x9c7   : > { %v21246_v1 = vpop.f32.mrb[15].mxu1 }
 0x9cb   : > { %v16283_v12 = vpop.f32.mrb[0].mxu0 }
 0x9cc   : > { %v17061_v46 = vadd.f32 %v16283_v12, %v16003_v55  ;;  %v12358_v18 = vpop.f32.mrb[1].mxu0 }
 0x9cd   : > { %v17062_v34 = vadd.f32 %v12358_v18, %v10312_v60 }
 0x9ce   : > { %v12557_v16 = vadd.f32 %v17061_v46, %v21251_v62 }
 0x9cf   : > { %v12556_v11 = vadd.f32 %v17062_v34, %v21251_v62  ;;  %v16286_v37 = vpop.f32.mrb[2].mxu0 }
 0x9d0   : > { %v12621_v51 = vadd.f32 %v12589_v38, %v12557_v16  ;;  %v17063_v61 = vadd.f32 %v16286_v37, %v16006_v30  ;;  %v12368_v9 = vpop.f32.mrb[3].mxu0  ;;  %v12601_v16 = vld [vmem:[%s17795_s16 + $0x68] sm:$0xff] }
 0x9d1   : > { %v12620_v26 = vadd.f32 %v12588_v32, %v12556_v11  ;;  %v17064_v15 = vadd.f32 %v12368_v9, %v10322_v6  ;;  %v12600_v11 = vld [vmem:[%s17795_s16 + $0x60] sm:$0xff] }
 0x9d2   : > { %12653 = vst.msk [vmem:[%s17883_s9 + $0x8] sm:$0xff] %vm1362_vm1, %v12621_v51  ;;  %v12559_v56 = vadd.f32 %v17063_v61, %v21251_v62 }
 0x9d3   : > { %12652 = vst.msk [vmem:[%s17883_s9] sm:$0xff] %vm1362_vm1, %v12620_v26  ;;  %v12558_v43 = vadd.f32 %v17064_v15, %v21251_v62  ;;  %v16289_v52 = vpop.f32.mrb[4].mxu0 }
 0x9d4   : > { %v12623_v42 = vadd.f32 %v12591_v22, %v12559_v56  ;;  %v17065_v24 = vadd.f32 %v16289_v52, %v16009_v47  ;;  %v12378_v57 = vpop.f32.mrb[5].mxu0  ;;  %v12603_v22 = vld [vmem:[%s17795_s16 + $0x78] sm:$0xff]  ;;  %v12602_v56 = vld [vmem:[%s17795_s16 + $0x70] sm:$0xff] }
 0x9d5   : > { %v12622_v10 = vadd.f32 %v12590_v3, %v12558_v43  ;;  %v17066_v33 = vadd.f32 %v12378_v57, %v10332_v14 }
 0x9d6   : > { %12655 = vst.msk [vmem:[%s17883_s9 + $0x18] sm:$0xff] %vm1362_vm1, %v12623_v42  ;;  %v12561_v29 = vadd.f32 %v17065_v24, %v21251_v62 }
 0x9d7   : > { %12654 = vst.msk [vmem:[%s17883_s9 + $0x10] sm:$0xff] %vm1362_vm1, %v12622_v10  ;;  %v12560_v45 = vadd.f32 %v17066_v33, %v21251_v62  ;;  %v16292_v13 = vpop.f32.mrb[6].mxu0 }
 0x9d8   : > { %v12625_v39 = vadd.f32 %v12593_v2, %v12561_v29  ;;  %v17067_v50 = vadd.f32 %v16292_v13, %v16012_v5  ;;  %v12388_v44 = vpop.f32.mrb[7].mxu0  ;;  %v12599_v5 = vld [vmem:[%s17795_s16 + $0x58] sm:$0xff]  ;;  %v12604_v29 = vld [vmem:[%s17795_s16 + $0x80] sm:$0xff] }
 0x9d9   : > { %v12624_v35 = vadd.f32 %v12592_v7, %v12560_v45  ;;  %v17068_v0 = vadd.f32 %v12388_v44, %v10342_v36 }
 0x9da   : > { %12657 = vst.msk [vmem:[%s17883_s9 + $0x28] sm:$0xff] %vm1362_vm1, %v12625_v39  ;;  %v12563_v58 = vadd.f32 %v17067_v50, %v21251_v62 }
 0x9db   : > { %12656 = vst.msk [vmem:[%s17883_s9 + $0x20] sm:$0xff] %vm1362_vm1, %v12624_v35  ;;  %v12562_v8 = vadd.f32 %v17068_v0, %v21251_v62  ;;  %v16295_v31 = vpop.f32.mrb[8].mxu0  ;;  %v12607_v0 = vld [vmem:[%s17795_s16 + $0x98] sm:$0xff] }
 0x9dc   : > { %v12627_v28 = vadd.f32 %v12595_v20, %v12563_v58  ;;  %v17069_v41 = vadd.f32 %v16295_v31, %v16015_v4  ;;  %v12398_v59 = vpop.f32.mrb[9].mxu0 }
 0x9dd   : > { %v12626_v27 = vadd.f32 %v12594_v63, %v12562_v8  ;;  %v17070_v53 = vadd.f32 %v12398_v59, %v10352_v21  ;;  %v12598_v21 = vld [vmem:[%s17795_s16 + $0x50] sm:$0xff] }
 0x9de   : > { %12659 = vst.msk [vmem:[%s17883_s9 + $0x38] sm:$0xff] %vm1362_vm1, %v12627_v28  ;;  %v12565_v23 = vadd.f32 %v17069_v41, %v21251_v62  ;;  %v12606_v8 = vld [vmem:[%s17795_s16 + $0x90] sm:$0xff] }
 0x9df   : > { %12658 = vst.msk [vmem:[%s17883_s9 + $0x30] sm:$0xff] %vm1362_vm1, %v12626_v27  ;;  %v12564_v55 = vadd.f32 %v17070_v53, %v21251_v62  ;;  %v16298_v60 = vpop.f32.mrb[10].mxu0 }
 0x9e0   : > { %v12629_v30 = vadd.f32 %v12597_v54, %v12565_v23  ;;  %v17071_v6 = vadd.f32 %v16298_v60, %v21236_v48  ;;  %v12408_v47 = vpop.f32.mrb[11].mxu0 }
 0x9e1   : > { %v12628_v14 = vadd.f32 %v12596_v25, %v12564_v55  ;;  %v17072_v36 = vadd.f32 %v12408_v47, %v21238_v19  ;;  %v12609_v25 = vld [vmem:[%s17795_s16 + $0xa8] sm:$0xff] }
 0x9e2   : > { %12661 = vst.msk [vmem:[%s17883_s9 + $0x48] sm:$0xff] %vm1362_vm1, %v12629_v30  ;;  %v12567_v4 = vadd.f32 %v17071_v6, %v21251_v62  ;;  %v12608_v30 = vld [vmem:[%s17795_s16 + $0xa0] sm:$0xff] }
 0x9e3   : > { %12660 = vst.msk [vmem:[%s17883_s9 + $0x40] sm:$0xff] %vm1362_vm1, %v12628_v14  ;;  %v12566_v12 = vadd.f32 %v17072_v36, %v21251_v62  ;;  %v16301_v46 = vpop.f32.mrb[12].mxu0 }
 0x9e4   : > { %v12631_v18 = vadd.f32 %v12599_v5, %v12567_v4  ;;  %v17073_v48 = vadd.f32 %v16301_v46, %v21240_v49  ;;  %v12418_v38 = vpop.f32.mrb[13].mxu0  ;;  %v12611_v46 = vld [vmem:[%s17795_s16 + $0xb8] sm:$0xff] }
 0x9e5   : > { %v12630_v34 = vadd.f32 %v12598_v21, %v12566_v12  ;;  %v17074_v19 = vadd.f32 %v12418_v38, %v21242_v40  ;;  %v12610_v38 = vld [vmem:[%s17795_s16 + $0xb0] sm:$0xff] }
 0x9e6   : > { %12663 = vst.msk [vmem:[%s17883_s9 + $0x58] sm:$0xff] %vm1362_vm1, %v12631_v18  ;;  %v12569_v32 = vadd.f32 %v17073_v48, %v21251_v62 }
 0x9e7   : > { %12662 = vst.msk [vmem:[%s17883_s9 + $0x50] sm:$0xff] %vm1362_vm1, %v12630_v34  ;;  %v12568_v37 = vadd.f32 %v17074_v19, %v21251_v62  ;;  %v16304_v51 = vpop.f32.mrb[14].mxu0 }
 0x9e8   : > { %v12633_v61 = vadd.f32 %v12601_v16, %v12569_v32  ;;  %v17075_v49 = vadd.f32 %v16304_v51, %v21244_v17  ;;  %v12428_v9 = vpop.f32.mrb[15].mxu0 }
 0x9e9   : > { %v12632_v26 = vadd.f32 %v12600_v11, %v12568_v37  ;;  %v17076_v40 = vadd.f32 %v12428_v9, %v21246_v1  ;;  %v12605_v1 = vld [vmem:[%s17795_s16 + $0x88] sm:$0xff] }
 0x9ea   : > { %12665 = vst.msk [vmem:[%s17883_s9 + $0x68] sm:$0xff] %vm1362_vm1, %v12633_v61  ;;  %v12571_v15 = vadd.f32 %v17075_v49, %v21251_v62  ;;  %v16083_v3 = vpop.f32.mrb[16].mxu1  ;;  %v12613_v49 = vld [vmem:[%s17795_s16 + $0xc8] sm:$0xff] }
 0x9eb   : > { %12664 = vst.msk [vmem:[%s17883_s9 + $0x60] sm:$0xff] %vm1362_vm1, %v12632_v26  ;;  %v12570_v43 = vadd.f32 %v17076_v40, %v21251_v62  ;;  %v16307_v17 = vpop.f32.mrb[16].mxu0  ;;  %v10782_v52 = vpop.f32.mrb[17].mxu1 }
 0x9ec   : > { %v12635_v42 = vadd.f32 %v12603_v22, %v12571_v15  ;;  %v17077_v24 = vadd.f32 %v16307_v17, %v16083_v3  ;;  %v12438_v57 = vpop.f32.mrb[17].mxu0  ;;  %v12612_v22 = vld [vmem:[%s17795_s16 + $0xc0] sm:$0xff] }
 0x9ed   : > { %v12634_v10 = vadd.f32 %v12602_v56, %v12570_v43  ;;  %v17078_v2 = vadd.f32 %v12438_v57, %v10782_v52 }
 0x9ee   : > { %12667 = vst.msk [vmem:[%s17883_s9 + $0x78] sm:$0xff] %vm1362_vm1, %v12635_v42  ;;  %v12573_v33 = vadd.f32 %v17077_v24, %v21251_v62  ;;  %v16086_v7 = vpop.f32.mrb[18].mxu1  ;;  %v12615_v24 = vld [vmem:[%s17795_s16 + $0xd8] sm:$0xff] }
 0x9ef   : > { %12666 = vst.msk [vmem:[%s17883_s9 + $0x70] sm:$0xff] %vm1362_vm1, %v12634_v10  ;;  %v12572_v45 = vadd.f32 %v17078_v2, %v21251_v62  ;;  %v16310_v13 = vpop.f32.mrb[18].mxu0  ;;  %v10792_v39 = vpop.f32.mrb[19].mxu1 }
 0x9f0   : > { %v12637_v50 = vadd.f32 %v12605_v1, %v12573_v33  ;;  %v17079_v44 = vadd.f32 %v16310_v13, %v16086_v7  ;;  %v12448_v35 = vpop.f32.mrb[19].mxu0  ;;  %v12614_v1 = vld [vmem:[%s17795_s16 + $0xd0] sm:$0xff] }
 0x9f1   : > { %v12636_v20 = vadd.f32 %v12604_v29, %v12572_v45  ;;  %v17080_v58 = vadd.f32 %v12448_v35, %v10792_v39 }
 0x9f2   : > { %12669 = vst.msk [vmem:[%s17883_s9 + $0x88] sm:$0xff] %vm1362_vm1, %v12637_v50  ;;  %v12575_v63 = vadd.f32 %v17079_v44, %v21251_v62  ;;  %v16089_v31 = vpop.f32.mrb[20].mxu1  ;;  %v12617_v44 = vld [vmem:[%s17795_s16 + $0xe8] sm:$0xff] }
 0x9f3   : > { %12668 = vst.msk [vmem:[%s17883_s9 + $0x80] sm:$0xff] %vm1362_vm1, %v12636_v20  ;;  %v12574_v28 = vadd.f32 %v17080_v58, %v21251_v62  ;;  %v16313_v41 = vpop.f32.mrb[20].mxu0  ;;  %v10802_v59 = vpop.f32.mrb[21].mxu1 }
 0x9f4   : > { %v12639_v27 = vadd.f32 %v12607_v0, %v12575_v63  ;;  %v17081_v54 = vadd.f32 %v16313_v41, %v16089_v31  ;;  %v12458_v53 = vpop.f32.mrb[21].mxu0  ;;  %v12616_v0 = vld [vmem:[%s17795_s16 + $0xe0] sm:$0xff] }
 0x9f5   : > { %v12638_v23 = vadd.f32 %v12606_v8, %v12574_v28  ;;  %v17082_v55 = vadd.f32 %v12458_v53, %v10802_v59 }
 0x9f6   : > { %12671 = vst.msk [vmem:[%s17883_s9 + $0x98] sm:$0xff] %vm1362_vm1, %v12639_v27  ;;  %v12577_v60 = vadd.f32 %v17081_v54, %v21251_v62  ;;  %v16092_v6 = vpop.f32.mrb[22].mxu1  ;;  %v12619_v54 = vld [vmem:[%s17795_s16 + $0xf8] sm:$0xff] }
 0x9f7   : > { %12670 = vst.msk [vmem:[%s17883_s9 + $0x90] sm:$0xff] %vm1362_vm1, %v12638_v23  ;;  %v12576_v47 = vadd.f32 %v17082_v55, %v21251_v62  ;;  %v16316_v14 = vpop.f32.mrb[22].mxu0  ;;  %v10812_v5 = vpop.f32.mrb[23].mxu1 }
 0x9f8   : > { %v12641_v36 = vadd.f32 %v12609_v25, %v12577_v60  ;;  %v17083_v4 = vadd.f32 %v16316_v14, %v16092_v6  ;;  %v12468_v21 = vpop.f32.mrb[23].mxu0  ;;  %v12618_v25 = vld [vmem:[%s17795_s16 + $0xf0] sm:$0xff] }
 0x9f9   : > { %v12640_v12 = vadd.f32 %v12608_v30, %v12576_v47  ;;  %v17084_v18 = vadd.f32 %v12468_v21, %v10812_v5 }
 0x9fa   : > { %12673 = vst.msk [vmem:[%s17883_s9 + $0xa8] sm:$0xff] %vm1362_vm1, %v12641_v36  ;;  %v12579_v48 = vadd.f32 %v17083_v4, %v21251_v62  ;;  %v16095_v34 = vpop.f32.mrb[24].mxu1 }
 0x9fb   : > { %12672 = vst.msk [vmem:[%s17883_s9 + $0xa0] sm:$0xff] %vm1362_vm1, %v12640_v12  ;;  %v12578_v16 = vadd.f32 %v17084_v18, %v21251_v62  ;;  %v16319_v19 = vpop.f32.mrb[24].mxu0  ;;  %v10822_v32 = vpop.f32.mrb[25].mxu1 }
 0x9fc   : > { %v12643_v11 = vadd.f32 %v12611_v46, %v12579_v48  ;;  %v17085_v37 = vadd.f32 %v16319_v19, %v16095_v34  ;;  %v12478_v51 = vpop.f32.mrb[25].mxu0 }
 0x9fd   : > { %v12642_v61 = vadd.f32 %v12610_v38, %v12578_v16  ;;  %v17086_v9 = vadd.f32 %v12478_v51, %v10822_v32 }
 0x9fe   : > { %12675 = vst.msk [vmem:[%s17883_s9 + $0xb8] sm:$0xff] %vm1362_vm1, %v12643_v11  ;;  %v12581_v26 = vadd.f32 %v17085_v37, %v21251_v62  ;;  %v16098_v40 = vpop.f32.mrb[26].mxu1 }
 0x9ff   : > { %12674 = vst.msk [vmem:[%s17883_s9 + $0xb0] sm:$0xff] %vm1362_vm1, %v12642_v61  ;;  %v12580_v15 = vadd.f32 %v17086_v9, %v21251_v62  ;;  %v16322_v56 = vpop.f32.mrb[26].mxu0  ;;  %v10832_v3 = vpop.f32.mrb[27].mxu1 }
 0xa00   : > { %v12645_v43 = vadd.f32 %v12613_v49, %v12581_v26  ;;  %v17087_v17 = vadd.f32 %v16322_v56, %v16098_v40  ;;  %v12488_v52 = vpop.f32.mrb[27].mxu0 }
 0xa01   : > { %v12644_v42 = vadd.f32 %v12612_v22, %v12580_v15  ;;  %v17088_v57 = vadd.f32 %v12488_v52, %v10832_v3 }
 0xa02   : > { %12677 = vst.msk [vmem:[%s17883_s9 + $0xc8] sm:$0xff] %vm1362_vm1, %v12645_v43  ;;  %v12583_v10 = vadd.f32 %v17087_v17, %v21251_v62  ;;  %v16101_v2 = vpop.f32.mrb[28].mxu1 }
 0xa03   : > { %12676 = vst.msk [vmem:[%s17883_s9 + $0xc0] sm:$0xff] %vm1362_vm1, %v12644_v42  ;;  %v12582_v33 = vadd.f32 %v17088_v57, %v21251_v62  ;;  %v16325_v29 = vpop.f32.mrb[28].mxu0  ;;  %v10842_v7 = vpop.f32.mrb[29].mxu1 }
 0xa04   : > { %v12647_v45 = vadd.f32 %v12615_v24, %v12583_v10  ;;  %v17089_v13 = vadd.f32 %v16325_v29, %v16101_v2  ;;  %v12498_v39 = vpop.f32.mrb[29].mxu0 }
 0xa05   : > { %v12646_v50 = vadd.f32 %v12614_v1, %v12582_v33  ;;  %v17090_v35 = vadd.f32 %v12498_v39, %v10842_v7 }
 0xa06   : > { %12679 = vst.msk [vmem:[%s17883_s9 + $0xd8] sm:$0xff] %vm1362_vm1, %v12647_v45  ;;  %v12585_v20 = vadd.f32 %v17089_v13, %v21251_v62  ;;  %v16104_v58 = vpop.f32.mrb[30].mxu1 }
 0xa07   : > { %12678 = vst.msk [vmem:[%s17883_s9 + $0xd0] sm:$0xff] %vm1362_vm1, %v12646_v50  ;;  %v12584_v63 = vadd.f32 %v17090_v35, %v21251_v62  ;;  %v16328_v8 = vpop.f32.mrb[30].mxu0  ;;  %v10852_v31 = vpop.f32.mrb[31].mxu1 }
 0xa08   : > { %v12649_v28 = vadd.f32 %v12617_v44, %v12585_v20  ;;  %v17091_v41 = vadd.f32 %v16328_v8, %v16104_v58  ;;  %v12508_v59 = vpop.f32.mrb[31].mxu0 }
 0xa09   : > { %v12648_v27 = vadd.f32 %v12616_v0, %v12584_v63  ;;  %v17092_v53 = vadd.f32 %v12508_v59, %v10852_v31 }
 0xa0a   : > { %12681 = vst.msk [vmem:[%s17883_s9 + $0xe8] sm:$0xff] %vm1362_vm1, %v12649_v28  ;;  %v12587_v23 = vadd.f32 %v17091_v41, %v21251_v62 }
 0xa0b   : > { %12680 = vst.msk [vmem:[%s17883_s9 + $0xe0] sm:$0xff] %vm1362_vm1, %v12648_v27  ;;  %v12586_v55 = vadd.f32 %v17092_v53, %v21251_v62 }
 0xa0c   : > { %v12651_v60 = vadd.f32 %v12619_v54, %v12587_v23 }
 0xa0d   : > { %v12650_v30 = vadd.f32 %v12618_v25, %v12586_v55 }
 0xa0e   : > { %12683 = vst.msk [vmem:[%s17883_s9 + $0xf8] sm:$0xff] %vm1362_vm1, %v12651_v60 }
 0xa0f   : > { %12682 = vst.msk [vmem:[%s17883_s9 + $0xf0] sm:$0xff] %vm1362_vm1, %v12650_v30 }
 0xa10 PF: > { %s25_s24 = sadd.s32 1, %s17541_s24   ;;  %s22407_s28 = sld [smem:[#allocation14_spill]] }
 0xa11   : > { %p22_p9 = scmp.ge.s32.totalorder %s25_s24, 6   ;;  %s22408_s20 = sld [smem:[#allocation10_spill]] }
 0xa12   : > { %s22409_s21 = sld [smem:[#allocation11_spill]]  ;;  %s22410_s22 = sld [smem:[#allocation12_spill]] }
 0xa13   : > { %s22411_s23 = sld [smem:[#allocation13_spill]]  ;;  %s22412_s17 = smov %s17517_s18 }
 0xa14   : > { %s22413_s18 = smov %s17521_s19  ;;  %24 = sbr.rel (!%p22_p9) target bundleno = 9 (0x9), region = 164 }
 0xa16   : > { %s22414_s19 = smov %s22407_s28 }
 0xa1b   :  { %12705 = vsyncpa [#allocation5], 1 }
 0xa1c   :  { %12707 = vsyncpa [#allocation5 + $0x1], 1 }
 0xa1d   :  { %12708 = vsyncpa [#allocation7], 1 }

</bundles_post_ra>
